<compile_context>
chip_gen: v7x
topology: tpu7x:2x2x1
jax: 0.10.0
libtpu: 0.0.40
codegen_flags: <defaults>
</compile_context>

<pallas_src>
import functools

import jax
import jax.numpy as jnp
from jax import lax
from jax.experimental import pallas as pl
from jax.experimental.pallas import tpu as pltpu


def _round_up(x, m):
    return (x + m - 1) // m * m


# ---------------------------------------------------------------------------
# Pallas kernel: [optional fused BN+LeakyReLU prologue] + tiled bf16 GEMM
#                + bias + per-channel BN-stat partials in the epilogue.
# ---------------------------------------------------------------------------
def _gemm_bias_stats_kernel(*refs, fuse_act):
    if fuse_act:
        (a_ref, b_ref, bias_ref, scale_ref, shift_ref,
         o_ref, stats_ref, acc_ref) = refs
    else:
        a_ref, b_ref, bias_ref, o_ref, stats_ref, acc_ref = refs
        scale_ref = shift_ref = None

    @pl.when(pl.program_id(2) == 0)
    def _():
        acc_ref[...] = jnp.zeros_like(acc_ref)

    a = a_ref[...]                                   # (bm, bk) bf16
    if fuse_act:
        # Previous layer's BatchNorm affine + LeakyReLU(0.2), applied to the
        # (pre-activation, bf16-stored) patches right before the MXU.
        z_in = a.astype(jnp.float32) * scale_ref[...] + shift_ref[...]
        a = jnp.where(z_in >= 0, z_in, 0.2 * z_in).astype(jnp.bfloat16)

    # bf16 x bf16 -> f32 accumulation on the MXU.
    acc_ref[...] += jnp.dot(a, b_ref[...], preferred_element_type=jnp.float32)

    @pl.when(pl.program_id(2) == pl.num_programs(2) - 1)
    def _():
        z = acc_ref[...] + bias_ref[...]             # (bm, bn) f32 conv output
        o_ref[...] = z.astype(o_ref.dtype)
        # Per-channel partial sums for BatchNorm (one contiguous (2, bn) store).
        s1 = jnp.sum(z, axis=0, keepdims=True)
        s2 = jnp.sum(z * z, axis=0, keepdims=True)
        stats_ref[...] = jnp.concatenate([s1, s2], axis=0)


def _conv_gemm(a, b_mat, bias, scale_k, shift_k, *, out_dtype, need_stats,
               bm_max=512, bk_max=2048):
    """a: (M, K) bf16 patches, b_mat: (K, N) f32 weights, bias: (N,).
    scale_k/shift_k: optional length-K fused-activation vectors.
    Returns (out (M, N) out_dtype, col_sum (N,), col_sumsq (N,))."""
    M, K = a.shape
    N = b_mat.shape[1]
    fuse = scale_k is not None

    # ---- M tiling: prefer a block that divides M exactly (no padded-A copy).
    if M <= bm_max:
        bm, Mp = M, M
    else:
        bm = next((c for c in (512, 256, 128, 64, 32, 16, 8)
                   if c <= bm_max and M % c == 0), 0)
        if bm:
            Mp = M
        else:                       # rare fallback: pad rows (stats corrected)
            bm, Mp = bm_max, _round_up(M, bm_max)

    # ---- K tiling: no HBM padding unless K is large and not 128-aligned
    # (layer 1's K=32 stays a single full-dim block -> no 4x inflation).
    Kp = K if (K % 128 == 0 or K <= bk_max) else _round_up(K, 128)
    bk = Kp if Kp <= bk_max else bk_max
    while Kp % bk:
        bk -= 128

    # ---- N tiling: full-dim lane block for N=64; pad only the N=1 final conv.
    if N % 128 == 0:
        Np = N
    elif N >= 64 and N % 8 == 0:
        Np = N
    else:
        Np = _round_up(N, 128)
    n_mb = Mp // bm
    if Np % 128 != 0:
        bn = Np                      # full-dim block (e.g. layer 1, N = 64)
    elif Np % 256 == 0 and (Np // 256 >= 2 or n_mb >= 2):
        bn = 256                     # 256-wide MXU, but keep >=2 parallel blocks
    else:
        bn = 128
    n_nb, n_kb = Np // bn, Kp // bk

    # ---- Operand prep (copies only in the rare padded paths).
    a_p = a.astype(jnp.bfloat16)
    if Kp > K:
        a_p = jnp.pad(a_p, ((0, 0), (0, Kp - K)))
    if Mp > M:
        a_p = jnp.pad(a_p, ((0, Mp - M), (0, 0)))
    b_p = b_mat.astype(jnp.bfloat16)
    bias_p = bias.astype(jnp.float32).reshape(1, N)
    if Kp > K:
        b_p = jnp.pad(b_p, ((0, Kp - K), (0, 0)))
    if Np > N:
        b_p = jnp.pad(b_p, ((0, 0), (0, Np - N)))
        bias_p = jnp.pad(bias_p, ((0, 0), (0, Np - N)))

    in_specs = [
        pl.BlockSpec((bm, bk), lambda i, j, k: (i, k)),
        pl.BlockSpec((bk, bn), lambda i, j, k: (k, j)),
        pl.BlockSpec((1, bn), lambda i, j, k: (0, j)),
    ]
    args = [a_p, b_p, bias_p]
    scale_p = shift_p = None
    if fuse:
        scale_p = scale_k.astype(jnp.float32).reshape(1, K)
        shift_p = shift_k.astype(jnp.float32).reshape(1, K)
        if Kp > K:
            scale_p = jnp.pad(scale_p, ((0, 0), (0, Kp - K)))
            shift_p = jnp.pad(shift_p, ((0, 0), (0, Kp - K)))
        in_specs += [pl.BlockSpec((1, bk), lambda i, j, k: (0, k)),
                     pl.BlockSpec((1, bk), lambda i, j, k: (0, k))]
        args += [scale_p, shift_p]

    cost = pl.CostEstimate(
        flops=2 * Mp * Np * Kp,
        transcendentals=0,
        bytes_accessed=(Mp * Kp * 2 * n_nb + Kp * Np * 2 * n_mb
                        + Mp * Np * jnp.dtype(out_dtype).itemsize))

    out, stats = pl.pallas_call(
        functools.partial(_gemm_bias_stats_kernel, fuse_act=fuse),
        out_shape=(jax.ShapeDtypeStruct((Mp, Np), out_dtype),
                   jax.ShapeDtypeStruct((n_mb, 2, Np), jnp.float32)),
        grid_spec=pltpu.PrefetchScalarGridSpec(
            num_scalar_prefetch=0,
            grid=(n_mb, n_nb, n_kb),
            in_specs=in_specs,
            out_specs=[
                pl.BlockSpec((bm, bn), lambda i, j, k: (i, j)),
                pl.BlockSpec((None, 2, bn), lambda i, j, k: (i, 0, j)),
            ],
            scratch_shapes=[pltpu.VMEM((bm, bn), jnp.float32)],
        ),
        compiler_params=pltpu.CompilerParams(
            dimension_semantics=("parallel", "parallel", "arbitrary"),
            # Worst-case double-buffered tiles here are ~18 MiB; v6e could raise
            # this (with bigger bk), v7x should stay <= ~48 MiB.
            vmem_limit_bytes=32 * 1024 * 1024),
        cost_estimate=cost,
    )(*args)

    if Mp > M or Np > N:
        out = out[:M, :N]

    col_sum = col_sumsq = None
    if need_stats:
        col_sum = jnp.sum(stats[:, 0, :N], axis=0)
        col_sumsq = jnp.sum(stats[:, 1, :N], axis=0)
        if Mp > M:
            # Zero-padded A rows pass through the (optional) prologue and the
            # GEMM; subtract their exact contribution to the statistics.
            if fuse:
                f0 = jnp.where(shift_p[0] >= 0, shift_p[0], 0.2 * shift_p[0])
            else:
                f0 = jnp.zeros((Kp,), jnp.float32)
            pad_out = (jnp.dot(f0.astype(jnp.bfloat16)[None, :], b_p,
                               preferred_element_type=jnp.float32)[0]
                       + bias_p[0])
            col_sum = col_sum - (Mp - M) * pad_out[:N]
            col_sumsq = col_sumsq - (Mp - M) * pad_out[:N] ** 2
    return out, col_sum, col_sumsq


# ---------------------------------------------------------------------------
# Conv building blocks (JAX glue around the Pallas kernel)
# ---------------------------------------------------------------------------
def _im2col(x_nhwc, k, stride, pad, pad_value=None):
    """Patch extraction in bf16.  `pad_value` (per-channel) is used when the
    consumer GEMM fuses the previous BN+LeakyReLU: padding with -shift/scale
    makes the fused prologue map padded entries back to exactly ~0."""
    n, h, w, c = x_nhwc.shape
    x_bf = x_nhwc.astype(jnp.bfloat16)
    if pad > 0:
        if pad_value is None:
            xp = jnp.pad(x_bf, ((0, 0), (pad, pad), (pad, pad), (0, 0)))
        else:
            pv = pad_value.astype(jnp.bfloat16).reshape(1, 1, 1, c)
            rows = jnp.broadcast_to(pv, (n, pad, w, c))
            xp = jnp.concatenate([rows, x_bf, rows], axis=1)
            cols_pad = jnp.broadcast_to(pv, (n, h + 2 * pad, pad, c))
            xp = jnp.concatenate([cols_pad, xp, cols_pad], axis=2)
    else:
        xp = x_bf
    ho = (h + 2 * pad - k) // stride + 1
    wo = (w + 2 * pad - k) // stride + 1
    cols = []
    for kh in range(k):
        for kw in range(k):
            cols.append(xp[:, kh:kh + stride * ho:stride,
                           kw:kw + stride * wo:stride, :])
    patches = jnp.concatenate(cols, axis=-1)          # (n, ho, wo, k*k*c)
    return patches.reshape(n * ho * wo, k * k * c), ho, wo


def _conv2d(x_nhwc, w_oihw, bias, *, stride, pad, act_scale, act_shift,
            out_dtype, need_stats):
    """PyTorch-equivalent Conv2d, optionally applying the previous layer's
    BatchNorm affine + LeakyReLU(0.2) to the input inside the GEMM prologue.
    Also returns per-channel sum / sum-of-squares of the conv output."""
    nb = x_nhwc.shape[0]
    cout, cin, kh, kw = w_oihw.shape
    fuse = act_scale is not None
    if fuse:
        # NOTE: degenerate gamma == 0 (scale == 0) is not supported by the
        # padding trick; guard the division anyway.
        safe_scale = jnp.where(act_scale == 0, 1.0, act_scale)
        pad_val = -act_shift / safe_scale
        scale_k = jnp.tile(act_scale, kh * kw)        # patch layout: (kh,kw,cin)
        shift_k = jnp.tile(act_shift, kh * kw)
    else:
        pad_val = scale_k = shift_k = None
    patches, ho, wo = _im2col(x_nhwc, kh, stride, pad, pad_value=pad_val)
    w_mat = jnp.transpose(w_oihw, (2, 3, 1, 0)).reshape(kh * kw * cin, cout)
    out2d, col_sum, col_sumsq = _conv_gemm(
        patches, w_mat, bias, scale_k, shift_k,
        out_dtype=out_dtype, need_stats=need_stats)
    return out2d.reshape(nb, ho, wo, cout), col_sum, col_sumsq


# ---------------------------------------------------------------------------
# Discriminator forward
# ---------------------------------------------------------------------------
_LAYER_CFG = [  # (cin, cout, stride, has_bn) -- exactly the PyTorch Sequential
    (2, 64, 2, False),
    (64, 128, 2, True),
    (128, 256, 2, True),
    (256, 512, 2, True),
    (512, 1, 1, False),
]


def init_params(key):
    params = {}
    for idx, (cin, cout, _, has_bn) in enumerate(_LAYER_CFG, start=1):
        key, kw_, kb_ = jax.random.split(key, 3)
        params[f"w{idx}"] = 0.05 * jax.random.normal(
            kw_, (cout, cin, 4, 4), jnp.float32)
        params[f"b{idx}"] = 0.05 * jax.random.normal(kb_, (cout,), jnp.float32)
        if has_bn:
            params[f"gamma{idx}"] = jnp.ones((cout,), jnp.float32)
            params[f"beta{idx}"] = jnp.zeros((cout,), jnp.float32)
    return params


@jax.jit
def discriminator_forward(x_nchw, params):
    x = jnp.transpose(x_nchw, (0, 2, 3, 1)).astype(jnp.float32)  # NCHW -> NHWC
    n_layers = len(_LAYER_CFG)
    act_scale = act_shift = None           # pending BN+LReLU to fuse into next conv
    for idx, (_, _, stride, has_bn) in enumerate(_LAYER_CFG, start=1):
        is_last = idx == n_layers
        z, col_sum, col_sumsq = _conv2d(
            x, params[f"w{idx}"], params[f"b{idx}"], stride=stride, pad=1,
            act_scale=act_scale, act_shift=act_shift,
            out_dtype=jnp.float32 if is_last else jnp.bfloat16,
            need_stats=has_bn)
        if has_bn:
            n, h, w, c = z.shape
            m = n * h * w
            mean = col_sum / m
            var = jnp.maximum(col_sumsq / m - mean * mean, 0.0)  # biased (train)
            act_scale = params[f"gamma{idx}"] * lax.rsqrt(var + 1e-5)
            act_shift = params[f"beta{idx}"] - mean * act_scale
        else:
            act_scale = act_shift = None
        x = z
    return jnp.transpose(x, (0, 3, 1, 2)).astype(jnp.float32)    # NHWC -> NCHW


# ---------------------------------------------------------------------------
# Pure-JAX reference (correctness check; matches the kernel's bf16 precision)
# ---------------------------------------------------------------------------
@jax.jit
def reference_forward(x_nchw, params):
    x = x_nchw.astype(jnp.float32)
    for idx, (_, _, stride, has_bn) in enumerate(_LAYER_CFG, start=1):
        y = lax.conv_general_dilated(
            x.astype(jnp.bfloat16), params[f"w{idx}"].astype(jnp.bfloat16),
            (stride, stride), [(1, 1), (1, 1)],
            dimension_numbers=("NCHW", "OIHW", "NCHW"),
            preferred_element_type=jnp.float32)
        z = y + params[f"b{idx}"][None, :, None, None]
        if has_bn:
            mean = jnp.mean(z, axis=(0, 2, 3), keepdims=True)
            var = jnp.mean(jnp.square(z - mean), axis=(0, 2, 3), keepdims=True)
            # Mirror the kernel's bf16 storage of the pre-BN conv output.
            zq = z.astype(jnp.bfloat16).astype(jnp.float32)
            zn = (zq - mean) * lax.rsqrt(var + 1e-5)
            z = zn * params[f"gamma{idx}"][None, :, None, None] \
                + params[f"beta{idx}"][None, :, None, None]
            z = jnp.where(z >= 0, z, 0.2 * z)
        x = z
    return x


if __name__ == "__main__":
    key = jax.random.PRNGKey(0)
    kx, kp = jax.random.split(key)
    # 32x32 spatial keeps every conv output >= 1 (32 -> 16 -> 8 -> 4 -> 2 -> 1).
    x = jax.random.normal(kx, (2, 2, 32, 32), jnp.float32)
    params = init_params(kp)

    out = jax.block_until_ready(discriminator_forward(x, params))
    assert out.shape == (2, 1, 1, 1), out.shape

    ref = jax.block_until_ready(reference_forward(x, params))
    err = float(jnp.max(jnp.abs(out - ref)))
    tol = 3e-2 * max(1.0, float(jnp.max(jnp.abs(ref))))
    if err > tol:
        raise AssertionError(f"mismatch vs reference: max abs err = {err} (tol {tol})")

    print("KERNEL_OK")
</pallas_src>

<mosaic_0001>
module attributes {stable_mosaic.version = 11 : i64} {
  func.func @_gemm_bias_stats_kernel(%arg0: i32, %arg1: i32, %arg2: i32, %arg3: memref<512x32xbf16, #tpu.memory_space<vmem>>, %arg4: memref<32x64xbf16, #tpu.memory_space<vmem>>, %arg5: memref<1x64xf32, #tpu.memory_space<vmem>>, %arg6: memref<512x64xbf16, #tpu.memory_space<vmem>>, %arg7: memref<1x2x64xf32, #tpu.memory_space<vmem>>, %arg8: memref<512x64xf32, #tpu.memory_space<vmem>>) attributes {dimension_semantics = [#tpu.dimension_semantics<parallel>, #tpu.dimension_semantics<parallel>, #tpu.dimension_semantics<arbitrary>], iteration_bounds = array<i64: 1, 1, 1>, scalar_prefetch = 0 : i64, scratch_operands = 1 : i64, tpu.core_type = #tpu.core_type<tc>, window_params = [{transform_indices = @transform_0, window_bounds = array<i64: 512, 32>}, {transform_indices = @transform_1, window_bounds = array<i64: 32, 64>}, {transform_indices = @transform_2, window_bounds = array<i64: 1, 64>}, {transform_indices = @transform_3, window_bounds = array<i64: 512, 64>}, {transform_indices = @transform_4, window_bounds = array<i64: 1, 2, 64>}]} {
    %c0_i32 = arith.constant 0 : i32
    %0 = arith.cmpi eq, %arg2, %c0_i32 : i32
    %1 = arith.extui %0 : i1 to i32
    %c0_i32_0 = arith.constant 0 : i32
    %2 = arith.cmpi ne, %1, %c0_i32_0 : i32
    scf.if %2 {
      %cst_10 = arith.constant 0.000000e+00 : f32
      %12 = vector.broadcast %cst_10 : f32 to vector<512x64xf32>
      %c0_11 = arith.constant 0 : index
      %c0_12 = arith.constant 0 : index
      %13 = vector.load %arg8[%c0_11, %c0_12] : memref<512x64xf32, #tpu.memory_space<vmem>>, vector<512x64xf32>
      tpu.vector_store %arg8[%c0_11, %c0_12], %12 {strides = array<i32>} : memref<512x64xf32, #tpu.memory_space<vmem>>, vector<512x64xf32>,
    } else {
    }
    %c0 = arith.constant 0 : index
    %c0_1 = arith.constant 0 : index
    %3 = vector.load %arg3[%c0, %c0_1] : memref<512x32xbf16, #tpu.memory_space<vmem>>, vector<512x32xbf16>
    %c0_2 = arith.constant 0 : index
    %c0_3 = arith.constant 0 : index
    %4 = vector.load %arg8[%c0_2, %c0_3] : memref<512x64xf32, #tpu.memory_space<vmem>>, vector<512x64xf32>
    %c0_4 = arith.constant 0 : index
    %c0_5 = arith.constant 0 : index
    %5 = vector.load %arg4[%c0_4, %c0_5] : memref<32x64xbf16, #tpu.memory_space<vmem>>, vector<32x64xbf16>
    %cst = arith.constant dense<0.000000e+00> : vector<512x64xf32>
    %6 = tpu.matmul %3, %5, %cst {dimension_numbers = #tpu.dot_dimension_numbers<[1], [0], [0], [1], [0, 0, 1, 1], [], []>} : vector<512x32xbf16>, vector<32x64xbf16>, vector<512x64xf32> -> vector<512x64xf32>
    %7 = arith.addf %4, %6 : vector<512x64xf32>
    %c0_6 = arith.constant 0 : index
    %c0_7 = arith.constant 0 : index
    %8 = vector.load %arg8[%c0_6, %c0_7] : memref<512x64xf32, #tpu.memory_space<vmem>>, vector<512x64xf32>
    tpu.vector_store %arg8[%c0_6, %c0_7], %7 {strides = array<i32>} : memref<512x64xf32, #tpu.memory_space<vmem>>, vector<512x64xf32>,
    %c0_i32_8 = arith.constant 0 : i32
    %9 = arith.cmpi eq, %arg2, %c0_i32_8 : i32
    %10 = arith.extui %9 : i1 to i32
    %c0_i32_9 = arith.constant 0 : i32
    %11 = arith.cmpi ne, %10, %c0_i32_9 : i32
    scf.if %11 {
      %c0_10 = arith.constant 0 : index
      %c0_11 = arith.constant 0 : index
      %12 = vector.load %arg8[%c0_10, %c0_11] : memref<512x64xf32, #tpu.memory_space<vmem>>, vector<512x64xf32>
      %c0_12 = arith.constant 0 : index
      %c0_13 = arith.constant 0 : index
      %13 = vector.load %arg5[%c0_12, %c0_13] : memref<1x64xf32, #tpu.memory_space<vmem>>, vector<1x64xf32>
      %14 = vector.broadcast %13 : vector<1x64xf32> to vector<512x64xf32>
      %15 = arith.addf %12, %14 : vector<512x64xf32>
      %16 = arith.truncf %15 : vector<512x64xf32> to vector<512x64xbf16>
      %c0_14 = arith.constant 0 : index
      %c0_15 = arith.constant 0 : index
      %17 = vector.load %arg6[%c0_14, %c0_15] : memref<512x64xbf16, #tpu.memory_space<vmem>>, vector<512x64xbf16>
      tpu.vector_store %arg6[%c0_14, %c0_15], %16 {strides = array<i32>} : memref<512x64xbf16, #tpu.memory_space<vmem>>, vector<512x64xbf16>,
      %cst_16 = arith.constant dense<0.000000e+00> : vector<64xf32>
      %18 = vector.multi_reduction <add>, %15, %cst_16 [0] : vector<512x64xf32> to vector<64xf32>
      %19 = vector.shape_cast %18 : vector<64xf32> to vector<1x64xf32>
      %20 = arith.mulf %15, %15 : vector<512x64xf32>
      %cst_17 = arith.constant dense<0.000000e+00> : vector<64xf32>
      %21 = vector.multi_reduction <add>, %20, %cst_17 [0] : vector<512x64xf32> to vector<64xf32>
      %22 = vector.shape_cast %21 : vector<64xf32> to vector<1x64xf32>
      %23 = tpu.concatenate %19, %22 in 0 : vector<1x64xf32>, vector<1x64xf32> -> vector<2x64xf32>
      %c0_18 = arith.constant 0 : index
      %c0_19 = arith.constant 0 : index
      %c0_20 = arith.constant 0 : index
      %24 = vector.load %arg7[%c0_18, %c0_19, %c0_20] : memref<1x2x64xf32, #tpu.memory_space<vmem>>, vector<1x2x64xf32>
      %25 = vector.shape_cast %24 : vector<1x2x64xf32> to vector<2x64xf32>
      %26 = vector.shape_cast %23 : vector<2x64xf32> to vector<1x2x64xf32>
      tpu.vector_store %arg7[%c0_18, %c0_19, %c0_20], %26 {strides = array<i32>} : memref<1x2x64xf32, #tpu.memory_space<vmem>>, vector<1x2x64xf32>,
    } else {
    }
    return
  }
  func.func @transform_0(%arg0: i32, %arg1: i32, %arg2: i32) -> (i32, i32) {
    %c0_i32 = arith.constant 0 : i32
    return %arg0, %arg2 : i32, i32
  }
  func.func @transform_1(%arg0: i32, %arg1: i32, %arg2: i32) -> (i32, i32) {
    %c0_i32 = arith.constant 0 : i32
    return %arg2, %arg1 : i32, i32
  }
  func.func @transform_2(%arg0: i32, %arg1: i32, %arg2: i32) -> (i32, i32) {
    %c0_i32 = arith.constant 0 : i32
    %c0_i32_0 = arith.constant 0 : i32
    return %c0_i32, %arg1 : i32, i32
  }
  func.func @transform_3(%arg0: i32, %arg1: i32, %arg2: i32) -> (i32, i32) {
    %c0_i32 = arith.constant 0 : i32
    return %arg0, %arg1 : i32, i32
  }
  func.func @transform_4(%arg0: i32, %arg1: i32, %arg2: i32) -> (i32, i32, i32) {
    %c0_i32 = arith.constant 0 : i32
    %c0_i32_0 = arith.constant 0 : i32
    return %arg0, %c0_i32, %arg1 : i32, i32, i32
  }
}

module attributes {stable_mosaic.version = 11 : i64} {
  func.func @_gemm_bias_stats_kernel(%arg0: i32, %arg1: i32, %arg2: i32, %arg3: memref<128x1024xbf16, #tpu.memory_space<vmem>>, %arg4: memref<1024x128xbf16, #tpu.memory_space<vmem>>, %arg5: memref<1x128xf32, #tpu.memory_space<vmem>>, %arg6: memref<128x128xbf16, #tpu.memory_space<vmem>>, %arg7: memref<1x2x128xf32, #tpu.memory_space<vmem>>, %arg8: memref<128x128xf32, #tpu.memory_space<vmem>>) attributes {dimension_semantics = [#tpu.dimension_semantics<parallel>, #tpu.dimension_semantics<parallel>, #tpu.dimension_semantics<arbitrary>], iteration_bounds = array<i64: 1, 1, 1>, scalar_prefetch = 0 : i64, scratch_operands = 1 : i64, tpu.core_type = #tpu.core_type<tc>, window_params = [{transform_indices = @transform_0, window_bounds = array<i64: 128, 1024>}, {transform_indices = @transform_1, window_bounds = array<i64: 1024, 128>}, {transform_indices = @transform_2, window_bounds = array<i64: 1, 128>}, {transform_indices = @transform_3, window_bounds = array<i64: 128, 128>}, {transform_indices = @transform_4, window_bounds = array<i64: 1, 2, 128>}]} {
    %c0_i32 = arith.constant 0 : i32
    %0 = arith.cmpi eq, %arg2, %c0_i32 : i32
    %1 = arith.extui %0 : i1 to i32
    %c0_i32_0 = arith.constant 0 : i32
    %2 = arith.cmpi ne, %1, %c0_i32_0 : i32
    scf.if %2 {
      %cst_10 = arith.constant 0.000000e+00 : f32
      %12 = vector.broadcast %cst_10 : f32 to vector<128x128xf32>
      %c0_11 = arith.constant 0 : index
      %c0_12 = arith.constant 0 : index
      %13 = vector.load %arg8[%c0_11, %c0_12] : memref<128x128xf32, #tpu.memory_space<vmem>>, vector<128x128xf32>
      tpu.vector_store %arg8[%c0_11, %c0_12], %12 {strides = array<i32>} : memref<128x128xf32, #tpu.memory_space<vmem>>, vector<128x128xf32>,
    } else {
    }
    %c0 = arith.constant 0 : index
    %c0_1 = arith.constant 0 : index
    %3 = vector.load %arg3[%c0, %c0_1] : memref<128x1024xbf16, #tpu.memory_space<vmem>>, vector<128x1024xbf16>
    %c0_2 = arith.constant 0 : index
    %c0_3 = arith.constant 0 : index
    %4 = vector.load %arg8[%c0_2, %c0_3] : memref<128x128xf32, #tpu.memory_space<vmem>>, vector<128x128xf32>
    %c0_4 = arith.constant 0 : index
    %c0_5 = arith.constant 0 : index
    %5 = vector.load %arg4[%c0_4, %c0_5] : memref<1024x128xbf16, #tpu.memory_space<vmem>>, vector<1024x128xbf16>
    %cst = arith.constant dense<0.000000e+00> : vector<128x128xf32>
    %6 = tpu.matmul %3, %5, %cst {dimension_numbers = #tpu.dot_dimension_numbers<[1], [0], [0], [1], [0, 0, 1, 1], [], []>} : vector<128x1024xbf16>, vector<1024x128xbf16>, vector<128x128xf32> -> vector<128x128xf32>
    %7 = arith.addf %4, %6 : vector<128x128xf32>
    %c0_6 = arith.constant 0 : index
    %c0_7 = arith.constant 0 : index
    %8 = vector.load %arg8[%c0_6, %c0_7] : memref<128x128xf32, #tpu.memory_space<vmem>>, vector<128x128xf32>
    tpu.vector_store %arg8[%c0_6, %c0_7], %7 {strides = array<i32>} : memref<128x128xf32, #tpu.memory_space<vmem>>, vector<128x128xf32>,
    %c0_i32_8 = arith.constant 0 : i32
    %9 = arith.cmpi eq, %arg2, %c0_i32_8 : i32
    %10 = arith.extui %9 : i1 to i32
    %c0_i32_9 = arith.constant 0 : i32
    %11 = arith.cmpi ne, %10, %c0_i32_9 : i32
    scf.if %11 {
      %c0_10 = arith.constant 0 : index
      %c0_11 = arith.constant 0 : index
      %12 = vector.load %arg8[%c0_10, %c0_11] : memref<128x128xf32, #tpu.memory_space<vmem>>, vector<128x128xf32>
      %c0_12 = arith.constant 0 : index
      %c0_13 = arith.constant 0 : index
      %13 = vector.load %arg5[%c0_12, %c0_13] : memref<1x128xf32, #tpu.memory_space<vmem>>, vector<1x128xf32>
      %14 = vector.broadcast %13 : vector<1x128xf32> to vector<128x128xf32>
      %15 = arith.addf %12, %14 : vector<128x128xf32>
      %16 = arith.truncf %15 : vector<128x128xf32> to vector<128x128xbf16>
      %c0_14 = arith.constant 0 : index
      %c0_15 = arith.constant 0 : index
      %17 = vector.load %arg6[%c0_14, %c0_15] : memref<128x128xbf16, #tpu.memory_space<vmem>>, vector<128x128xbf16>
      tpu.vector_store %arg6[%c0_14, %c0_15], %16 {strides = array<i32>} : memref<128x128xbf16, #tpu.memory_space<vmem>>, vector<128x128xbf16>,
      %cst_16 = arith.constant dense<0.000000e+00> : vector<128xf32>
      %18 = vector.multi_reduction <add>, %15, %cst_16 [0] : vector<128x128xf32> to vector<128xf32>
      %19 = vector.shape_cast %18 : vector<128xf32> to vector<1x128xf32>
      %20 = arith.mulf %15, %15 : vector<128x128xf32>
      %cst_17 = arith.constant dense<0.000000e+00> : vector<128xf32>
      %21 = vector.multi_reduction <add>, %20, %cst_17 [0] : vector<128x128xf32> to vector<128xf32>
      %22 = vector.shape_cast %21 : vector<128xf32> to vector<1x128xf32>
      %23 = tpu.concatenate %19, %22 in 0 : vector<1x128xf32>, vector<1x128xf32> -> vector<2x128xf32>
      %c0_18 = arith.constant 0 : index
      %c0_19 = arith.constant 0 : index
      %c0_20 = arith.constant 0 : index
      %24 = vector.load %arg7[%c0_18, %c0_19, %c0_20] : memref<1x2x128xf32, #tpu.memory_space<vmem>>, vector<1x2x128xf32>
      %25 = vector.shape_cast %24 : vector<1x2x128xf32> to vector<2x128xf32>
      %26 = vector.shape_cast %23 : vector<2x128xf32> to vector<1x2x128xf32>
      tpu.vector_store %arg7[%c0_18, %c0_19, %c0_20], %26 {strides = array<i32>} : memref<1x2x128xf32, #tpu.memory_space<vmem>>, vector<1x2x128xf32>,
    } else {
    }
    return
  }
  func.func @transform_0(%arg0: i32, %arg1: i32, %arg2: i32) -> (i32, i32) {
    %c0_i32 = arith.constant 0 : i32
    return %arg0, %arg2 : i32, i32
  }
  func.func @transform_1(%arg0: i32, %arg1: i32, %arg2: i32) -> (i32, i32) {
    %c0_i32 = arith.constant 0 : i32
    return %arg2, %arg1 : i32, i32
  }
  func.func @transform_2(%arg0: i32, %arg1: i32, %arg2: i32) -> (i32, i32) {
    %c0_i32 = arith.constant 0 : i32
    %c0_i32_0 = arith.constant 0 : i32
    return %c0_i32, %arg1 : i32, i32
  }
  func.func @transform_3(%arg0: i32, %arg1: i32, %arg2: i32) -> (i32, i32) {
    %c0_i32 = arith.constant 0 : i32
    return %arg0, %arg1 : i32, i32
  }
  func.func @transform_4(%arg0: i32, %arg1: i32, %arg2: i32) -> (i32, i32, i32) {
    %c0_i32 = arith.constant 0 : i32
    %c0_i32_0 = arith.constant 0 : i32
    return %arg0, %c0_i32, %arg1 : i32, i32, i32
  }
}

module attributes {stable_mosaic.version = 11 : i64} {
  func.func @_gemm_bias_stats_kernel(%arg0: i32, %arg1: i32, %arg2: i32, %arg3: memref<32x2048xbf16, #tpu.memory_space<vmem>>, %arg4: memref<2048x128xbf16, #tpu.memory_space<vmem>>, %arg5: memref<1x128xf32, #tpu.memory_space<vmem>>, %arg6: memref<1x2048xf32, #tpu.memory_space<vmem>>, %arg7: memref<1x2048xf32, #tpu.memory_space<vmem>>, %arg8: memref<32x128xbf16, #tpu.memory_space<vmem>>, %arg9: memref<1x2x128xf32, #tpu.memory_space<vmem>>, %arg10: memref<32x128xf32, #tpu.memory_space<vmem>>) attributes {dimension_semantics = [#tpu.dimension_semantics<parallel>, #tpu.dimension_semantics<parallel>, #tpu.dimension_semantics<arbitrary>], iteration_bounds = array<i64: 1, 2, 1>, scalar_prefetch = 0 : i64, scratch_operands = 1 : i64, tpu.core_type = #tpu.core_type<tc>, window_params = [{transform_indices = @transform_0, window_bounds = array<i64: 32, 2048>}, {transform_indices = @transform_1, window_bounds = array<i64: 2048, 128>}, {transform_indices = @transform_2, window_bounds = array<i64: 1, 128>}, {transform_indices = @transform_3, window_bounds = array<i64: 1, 2048>}, {transform_indices = @transform_4, window_bounds = array<i64: 1, 2048>}, {transform_indices = @transform_5, window_bounds = array<i64: 32, 128>}, {transform_indices = @transform_6, window_bounds = array<i64: 1, 2, 128>}]} {
    %c0_i32 = arith.constant 0 : i32
    %0 = arith.cmpi eq, %arg2, %c0_i32 : i32
    %1 = arith.extui %0 : i1 to i32
    %c0_i32_0 = arith.constant 0 : i32
    %2 = arith.cmpi ne, %1, %c0_i32_0 : i32
    scf.if %2 {
      %cst_16 = arith.constant 0.000000e+00 : f32
      %25 = vector.broadcast %cst_16 : f32 to vector<32x128xf32>
      %c0_17 = arith.constant 0 : index
      %c0_18 = arith.constant 0 : index
      %26 = vector.load %arg10[%c0_17, %c0_18] : memref<32x128xf32, #tpu.memory_space<vmem>>, vector<32x128xf32>
      tpu.vector_store %arg10[%c0_17, %c0_18], %25 {strides = array<i32>} : memref<32x128xf32, #tpu.memory_space<vmem>>, vector<32x128xf32>,
    } else {
    }
    %c0 = arith.constant 0 : index
    %c0_1 = arith.constant 0 : index
    %3 = vector.load %arg3[%c0, %c0_1] : memref<32x2048xbf16, #tpu.memory_space<vmem>>, vector<32x2048xbf16>
    %4 = arith.extf %3 : vector<32x2048xbf16> to vector<32x2048xf32>
    %c0_2 = arith.constant 0 : index
    %c0_3 = arith.constant 0 : index
    %5 = vector.load %arg6[%c0_2, %c0_3] : memref<1x2048xf32, #tpu.memory_space<vmem>>, vector<1x2048xf32>
    %6 = vector.broadcast %5 : vector<1x2048xf32> to vector<32x2048xf32>
    %7 = arith.mulf %4, %6 : vector<32x2048xf32>
    %c0_4 = arith.constant 0 : index
    %c0_5 = arith.constant 0 : index
    %8 = vector.load %arg7[%c0_4, %c0_5] : memref<1x2048xf32, #tpu.memory_space<vmem>>, vector<1x2048xf32>
    %9 = vector.broadcast %8 : vector<1x2048xf32> to vector<32x2048xf32>
    %10 = arith.addf %7, %9 : vector<32x2048xf32>
    %cst = arith.constant 0.000000e+00 : f32
    %11 = vector.broadcast %cst : f32 to vector<32x2048xf32>
    %12 = arith.cmpf oge, %10, %11 : vector<32x2048xf32>
    %cst_6 = arith.constant 2.000000e-01 : f32
    %13 = vector.broadcast %cst_6 : f32 to vector<32x2048xf32>
    %14 = arith.mulf %13, %10 : vector<32x2048xf32>
    %15 = arith.select %12, %10, %14 : vector<32x2048xi1>, vector<32x2048xf32>
    %16 = arith.truncf %15 : vector<32x2048xf32> to vector<32x2048xbf16>
    %c0_7 = arith.constant 0 : index
    %c0_8 = arith.constant 0 : index
    %17 = vector.load %arg10[%c0_7, %c0_8] : memref<32x128xf32, #tpu.memory_space<vmem>>, vector<32x128xf32>
    %c0_9 = arith.constant 0 : index
    %c0_10 = arith.constant 0 : index
    %18 = vector.load %arg4[%c0_9, %c0_10] : memref<2048x128xbf16, #tpu.memory_space<vmem>>, vector<2048x128xbf16>
    %cst_11 = arith.constant dense<0.000000e+00> : vector<32x128xf32>
    %19 = tpu.matmul %16, %18, %cst_11 {dimension_numbers = #tpu.dot_dimension_numbers<[1], [0], [0], [1], [0, 0, 1, 1], [], []>} : vector<32x2048xbf16>, vector<2048x128xbf16>, vector<32x128xf32> -> vector<32x128xf32>
    %20 = arith.addf %17, %19 : vector<32x128xf32>
    %c0_12 = arith.constant 0 : index
    %c0_13 = arith.constant 0 : index
    %21 = vector.load %arg10[%c0_12, %c0_13] : memref<32x128xf32, #tpu.memory_space<vmem>>, vector<32x128xf32>
    tpu.vector_store %arg10[%c0_12, %c0_13], %20 {strides = array<i32>} : memref<32x128xf32, #tpu.memory_space<vmem>>, vector<32x128xf32>,
    %c0_i32_14 = arith.constant 0 : i32
    %22 = arith.cmpi eq, %arg2, %c0_i32_14 : i32
    %23 = arith.extui %22 : i1 to i32
    %c0_i32_15 = arith.constant 0 : i32
    %24 = arith.cmpi ne, %23, %c0_i32_15 : i32
    scf.if %24 {
      %c0_16 = arith.constant 0 : index
      %c0_17 = arith.constant 0 : index
      %25 = vector.load %arg10[%c0_16, %c0_17] : memref<32x128xf32, #tpu.memory_space<vmem>>, vector<32x128xf32>
      %c0_18 = arith.constant 0 : index
      %c0_19 = arith.constant 0 : index
      %26 = vector.load %arg5[%c0_18, %c0_19] : memref<1x128xf32, #tpu.memory_space<vmem>>, vector<1x128xf32>
      %27 = vector.broadcast %26 : vector<1x128xf32> to vector<32x128xf32>
      %28 = arith.addf %25, %27 : vector<32x128xf32>
      %29 = arith.truncf %28 : vector<32x128xf32> to vector<32x128xbf16>
      %c0_20 = arith.constant 0 : index
      %c0_21 = arith.constant 0 : index
      %30 = vector.load %arg8[%c0_20, %c0_21] : memref<32x128xbf16, #tpu.memory_space<vmem>>, vector<32x128xbf16>
      tpu.vector_store %arg8[%c0_20, %c0_21], %29 {strides = array<i32>} : memref<32x128xbf16, #tpu.memory_space<vmem>>, vector<32x128xbf16>,
      %cst_22 = arith.constant dense<0.000000e+00> : vector<128xf32>
      %31 = vector.multi_reduction <add>, %28, %cst_22 [0] : vector<32x128xf32> to vector<128xf32>
      %32 = vector.shape_cast %31 : vector<128xf32> to vector<1x128xf32>
      %33 = arith.mulf %28, %28 : vector<32x128xf32>
      %cst_23 = arith.constant dense<0.000000e+00> : vector<128xf32>
      %34 = vector.multi_reduction <add>, %33, %cst_23 [0] : vector<32x128xf32> to vector<128xf32>
      %35 = vector.shape_cast %34 : vector<128xf32> to vector<1x128xf32>
      %36 = tpu.concatenate %32, %35 in 0 : vector<1x128xf32>, vector<1x128xf32> -> vector<2x128xf32>
      %c0_24 = arith.constant 0 : index
      %c0_25 = arith.constant 0 : index
      %c0_26 = arith.constant 0 : index
      %37 = vector.load %arg9[%c0_24, %c0_25, %c0_26] : memref<1x2x128xf32, #tpu.memory_space<vmem>>, vector<1x2x128xf32>
      %38 = vector.shape_cast %37 : vector<1x2x128xf32> to vector<2x128xf32>
      %39 = vector.shape_cast %36 : vector<2x128xf32> to vector<1x2x128xf32>
      tpu.vector_store %arg9[%c0_24, %c0_25, %c0_26], %39 {strides = array<i32>} : memref<1x2x128xf32, #tpu.memory_space<vmem>>, vector<1x2x128xf32>,
    } else {
    }
    return
  }
  func.func @transform_0(%arg0: i32, %arg1: i32, %arg2: i32) -> (i32, i32) {
    %c0_i32 = arith.constant 0 : i32
    return %arg0, %arg2 : i32, i32
  }
  func.func @transform_1(%arg0: i32, %arg1: i32, %arg2: i32) -> (i32, i32) {
    %c0_i32 = arith.constant 0 : i32
    return %arg2, %arg1 : i32, i32
  }
  func.func @transform_2(%arg0: i32, %arg1: i32, %arg2: i32) -> (i32, i32) {
    %c0_i32 = arith.constant 0 : i32
    %c0_i32_0 = arith.constant 0 : i32
    return %c0_i32, %arg1 : i32, i32
  }
  func.func @transform_3(%arg0: i32, %arg1: i32, %arg2: i32) -> (i32, i32) {
    %c0_i32 = arith.constant 0 : i32
    %c0_i32_0 = arith.constant 0 : i32
    return %c0_i32, %arg2 : i32, i32
  }
  func.func @transform_4(%arg0: i32, %arg1: i32, %arg2: i32) -> (i32, i32) {
    %c0_i32 = arith.constant 0 : i32
    %c0_i32_0 = arith.constant 0 : i32
    return %c0_i32, %arg2 : i32, i32
  }
  func.func @transform_5(%arg0: i32, %arg1: i32, %arg2: i32) -> (i32, i32) {
    %c0_i32 = arith.constant 0 : i32
    return %arg0, %arg1 : i32, i32
  }
  func.func @transform_6(%arg0: i32, %arg1: i32, %arg2: i32) -> (i32, i32, i32) {
    %c0_i32 = arith.constant 0 : i32
    %c0_i32_0 = arith.constant 0 : i32
    return %arg0, %c0_i32, %arg1 : i32, i32, i32
  }
}

module attributes {stable_mosaic.version = 11 : i64} {
  func.func @_gemm_bias_stats_kernel(%arg0: i32, %arg1: i32, %arg2: i32, %arg3: memref<8x2048xbf16, #tpu.memory_space<vmem>>, %arg4: memref<2048x256xbf16, #tpu.memory_space<vmem>>, %arg5: memref<1x256xf32, #tpu.memory_space<vmem>>, %arg6: memref<1x2048xf32, #tpu.memory_space<vmem>>, %arg7: memref<1x2048xf32, #tpu.memory_space<vmem>>, %arg8: memref<8x256xbf16, #tpu.memory_space<vmem>>, %arg9: memref<1x2x256xf32, #tpu.memory_space<vmem>>, %arg10: memref<8x256xf32, #tpu.memory_space<vmem>>) attributes {dimension_semantics = [#tpu.dimension_semantics<parallel>, #tpu.dimension_semantics<parallel>, #tpu.dimension_semantics<arbitrary>], iteration_bounds = array<i64: 1, 2, 2>, scalar_prefetch = 0 : i64, scratch_operands = 1 : i64, tpu.core_type = #tpu.core_type<tc>, window_params = [{transform_indices = @transform_0, window_bounds = array<i64: 8, 2048>}, {transform_indices = @transform_1, window_bounds = array<i64: 2048, 256>}, {transform_indices = @transform_2, window_bounds = array<i64: 1, 256>}, {transform_indices = @transform_3, window_bounds = array<i64: 1, 2048>}, {transform_indices = @transform_4, window_bounds = array<i64: 1, 2048>}, {transform_indices = @transform_5, window_bounds = array<i64: 8, 256>}, {transform_indices = @transform_6, window_bounds = array<i64: 1, 2, 256>}]} {
    %c0_i32 = arith.constant 0 : i32
    %0 = arith.cmpi eq, %arg2, %c0_i32 : i32
    %1 = arith.extui %0 : i1 to i32
    %c0_i32_0 = arith.constant 0 : i32
    %2 = arith.cmpi ne, %1, %c0_i32_0 : i32
    scf.if %2 {
      %cst_15 = arith.constant 0.000000e+00 : f32
      %25 = vector.broadcast %cst_15 : f32 to vector<8x256xf32>
      %c0_16 = arith.constant 0 : index
      %c0_17 = arith.constant 0 : index
      %26 = vector.load %arg10[%c0_16, %c0_17] : memref<8x256xf32, #tpu.memory_space<vmem>>, vector<8x256xf32>
      tpu.vector_store %arg10[%c0_16, %c0_17], %25 {strides = array<i32>} : memref<8x256xf32, #tpu.memory_space<vmem>>, vector<8x256xf32>,
    } else {
    }
    %c0 = arith.constant 0 : index
    %c0_1 = arith.constant 0 : index
    %3 = vector.load %arg3[%c0, %c0_1] : memref<8x2048xbf16, #tpu.memory_space<vmem>>, vector<8x2048xbf16>
    %4 = arith.extf %3 : vector<8x2048xbf16> to vector<8x2048xf32>
    %c0_2 = arith.constant 0 : index
    %c0_3 = arith.constant 0 : index
    %5 = vector.load %arg6[%c0_2, %c0_3] : memref<1x2048xf32, #tpu.memory_space<vmem>>, vector<1x2048xf32>
    %6 = vector.broadcast %5 : vector<1x2048xf32> to vector<8x2048xf32>
    %7 = arith.mulf %4, %6 : vector<8x2048xf32>
    %c0_4 = arith.constant 0 : index
    %c0_5 = arith.constant 0 : index
    %8 = vector.load %arg7[%c0_4, %c0_5] : memref<1x2048xf32, #tpu.memory_space<vmem>>, vector<1x2048xf32>
    %9 = vector.broadcast %8 : vector<1x2048xf32> to vector<8x2048xf32>
    %10 = arith.addf %7, %9 : vector<8x2048xf32>
    %cst = arith.constant 0.000000e+00 : f32
    %11 = vector.broadcast %cst : f32 to vector<8x2048xf32>
    %12 = arith.cmpf oge, %10, %11 : vector<8x2048xf32>
    %cst_6 = arith.constant 2.000000e-01 : f32
    %13 = vector.broadcast %cst_6 : f32 to vector<8x2048xf32>
    %14 = arith.mulf %13, %10 : vector<8x2048xf32>
    %15 = arith.select %12, %10, %14 : vector<8x2048xi1>, vector<8x2048xf32>
    %16 = arith.truncf %15 : vector<8x2048xf32> to vector<8x2048xbf16>
    %c0_7 = arith.constant 0 : index
    %c0_8 = arith.constant 0 : index
    %17 = vector.load %arg10[%c0_7, %c0_8] : memref<8x256xf32, #tpu.memory_space<vmem>>, vector<8x256xf32>
    %c0_9 = arith.constant 0 : index
    %c0_10 = arith.constant 0 : index
    %18 = vector.load %arg4[%c0_9, %c0_10] : memref<2048x256xbf16, #tpu.memory_space<vmem>>, vector<2048x256xbf16>
    %cst_11 = arith.constant dense<0.000000e+00> : vector<8x256xf32>
    %19 = tpu.matmul %16, %18, %cst_11 {dimension_numbers = #tpu.dot_dimension_numbers<[1], [0], [0], [1], [0, 0, 1, 1], [], []>} : vector<8x2048xbf16>, vector<2048x256xbf16>, vector<8x256xf32> -> vector<8x256xf32>
    %20 = arith.addf %17, %19 : vector<8x256xf32>
    %c0_12 = arith.constant 0 : index
    %c0_13 = arith.constant 0 : index
    %21 = vector.load %arg10[%c0_12, %c0_13] : memref<8x256xf32, #tpu.memory_space<vmem>>, vector<8x256xf32>
    tpu.vector_store %arg10[%c0_12, %c0_13], %20 {strides = array<i32>} : memref<8x256xf32, #tpu.memory_space<vmem>>, vector<8x256xf32>,
    %c1_i32 = arith.constant 1 : i32
    %22 = arith.cmpi eq, %arg2, %c1_i32 : i32
    %23 = arith.extui %22 : i1 to i32
    %c0_i32_14 = arith.constant 0 : i32
    %24 = arith.cmpi ne, %23, %c0_i32_14 : i32
    scf.if %24 {
      %c0_15 = arith.constant 0 : index
      %c0_16 = arith.constant 0 : index
      %25 = vector.load %arg10[%c0_15, %c0_16] : memref<8x256xf32, #tpu.memory_space<vmem>>, vector<8x256xf32>
      %c0_17 = arith.constant 0 : index
      %c0_18 = arith.constant 0 : index
      %26 = vector.load %arg5[%c0_17, %c0_18] : memref<1x256xf32, #tpu.memory_space<vmem>>, vector<1x256xf32>
      %27 = vector.broadcast %26 : vector<1x256xf32> to vector<8x256xf32>
      %28 = arith.addf %25, %27 : vector<8x256xf32>
      %29 = arith.truncf %28 : vector<8x256xf32> to vector<8x256xbf16>
      %c0_19 = arith.constant 0 : index
      %c0_20 = arith.constant 0 : index
      %30 = vector.load %arg8[%c0_19, %c0_20] : memref<8x256xbf16, #tpu.memory_space<vmem>>, vector<8x256xbf16>
      tpu.vector_store %arg8[%c0_19, %c0_20], %29 {strides = array<i32>} : memref<8x256xbf16, #tpu.memory_space<vmem>>, vector<8x256xbf16>,
      %cst_21 = arith.constant dense<0.000000e+00> : vector<256xf32>
      %31 = vector.multi_reduction <add>, %28, %cst_21 [0] : vector<8x256xf32> to vector<256xf32>
      %32 = vector.shape_cast %31 : vector<256xf32> to vector<1x256xf32>
      %33 = arith.mulf %28, %28 : vector<8x256xf32>
      %cst_22 = arith.constant dense<0.000000e+00> : vector<256xf32>
      %34 = vector.multi_reduction <add>, %33, %cst_22 [0] : vector<8x256xf32> to vector<256xf32>
      %35 = vector.shape_cast %34 : vector<256xf32> to vector<1x256xf32>
      %36 = tpu.concatenate %32, %35 in 0 : vector<1x256xf32>, vector<1x256xf32> -> vector<2x256xf32>
      %c0_23 = arith.constant 0 : index
      %c0_24 = arith.constant 0 : index
      %c0_25 = arith.constant 0 : index
      %37 = vector.load %arg9[%c0_23, %c0_24, %c0_25] : memref<1x2x256xf32, #tpu.memory_space<vmem>>, vector<1x2x256xf32>
      %38 = vector.shape_cast %37 : vector<1x2x256xf32> to vector<2x256xf32>
      %39 = vector.shape_cast %36 : vector<2x256xf32> to vector<1x2x256xf32>
      tpu.vector_store %arg9[%c0_23, %c0_24, %c0_25], %39 {strides = array<i32>} : memref<1x2x256xf32, #tpu.memory_space<vmem>>, vector<1x2x256xf32>,
    } else {
    }
    return
  }
  func.func @transform_0(%arg0: i32, %arg1: i32, %arg2: i32) -> (i32, i32) {
    %c0_i32 = arith.constant 0 : i32
    return %arg0, %arg2 : i32, i32
  }
  func.func @transform_1(%arg0: i32, %arg1: i32, %arg2: i32) -> (i32, i32) {
    %c0_i32 = arith.constant 0 : i32
    return %arg2, %arg1 : i32, i32
  }
  func.func @transform_2(%arg0: i32, %arg1: i32, %arg2: i32) -> (i32, i32) {
    %c0_i32 = arith.constant 0 : i32
    %c0_i32_0 = arith.constant 0 : i32
    return %c0_i32, %arg1 : i32, i32
  }
  func.func @transform_3(%arg0: i32, %arg1: i32, %arg2: i32) -> (i32, i32) {
    %c0_i32 = arith.constant 0 : i32
    %c0_i32_0 = arith.constant 0 : i32
    return %c0_i32, %arg2 : i32, i32
  }
  func.func @transform_4(%arg0: i32, %arg1: i32, %arg2: i32) -> (i32, i32) {
    %c0_i32 = arith.constant 0 : i32
    %c0_i32_0 = arith.constant 0 : i32
    return %c0_i32, %arg2 : i32, i32
  }
  func.func @transform_5(%arg0: i32, %arg1: i32, %arg2: i32) -> (i32, i32) {
    %c0_i32 = arith.constant 0 : i32
    return %arg0, %arg1 : i32, i32
  }
  func.func @transform_6(%arg0: i32, %arg1: i32, %arg2: i32) -> (i32, i32, i32) {
    %c0_i32 = arith.constant 0 : i32
    %c0_i32_0 = arith.constant 0 : i32
    return %arg0, %c0_i32, %arg1 : i32, i32, i32
  }
}

module attributes {stable_mosaic.version = 11 : i64} {
  func.func @_gemm_bias_stats_kernel(%arg0: i32, %arg1: i32, %arg2: i32, %arg3: memref<2x2048xbf16, #tpu.memory_space<vmem>>, %arg4: memref<2048x128xbf16, #tpu.memory_space<vmem>>, %arg5: memref<1x128xf32, #tpu.memory_space<vmem>>, %arg6: memref<1x2048xf32, #tpu.memory_space<vmem>>, %arg7: memref<1x2048xf32, #tpu.memory_space<vmem>>, %arg8: memref<2x128xf32, #tpu.memory_space<vmem>>, %arg9: memref<1x2x128xf32, #tpu.memory_space<vmem>>, %arg10: memref<2x128xf32, #tpu.memory_space<vmem>>) attributes {dimension_semantics = [#tpu.dimension_semantics<parallel>, #tpu.dimension_semantics<parallel>, #tpu.dimension_semantics<arbitrary>], iteration_bounds = array<i64: 1, 1, 4>, scalar_prefetch = 0 : i64, scratch_operands = 1 : i64, tpu.core_type = #tpu.core_type<tc>, window_params = [{transform_indices = @transform_0, window_bounds = array<i64: 2, 2048>}, {transform_indices = @transform_1, window_bounds = array<i64: 2048, 128>}, {transform_indices = @transform_2, window_bounds = array<i64: 1, 128>}, {transform_indices = @transform_3, window_bounds = array<i64: 1, 2048>}, {transform_indices = @transform_4, window_bounds = array<i64: 1, 2048>}, {transform_indices = @transform_5, window_bounds = array<i64: 2, 128>}, {transform_indices = @transform_6, window_bounds = array<i64: 1, 2, 128>}]} {
    %c0_i32 = arith.constant 0 : i32
    %0 = arith.cmpi eq, %arg2, %c0_i32 : i32
    %1 = arith.extui %0 : i1 to i32
    %c0_i32_0 = arith.constant 0 : i32
    %2 = arith.cmpi ne, %1, %c0_i32_0 : i32
    scf.if %2 {
      %cst_15 = arith.constant 0.000000e+00 : f32
      %25 = vector.broadcast %cst_15 : f32 to vector<2x128xf32>
      %c0_16 = arith.constant 0 : index
      %c0_17 = arith.constant 0 : index
      %26 = vector.load %arg10[%c0_16, %c0_17] : memref<2x128xf32, #tpu.memory_space<vmem>>, vector<2x128xf32>
      tpu.vector_store %arg10[%c0_16, %c0_17], %25 {strides = array<i32>} : memref<2x128xf32, #tpu.memory_space<vmem>>, vector<2x128xf32>,
    } else {
    }
    %c0 = arith.constant 0 : index
    %c0_1 = arith.constant 0 : index
    %3 = vector.load %arg3[%c0, %c0_1] : memref<2x2048xbf16, #tpu.memory_space<vmem>>, vector<2x2048xbf16>
    %4 = arith.extf %3 : vector<2x2048xbf16> to vector<2x2048xf32>
    %c0_2 = arith.constant 0 : index
    %c0_3 = arith.constant 0 : index
    %5 = vector.load %arg6[%c0_2, %c0_3] : memref<1x2048xf32, #tpu.memory_space<vmem>>, vector<1x2048xf32>
    %6 = vector.broadcast %5 : vector<1x2048xf32> to vector<2x2048xf32>
    %7 = arith.mulf %4, %6 : vector<2x2048xf32>
    %c0_4 = arith.constant 0 : index
    %c0_5 = arith.constant 0 : index
    %8 = vector.load %arg7[%c0_4, %c0_5] : memref<1x2048xf32, #tpu.memory_space<vmem>>, vector<1x2048xf32>
    %9 = vector.broadcast %8 : vector<1x2048xf32> to vector<2x2048xf32>
    %10 = arith.addf %7, %9 : vector<2x2048xf32>
    %cst = arith.constant 0.000000e+00 : f32
    %11 = vector.broadcast %cst : f32 to vector<2x2048xf32>
    %12 = arith.cmpf oge, %10, %11 : vector<2x2048xf32>
    %cst_6 = arith.constant 2.000000e-01 : f32
    %13 = vector.broadcast %cst_6 : f32 to vector<2x2048xf32>
    %14 = arith.mulf %13, %10 : vector<2x2048xf32>
    %15 = arith.select %12, %10, %14 : vector<2x2048xi1>, vector<2x2048xf32>
    %16 = arith.truncf %15 : vector<2x2048xf32> to vector<2x2048xbf16>
    %c0_7 = arith.constant 0 : index
    %c0_8 = arith.constant 0 : index
    %17 = vector.load %arg10[%c0_7, %c0_8] : memref<2x128xf32, #tpu.memory_space<vmem>>, vector<2x128xf32>
    %c0_9 = arith.constant 0 : index
    %c0_10 = arith.constant 0 : index
    %18 = vector.load %arg4[%c0_9, %c0_10] : memref<2048x128xbf16, #tpu.memory_space<vmem>>, vector<2048x128xbf16>
    %cst_11 = arith.constant dense<0.000000e+00> : vector<2x128xf32>
    %19 = tpu.matmul %16, %18, %cst_11 {dimension_numbers = #tpu.dot_dimension_numbers<[1], [0], [0], [1], [0, 0, 1, 1], [], []>} : vector<2x2048xbf16>, vector<2048x128xbf16>, vector<2x128xf32> -> vector<2x128xf32>
    %20 = arith.addf %17, %19 : vector<2x128xf32>
    %c0_12 = arith.constant 0 : index
    %c0_13 = arith.constant 0 : index
    %21 = vector.load %arg10[%c0_12, %c0_13] : memref<2x128xf32, #tpu.memory_space<vmem>>, vector<2x128xf32>
    tpu.vector_store %arg10[%c0_12, %c0_13], %20 {strides = array<i32>} : memref<2x128xf32, #tpu.memory_space<vmem>>, vector<2x128xf32>,
    %c3_i32 = arith.constant 3 : i32
    %22 = arith.cmpi eq, %arg2, %c3_i32 : i32
    %23 = arith.extui %22 : i1 to i32
    %c0_i32_14 = arith.constant 0 : i32
    %24 = arith.cmpi ne, %23, %c0_i32_14 : i32
    scf.if %24 {
      %c0_15 = arith.constant 0 : index
      %c0_16 = arith.constant 0 : index
      %25 = vector.load %arg10[%c0_15, %c0_16] : memref<2x128xf32, #tpu.memory_space<vmem>>, vector<2x128xf32>
      %c0_17 = arith.constant 0 : index
      %c0_18 = arith.constant 0 : index
      %26 = vector.load %arg5[%c0_17, %c0_18] : memref<1x128xf32, #tpu.memory_space<vmem>>, vector<1x128xf32>
      %27 = vector.broadcast %26 : vector<1x128xf32> to vector<2x128xf32>
      %28 = arith.addf %25, %27 : vector<2x128xf32>
      %c0_19 = arith.constant 0 : index
      %c0_20 = arith.constant 0 : index
      %29 = vector.load %arg8[%c0_19, %c0_20] : memref<2x128xf32, #tpu.memory_space<vmem>>, vector<2x128xf32>
      tpu.vector_store %arg8[%c0_19, %c0_20], %28 {strides = array<i32>} : memref<2x128xf32, #tpu.memory_space<vmem>>, vector<2x128xf32>,
      %cst_21 = arith.constant dense<0.000000e+00> : vector<128xf32>
      %30 = vector.multi_reduction <add>, %28, %cst_21 [0] : vector<2x128xf32> to vector<128xf32>
      %31 = vector.shape_cast %30 : vector<128xf32> to vector<1x128xf32>
      %32 = arith.mulf %28, %28 : vector<2x128xf32>
      %cst_22 = arith.constant dense<0.000000e+00> : vector<128xf32>
      %33 = vector.multi_reduction <add>, %32, %cst_22 [0] : vector<2x128xf32> to vector<128xf32>
      %34 = vector.shape_cast %33 : vector<128xf32> to vector<1x128xf32>
      %35 = tpu.concatenate %31, %34 in 0 : vector<1x128xf32>, vector<1x128xf32> -> vector<2x128xf32>
      %c0_23 = arith.constant 0 : index
      %c0_24 = arith.constant 0 : index
      %c0_25 = arith.constant 0 : index
      %36 = vector.load %arg9[%c0_23, %c0_24, %c0_25] : memref<1x2x128xf32, #tpu.memory_space<vmem>>, vector<1x2x128xf32>
      %37 = vector.shape_cast %36 : vector<1x2x128xf32> to vector<2x128xf32>
      %38 = vector.shape_cast %35 : vector<2x128xf32> to vector<1x2x128xf32>
      tpu.vector_store %arg9[%c0_23, %c0_24, %c0_25], %38 {strides = array<i32>} : memref<1x2x128xf32, #tpu.memory_space<vmem>>, vector<1x2x128xf32>,
    } else {
    }
    return
  }
  func.func @transform_0(%arg0: i32, %arg1: i32, %arg2: i32) -> (i32, i32) {
    %c0_i32 = arith.constant 0 : i32
    return %arg0, %arg2 : i32, i32
  }
  func.func @transform_1(%arg0: i32, %arg1: i32, %arg2: i32) -> (i32, i32) {
    %c0_i32 = arith.constant 0 : i32
    return %arg2, %arg1 : i32, i32
  }
  func.func @transform_2(%arg0: i32, %arg1: i32, %arg2: i32) -> (i32, i32) {
    %c0_i32 = arith.constant 0 : i32
    %c0_i32_0 = arith.constant 0 : i32
    return %c0_i32, %arg1 : i32, i32
  }
  func.func @transform_3(%arg0: i32, %arg1: i32, %arg2: i32) -> (i32, i32) {
    %c0_i32 = arith.constant 0 : i32
    %c0_i32_0 = arith.constant 0 : i32
    return %c0_i32, %arg2 : i32, i32
  }
  func.func @transform_4(%arg0: i32, %arg1: i32, %arg2: i32) -> (i32, i32) {
    %c0_i32 = arith.constant 0 : i32
    %c0_i32_0 = arith.constant 0 : i32
    return %c0_i32, %arg2 : i32, i32
  }
  func.func @transform_5(%arg0: i32, %arg1: i32, %arg2: i32) -> (i32, i32) {
    %c0_i32 = arith.constant 0 : i32
    return %arg0, %arg1 : i32, i32
  }
  func.func @transform_6(%arg0: i32, %arg1: i32, %arg2: i32) -> (i32, i32, i32) {
    %c0_i32 = arith.constant 0 : i32
    %c0_i32_0 = arith.constant 0 : i32
    return %arg0, %c0_i32, %arg1 : i32, i32, i32
  }
}

</mosaic_0001>

<bundles_post_ra>
// kernel: discriminator_forward.5
= control target key start
LH: loop header
LB: loop body
LE: loop exit
PB: predicated region body
PF: predicated region fallthrough
CT: control target
= control target key end

     0   :  { %10 = vsyncpa [#allocation4], 0  ;;  %s3220_s0 = inlined_call_operand.vmem [shape: bf16[512,32], index: 0, kind: input, shape index: {}]   ;;  %s3221_s1 = inlined_call_operand.vmem [shape: bf16[32,64], index: 1, kind: input, shape index: {}]   ;;  %s3222_s2 = inlined_call_operand.hbm [shape: f32[1,64], index: 2, kind: input, shape index: {}]   ;;  %s3223_s3 = inlined_call_operand.vmem [shape: bf16[512,64], index: 3, kind: output, shape index: {0}]   ;;  %s3224_s4 = inlined_call_operand.hbm [shape: f32[1,2,64], index: 4, kind: output, shape index: {1}]  }
   0x1   :  { %11 = vsyncpa [#allocation5], 0  ;;  %s2117_s15 = smov [#allocation3]   ;;  %s2069_s19 = scalar_lea.hbm %s3222_s2, 16 }
   0x2   :  { %s22_s16 = sshll.u32 %s2117_s15, 4  ;;  %p2070_p0 = scmp.ne.s32.totalorder %s3222_s2, %s2069_s19  ;;  %s23_s16 = int_to_ptr.vmem [resolvable:$true] %s22_s16 }
   0x3   :  { %p2073_p1 = scmp.lt.u32.totalorder %s2069_s19, %s3222_s2 }
   0x5   :  { %p2075_p2 = pnand %p2073_p1, %p2070_p0 }
   0x7   :  { %2078 = shalt.err (!%p2075_p2)
}
   0x8   :  { %s2079_s24 = scalar_lea.vmem %s23_s16, 16  ;;  %s2083_s25 = scalar_lea.vmem %s23_s16, 32 }
   0x9   :  { %p2080_p3 = scmp.ne.s32.totalorder %s23_s16, %s2079_s24  ;;  %p2084_p4 = scmp.lt.s32.totalorder %s23_s16, %s23_s16 }
   0xa   :  { %p2085_p5 = scmp.lt.s32.totalorder %s2083_s25, %s2079_s24 }
   0xc   :  { %p2086_p6 = por %p2085_p5, %p2084_p4 }
   0xe   :  { %p2087_p7 = pnand %p2086_p6, %p2080_p3 }
  0x10   :  { %2090 = shalt.err (!%p2087_p7)
}
  0x11   :  { %25 = dma.hbm_to_vmem [thread:$0]  %s3222_s2, 16, %s23_s16, [#allocation4]  }
  0x12   :  { %2113 = dma.done.wait [#allocation4], 16  }
  0x13   :  { %2114 = vsyncadd [#allocation4], 4294967280  ;;  %vm34_vm0 = vcmask 523264   ;;  %v2118_v0 = vmov 0.0   ;;  %v2034_v1 = vld [vmem:[%s3221_s1] sm:$0xff]   ;;  %v2035_v2 = vld [vmem:[%s3221_s1 + $0x8] sm:$0xff]  }
  0x14   :  { %37 = vst.msk [vmem:[#allocation2 + $0x10] sm:$0xff] %vm34_vm0, %v2118_v0  ;;  %35 = vst.msk [vmem:[#allocation2] sm:$0xff] %vm34_vm0, %v2118_v0  ;;  %vm403_vm1 = vcmask 261120   ;;  %1959 = vmatprep.subr.bf16.mxu0 %v2034_v1  ;;  %v2036_v3 = vld [vmem:[%s3220_s0] sm:$0xff]   ;;  %2027 = vmatprep.subr.bf16.mxu1 %v2034_v1  ;;  %v2037_v4 = vld [vmem:[%s3220_s0 + $0x8] sm:$0xff]   ;;  %vm1312_vm2 = vcmask 519168  }
  0x15   :  { %36 = vst.msk [vmem:[#allocation2 + $0x8] sm:$0xff] %vm34_vm0, %v2118_v0  ;;  %38 = vst.msk [vmem:[#allocation2 + $0x18] sm:$0xff] %vm34_vm0, %v2118_v0  ;;  %1960 = vmatpush3.bf16.msra.mxu0 %v2034_v1  ;;  %2029 = vmatpush3.bf16.msra.mxu1 %v2034_v1  ;;  %v2038_v5 = vld [vmem:[%s3220_s0 + $0x10] sm:$0xff]   ;;  %v2039_v6 = vld [vmem:[%s3220_s0 + $0x18] sm:$0xff]   ;;  %vm1707_vm3 = vcmask 1040384   ;;  %vm1709_vm4 = vcmask 517120  }
  0x16   :  { %39 = vst.msk [vmem:[#allocation2 + $0x20] sm:$0xff] %vm34_vm0, %v2118_v0  ;;  %40 = vst.msk [vmem:[#allocation2 + $0x28] sm:$0xff] %vm34_vm0, %v2118_v0  ;;  %1961 = vmatprep.subr.bf16.mxu0 %v2035_v2  ;;  %1963 = vmatprep.mubr.msk.bf16.mxu0 %vm403_vm1, %v2036_v3  ;;  %v2040_v7 = vld [vmem:[%s3220_s0 + $0x20] sm:$0xff]   ;;  %v2053_v9 = vld [vmem:[%s3220_s0 + $0x88] sm:$0xff]  }
  0x17   :  { %41 = vst.msk [vmem:[#allocation2 + $0x30] sm:$0xff] %vm34_vm0, %v2118_v0  ;;  %42 = vst.msk [vmem:[#allocation2 + $0x38] sm:$0xff] %vm34_vm0, %v2118_v0  ;;  %2028 = vmatprep.subr.bf16.mxu1 %v2035_v2  ;;  %v2052_v8 = vld [vmem:[%s3220_s0 + $0x80] sm:$0xff]   ;;  %v2054_v10 = vld [vmem:[%s3220_s0 + $0x90] sm:$0xff]  }
  0x18   :  { %43 = vst.msk [vmem:[#allocation2 + $0x40] sm:$0xff] %vm34_vm0, %v2118_v0  ;;  %44 = vst.msk [vmem:[#allocation2 + $0x48] sm:$0xff] %vm34_vm0, %v2118_v0  ;;  %1995 = vmatprep.mubr.msk.bf16.mxu1 %vm403_vm1, %v2052_v8  ;;  %v2041_v11 = vld [vmem:[%s3220_s0 + $0x28] sm:$0xff]   ;;  %v2042_v12 = vld [vmem:[%s3220_s0 + $0x30] sm:$0xff]  }
  0x19   :  { %45 = vst.msk [vmem:[#allocation2 + $0x50] sm:$0xff] %vm34_vm0, %v2118_v0  ;;  %46 = vst.msk [vmem:[#allocation2 + $0x58] sm:$0xff] %vm34_vm0, %v2118_v0  ;;  %1962 = vmatpush3.bf16.msra.mxu0 %v2035_v2  ;;  %2030 = vmatpush3.bf16.msra.mxu1 %v2035_v2  ;;  %v2055_v13 = vld [vmem:[%s3220_s0 + $0x98] sm:$0xff]   ;;  %v2056_v14 = vld [vmem:[%s3220_s0 + $0xa0] sm:$0xff]  }
  0x1a   :  { %47 = vst.msk [vmem:[#allocation2 + $0x60] sm:$0xff] %vm34_vm0, %v2118_v0  ;;  %48 = vst.msk [vmem:[#allocation2 + $0x68] sm:$0xff] %vm34_vm0, %v2118_v0  ;;  %v2043_v15 = vld [vmem:[%s3220_s0 + $0x38] sm:$0xff]   ;;  %v2044_v16 = vld [vmem:[%s3220_s0 + $0x40] sm:$0xff]  }
  0x1b   :  { %49 = vst.msk [vmem:[#allocation2 + $0x70] sm:$0xff] %vm34_vm0, %v2118_v0  ;;  %50 = vst.msk [vmem:[#allocation2 + $0x78] sm:$0xff] %vm34_vm0, %v2118_v0  ;;  %v2057_v17 = vld [vmem:[%s3220_s0 + $0xa8] sm:$0xff]   ;;  %v2058_v18 = vld [vmem:[%s3220_s0 + $0xb0] sm:$0xff]  }
  0x1c   :  { %51 = vst.msk [vmem:[#allocation2 + $0x80] sm:$0xff] %vm34_vm0, %v2118_v0  ;;  %52 = vst.msk [vmem:[#allocation2 + $0x88] sm:$0xff] %vm34_vm0, %v2118_v0  ;;  %1964 = vmatmul.mubr.msk.bf16.vlgmr.msra.gmra.mrb[0].mxu0 %vm403_vm1, %v2037_v4  ;;  %1996 = vmatmul.mubr.msk.bf16.vlgmr.msra.gmra.mrb[0].mxu1 %vm403_vm1, %v2053_v9  ;;  %v2045_v19 = vld [vmem:[%s3220_s0 + $0x48] sm:$0xff]   ;;  %v2046_v20 = vld [vmem:[%s3220_s0 + $0x50] sm:$0xff]  }
  0x1d   :  { %53 = vst.msk [vmem:[#allocation2 + $0x90] sm:$0xff] %vm34_vm0, %v2118_v0  ;;  %54 = vst.msk [vmem:[#allocation2 + $0x98] sm:$0xff] %vm34_vm0, %v2118_v0  ;;  %1967 = vmatprep.mubr.msk.bf16.mxu0 %vm403_vm1, %v2038_v5  ;;  %1999 = vmatprep.mubr.msk.bf16.mxu1 %vm403_vm1, %v2054_v10  ;;  %v2059_v21 = vld [vmem:[%s3220_s0 + $0xb8] sm:$0xff]   ;;  %v2060_v22 = vld [vmem:[%s3220_s0 + $0xc0] sm:$0xff]  }
  0x1e   :  { %55 = vst.msk [vmem:[#allocation2 + $0xa0] sm:$0xff] %vm34_vm0, %v2118_v0  ;;  %56 = vst.msk [vmem:[#allocation2 + $0xa8] sm:$0xff] %vm34_vm0, %v2118_v0  ;;  %v2047_v23 = vld [vmem:[%s3220_s0 + $0x58] sm:$0xff]   ;;  %v2048_v24 = vld [vmem:[%s3220_s0 + $0x60] sm:$0xff]  }
  0x1f   :  { %57 = vst.msk [vmem:[#allocation2 + $0xb0] sm:$0xff] %vm34_vm0, %v2118_v0  ;;  %58 = vst.msk [vmem:[#allocation2 + $0xb8] sm:$0xff] %vm34_vm0, %v2118_v0  ;;  %v2061_v25 = vld [vmem:[%s3220_s0 + $0xc8] sm:$0xff]   ;;  %v2062_v26 = vld [vmem:[%s3220_s0 + $0xd0] sm:$0xff]  }
  0x20   :  { %59 = vst.msk [vmem:[#allocation2 + $0xc0] sm:$0xff] %vm34_vm0, %v2118_v0  ;;  %60 = vst.msk [vmem:[#allocation2 + $0xc8] sm:$0xff] %vm34_vm0, %v2118_v0  ;;  %v2049_v27 = vld [vmem:[%s3220_s0 + $0x68] sm:$0xff]   ;;  %v2050_v28 = vld [vmem:[%s3220_s0 + $0x70] sm:$0xff]  }
  0x21   :  { %61 = vst.msk [vmem:[#allocation2 + $0xd0] sm:$0xff] %vm34_vm0, %v2118_v0  ;;  %62 = vst.msk [vmem:[#allocation2 + $0xd8] sm:$0xff] %vm34_vm0, %v2118_v0  ;;  %v2063_v29 = vld [vmem:[%s3220_s0 + $0xd8] sm:$0xff]   ;;  %v2064_v30 = vld [vmem:[%s3220_s0 + $0xe0] sm:$0xff]  }
  0x22   :  { %63 = vst.msk [vmem:[#allocation2 + $0xe0] sm:$0xff] %vm34_vm0, %v2118_v0  ;;  %64 = vst.msk [vmem:[#allocation2 + $0xe8] sm:$0xff] %vm34_vm0, %v2118_v0  ;;  %v2051_v31 = vld [vmem:[%s3220_s0 + $0x78] sm:$0xff]   ;;  %v2065_v32 = vld [vmem:[%s3220_s0 + $0xe8] sm:$0xff]  }
  0x23   :  { %65 = vst.msk [vmem:[#allocation2 + $0xf0] sm:$0xff] %vm34_vm0, %v2118_v0  ;;  %66 = vst.msk [vmem:[#allocation2 + $0xf8] sm:$0xff] %vm34_vm0, %v2118_v0  ;;  %v2066_v33 = vld [vmem:[%s3220_s0 + $0xf0] sm:$0xff]   ;;  %v2067_v34 = vld [vmem:[%s3220_s0 + $0xf8] sm:$0xff]  }
  0x24   :  { %67 = vst.msk [vmem:[#allocation2 + $0x100] sm:$0xff] %vm34_vm0, %v2118_v0  ;;  %68 = vst.msk [vmem:[#allocation2 + $0x108] sm:$0xff] %vm34_vm0, %v2118_v0  ;;  %1968 = vmatmul.mubr.msk.bf16.gmra.mrb[4].mxu0 %vm403_vm1, %v2039_v6  ;;  %2000 = vmatmul.mubr.msk.bf16.gmra.mrb[4].mxu1 %vm403_vm1, %v2055_v13  ;;  %v165_v35 = vld [vmem:[#allocation2 + $0x10] sm:$0xff]  ;;  %v163_v36 = vld [vmem:[#allocation2] sm:$0xff] }
  0x25   :  { %69 = vst.msk [vmem:[#allocation2 + $0x110] sm:$0xff] %vm34_vm0, %v2118_v0  ;;  %70 = vst.msk [vmem:[#allocation2 + $0x118] sm:$0xff] %vm34_vm0, %v2118_v0  ;;  %1971 = vmatprep.mubr.msk.bf16.mxu0 %vm403_vm1, %v2040_v7  ;;  %2003 = vmatprep.mubr.msk.bf16.mxu1 %vm403_vm1, %v2056_v14  ;;  %v166_v38 = vld [vmem:[#allocation2 + $0x18] sm:$0xff]  ;;  %v164_v41 = vld [vmem:[#allocation2 + $0x8] sm:$0xff] }
  0x26   :  { %71 = vst.msk [vmem:[#allocation2 + $0x120] sm:$0xff] %vm34_vm0, %v2118_v0  ;;  %72 = vst.msk [vmem:[#allocation2 + $0x128] sm:$0xff] %vm34_vm0, %v2118_v0  ;;  %v169_v47 = vld [vmem:[#allocation2 + $0x30] sm:$0xff]  ;;  %v167_v48 = vld [vmem:[#allocation2 + $0x20] sm:$0xff] }
  0x27   :  { %73 = vst.msk [vmem:[#allocation2 + $0x130] sm:$0xff] %vm34_vm0, %v2118_v0  ;;  %74 = vst.msk [vmem:[#allocation2 + $0x138] sm:$0xff] %vm34_vm0, %v2118_v0  ;;  %v2423_v49 = vld [vmem:[#allocation3] ss:$0 sm:$0xff]  ;;  %v170_v51 = vld [vmem:[#allocation2 + $0x38] sm:$0xff] }
  0x28   :  { %75 = vst.msk [vmem:[#allocation2 + $0x140] sm:$0xff] %vm34_vm0, %v2118_v0  ;;  %76 = vst.msk [vmem:[#allocation2 + $0x148] sm:$0xff] %vm34_vm0, %v2118_v0  ;;  %v168_v54 = vld [vmem:[#allocation2 + $0x28] sm:$0xff]  ;;  %v173_v13 = vld [vmem:[#allocation2 + $0x50] sm:$0xff] }
  0x29   :  { %77 = vst.msk [vmem:[#allocation2 + $0x150] sm:$0xff] %vm34_vm0, %v2118_v0  ;;  %78 = vst.msk [vmem:[#allocation2 + $0x158] sm:$0xff] %vm34_vm0, %v2118_v0 }
  0x2a   :  { %79 = vst.msk [vmem:[#allocation2 + $0x160] sm:$0xff] %vm34_vm0, %v2118_v0  ;;  %80 = vst.msk [vmem:[#allocation2 + $0x168] sm:$0xff] %vm34_vm0, %v2118_v0 }
  0x2b   :  { %81 = vst.msk [vmem:[#allocation2 + $0x170] sm:$0xff] %vm34_vm0, %v2118_v0  ;;  %82 = vst.msk [vmem:[#allocation2 + $0x178] sm:$0xff] %vm34_vm0, %v2118_v0  ;;  %v195_v14 = vld [vmem:[#allocation2 + $0x100] sm:$0xff] }
  0x2c   :  { %83 = vst.msk [vmem:[#allocation2 + $0x180] sm:$0xff] %vm34_vm0, %v2118_v0  ;;  %84 = vst.msk [vmem:[#allocation2 + $0x188] sm:$0xff] %vm34_vm0, %v2118_v0  ;;  %1972 = vmatmul.mubr.msk.bf16.gmra.mrb[8].mxu0 %vm403_vm1, %v2041_v11  ;;  %2004 = vmatmul.mubr.msk.bf16.gmra.mrb[8].mxu1 %vm403_vm1, %v2057_v17  ;;  %v197_v55 = vld [vmem:[#allocation2 + $0x110] sm:$0xff] }
  0x2d   :  { %85 = vst.msk [vmem:[#allocation2 + $0x190] sm:$0xff] %vm34_vm0, %v2118_v0  ;;  %86 = vst.msk [vmem:[#allocation2 + $0x198] sm:$0xff] %vm34_vm0, %v2118_v0  ;;  %1975 = vmatprep.mubr.msk.bf16.mxu0 %vm403_vm1, %v2042_v12  ;;  %2007 = vmatprep.mubr.msk.bf16.mxu1 %vm403_vm1, %v2058_v18 }
  0x2e   :  { %87 = vst.msk [vmem:[#allocation2 + $0x1a0] sm:$0xff] %vm34_vm0, %v2118_v0  ;;  %88 = vst.msk [vmem:[#allocation2 + $0x1a8] sm:$0xff] %vm34_vm0, %v2118_v0 }
  0x2f   :  { %89 = vst.msk [vmem:[#allocation2 + $0x1b0] sm:$0xff] %vm34_vm0, %v2118_v0  ;;  %90 = vst.msk [vmem:[#allocation2 + $0x1b8] sm:$0xff] %vm34_vm0, %v2118_v0 }
  0x30   :  { %91 = vst.msk [vmem:[#allocation2 + $0x1c0] sm:$0xff] %vm34_vm0, %v2118_v0  ;;  %92 = vst.msk [vmem:[#allocation2 + $0x1c8] sm:$0xff] %vm34_vm0, %v2118_v0 }
  0x31   :  { %93 = vst.msk [vmem:[#allocation2 + $0x1d0] sm:$0xff] %vm34_vm0, %v2118_v0  ;;  %94 = vst.msk [vmem:[#allocation2 + $0x1d8] sm:$0xff] %vm34_vm0, %v2118_v0 }
  0x32   :  { %95 = vst.msk [vmem:[#allocation2 + $0x1e0] sm:$0xff] %vm34_vm0, %v2118_v0  ;;  %96 = vst.msk [vmem:[#allocation2 + $0x1e8] sm:$0xff] %vm34_vm0, %v2118_v0 }
  0x33   :  { %97 = vst.msk [vmem:[#allocation2 + $0x1f0] sm:$0xff] %vm34_vm0, %v2118_v0  ;;  %98 = vst.msk [vmem:[#allocation2 + $0x1f8] sm:$0xff] %vm34_vm0, %v2118_v0 }
  0x34   :  { %1976 = vmatmul.mubr.msk.bf16.gmra.mrb[12].mxu0 %vm403_vm1, %v2043_v15  ;;  %2008 = vmatmul.mubr.msk.bf16.gmra.mrb[12].mxu1 %vm403_vm1, %v2059_v21  ;;  %v198_v21 = vld [vmem:[#allocation2 + $0x118] sm:$0xff] }
  0x35   :  { %1979 = vmatprep.mubr.msk.bf16.mxu0 %vm403_vm1, %v2044_v16  ;;  %2011 = vmatprep.mubr.msk.bf16.mxu1 %vm403_vm1, %v2060_v22  ;;  %v196_v22 = vld [vmem:[#allocation2 + $0x108] sm:$0xff] }
  0x3c   :  { %1980 = vmatmul.mubr.msk.bf16.gmra.mrb[16].mxu0 %vm403_vm1, %v2045_v19  ;;  %2012 = vmatmul.mubr.msk.bf16.gmra.mrb[16].mxu1 %vm403_vm1, %v2061_v25 }
  0x3d   :  { %1983 = vmatprep.mubr.msk.bf16.mxu0 %vm403_vm1, %v2046_v20  ;;  %2015 = vmatprep.mubr.msk.bf16.mxu1 %vm403_vm1, %v2062_v26  ;;  %v171_v20 = vld [vmem:[#allocation2 + $0x40] sm:$0xff] }
  0x44   :  { %1984 = vmatmul.mubr.msk.bf16.gmra.mrb[20].mxu0 %vm403_vm1, %v2047_v23  ;;  %2016 = vmatmul.mubr.msk.bf16.gmra.mrb[20].mxu1 %vm403_vm1, %v2063_v29 }
  0x45   :  { %1987 = vmatprep.mubr.msk.bf16.mxu0 %vm403_vm1, %v2048_v24  ;;  %2019 = vmatprep.mubr.msk.bf16.mxu1 %vm403_vm1, %v2064_v30 }
  0x4c   :  { %1988 = vmatmul.mubr.msk.bf16.gmra.mrb[24].mxu0 %vm403_vm1, %v2049_v27  ;;  %2020 = vmatmul.mubr.msk.bf16.gmra.mrb[24].mxu1 %vm403_vm1, %v2065_v32 }
  0x4d   :  { %1991 = vmatprep.mubr.msk.bf16.mxu0 %vm403_vm1, %v2050_v28  ;;  %2023 = vmatprep.mubr.msk.bf16.mxu1 %vm403_vm1, %v2066_v33  ;;  %v174_v28 = vld [vmem:[#allocation2 + $0x58] sm:$0xff]  ;;  %v172_v33 = vld [vmem:[#allocation2 + $0x48] sm:$0xff] }
  0x54   :  { %1992 = vmatmul.mubr.msk.bf16.gmra.mrb[28].mxu0 %vm403_vm1, %v2051_v31  ;;  %2024 = vmatmul.mubr.msk.bf16.gmra.mrb[28].mxu1 %vm403_vm1, %v2067_v34 }
  0xef   :  { %v1965_v37 = vpop.f32.mrb[0].mxu0  ;;  %v1997_v63 = vpop.f32.mrb[0].mxu1 }
  0xf0   :  { %v791_v39 = vadd.f32 %v1965_v37, %v165_v35  ;;  %v534_v40 = vpop.f32.mrb[1].mxu0  ;;  %v823_v3 = vadd.f32 %v1997_v63, %v197_v55  ;;  %v662_v4 = vpop.f32.mrb[1].mxu1  ;;  %v201_v35 = vld [vmem:[#allocation2 + $0x130] sm:$0xff] }
  0xf1   :  { %v789_v42 = vadd.f32 %v534_v40, %v163_v36  ;;  %v1966_v43 = vpop.f32.mrb[2].mxu0  ;;  %v1998_v9 = vpop.f32.mrb[2].mxu1  ;;  %v821_v34 = vadd.f32 %v662_v4, %v195_v14 }
  0xf2   :  { %856 = vst.msk [vmem:[#allocation2 + $0x10] sm:$0xff] %vm34_vm0, %v791_v39  ;;  %v792_v44 = vadd.f32 %v1966_v43, %v166_v38  ;;  %v537_v45 = vpop.f32.mrb[3].mxu0  ;;  %888 = vst.msk [vmem:[#allocation2 + $0x110] sm:$0xff] %vm34_vm0, %v823_v3  ;;  %v665_v15 = vpop.f32.mrb[3].mxu1  ;;  %v824_v40 = vadd.f32 %v1998_v9, %v198_v21 }
  0xf3   :  { %854 = vst.msk [vmem:[#allocation2] sm:$0xff] %vm34_vm0, %v789_v42  ;;  %v790_v46 = vadd.f32 %v537_v45, %v164_v41  ;;  %v822_v41 = vadd.f32 %v665_v15, %v196_v22  ;;  %886 = vst.msk [vmem:[#allocation2 + $0x100] sm:$0xff] %vm34_vm0, %v821_v34 }
  0xf4   :  { %857 = vst.msk [vmem:[#allocation2 + $0x18] sm:$0xff] %vm34_vm0, %v792_v44  ;;  %889 = vst.msk [vmem:[#allocation2 + $0x118] sm:$0xff] %vm34_vm0, %v824_v40 }
  0xf5   :  { %855 = vst.msk [vmem:[#allocation2 + $0x8] sm:$0xff] %vm34_vm0, %v790_v46  ;;  %887 = vst.msk [vmem:[#allocation2 + $0x108] sm:$0xff] %vm34_vm0, %v822_v41 }
  0xf7   :  { %v1969_v50 = vpop.f32.mrb[4].mxu0 }
  0xf8   :  { %v795_v52 = vadd.f32 %v1969_v50, %v169_v47  ;;  %v550_v53 = vpop.f32.mrb[5].mxu0 }
  0xf9   :  { %v923_v56 = vld [vmem:[#allocation2 + $0x10] sm:$0xff]  ;;  %v793_v57 = vadd.f32 %v550_v53, %v167_v48  ;;  %v1970_v58 = vpop.f32.mrb[6].mxu0  ;;  %v2001_v48 = vpop.f32.mrb[4].mxu1 }
  0xfa   :  { %v994_v59 = vadd.f32 %v2423_v49, %v923_v56  ;;  %v921_v60 = vld [vmem:[#allocation2] sm:$0xff]  ;;  %860 = vst.msk [vmem:[#allocation2 + $0x30] sm:$0xff] %vm34_vm0, %v795_v52  ;;  %v796_v61 = vadd.f32 %v1970_v58, %v170_v51  ;;  %v553_v62 = vpop.f32.mrb[7].mxu0  ;;  %v678_v55 = vpop.f32.mrb[5].mxu1  ;;  %v955_v3 = vld [vmem:[#allocation2 + $0x110] sm:$0xff] }
  0xfb   :  { %v992_v0 = vadd.f32 %v2423_v49, %v921_v60  ;;  %v924_v1 = vld [vmem:[#allocation2 + $0x18] sm:$0xff]  ;;  %858 = vst.msk [vmem:[#allocation2 + $0x20] sm:$0xff] %vm34_vm0, %v793_v57  ;;  %v794_v2 = vadd.f32 %v553_v62, %v168_v54  ;;  %v827_v54 = vadd.f32 %v2001_v48, %v201_v35  ;;  %v2466_v62 = vpop.f32.mrb[6].mxu1  ;;  %v2487_v21 = vadd.f32 %v2423_v49, %v955_v3 }
  0xfc   :  { %v1863_v5 = vpack.c.bf16 %v994_v59, %v994_v59  ;;  %v1512_v6 = vmul.f32 %v994_v59, %v994_v59  ;;  %v995_v7 = vadd.f32 %v2423_v49, %v924_v1  ;;  %v922_v8 = vld [vmem:[#allocation2 + $0x8] sm:$0xff]  ;;  %861 = vst.msk [vmem:[#allocation2 + $0x38] sm:$0xff] %vm34_vm0, %v796_v61  ;;  %v1380_v16 = vsel %vm34_vm0, %v994_v59, 0.0  ;;  %v199_v61 = vld [vmem:[#allocation2 + $0x120] sm:$0xff]  ;;  %v2471_v4 = vpop.f32.mrb[7].mxu1 }
  0xfd   :  { %v1861_v10 = vpack.c.bf16 %v992_v0, %v992_v0  ;;  %v1510_v11 = vmul.f32 %v992_v0, %v992_v0  ;;  %v993_v12 = vadd.f32 %v2423_v49, %v922_v8  ;;  %859 = vst.msk [vmem:[#allocation2 + $0x28] sm:$0xff] %vm34_vm0, %v794_v2  ;;  %v1377_v18 = vsel %vm34_vm0, %v992_v0, 0.0  ;;  %892 = vst.msk [vmem:[#allocation2 + $0x130] sm:$0xff] %vm34_vm0, %v827_v54  ;;  %v177_v8 = vld [vmem:[#allocation2 + $0x70] sm:$0xff] }
  0xfe   :  { %1315 = vst.msk [vmem:[%s3223_s3 + $0x8] sm:$0xf] %vm1312_vm2, %v1863_v5  ;;  %v1577_v17 = vsel %vm34_vm0, %v1512_v6, 0.0  ;;  %v1864_v19 = vpack.c.bf16 %v995_v7, %v995_v7  ;;  %v1513_v23 = vmul.f32 %v995_v7, %v995_v7  ;;  %v1382_v50 = vsel %vm34_vm0, %v995_v7, 0.0 }
  0xff   :  { %1313 = vst.msk [vmem:[%s3223_s3] sm:$0xf] %vm1312_vm2, %v1861_v10  ;;  %v1862_v24 = vpack.c.bf16 %v993_v12, %v993_v12  ;;  %v1378_v25 = vsel %vm34_vm0, %v993_v12, 0.0  ;;  %v1511_v26 = vmul.f32 %v993_v12, %v993_v12  ;;  %v1973_v27 = vpop.f32.mrb[8].mxu0  ;;  %v1574_v29 = vsel %vm34_vm0, %v1510_v11, 0.0  ;;  %v2496_v34 = vpop.f32.mrb[8].mxu1 }
 0x100   :  { %1316 = vst.msk [vmem:[%s3223_s3 + $0xc] sm:$0xf] %vm1312_vm2, %v1864_v19  ;;  %v1379_v30 = vadd.f32 %v1378_v25, %v1377_v18  ;;  %v799_v31 = vadd.f32 %v1973_v27, %v173_v13  ;;  %v566_v32 = vpop.f32.mrb[9].mxu0  ;;  %v1579_v56 = vsel %vm34_vm0, %v1513_v23, 0.0  ;;  %v175_v13 = vld [vmem:[#allocation2 + $0x60] sm:$0xff]  ;;  %v825_v14 = vadd.f32 %v678_v55, %v199_v61  ;;  %v178_v19 = vld [vmem:[#allocation2 + $0x78] sm:$0xff] }
 0x101   :  { %1314 = vst.msk [vmem:[%s3223_s3 + $0x4] sm:$0xf] %vm1312_vm2, %v1862_v24  ;;  %v1575_v36 = vsel %vm34_vm0, %v1511_v26, 0.0  ;;  %v927_v37 = vld [vmem:[#allocation2 + $0x30] sm:$0xff]  ;;  %v797_v38 = vadd.f32 %v566_v32, %v171_v20  ;;  %v1974_v39 = vpop.f32.mrb[10].mxu0  ;;  %v176_v20 = vld [vmem:[#allocation2 + $0x68] sm:$0xff] }
 0x102   :  { %v1381_v42 = vadd.f32 %v1380_v16, %v1379_v30  ;;  %v1576_v43 = vadd.f32 %v1575_v36, %v1574_v29  ;;  %v998_v44 = vadd.f32 %v2423_v49, %v927_v37  ;;  %v925_v45 = vld [vmem:[#allocation2 + $0x20] sm:$0xff]  ;;  %864 = vst.msk [vmem:[#allocation2 + $0x50] sm:$0xff] %vm34_vm0, %v799_v31  ;;  %v800_v46 = vadd.f32 %v1974_v39, %v174_v28  ;;  %v569_v47 = vpop.f32.mrb[11].mxu0  ;;  %v2505_v40 = vpop.f32.mrb[9].mxu1 }
 0x103   :  { %v996_v51 = vadd.f32 %v2423_v49, %v925_v45  ;;  %v928_v52 = vld [vmem:[#allocation2 + $0x38] sm:$0xff]  ;;  %862 = vst.msk [vmem:[#allocation2 + $0x40] sm:$0xff] %vm34_vm0, %v797_v38  ;;  %v798_v53 = vadd.f32 %v569_v47, %v172_v33  ;;  %890 = vst.msk [vmem:[#allocation2 + $0x120] sm:$0xff] %vm34_vm0, %v825_v14 }
 0x104   :  { %v1578_v57 = vadd.f32 %v1577_v17, %v1576_v43  ;;  %v1867_v58 = vpack.c.bf16 %v998_v44, %v998_v44  ;;  %v1516_v59 = vmul.f32 %v998_v44, %v998_v44  ;;  %v926_v60 = vld [vmem:[#allocation2 + $0x28] sm:$0xff]  ;;  %865 = vst.msk [vmem:[#allocation2 + $0x58] sm:$0xff] %vm34_vm0, %v800_v46  ;;  %v1383_v0 = vadd.f32 %v1382_v50, %v1381_v42  ;;  %v2509_v46 = vpop.f32.mrb[10].mxu1 }
 0x105   :  { %v1865_v63 = vpack.c.bf16 %v996_v51, %v996_v51  ;;  %v1384_v1 = vsel %vm34_vm0, %v996_v51, 0.0  ;;  %v1514_v2 = vmul.f32 %v996_v51, %v996_v51  ;;  %863 = vst.msk [vmem:[#allocation2 + $0x48] sm:$0xff] %vm34_vm0, %v798_v53  ;;  %v999_v6 = vadd.f32 %v2423_v49, %v928_v52  ;;  %v2514_v52 = vpop.f32.mrb[11].mxu1 }
 0x106   :  { %1319 = vst.msk [vmem:[%s3223_s3 + $0x18] sm:$0xf] %vm1312_vm2, %v1867_v58  ;;  %v1580_v5 = vadd.f32 %v1579_v56, %v1578_v57  ;;  %v997_v7 = vadd.f32 %v2423_v49, %v926_v60  ;;  %v1388_v9 = vsel %vm34_vm0, %v998_v44, 0.0  ;;  %v1385_v10 = vadd.f32 %v1384_v1, %v1383_v0  ;;  %v181_v60 = vld [vmem:[#allocation2 + $0x90] sm:$0xff] }
 0x107   :  { %1317 = vst.msk [vmem:[%s3223_s3 + $0x10] sm:$0xf] %vm1312_vm2, %v1865_v63  ;;  %v1581_v11 = vsel %vm34_vm0, %v1514_v2, 0.0  ;;  %v1977_v12 = vpop.f32.mrb[12].mxu0  ;;  %v1585_v15 = vsel %vm34_vm0, %v1516_v59, 0.0  ;;  %v1868_v17 = vpack.c.bf16 %v999_v6, %v999_v6  ;;  %v1517_v28 = vmul.f32 %v999_v6, %v999_v6  ;;  %v179_v63 = vld [vmem:[#allocation2 + $0x80] sm:$0xff] }
 0x108   :  { %v1582_v16 = vadd.f32 %v1581_v11, %v1580_v5  ;;  %v582_v18 = vpop.f32.mrb[13].mxu0  ;;  %v1866_v22 = vpack.c.bf16 %v997_v7, %v997_v7  ;;  %v1386_v23 = vsel %vm34_vm0, %v997_v7, 0.0  ;;  %v1515_v24 = vmul.f32 %v997_v7, %v997_v7  ;;  %v182_v7 = vld [vmem:[#allocation2 + $0x98] sm:$0xff] }
 0x109   :  { %v931_v25 = vld [vmem:[#allocation2 + $0x50] sm:$0xff]  ;;  %v803_v26 = vadd.f32 %v1977_v12, %v177_v8  ;;  %v1978_v27 = vpop.f32.mrb[14].mxu0  ;;  %1320 = vst.msk [vmem:[%s3223_s3 + $0x1c] sm:$0xf] %vm1312_vm2, %v1868_v17  ;;  %v1387_v29 = vadd.f32 %v1386_v23, %v1385_v10  ;;  %v801_v32 = vadd.f32 %v582_v18, %v175_v13  ;;  %v1390_v41 = vsel %vm34_vm0, %v999_v6, 0.0  ;;  %v180_v12 = vld [vmem:[#allocation2 + $0x88] sm:$0xff] }
 0x10a   :  { %v1002_v30 = vadd.f32 %v2423_v49, %v931_v25  ;;  %v929_v31 = vld [vmem:[#allocation2 + $0x40] sm:$0xff]  ;;  %v585_v33 = vpop.f32.mrb[15].mxu0  ;;  %1318 = vst.msk [vmem:[%s3223_s3 + $0x14] sm:$0xf] %vm1312_vm2, %v1866_v22  ;;  %v1583_v35 = vsel %vm34_vm0, %v1515_v24, 0.0  ;;  %v804_v38 = vadd.f32 %v1978_v27, %v178_v19  ;;  %v1587_v57 = vsel %vm34_vm0, %v1517_v28, 0.0 }
 0x10b   :  { %v1000_v36 = vadd.f32 %v2423_v49, %v929_v31  ;;  %v932_v37 = vld [vmem:[#allocation2 + $0x58] sm:$0xff]  ;;  %868 = vst.msk [vmem:[#allocation2 + $0x70] sm:$0xff] %vm34_vm0, %v803_v26  ;;  %v802_v39 = vadd.f32 %v585_v33, %v176_v20  ;;  %v1389_v42 = vadd.f32 %v1388_v9, %v1387_v29  ;;  %v1584_v43 = vadd.f32 %v1583_v35, %v1582_v16  ;;  %v2545_v20 = vpop.f32.mrb[12].mxu1 }
 0x10c   :  { %v1871_v44 = vpack.c.bf16 %v1002_v30, %v1002_v30  ;;  %v930_v45 = vld [vmem:[#allocation2 + $0x48] sm:$0xff]  ;;  %866 = vst.msk [vmem:[#allocation2 + $0x60] sm:$0xff] %vm34_vm0, %v801_v32  ;;  %v1520_v47 = vmul.f32 %v1002_v30, %v1002_v30  ;;  %869 = vst.msk [vmem:[#allocation2 + $0x78] sm:$0xff] %vm34_vm0, %v804_v38  ;;  %v1003_v55 = vadd.f32 %v2423_v49, %v932_v37  ;;  %v1396_v58 = vsel %vm34_vm0, %v1002_v30, 0.0  ;;  %v2553_v27 = vpop.f32.mrb[13].mxu1 }
 0x10d   :  { %v1869_v48 = vpack.c.bf16 %v1000_v36, %v1000_v36  ;;  %v1392_v50 = vsel %vm34_vm0, %v1000_v36, 0.0  ;;  %v1518_v51 = vmul.f32 %v1000_v36, %v1000_v36  ;;  %867 = vst.msk [vmem:[#allocation2 + $0x68] sm:$0xff] %vm34_vm0, %v802_v39  ;;  %v1586_v53 = vadd.f32 %v1585_v15, %v1584_v43  ;;  %v2558_v33 = vpop.f32.mrb[14].mxu1 }
 0x10e   :  { %1323 = vst.msk [vmem:[%s3223_s3 + $0x28] sm:$0xf] %vm1312_vm2, %v1871_v44  ;;  %v1391_v54 = vadd.f32 %v1390_v41, %v1389_v42  ;;  %v1001_v56 = vadd.f32 %v2423_v49, %v930_v45  ;;  %v1895_v0 = vpack.c.bf16 %v2487_v21, %v2487_v21  ;;  %v1593_v1 = vsel %vm34_vm0, %v1520_v47, 0.0  ;;  %v2563_v41 = vpop.f32.mrb[15].mxu1  ;;  %v185_v47 = vld [vmem:[#allocation2 + $0xb0] sm:$0xff] }
 0x10f   :  { %1321 = vst.msk [vmem:[%s3223_s3 + $0x20] sm:$0xf] %vm1312_vm2, %v1869_v48  ;;  %v1589_v59 = vsel %vm34_vm0, %v1518_v51, 0.0  ;;  %v1981_v61 = vpop.f32.mrb[16].mxu0  ;;  %v1588_v3 = vadd.f32 %v1587_v57, %v1586_v53  ;;  %v1872_v5 = vpack.c.bf16 %v1003_v55, %v1003_v55  ;;  %v2539_v13 = vsel %vm34_vm0, %v2487_v21, 0.0  ;;  %v183_v48 = vld [vmem:[#allocation2 + $0xa0] sm:$0xff] }
 0x110   :  { %v1393_v2 = vadd.f32 %v1392_v50, %v1391_v54  ;;  %v598_v6 = vpop.f32.mrb[17].mxu0  ;;  %v1870_v8 = vpack.c.bf16 %v1001_v56, %v1001_v56  ;;  %v1394_v9 = vsel %vm34_vm0, %v1001_v56, 0.0  ;;  %v1519_v10 = vmul.f32 %v1001_v56, %v1001_v56  ;;  %1347 = vst.msk [vmem:[%s3223_s3 + $0x88] sm:$0xf] %vm1312_vm2, %v1895_v0 }
 0x111   :  { %v1982_v11 = vpop.f32.mrb[18].mxu0  ;;  %v1590_v14 = vadd.f32 %v1589_v59, %v1588_v3  ;;  %1324 = vst.msk [vmem:[%s3223_s3 + $0x2c] sm:$0xf] %vm1312_vm2, %v1872_v5  ;;  %v807_v17 = vadd.f32 %v1981_v61, %v181_v60  ;;  %v805_v18 = vadd.f32 %v598_v6, %v179_v63  ;;  %v1521_v22 = vmul.f32 %v1003_v55, %v1003_v55  ;;  %v186_v61 = vld [vmem:[#allocation2 + $0xb8] sm:$0xff]  ;;  %v184_v63 = vld [vmem:[#allocation2 + $0xa8] sm:$0xff] }
 0x112   :  { %v1395_v15 = vadd.f32 %v1394_v9, %v1393_v2  ;;  %v935_v16 = vld [vmem:[#allocation2 + $0x70] sm:$0xff]  ;;  %v601_v19 = vpop.f32.mrb[19].mxu0  ;;  %1322 = vst.msk [vmem:[%s3223_s3 + $0x24] sm:$0xf] %vm1312_vm2, %v1870_v8  ;;  %v1591_v23 = vsel %vm34_vm0, %v1519_v10, 0.0  ;;  %v808_v26 = vadd.f32 %v1982_v11, %v182_v7  ;;  %v1398_v35 = vsel %vm34_vm0, %v1003_v55, 0.0 }
 0x113   :  { %v1006_v24 = vadd.f32 %v2423_v49, %v935_v16  ;;  %v933_v25 = vld [vmem:[#allocation2 + $0x60] sm:$0xff]  ;;  %v1592_v29 = vadd.f32 %v1591_v23, %v1590_v14  ;;  %v936_v31 = vld [vmem:[#allocation2 + $0x78] sm:$0xff]  ;;  %872 = vst.msk [vmem:[#allocation2 + $0x90] sm:$0xff] %vm34_vm0, %v807_v17  ;;  %870 = vst.msk [vmem:[#allocation2 + $0x80] sm:$0xff] %vm34_vm0, %v805_v18  ;;  %v806_v32 = vadd.f32 %v601_v19, %v180_v12  ;;  %v1595_v50 = vsel %vm34_vm0, %v1521_v22, 0.0  ;;  %v2587_v11 = vpop.f32.mrb[16].mxu1 }
 0x114   :  { %v1397_v28 = vadd.f32 %v1396_v58, %v1395_v15  ;;  %v1004_v30 = vadd.f32 %v2423_v49, %v933_v25  ;;  %v1007_v38 = vadd.f32 %v2423_v49, %v936_v31  ;;  %v934_v39 = vld [vmem:[#allocation2 + $0x68] sm:$0xff]  ;;  %873 = vst.msk [vmem:[#allocation2 + $0x98] sm:$0xff] %vm34_vm0, %v808_v26  ;;  %v1544_v5 = vmul.f32 %v2487_v21, %v2487_v21  ;;  %v953_v21 = vld [vmem:[#allocation2 + $0x100] sm:$0xff]  ;;  %v2591_v19 = vpop.f32.mrb[17].mxu1 }
 0x115   :  { %v1875_v36 = vpack.c.bf16 %v1006_v24, %v1006_v24  ;;  %v1524_v37 = vmul.f32 %v1006_v24, %v1006_v24  ;;  %v1594_v42 = vadd.f32 %v1593_v1, %v1592_v29  ;;  %871 = vst.msk [vmem:[#allocation2 + $0x88] sm:$0xff] %vm34_vm0, %v806_v32  ;;  %v1404_v51 = vsel %vm34_vm0, %v1006_v24, 0.0 }
 0x116   :  { %v1873_v43 = vpack.c.bf16 %v1004_v30, %v1004_v30  ;;  %v1399_v44 = vadd.f32 %v1398_v35, %v1397_v28  ;;  %v1400_v45 = vsel %vm34_vm0, %v1004_v30, 0.0  ;;  %v1522_v53 = vmul.f32 %v1004_v30, %v1004_v30  ;;  %v2601_v28 = vpop.f32.mrb[18].mxu1  ;;  %v956_v35 = vld [vmem:[#allocation2 + $0x118] sm:$0xff] }
 0x117   :  { %1327 = vst.msk [vmem:[%s3223_s3 + $0x38] sm:$0xf] %vm1312_vm2, %v1875_v36  ;;  %v1876_v54 = vpack.c.bf16 %v1007_v38, %v1007_v38  ;;  %v1985_v55 = vpop.f32.mrb[20].mxu0  ;;  %v1596_v57 = vadd.f32 %v1595_v50, %v1594_v42  ;;  %v1525_v58 = vmul.f32 %v1007_v38, %v1007_v38  ;;  %v1005_v59 = vadd.f32 %v2423_v49, %v934_v39  ;;  %v2610_v36 = vpop.f32.mrb[19].mxu1  ;;  %v189_v50 = vld [vmem:[#allocation2 + $0xd0] sm:$0xff] }
 0x118   :  { %1325 = vst.msk [vmem:[%s3223_s3 + $0x30] sm:$0xf] %vm1312_vm2, %v1873_v43  ;;  %v1401_v56 = vadd.f32 %v1400_v45, %v1399_v44  ;;  %v614_v60 = vpop.f32.mrb[21].mxu0  ;;  %v1597_v0 = vsel %vm34_vm0, %v1522_v53, 0.0  ;;  %v811_v1 = vadd.f32 %v1985_v55, %v185_v47  ;;  %v1601_v6 = vsel %vm34_vm0, %v1524_v37, 0.0  ;;  %v187_v53 = vld [vmem:[#allocation2 + $0xc0] sm:$0xff] }
 0x119   :  { %1328 = vst.msk [vmem:[%s3223_s3 + $0x3c] sm:$0xf] %vm1312_vm2, %v1876_v54  ;;  %v809_v2 = vadd.f32 %v614_v60, %v183_v48  ;;  %v1986_v3 = vpop.f32.mrb[22].mxu0  ;;  %v1598_v7 = vadd.f32 %v1597_v0, %v1596_v57  ;;  %v1874_v8 = vpack.c.bf16 %v1005_v59, %v1005_v59  ;;  %v1402_v9 = vsel %vm34_vm0, %v1005_v59, 0.0  ;;  %v190_v54 = vld [vmem:[#allocation2 + $0xd8] sm:$0xff] }
 0x11a   :  { %v617_v10 = vpop.f32.mrb[23].mxu0  ;;  %v1403_v12 = vadd.f32 %v1402_v9, %v1401_v56  ;;  %v1523_v14 = vmul.f32 %v1005_v59, %v1005_v59  ;;  %v939_v15 = vld [vmem:[#allocation2 + $0x90] sm:$0xff]  ;;  %v937_v16 = vld [vmem:[#allocation2 + $0x80] sm:$0xff]  ;;  %876 = vst.msk [vmem:[#allocation2 + $0xb0] sm:$0xff] %vm34_vm0, %v811_v1  ;;  %v812_v17 = vadd.f32 %v1986_v3, %v186_v61  ;;  %v1406_v22 = vsel %vm34_vm0, %v1007_v38, 0.0  ;;  %v188_v9 = vld [vmem:[#allocation2 + $0xc8] sm:$0xff] }
 0x11b   :  { %874 = vst.msk [vmem:[#allocation2 + $0xa0] sm:$0xff] %vm34_vm0, %v809_v2  ;;  %v810_v18 = vadd.f32 %v617_v10, %v184_v63  ;;  %v1603_v23 = vsel %vm34_vm0, %v1525_v58, 0.0  ;;  %v1010_v24 = vadd.f32 %v2423_v49, %v939_v15  ;;  %v1008_v25 = vadd.f32 %v2423_v49, %v937_v16  ;;  %v940_v26 = vld [vmem:[#allocation2 + $0x98] sm:$0xff] }
 0x11c   :  { %1326 = vst.msk [vmem:[%s3223_s3 + $0x34] sm:$0xf] %vm1312_vm2, %v1874_v8  ;;  %v1405_v29 = vadd.f32 %v1404_v51, %v1403_v12  ;;  %v1599_v30 = vsel %vm34_vm0, %v1523_v14, 0.0  ;;  %v1011_v31 = vadd.f32 %v2423_v49, %v940_v26  ;;  %v2608_v32 = vsel %vm34_vm0, %v1544_v5, 0.0  ;;  %v938_v42 = vld [vmem:[#allocation2 + $0x88] sm:$0xff]  ;;  %v2635_v12 = vpop.f32.mrb[20].mxu1 }
 0x11d   :  { %877 = vst.msk [vmem:[#allocation2 + $0xb8] sm:$0xff] %vm34_vm0, %v812_v17  ;;  %875 = vst.msk [vmem:[#allocation2 + $0xa8] sm:$0xff] %vm34_vm0, %v810_v18  ;;  %v1600_v37 = vadd.f32 %v1599_v30, %v1598_v7  ;;  %v1879_v38 = vpack.c.bf16 %v1010_v24, %v1010_v24  ;;  %v1528_v39 = vmul.f32 %v1010_v24, %v1010_v24  ;;  %v1408_v47 = vsel %vm34_vm0, %v1008_v25, 0.0  ;;  %v2638_v18 = vpop.f32.mrb[21].mxu1 }
 0x11e   :  { %v2613_v43 = vadd.f32 %v2423_v49, %v953_v21  ;;  %v1877_v44 = vpack.c.bf16 %v1008_v25, %v1008_v25  ;;  %v1407_v45 = vadd.f32 %v1406_v22, %v1405_v29  ;;  %v1526_v48 = vmul.f32 %v1008_v25, %v1008_v25  ;;  %v2645_v29 = vpop.f32.mrb[22].mxu1 }
 0x11f   :  { %v1989_v51 = vpop.f32.mrb[24].mxu0  ;;  %v1602_v55 = vadd.f32 %v1601_v6, %v1600_v37  ;;  %1331 = vst.msk [vmem:[%s3223_s3 + $0x48] sm:$0xf] %vm1312_vm2, %v1879_v38  ;;  %v1412_v56 = vsel %vm34_vm0, %v1010_v24, 0.0  ;;  %v1880_v57 = vpack.c.bf16 %v1011_v31, %v1011_v31  ;;  %v2622_v59 = vadd.f32 %v2423_v49, %v956_v35 }
 0x120   :  { %v630_v58 = vpop.f32.mrb[25].mxu0  ;;  %v1609_v60 = vsel %vm34_vm0, %v1528_v39, 0.0  ;;  %1329 = vst.msk [vmem:[%s3223_s3 + $0x40] sm:$0xf] %vm1312_vm2, %v1877_v44  ;;  %v1409_v61 = vadd.f32 %v1408_v47, %v1407_v45  ;;  %v1605_v63 = vsel %vm34_vm0, %v1526_v48, 0.0  ;;  %v1009_v0 = vadd.f32 %v2423_v49, %v938_v42  ;;  %v2654_v39 = vpop.f32.mrb[23].mxu1 }
 0x121   :  { %v1990_v1 = vpop.f32.mrb[26].mxu0  ;;  %v1604_v2 = vadd.f32 %v1603_v23, %v1602_v55  ;;  %1332 = vst.msk [vmem:[%s3223_s3 + $0x4c] sm:$0xf] %vm1312_vm2, %v1880_v57  ;;  %v943_v3 = vld [vmem:[#allocation2 + $0xb0] sm:$0xff]  ;;  %v815_v6 = vadd.f32 %v1989_v51, %v189_v50  ;;  %v813_v7 = vadd.f32 %v630_v58, %v187_v53  ;;  %v1529_v14 = vmul.f32 %v1011_v31, %v1011_v31 }
 0x122   :  { %v941_v5 = vld [vmem:[#allocation2 + $0xa0] sm:$0xff]  ;;  %v816_v8 = vadd.f32 %v1990_v1, %v190_v54  ;;  %v633_v10 = vpop.f32.mrb[27].mxu0  ;;  %v1878_v15 = vpack.c.bf16 %v1009_v0, %v1009_v0  ;;  %v1410_v16 = vsel %vm34_vm0, %v1009_v0, 0.0  ;;  %v1527_v17 = vmul.f32 %v1009_v0, %v1009_v0  ;;  %v193_v58 = vld [vmem:[#allocation2 + $0xf0] sm:$0xff]  ;;  %v194_v0 = vld [vmem:[#allocation2 + $0xf8] sm:$0xff] }
 0x123   :  { %v1606_v21 = vadd.f32 %v1605_v63, %v1604_v2  ;;  %v1411_v22 = vadd.f32 %v1410_v16, %v1409_v61  ;;  %v1014_v23 = vadd.f32 %v2423_v49, %v943_v3  ;;  %v1012_v24 = vadd.f32 %v2423_v49, %v941_v5  ;;  %880 = vst.msk [vmem:[#allocation2 + $0xd0] sm:$0xff] %vm34_vm0, %v815_v6  ;;  %v191_v61 = vld [vmem:[#allocation2 + $0xe0] sm:$0xff] }
 0x124   :  { %v944_v25 = vld [vmem:[#allocation2 + $0xb8] sm:$0xff]  ;;  %v942_v26 = vld [vmem:[#allocation2 + $0xa8] sm:$0xff]  ;;  %878 = vst.msk [vmem:[#allocation2 + $0xc0] sm:$0xff] %vm34_vm0, %v813_v7  ;;  %881 = vst.msk [vmem:[#allocation2 + $0xd8] sm:$0xff] %vm34_vm0, %v816_v8  ;;  %v1607_v30 = vsel %vm34_vm0, %v1527_v17, 0.0  ;;  %v814_v38 = vadd.f32 %v633_v10, %v188_v9  ;;  %v1414_v42 = vsel %vm34_vm0, %v1011_v31, 0.0 }
 0x125   :  { %1330 = vst.msk [vmem:[%s3223_s3 + $0x44] sm:$0xf] %vm1312_vm2, %v1878_v15  ;;  %v1015_v35 = vadd.f32 %v2423_v49, %v944_v25  ;;  %v1013_v37 = vadd.f32 %v2423_v49, %v942_v26  ;;  %v1413_v44 = vadd.f32 %v1412_v56, %v1411_v22  ;;  %v1608_v45 = vadd.f32 %v1607_v30, %v1606_v21  ;;  %v192_v10 = vld [vmem:[#allocation2 + $0xe8] sm:$0xff]  ;;  %v2676_v15 = vpop.f32.mrb[24].mxu1 }
 0x126   :  { %v1883_v47 = vpack.c.bf16 %v1014_v23, %v1014_v23  ;;  %v1611_v48 = vsel %vm34_vm0, %v1529_v14, 0.0  ;;  %v1881_v50 = vpack.c.bf16 %v1012_v24, %v1012_v24  ;;  %v1416_v51 = vsel %vm34_vm0, %v1012_v24, 0.0  ;;  %879 = vst.msk [vmem:[#allocation2 + $0xc8] sm:$0xff] %vm34_vm0, %v814_v38  ;;  %v2682_v26 = vpop.f32.mrb[25].mxu1 }
 0x127   :  { %v1530_v53 = vmul.f32 %v1012_v24, %v1012_v24  ;;  %v1993_v54 = vpop.f32.mrb[28].mxu0  ;;  %v1610_v55 = vadd.f32 %v1609_v60, %v1608_v45  ;;  %v1420_v31 = vsel %vm34_vm0, %v1014_v23, 0.0  ;;  %v1415_v56 = vadd.f32 %v1414_v42, %v1413_v44 }
 0x128   :  { %1335 = vst.msk [vmem:[%s3223_s3 + $0x58] sm:$0xf] %vm1312_vm2, %v1883_v47  ;;  %v1884_v57 = vpack.c.bf16 %v1015_v35, %v1015_v35  ;;  %v646_v63 = vpop.f32.mrb[29].mxu0  ;;  %v1532_v1 = vmul.f32 %v1014_v23, %v1014_v23  ;;  %1333 = vst.msk [vmem:[%s3223_s3 + $0x50] sm:$0xf] %vm1312_vm2, %v1881_v50  ;;  %v1422_v2 = vsel %vm34_vm0, %v1015_v35, 0.0  ;;  %v1882_v3 = vpack.c.bf16 %v1013_v37, %v1013_v37 }
 0x129   :  { %v1613_v60 = vsel %vm34_vm0, %v1530_v53, 0.0  ;;  %v1994_v5 = vpop.f32.mrb[30].mxu0  ;;  %v1417_v6 = vadd.f32 %v1416_v51, %v1415_v56  ;;  %v1612_v7 = vadd.f32 %v1611_v48, %v1610_v55  ;;  %v1418_v8 = vsel %vm34_vm0, %v1013_v37, 0.0 }
 0x12a   :  { %1336 = vst.msk [vmem:[%s3223_s3 + $0x5c] sm:$0xf] %vm1312_vm2, %v1884_v57  ;;  %v1531_v9 = vmul.f32 %v1013_v37, %v1013_v37  ;;  %v649_v14 = vpop.f32.mrb[31].mxu0  ;;  %v1533_v16 = vmul.f32 %v1015_v35, %v1015_v35  ;;  %1334 = vst.msk [vmem:[%s3223_s3 + $0x54] sm:$0xf] %vm1312_vm2, %v1882_v3  ;;  %v947_v17 = vld [vmem:[#allocation2 + $0xd0] sm:$0xff]  ;;  %v819_v23 = vadd.f32 %v1993_v54, %v193_v58 }
 0x12b   :  { %v945_v21 = vld [vmem:[#allocation2 + $0xc0] sm:$0xff]  ;;  %v948_v22 = vld [vmem:[#allocation2 + $0xd8] sm:$0xff]  ;;  %v817_v24 = vadd.f32 %v646_v63, %v191_v61  ;;  %v820_v25 = vadd.f32 %v1994_v5, %v194_v0  ;;  %v1614_v30 = vadd.f32 %v1613_v60, %v1612_v7  ;;  %v1419_v37 = vadd.f32 %v1418_v8, %v1417_v6  ;;  %v2686_v35 = vpop.f32.mrb[26].mxu1 }
 0x12c   :  { %v1615_v38 = vsel %vm34_vm0, %v1531_v9, 0.0  ;;  %v1018_v42 = vadd.f32 %v2423_v49, %v947_v17  ;;  %v1016_v44 = vadd.f32 %v2423_v49, %v945_v21  ;;  %v1019_v45 = vadd.f32 %v2423_v49, %v948_v22  ;;  %884 = vst.msk [vmem:[#allocation2 + $0xf0] sm:$0xff] %vm34_vm0, %v819_v23  ;;  %v2695_v50 = vpop.f32.mrb[27].mxu1 }
 0x12d   :  { %882 = vst.msk [vmem:[#allocation2 + $0xe0] sm:$0xff] %vm34_vm0, %v817_v24  ;;  %885 = vst.msk [vmem:[#allocation2 + $0xf8] sm:$0xff] %vm34_vm0, %v820_v25  ;;  %v818_v47 = vadd.f32 %v649_v14, %v192_v10  ;;  %v1893_v48 = vpack.c.bf16 %v2613_v43, %v2613_v43  ;;  %v1617_v51 = vsel %vm34_vm0, %v1532_v1, 0.0  ;;  %v1421_v53 = vadd.f32 %v1420_v31, %v1419_v37  ;;  %v946_v56 = vld [vmem:[#allocation2 + $0xc8] sm:$0xff]  ;;  %v2723_v14 = vpop.f32.mrb[28].mxu1 }
 0x12e   :  { %v1616_v54 = vadd.f32 %v1615_v38, %v1614_v30  ;;  %v1887_v55 = vpack.c.bf16 %v1018_v42, %v1018_v42  ;;  %v1536_v57 = vmul.f32 %v1018_v42, %v1018_v42  ;;  %v1885_v58 = vpack.c.bf16 %v1016_v44, %v1016_v44  ;;  %v2727_v23 = vpop.f32.mrb[29].mxu1 }
 0x12f   :  { %v1424_v61 = vsel %vm34_vm0, %v1016_v44, 0.0  ;;  %v1534_v63 = vmul.f32 %v1016_v44, %v1016_v44  ;;  %883 = vst.msk [vmem:[#allocation2 + $0xe8] sm:$0xff] %vm34_vm0, %v818_v47  ;;  %v1619_v0 = vsel %vm34_vm0, %v1533_v16, 0.0  ;;  %v1423_v31 = vadd.f32 %v1422_v2, %v1421_v53 }
 0x130   :  { %1345 = vst.msk [vmem:[%s3223_s3 + $0x80] sm:$0xf] %vm1312_vm2, %v1893_v48  ;;  %v1618_v60 = vadd.f32 %v1617_v51, %v1616_v54  ;;  %1339 = vst.msk [vmem:[%s3223_s3 + $0x68] sm:$0xf] %vm1312_vm2, %v1887_v55  ;;  %v1888_v1 = vpack.c.bf16 %v1019_v45, %v1019_v45  ;;  %v1428_v3 = vsel %vm34_vm0, %v1018_v42, 0.0  ;;  %v1430_v6 = vsel %vm34_vm0, %v1019_v45, 0.0 }
 0x131   :  { %1337 = vst.msk [vmem:[%s3223_s3 + $0x60] sm:$0xf] %vm1312_vm2, %v1885_v58  ;;  %v1621_v5 = vsel %vm34_vm0, %v1534_v63, 0.0  ;;  %v1017_v7 = vadd.f32 %v2423_v49, %v946_v56  ;;  %v1425_v8 = vadd.f32 %v1424_v61, %v1423_v31  ;;  %v1537_v2 = vmul.f32 %v1019_v45, %v1019_v45  ;;  %v2735_v45 = vpop.f32.mrb[30].mxu1 }
 0x132   :  { %v1620_v9 = vadd.f32 %v1619_v0, %v1618_v60  ;;  %1340 = vst.msk [vmem:[%s3223_s3 + $0x6c] sm:$0xf] %vm1312_vm2, %v1888_v1  ;;  %v1542_v10 = vmul.f32 %v2613_v43, %v2613_v43  ;;  %v1625_v16 = vsel %vm34_vm0, %v1536_v57, 0.0  ;;  %v2731_v42 = vsel %vm34_vm0, %v2613_v43, 0.0  ;;  %v2745_v43 = vpop.f32.mrb[31].mxu1 }
 0x133   :  { %v1886_v17 = vpack.c.bf16 %v1017_v7, %v1017_v7  ;;  %v1426_v21 = vsel %vm34_vm0, %v1017_v7, 0.0  ;;  %v1535_v22 = vmul.f32 %v1017_v7, %v1017_v7  ;;  %v951_v30 = vld [vmem:[#allocation2 + $0xf0] sm:$0xff]  ;;  %v1896_v44 = vpack.c.bf16 %v2622_v59, %v2622_v59  ;;  %v954_v7 = vld [vmem:[#allocation2 + $0x108] sm:$0xff] }
 0x134   :  { %v1622_v24 = vadd.f32 %v1621_v5, %v1620_v9  ;;  %v1427_v25 = vadd.f32 %v1426_v21, %v1425_v8  ;;  %v949_v37 = vld [vmem:[#allocation2 + $0xe0] sm:$0xff]  ;;  %v952_v38 = vld [vmem:[#allocation2 + $0xf8] sm:$0xff]  ;;  %v1022_v48 = vadd.f32 %v2423_v49, %v951_v30  ;;  %v1627_v54 = vsel %vm34_vm0, %v1537_v2, 0.0  ;;  %v959_v8 = vld [vmem:[#allocation2 + $0x130] sm:$0xff] }
 0x135   :  { %1338 = vst.msk [vmem:[%s3223_s3 + $0x64] sm:$0xf] %vm1312_vm2, %v1886_v17  ;;  %v1623_v47 = vsel %vm34_vm0, %v1535_v22, 0.0  ;;  %v1020_v51 = vadd.f32 %v2423_v49, %v949_v37  ;;  %v1023_v53 = vadd.f32 %v2423_v49, %v952_v38  ;;  %v2749_v57 = vsel %vm34_vm0, %v1542_v10, 0.0  ;;  %1348 = vst.msk [vmem:[%s3223_s3 + $0x8c] sm:$0xf] %vm1312_vm2, %v1896_v44 }
 0x136   :  { %v1429_v55 = vadd.f32 %v1428_v3, %v1427_v25  ;;  %v1624_v56 = vadd.f32 %v1623_v47, %v1622_v24  ;;  %v1891_v58 = vpack.c.bf16 %v1022_v48, %v1022_v48  ;;  %v1540_v61 = vmul.f32 %v1022_v48, %v1022_v48  ;;  %v950_v0 = vld [vmem:[#allocation2 + $0xe8] sm:$0xff] }
 0x137   :  { %v1889_v63 = vpack.c.bf16 %v1020_v51, %v1020_v51  ;;  %v2757_v60 = vsel %vm34_vm0, %v2622_v59, 0.0  ;;  %v1432_v3 = vsel %vm34_vm0, %v1020_v51, 0.0  ;;  %v1538_v5 = vmul.f32 %v1020_v51, %v1020_v51 }
 0x138   :  { %v1626_v31 = vadd.f32 %v1625_v16, %v1624_v56  ;;  %v1431_v1 = vadd.f32 %v1430_v6, %v1429_v55  ;;  %1343 = vst.msk [vmem:[%s3223_s3 + $0x78] sm:$0xf] %vm1312_vm2, %v1891_v58  ;;  %v1436_v9 = vsel %vm34_vm0, %v1022_v48, 0.0  ;;  %v1892_v2 = vpack.c.bf16 %v1023_v53, %v1023_v53  ;;  %v957_v48 = vld [vmem:[#allocation2 + $0x120] sm:$0xff]  ;;  %v202_v58 = vld [vmem:[#allocation2 + $0x138] sm:$0xff] }
 0x139   :  { %1341 = vst.msk [vmem:[%s3223_s3 + $0x70] sm:$0xf] %vm1312_vm2, %v1889_v63  ;;  %v1541_v10 = vmul.f32 %v1023_v53, %v1023_v53  ;;  %v1545_v6 = vmul.f32 %v2622_v59, %v2622_v59  ;;  %v1629_v21 = vsel %vm34_vm0, %v1538_v5, 0.0  ;;  %v1021_v22 = vadd.f32 %v2423_v49, %v950_v0  ;;  %v205_v63 = vld [vmem:[#allocation2 + $0x150] sm:$0xff] }
 0x13a   :  { %v1433_v16 = vadd.f32 %v1432_v3, %v1431_v1  ;;  %v1628_v17 = vadd.f32 %v1627_v54, %v1626_v31  ;;  %v1633_v24 = vsel %vm34_vm0, %v1540_v61, 0.0  ;;  %1344 = vst.msk [vmem:[%s3223_s3 + $0x7c] sm:$0xf] %vm1312_vm2, %v1892_v2  ;;  %v1438_v25 = vsel %vm34_vm0, %v1023_v53, 0.0  ;;  %v200_v61 = vld [vmem:[#allocation2 + $0x128] sm:$0xff]  ;;  %v203_v2 = vld [vmem:[#allocation2 + $0x140] sm:$0xff] }
 0x13b   :  { %v1025_v30 = vadd.f32 %v2423_v49, %v954_v7  ;;  %v2781_v37 = vadd.f32 %v2423_v49, %v959_v8  ;;  %v1890_v38 = vpack.c.bf16 %v1021_v22, %v1021_v22  ;;  %v1434_v44 = vsel %vm34_vm0, %v1021_v22, 0.0 }
 0x13c   :  { %v1630_v59 = vadd.f32 %v1629_v21, %v1628_v17  ;;  %v1539_v47 = vmul.f32 %v1021_v22, %v1021_v22  ;;  %v1635_v51 = vsel %vm34_vm0, %v1541_v10, 0.0  ;;  %v1435_v54 = vadd.f32 %v1434_v44, %v1433_v16  ;;  %v206_v10 = vld [vmem:[#allocation2 + $0x158] sm:$0xff]  ;;  %v209_v22 = vld [vmem:[#allocation2 + $0x170] sm:$0xff] }
 0x13d   :  { %v1894_v55 = vpack.c.bf16 %v1025_v30, %v1025_v30  ;;  %v1543_v56 = vmul.f32 %v1025_v30, %v1025_v30  ;;  %1342 = vst.msk [vmem:[%s3223_s3 + $0x74] sm:$0xf] %vm1312_vm2, %v1890_v38  ;;  %v2791_v0 = vsel %vm34_vm0, %v1545_v6, 0.0  ;;  %v1442_v31 = vsel %vm34_vm0, %v1025_v30, 0.0  ;;  %v204_v6 = vld [vmem:[#allocation2 + $0x148] sm:$0xff]  ;;  %v207_v30 = vld [vmem:[#allocation2 + $0x160] sm:$0xff] }
 0x13e   :  { %v1631_v53 = vsel %vm34_vm0, %v1539_v47, 0.0  ;;  %v1899_v1 = vpack.c.bf16 %v2781_v37, %v2781_v37  ;;  %v1437_v3 = vadd.f32 %v1436_v9, %v1435_v54  ;;  %v2802_v7 = vmul.f32 %v2781_v37, %v2781_v37  ;;  %v210_v47 = vld [vmem:[#allocation2 + $0x178] sm:$0xff]  ;;  %v213_v54 = vld [vmem:[#allocation2 + $0x190] sm:$0xff] }
 0x13f   :  { %v1632_v5 = vadd.f32 %v1631_v53, %v1630_v59  ;;  %1346 = vst.msk [vmem:[%s3223_s3 + $0x84] sm:$0xf] %vm1312_vm2, %v1894_v55  ;;  %v1028_v8 = vadd.f32 %v2423_v49, %v957_v48  ;;  %v1639_v16 = vsel %vm34_vm0, %v1543_v56, 0.0  ;;  %v828_v9 = vadd.f32 %v2466_v62, %v202_v58  ;;  %v208_v48 = vld [vmem:[#allocation2 + $0x168] sm:$0xff] }
 0x140   :  { %1351 = vst.msk [vmem:[%s3223_s3 + $0x98] sm:$0xf] %vm1312_vm2, %v1899_v1  ;;  %v826_v17 = vadd.f32 %v2471_v4, %v200_v61  ;;  %v831_v21 = vadd.f32 %v2496_v34, %v205_v63  ;;  %v1439_v49 = vadd.f32 %v1438_v25, %v1437_v3  ;;  %v829_v62 = vadd.f32 %v2505_v40, %v203_v2  ;;  %v214_v25 = vld [vmem:[#allocation2 + $0x198] sm:$0xff]  ;;  %v212_v56 = vld [vmem:[#allocation2 + $0x188] sm:$0xff]  ;;  %v217_v40 = vld [vmem:[#allocation2 + $0x1b0] sm:$0xff] }
 0x141   :  { %v1634_v59 = vadd.f32 %v1633_v24, %v1632_v5  ;;  %v1897_v38 = vpack.c.bf16 %v1028_v8, %v1028_v8  ;;  %v2814_v44 = vsel %vm34_vm0, %v1028_v8, 0.0  ;;  %v1546_v55 = vmul.f32 %v1028_v8, %v1028_v8  ;;  %893 = vst.msk [vmem:[#allocation2 + $0x138] sm:$0xff] %vm34_vm0, %v828_v9  ;;  %v211_v24 = vld [vmem:[#allocation2 + $0x180] sm:$0xff]  ;;  %v216_v3 = vld [vmem:[#allocation2 + $0x1a8] sm:$0xff]  ;;  %v222_v9 = vld [vmem:[#allocation2 + $0x1d8] sm:$0xff] }
 0x142   :  { %891 = vst.msk [vmem:[#allocation2 + $0x128] sm:$0xff] %vm34_vm0, %v826_v17  ;;  %896 = vst.msk [vmem:[#allocation2 + $0x150] sm:$0xff] %vm34_vm0, %v831_v21  ;;  %v832_v4 = vadd.f32 %v2509_v46, %v206_v10  ;;  %v830_v34 = vadd.f32 %v2514_v52, %v204_v6  ;;  %v1441_v58 = vadd.f32 %v2731_v42, %v1439_v49  ;;  %v215_v1 = vld [vmem:[#allocation2 + $0x1a0] sm:$0xff]  ;;  %v218_v46 = vld [vmem:[#allocation2 + $0x1b8] sm:$0xff] }
 0x143   :  { %v1636_v61 = vadd.f32 %v1635_v51, %v1634_v59  ;;  %1349 = vst.msk [vmem:[%s3223_s3 + $0x90] sm:$0xf] %vm1312_vm2, %v1897_v38  ;;  %v835_v63 = vadd.f32 %v2545_v20, %v209_v22  ;;  %v833_v53 = vadd.f32 %v2553_v27, %v207_v30  ;;  %v2830_v52 = vsel %vm34_vm0, %v1546_v55, 0.0  ;;  %v221_v27 = vld [vmem:[#allocation2 + $0x1d0] sm:$0xff]  ;;  %v219_v5 = vld [vmem:[#allocation2 + $0x1c0] sm:$0xff]  ;;  %v226_v21 = vld [vmem:[#allocation2 + $0x1f8] sm:$0xff] }
 0x144   :  { %894 = vst.msk [vmem:[#allocation2 + $0x140] sm:$0xff] %vm34_vm0, %v829_v62  ;;  %897 = vst.msk [vmem:[#allocation2 + $0x158] sm:$0xff] %vm34_vm0, %v832_v4  ;;  %v836_v42 = vadd.f32 %v2558_v33, %v210_v47  ;;  %v834_v51 = vadd.f32 %v2563_v41, %v208_v48  ;;  %v839_v20 = vadd.f32 %v2587_v11, %v213_v54  ;;  %v220_v33 = vld [vmem:[#allocation2 + $0x1c8] sm:$0xff]  ;;  %v225_v17 = vld [vmem:[#allocation2 + $0x1f0] sm:$0xff] }
 0x145   :  { %895 = vst.msk [vmem:[#allocation2 + $0x148] sm:$0xff] %vm34_vm0, %v830_v34  ;;  %v1638_v8 = vadd.f32 %v2749_v57, %v1636_v61  ;;  %v1443_v2 = vadd.f32 %v1442_v31, %v1441_v58  ;;  %900 = vst.msk [vmem:[#allocation2 + $0x170] sm:$0xff] %vm34_vm0, %v835_v63  ;;  %v837_v10 = vadd.f32 %v2591_v19, %v211_v24  ;;  %v223_v19 = vld [vmem:[#allocation2 + $0x1e0] sm:$0xff] }
 0x146   :  { %898 = vst.msk [vmem:[#allocation2 + $0x160] sm:$0xff] %vm34_vm0, %v833_v53  ;;  %v840_v6 = vadd.f32 %v2601_v28, %v214_v25  ;;  %901 = vst.msk [vmem:[#allocation2 + $0x178] sm:$0xff] %vm34_vm0, %v836_v42  ;;  %v838_v41 = vadd.f32 %v2610_v36, %v212_v56  ;;  %v843_v11 = vadd.f32 %v2635_v12, %v217_v40  ;;  %v224_v36 = vld [vmem:[#allocation2 + $0x1e8] sm:$0xff]  ;;  %v1452_v25 = vsel %vm34_vm0, %v2781_v37, 0.0 }
 0x147   :  { %899 = vst.msk [vmem:[#allocation2 + $0x168] sm:$0xff] %vm34_vm0, %v834_v51  ;;  %904 = vst.msk [vmem:[#allocation2 + $0x190] sm:$0xff] %vm34_vm0, %v839_v20  ;;  %v841_v57 = vadd.f32 %v2638_v18, %v215_v1  ;;  %v844_v31 = vadd.f32 %v2645_v29, %v218_v46  ;;  %v1445_v28 = vadd.f32 %v2539_v13, %v1443_v2  ;;  %v1649_v56 = vsel %vm34_vm0, %v2802_v7, 0.0 }
 0x148   :  { %v1640_v22 = vadd.f32 %v1639_v16, %v1638_v8  ;;  %902 = vst.msk [vmem:[#allocation2 + $0x180] sm:$0xff] %vm34_vm0, %v837_v10  ;;  %905 = vst.msk [vmem:[#allocation2 + $0x198] sm:$0xff] %vm34_vm0, %v840_v6  ;;  %v842_v30 = vadd.f32 %v2654_v39, %v216_v3  ;;  %v847_v59 = vadd.f32 %v2676_v15, %v221_v27  ;;  %v960_v16 = vld [vmem:[#allocation2 + $0x138] sm:$0xff] }
 0x149   :  { %903 = vst.msk [vmem:[#allocation2 + $0x188] sm:$0xff] %vm34_vm0, %v838_v41  ;;  %908 = vst.msk [vmem:[#allocation2 + $0x1b0] sm:$0xff] %vm34_vm0, %v843_v11  ;;  %v845_v13 = vadd.f32 %v2682_v26, %v219_v5  ;;  %v848_v12 = vadd.f32 %v2686_v35, %v222_v9  ;;  %v846_v18 = vadd.f32 %v2695_v50, %v220_v33  ;;  %v958_v49 = vld [vmem:[#allocation2 + $0x128] sm:$0xff]  ;;  %v963_v38 = vld [vmem:[#allocation2 + $0x150] sm:$0xff] }
 0x14a   :  { %906 = vst.msk [vmem:[#allocation2 + $0x1a0] sm:$0xff] %vm34_vm0, %v841_v57  ;;  %909 = vst.msk [vmem:[#allocation2 + $0x1b8] sm:$0xff] %vm34_vm0, %v844_v31  ;;  %v851_v29 = vadd.f32 %v2723_v14, %v225_v17  ;;  %v1642_v39 = vadd.f32 %v2608_v32, %v1640_v22  ;;  %v1447_v15 = vadd.f32 %v2757_v60, %v1445_v28  ;;  %v2869_v35 = vld [vmem:[#allocation3] ss:$0 sm:$0xff] }
 0x14b   :  { %907 = vst.msk [vmem:[#allocation2 + $0x1a8] sm:$0xff] %vm34_vm0, %v842_v30  ;;  %912 = vst.msk [vmem:[#allocation2 + $0x1d0] sm:$0xff] %vm34_vm0, %v847_v59  ;;  %v849_v47 = vadd.f32 %v2727_v23, %v223_v19  ;;  %v852_v26 = vadd.f32 %v2735_v45, %v226_v21  ;;  %v1031_v50 = vadd.f32 %v2869_v35, %v960_v16  ;;  %v961_v55 = vld [vmem:[#allocation2 + $0x140] sm:$0xff]  ;;  %v964_v62 = vld [vmem:[#allocation2 + $0x158] sm:$0xff] }
 0x14c   :  { %v1029_v14 = vadd.f32 %v2869_v35, %v958_v49  ;;  %v2874_v32 = vadd.f32 %v2869_v35, %v963_v38  ;;  %910 = vst.msk [vmem:[#allocation2 + $0x1c0] sm:$0xff] %vm34_vm0, %v845_v13  ;;  %913 = vst.msk [vmem:[#allocation2 + $0x1d8] sm:$0xff] %vm34_vm0, %v848_v12  ;;  %v850_v23 = vadd.f32 %v2745_v43, %v224_v36  ;;  %v962_v4 = vld [vmem:[#allocation2 + $0x148] sm:$0xff] }
 0x14d   :  { %911 = vst.msk [vmem:[#allocation2 + $0x1c8] sm:$0xff] %vm34_vm0, %v846_v18  ;;  %916 = vst.msk [vmem:[#allocation2 + $0x1f0] sm:$0xff] %vm34_vm0, %v851_v29  ;;  %v1449_v45 = vadd.f32 %v2814_v44, %v1447_v15  ;;  %v1644_v60 = vadd.f32 %v2791_v0, %v1642_v39  ;;  %v1900_v48 = vpack.c.bf16 %v1031_v50, %v1031_v50  ;;  %v967_v0 = vld [vmem:[#allocation2 + $0x170] sm:$0xff]  ;;  %v1454_v40 = vsel %vm34_vm0, %v1031_v50, 0.0  ;;  %v965_v8 = vld [vmem:[#allocation2 + $0x160] sm:$0xff] }
 0x14e   :  { %914 = vst.msk [vmem:[#allocation2 + $0x1e0] sm:$0xff] %vm34_vm0, %v849_v47  ;;  %917 = vst.msk [vmem:[#allocation2 + $0x1f8] sm:$0xff] %vm34_vm0, %v852_v26  ;;  %v1898_v54 = vpack.c.bf16 %v1029_v14, %v1029_v14  ;;  %v1450_v24 = vsel %vm34_vm0, %v1029_v14, 0.0  ;;  %v1547_v43 = vmul.f32 %v1029_v14, %v1029_v14  ;;  %v1903_v44 = vpack.c.bf16 %v2874_v32, %v2874_v32  ;;  %v968_v33 = vld [vmem:[#allocation2 + $0x178] sm:$0xff]  ;;  %v966_v17 = vld [vmem:[#allocation2 + $0x168] sm:$0xff] }
 0x14f   :  { %915 = vst.msk [vmem:[#allocation2 + $0x1e8] sm:$0xff] %vm34_vm0, %v850_v23  ;;  %v1646_v34 = vadd.f32 %v2830_v52, %v1644_v60  ;;  %v1549_v58 = vmul.f32 %v1031_v50, %v1031_v50  ;;  %v1451_v61 = vadd.f32 %v1450_v24, %v1449_v45  ;;  %v1032_v37 = vadd.f32 %v2869_v35, %v961_v55  ;;  %v971_v18 = vld [vmem:[#allocation2 + $0x190] sm:$0xff]  ;;  %v969_v49 = vld [vmem:[#allocation2 + $0x180] sm:$0xff]  ;;  %v972_v38 = vld [vmem:[#allocation2 + $0x198] sm:$0xff] }
 0x150   :  { %1352 = vst.msk [vmem:[%s3223_s3 + $0x9c] sm:$0xf] %vm1312_vm2, %v1900_v48  ;;  %1350 = vst.msk [vmem:[%s3223_s3 + $0x94] sm:$0xf] %vm1312_vm2, %v1898_v54  ;;  %v1647_v63 = vsel %vm34_vm0, %v1547_v43, 0.0  ;;  %v1035_v7 = vadd.f32 %v2869_v35, %v964_v62  ;;  %v1033_v53 = vadd.f32 %v2869_v35, %v962_v4  ;;  %v2912_v52 = vadd.f32 %v2869_v35, %v967_v0  ;;  %v970_v47 = vld [vmem:[#allocation2 + $0x188] sm:$0xff] }
 0x151   :  { %1355 = vst.msk [vmem:[%s3223_s3 + $0xa8] sm:$0xf] %vm1312_vm2, %v1903_v44  ;;  %v1453_v1 = vadd.f32 %v1452_v25, %v1451_v61  ;;  %v1648_v46 = vadd.f32 %v1647_v63, %v1646_v34  ;;  %v1901_v42 = vpack.c.bf16 %v1032_v37, %v1032_v37  ;;  %v1456_v51 = vsel %vm34_vm0, %v1032_v37, 0.0  ;;  %v973_v4 = vld [vmem:[#allocation2 + $0x1a0] sm:$0xff]  ;;  %v975_v25 = vld [vmem:[#allocation2 + $0x1b0] sm:$0xff] }
 0x152   :  { %v1550_v20 = vmul.f32 %v1032_v37, %v1032_v37  ;;  %v1904_v3 = vpack.c.bf16 %v1035_v7, %v1035_v7  ;;  %v1651_v2 = vsel %vm34_vm0, %v1549_v58, 0.0  ;;  %v1902_v6 = vpack.c.bf16 %v1033_v53, %v1033_v53  ;;  %v974_v0 = vld [vmem:[#allocation2 + $0x1a8] sm:$0xff] }
 0x153   :  { %v1650_v27 = vadd.f32 %v1649_v56, %v1648_v46  ;;  %v1455_v5 = vadd.f32 %v1454_v40, %v1453_v1  ;;  %1353 = vst.msk [vmem:[%s3223_s3 + $0xa0] sm:$0xf] %vm1312_vm2, %v1901_v42  ;;  %v1551_v9 = vmul.f32 %v1033_v53, %v1033_v53  ;;  %v1907_v57 = vpack.c.bf16 %v2912_v52, %v2912_v52  ;;  %v976_v56 = vld [vmem:[#allocation2 + $0x1b8] sm:$0xff] }
 0x154   :  { %v1653_v10 = vsel %vm34_vm0, %v1550_v20, 0.0  ;;  %1356 = vst.msk [vmem:[%s3223_s3 + $0xac] sm:$0xf] %vm1312_vm2, %v1904_v3  ;;  %v1552_v31 = vmul.f32 %v2874_v32, %v2874_v32  ;;  %1354 = vst.msk [vmem:[%s3223_s3 + $0xa4] sm:$0xf] %vm1312_vm2, %v1902_v6  ;;  %v1458_v19 = vsel %vm34_vm0, %v1033_v53, 0.0  ;;  %v1036_v21 = vadd.f32 %v2869_v35, %v965_v8 }
 0x155   :  { %v1457_v41 = vadd.f32 %v1456_v51, %v1455_v5  ;;  %v1652_v11 = vadd.f32 %v1651_v2, %v1650_v27  ;;  %1359 = vst.msk [vmem:[%s3223_s3 + $0xb8] sm:$0xf] %vm1312_vm2, %v1907_v57  ;;  %v2940_v30 = vadd.f32 %v2869_v35, %v968_v33  ;;  %v2943_v59 = vadd.f32 %v2869_v35, %v966_v17  ;;  %v978_v53 = vld [vmem:[#allocation2 + $0x1c8] sm:$0xff]  ;;  %v979_v51 = vld [vmem:[#allocation2 + $0x1d0] sm:$0xff]  ;;  %v980_v20 = vld [vmem:[#allocation2 + $0x1d8] sm:$0xff] }
 0x156   :  { %v1460_v36 = vsel %vm34_vm0, %v2874_v32, 0.0  ;;  %v1655_v13 = vsel %vm34_vm0, %v1551_v9, 0.0  ;;  %v1905_v12 = vpack.c.bf16 %v1036_v21, %v1036_v21  ;;  %v1553_v29 = vmul.f32 %v1035_v7, %v1035_v7  ;;  %v981_v3 = vld [vmem:[#allocation2 + $0x1e0] sm:$0xff]  ;;  %v982_v5 = vld [vmem:[#allocation2 + $0x1e8] sm:$0xff]  ;;  %v983_v8 = vld [vmem:[#allocation2 + $0x1f0] sm:$0xff] }
 0x157   :  { %v1654_v28 = vadd.f32 %v1653_v10, %v1652_v11  ;;  %v1459_v22 = vadd.f32 %v1458_v19, %v1457_v41  ;;  %v1908_v16 = vpack.c.bf16 %v2940_v30, %v2940_v30  ;;  %v1657_v26 = vsel %vm34_vm0, %v1552_v31, 0.0  ;;  %v984_v2 = vld [vmem:[#allocation2 + $0x1f8] sm:$0xff] }
 0x158   :  { %v1462_v50 = vsel %vm34_vm0, %v1035_v7, 0.0  ;;  %1357 = vst.msk [vmem:[%s3223_s3 + $0xb0] sm:$0xf] %vm1312_vm2, %v1905_v12  ;;  %v1464_v14 = vsel %vm34_vm0, %v1036_v21, 0.0  ;;  %v1906_v32 = vpack.c.bf16 %v2943_v59, %v2943_v59  ;;  %v1554_v60 = vmul.f32 %v1036_v21, %v1036_v21  ;;  %v977_v7 = vld [vmem:[#allocation2 + $0x1c0] sm:$0xff] }
 0x159   :  { %v1461_v39 = vadd.f32 %v1460_v36, %v1459_v22  ;;  %v1656_v15 = vadd.f32 %v1655_v13, %v1654_v28  ;;  %1360 = vst.msk [vmem:[%s3223_s3 + $0xbc] sm:$0xf] %vm1312_vm2, %v1908_v16  ;;  %v2964_v48 = vadd.f32 %v2869_v35, %v971_v18  ;;  %v2971_v54 = vadd.f32 %v2869_v35, %v969_v49 }
 0x15a   :  { %1358 = vst.msk [vmem:[%s3223_s3 + $0xb4] sm:$0xf] %vm1312_vm2, %v1906_v32  ;;  %v2974_v55 = vadd.f32 %v2869_v35, %v972_v38  ;;  %v2977_v62 = vadd.f32 %v2869_v35, %v970_v47  ;;  %v1659_v34 = vsel %vm34_vm0, %v1553_v29, 0.0  ;;  %v1468_v24 = vsel %vm34_vm0, %v2912_v52, 0.0 }
 0x15b   :  { %v1658_v23 = vadd.f32 %v1657_v26, %v1656_v15  ;;  %v1463_v45 = vadd.f32 %v1462_v50, %v1461_v39  ;;  %v1911_v44 = vpack.c.bf16 %v2964_v48, %v2964_v48  ;;  %v1470_v58 = vsel %vm34_vm0, %v2940_v30, 0.0 }
 0x15c   :  { %v1466_v61 = vsel %vm34_vm0, %v2943_v59, 0.0  ;;  %v1909_v63 = vpack.c.bf16 %v2971_v54, %v2971_v54  ;;  %v1912_v37 = vpack.c.bf16 %v2974_v55, %v2974_v55  ;;  %v1661_v1 = vsel %vm34_vm0, %v1554_v60, 0.0 }
 0x15d   :  { %v1465_v43 = vadd.f32 %v1464_v14, %v1463_v45  ;;  %v1660_v40 = vadd.f32 %v1659_v34, %v1658_v23  ;;  %1363 = vst.msk [vmem:[%s3223_s3 + $0xc8] sm:$0xf] %vm1312_vm2, %v1911_v44  ;;  %v1910_v42 = vpack.c.bf16 %v2977_v62, %v2977_v62  ;;  %v3008_v27 = vadd.f32 %v2869_v35, %v973_v4 }
 0x15e   :  { %1361 = vst.msk [vmem:[%s3223_s3 + $0xc0] sm:$0xf] %vm1312_vm2, %v1909_v63  ;;  %1364 = vst.msk [vmem:[%s3223_s3 + $0xcc] sm:$0xf] %vm1312_vm2, %v1912_v37  ;;  %v3011_v10 = vadd.f32 %v2869_v35, %v974_v0  ;;  %v3014_v6 = vadd.f32 %v2869_v35, %v975_v25  ;;  %v3017_v9 = vadd.f32 %v2869_v35, %v976_v56  ;;  %v1472_v17 = vsel %vm34_vm0, %v2971_v54, 0.0 }
 0x15f   :  { %v1467_v46 = vadd.f32 %v1466_v61, %v1465_v43  ;;  %1362 = vst.msk [vmem:[%s3223_s3 + $0xc4] sm:$0xf] %vm1312_vm2, %v1910_v42  ;;  %v3026_v41 = vadd.f32 %v2869_v35, %v977_v7  ;;  %v3029_v11 = vadd.f32 %v2869_v35, %v978_v53  ;;  %v1913_v57 = vpack.c.bf16 %v3008_v27, %v3008_v27 }
 0x160   :  { %v3034_v31 = vadd.f32 %v2869_v35, %v979_v51  ;;  %v3037_v19 = vadd.f32 %v2869_v35, %v980_v20  ;;  %v3040_v21 = vadd.f32 %v2869_v35, %v981_v3  ;;  %v3043_v28 = vadd.f32 %v2869_v35, %v982_v5 }
 0x161   :  { %v1469_v33 = vadd.f32 %v1468_v24, %v1467_v46  ;;  %v3046_v22 = vadd.f32 %v2869_v35, %v983_v8  ;;  %v3049_v36 = vadd.f32 %v2869_v35, %v984_v2  ;;  %v1914_v13 = vpack.c.bf16 %v3011_v10, %v3011_v10  ;;  %1365 = vst.msk [vmem:[%s3223_s3 + $0xd0] sm:$0xf] %vm1312_vm2, %v1913_v57 }
 0x162   :  { %v1915_v12 = vpack.c.bf16 %v3014_v6, %v3014_v6  ;;  %v1916_v18 = vpack.c.bf16 %v3017_v9, %v3017_v9  ;;  %v1917_v29 = vpack.c.bf16 %v3026_v41, %v3026_v41  ;;  %v1918_v35 = vpack.c.bf16 %v3029_v11, %v3029_v11 }
 0x163   :  { %v1919_v39 = vpack.c.bf16 %v3034_v31, %v3034_v31  ;;  %v1920_v15 = vpack.c.bf16 %v3037_v19, %v3037_v19  ;;  %v1921_v16 = vpack.c.bf16 %v3040_v21, %v3040_v21  ;;  %v1922_v49 = vpack.c.bf16 %v3043_v28, %v3043_v28  ;;  %1366 = vst.msk [vmem:[%s3223_s3 + $0xd4] sm:$0xf] %vm1312_vm2, %v1914_v13 }
 0x164   :  { %v1555_v38 = vmul.f32 %v2943_v59, %v2943_v59  ;;  %v1923_v47 = vpack.c.bf16 %v3046_v22, %v3046_v22  ;;  %v1924_v26 = vpack.c.bf16 %v3049_v36, %v3049_v36  ;;  %1367 = vst.msk [vmem:[%s3223_s3 + $0xd8] sm:$0xf] %vm1312_vm2, %v1915_v12  ;;  %1368 = vst.msk [vmem:[%s3223_s3 + $0xdc] sm:$0xf] %vm1312_vm2, %v1916_v18  ;;  %v1474_v32 = vsel %vm34_vm0, %v2977_v62, 0.0 }
 0x165   :  { %1369 = vst.msk [vmem:[%s3223_s3 + $0xe0] sm:$0xf] %vm1312_vm2, %v1917_v29  ;;  %1370 = vst.msk [vmem:[%s3223_s3 + $0xe4] sm:$0xf] %vm1312_vm2, %v1918_v35  ;;  %v1471_v59 = vadd.f32 %v1470_v58, %v1469_v33  ;;  %v1662_v50 = vadd.f32 %v1661_v1, %v1660_v40  ;;  %v1556_v23 = vmul.f32 %v2912_v52, %v2912_v52  ;;  %v1476_v34 = vsel %vm34_vm0, %v2964_v48, 0.0 }
 0x166   :  { %1371 = vst.msk [vmem:[%s3223_s3 + $0xe8] sm:$0xf] %vm1312_vm2, %v1919_v39  ;;  %1372 = vst.msk [vmem:[%s3223_s3 + $0xec] sm:$0xf] %vm1312_vm2, %v1920_v15  ;;  %v1663_v45 = vsel %vm34_vm0, %v1555_v38, 0.0  ;;  %v1557_v24 = vmul.f32 %v2940_v30, %v2940_v30  ;;  %v1558_v43 = vmul.f32 %v2971_v54, %v2971_v54  ;;  %v1478_v0 = vsel %vm34_vm0, %v2974_v55, 0.0 }
 0x167   :  { %1373 = vst.msk [vmem:[%s3223_s3 + $0xf0] sm:$0xf] %vm1312_vm2, %v1921_v16  ;;  %1374 = vst.msk [vmem:[%s3223_s3 + $0xf4] sm:$0xf] %vm1312_vm2, %v1922_v49  ;;  %v1473_v14 = vadd.f32 %v1472_v17, %v1471_v59  ;;  %v1664_v4 = vadd.f32 %v1663_v45, %v1662_v50  ;;  %v1480_v52 = vsel %vm34_vm0, %v3008_v27, 0.0  ;;  %v1665_v25 = vsel %vm34_vm0, %v1556_v23, 0.0 }
 0x168   :  { %1375 = vst.msk [vmem:[%s3223_s3 + $0xf8] sm:$0xf] %vm1312_vm2, %v1923_v47  ;;  %1376 = vst.msk [vmem:[%s3223_s3 + $0xfc] sm:$0xf] %vm1312_vm2, %v1924_v26  ;;  %v1667_v61 = vsel %vm34_vm0, %v1557_v24, 0.0  ;;  %v1559_v63 = vmul.f32 %v2977_v62, %v2977_v62  ;;  %v1669_v37 = vsel %vm34_vm0, %v1558_v43, 0.0  ;;  %v1560_v40 = vmul.f32 %v2964_v48, %v2964_v48 }
 0x169   :  { %v1475_v60 = vadd.f32 %v1474_v32, %v1473_v14  ;;  %v1666_v58 = vadd.f32 %v1665_v25, %v1664_v4  ;;  %v1482_v54 = vsel %vm34_vm0, %v3011_v10, 0.0  ;;  %v1484_v1 = vsel %vm34_vm0, %v3014_v6, 0.0  ;;  %s2119_s3 = smov [#allocation6]  }
 0x16a   :  { %v1561_v51 = vmul.f32 %v2974_v55, %v2974_v55  ;;  %v1562_v62 = vmul.f32 %v3008_v27, %v3008_v27  ;;  %v1671_v20 = vsel %vm34_vm0, %v1559_v63, 0.0  ;;  %v1486_v3 = vsel %vm34_vm0, %v3017_v9, 0.0  ;;  %s1719_s23 = sshll.u32 %s2119_s3, 4  ;;  %s1720_s23 = int_to_ptr.vmem [resolvable:$true] %s1719_s23 }
 0x16b   :  { %v1477_v44 = vadd.f32 %v1476_v34, %v1475_v60  ;;  %v1668_v7 = vadd.f32 %v1667_v61, %v1666_v58  ;;  %v1488_v5 = vsel %vm34_vm0, %v3026_v41, 0.0  ;;  %v1673_v2 = vsel %vm34_vm0, %v1560_v40, 0.0  ;;  %s2091_s24 = scalar_lea.vmem %s1720_s23, 32  ;;  %p2096_p9 = scmp.lt.s32.totalorder %s1720_s23, %s1720_s23 }
 0x16c   :  { %v1563_v55 = vmul.f32 %v3011_v10, %v3011_v10  ;;  %v1675_v57 = vsel %vm34_vm0, %v1561_v51, 0.0  ;;  %v1677_v27 = vsel %vm34_vm0, %v1562_v62, 0.0  ;;  %v1490_v13 = vsel %vm34_vm0, %v3029_v11, 0.0  ;;  %p2092_p8 = scmp.ne.s32.totalorder %s1720_s23, %s2091_s24  ;;  %p2097_p10 = scmp.lt.s32.totalorder %s2091_s24, %s2091_s24 }
 0x16d   :  { %v1479_v56 = vadd.f32 %v1478_v0, %v1477_v44  ;;  %v1670_v46 = vadd.f32 %v1669_v37, %v1668_v7  ;;  %v1564_v29 = vmul.f32 %v3014_v6, %v3014_v6  ;;  %v1492_v35 = vsel %vm34_vm0, %v3034_v31, 0.0 }
 0x16e   :  { %v1565_v10 = vmul.f32 %v3017_v9, %v3017_v9  ;;  %v1566_v16 = vmul.f32 %v3026_v41, %v3026_v41  ;;  %v1679_v49 = vsel %vm34_vm0, %v1563_v55, 0.0  ;;  %v1494_v38 = vsel %vm34_vm0, %v3037_v19, 0.0  ;;  %p2098_p11 = por %p2097_p10, %p2096_p9 }
 0x16f   :  { %v1481_v30 = vadd.f32 %v1480_v52, %v1479_v56  ;;  %v1672_v48 = vadd.f32 %v1671_v20, %v1670_v46  ;;  %v1496_v47 = vsel %vm34_vm0, %v3040_v21, 0.0  ;;  %v1681_v59 = vsel %vm34_vm0, %v1564_v29, 0.0 }
 0x170   :  { %v1567_v9 = vmul.f32 %v3029_v11, %v3029_v11  ;;  %v1683_v32 = vsel %vm34_vm0, %v1565_v10, 0.0  ;;  %v1685_v41 = vsel %vm34_vm0, %v1566_v16, 0.0  ;;  %v1498_v23 = vsel %vm34_vm0, %v3043_v28, 0.0  ;;  %p2099_p12 = pnand %p2098_p11, %p2092_p8 }
 0x171   :  { %v1483_v53 = vadd.f32 %v1482_v54, %v1481_v30  ;;  %v1674_v33 = vadd.f32 %v1673_v2, %v1672_v48  ;;  %v1568_v4 = vmul.f32 %v3034_v31, %v3034_v31  ;;  %v1500_v34 = vsel %vm34_vm0, %v3046_v22, 0.0 }
 0x172   :  { %v1569_v11 = vmul.f32 %v3037_v19, %v3037_v19  ;;  %v1570_v44 = vmul.f32 %v3040_v21, %v3040_v21  ;;  %v1687_v0 = vsel %vm34_vm0, %v1567_v9, 0.0  ;;  %v1502_v52 = vsel %vm34_vm0, %v3049_v36, 0.0 }
 0x173   :  { %v1485_v42 = vadd.f32 %v1484_v1, %v1483_v53  ;;  %v1676_v12 = vadd.f32 %v1675_v57, %v1674_v33  ;;  %v1689_v31 = vsel %vm34_vm0, %v1568_v4, 0.0  ;;  %v1571_v61 = vmul.f32 %v3043_v28, %v3043_v28 }
 0x174   :  { %v1691_v63 = vsel %vm34_vm0, %v1569_v11, 0.0  ;;  %v1693_v19 = vsel %vm34_vm0, %v1570_v44, 0.0  ;;  %v1572_v21 = vmul.f32 %v3046_v22, %v3046_v22  ;;  %v1573_v7 = vmul.f32 %v3049_v36, %v3049_v36 }
 0x175   :  { %v1487_v8 = vadd.f32 %v1486_v3, %v1485_v42  ;;  %v1678_v39 = vadd.f32 %v1677_v27, %v1676_v12  ;;  %v1695_v53 = vsel %vm34_vm0, %v1571_v61, 0.0 }
 0x176   :  { %v1697_v46 = vsel %vm34_vm0, %v1572_v21, 0.0  ;;  %v1699_v42 = vsel %vm34_vm0, %v1573_v7, 0.0 }
 0x177   :  { %v1489_v17 = vadd.f32 %v1488_v5, %v1487_v8  ;;  %v1680_v6 = vadd.f32 %v1679_v49, %v1678_v39 }
 0x179   :  { %v1491_v18 = vadd.f32 %v1490_v13, %v1489_v17  ;;  %v1682_v50 = vadd.f32 %v1681_v59, %v1680_v6 }
 0x17b   :  { %v1493_v15 = vadd.f32 %v1492_v35, %v1491_v18  ;;  %v1684_v45 = vadd.f32 %v1683_v32, %v1682_v50 }
 0x17d   :  { %v1495_v26 = vadd.f32 %v1494_v38, %v1493_v15  ;;  %v1686_v24 = vadd.f32 %v1685_v41, %v1684_v45 }
 0x17f   :  { %v1497_v14 = vadd.f32 %v1496_v47, %v1495_v26  ;;  %v1688_v25 = vadd.f32 %v1687_v0, %v1686_v24 }
 0x181   :  { %v1499_v60 = vadd.f32 %v1498_v23, %v1497_v14  ;;  %v1690_v58 = vadd.f32 %v1689_v31, %v1688_v25 }
 0x183   :  { %v1501_v43 = vadd.f32 %v1500_v34, %v1499_v60  ;;  %v1692_v37 = vadd.f32 %v1691_v63, %v1690_v58 }
 0x185   :  { %v1503_v56 = vadd.f32 %v1502_v52, %v1501_v43  ;;  %v1694_v54 = vadd.f32 %v1693_v19, %v1692_v37 }
 0x187   :  { %v1504_v30 = vrot.slane %v1503_v56, 4  ;;  %v1696_v1 = vadd.f32 %v1695_v53, %v1694_v54 }
 0x189   :  { %v1505_v40 = vadd.f32 %v1504_v30, %v1503_v56  ;;  %v1698_v28 = vadd.f32 %v1697_v46, %v1696_v1 }
 0x18b   :  { %v1506_v51 = vrot.slane %v1505_v40, 2  ;;  %v1700_v62 = vadd.f32 %v1699_v42, %v1698_v28 }
 0x18d   :  { %v1701_v20 = vrot.slane %v1700_v62, 4  ;;  %v1507_v3 = vadd.f32 %v1506_v51, %v1505_v40 }
 0x18f   :  { %v1702_v5 = vadd.f32 %v1701_v20, %v1700_v62  ;;  %v1508_v22 = vrot.slane %v1507_v3, 1 }
 0x191   :  { %v1703_v48 = vrot.slane %v1702_v5, 2  ;;  %v1509_v36 = vadd.f32 %v1508_v22, %v1507_v3 }
 0x193   :  { %v1704_v8 = vadd.f32 %v1703_v48, %v1702_v5 }
 0x195   :  { %v1705_v2 = vrot.slane %v1704_v8, 1 }
 0x197   :  { %v1706_v33 = vadd.f32 %v1705_v2, %v1704_v8 }
 0x199   :  { %v1708_v17 = vsel %vm1707_vm3, %v1509_v36, %v1706_v33 }
 0x19a   :  { %1710 = vst.msk [vmem:[#allocation6] sm:$0x3] %vm1709_vm4, %v1708_v17 }
 0x19b   :  { %2102 = shalt.err (!%p2099_p12)
}
 0x19c   :  { %s2103_s27 = scalar_lea.hbm %s3224_s4, 32 }
 0x19d   :  { %p2104_p13 = scmp.ne.s32.totalorder %s3224_s4, %s2103_s27  ;;  %p2107_p0 = scmp.lt.u32.totalorder %s2103_s27, %s3224_s4 }
 0x19f   :  { %p2109_p1 = pnand %p2107_p0, %p2104_p13 }
 0x1a1   :  { %2112 = shalt.err (!%p2109_p1)
}
 0x1a2   :  { %1722 = dma.vmem_to_hbm [thread:$0]  %s1720_s23, 32, %s3224_s4, [#allocation5]  }
 0x1a3   :  { %2115 = dma.done.wait [#allocation5], 32  }
 0x1a4   :  { %2116 = vsyncadd [#allocation5], 4294967264 }
 0x1a5   :  { %1728 = vsyncpa [#allocation4], 1 }
 0x1a6   :  { %1729 = vsyncpa [#allocation5], 1 }

// kernel: discriminator_forward.6
= control target key start
LH: loop header
LB: loop body
LE: loop exit
PB: predicated region body
PF: predicated region fallthrough
CT: control target
= control target key end

     0   :  { %vm1549_vm0 = vcmask 1040384   ;;  %s2593_s1 = inlined_call_operand.vmem [shape: bf16[1024,128], index: 1, kind: input, shape index: {}]   ;;  %s2594_s0 = inlined_call_operand.vmem [shape: bf16[128,1024], index: 0, kind: input, shape index: {}]   ;;  %s2595_s2 = inlined_call_operand.vmem [shape: f32[1,128], index: 2, kind: input, shape index: {}]   ;;  %s2596_s3 = inlined_call_operand.vmem [shape: bf16[128,128], index: 3, kind: output, shape index: {0}]   ;;  %s2597_s4 = inlined_call_operand.vmem [shape: f32[1,2,128], index: 4, kind: output, shape index: {1}]  }
   0x1   :  { %v2024_v0 = vld [vmem:[%s2593_s1 + $0x40] sm:$0xff]   ;;  %v2028_v4 = vld [vmem:[%s2593_s1 + $0x48] sm:$0xff]   ;;  %v2032_v8 = vld [vmem:[%s2593_s1 + $0x50] sm:$0xff]  }
   0x2   :  { %v2025_v1 = vld [vmem:[%s2593_s1 + $0xc0] sm:$0xff]   ;;  %1768 = vmatprep.subr.bf16.mxu0 %v2024_v0  ;;  %v2029_v5 = vld [vmem:[%s2593_s1 + $0xc8] sm:$0xff]   ;;  %v2033_v9 = vld [vmem:[%s2593_s1 + $0xd0] sm:$0xff]  }
   0x3   :  { %v2026_v2 = vld [vmem:[%s2593_s1] sm:$0xff]   ;;  %1832 = vmatprep.subr.bf16.mxu1 %v2025_v1  ;;  %v2030_v6 = vld [vmem:[%s2593_s1 + $0x8] sm:$0xff]   ;;  %v2034_v10 = vld [vmem:[%s2593_s1 + $0x10] sm:$0xff]  }
   0x4   :  { %v2027_v3 = vld [vmem:[%s2593_s1 + $0x80] sm:$0xff]   ;;  %1769 = vmatpush3.bf16.msra.mxu0 %v2026_v2  ;;  %v2031_v7 = vld [vmem:[%s2593_s1 + $0x88] sm:$0xff]   ;;  %v2035_v11 = vld [vmem:[%s2593_s1 + $0x90] sm:$0xff]  }
   0x5   :  { %1833 = vmatpush3.bf16.msra.mxu1 %v2027_v3  ;;  %1770 = vmatprep.subr.bf16.mxu0 %v2028_v4  ;;  %v2036_v12 = vld [vmem:[%s2593_s1 + $0x58] sm:$0xff]   ;;  %v2040_v16 = vld [vmem:[%s2593_s1 + $0x60] sm:$0xff]   ;;  %v2044_v20 = vld [vmem:[%s2593_s1 + $0x68] sm:$0xff]  }
   0x6   :  { %1834 = vmatprep.subr.bf16.mxu1 %v2029_v5  ;;  %v2037_v13 = vld [vmem:[%s2593_s1 + $0xd8] sm:$0xff]   ;;  %v2041_v17 = vld [vmem:[%s2593_s1 + $0xe0] sm:$0xff]   ;;  %v2045_v21 = vld [vmem:[%s2593_s1 + $0xe8] sm:$0xff]  }
   0x7   :  { %v2038_v14 = vld [vmem:[%s2593_s1 + $0x18] sm:$0xff]   ;;  %v2042_v18 = vld [vmem:[%s2593_s1 + $0x20] sm:$0xff]   ;;  %v2046_v22 = vld [vmem:[%s2593_s1 + $0x28] sm:$0xff]  }
   0x8   :  { %1771 = vmatpush3.bf16.msra.mxu0 %v2030_v6  ;;  %v2039_v15 = vld [vmem:[%s2593_s1 + $0x98] sm:$0xff]   ;;  %v2043_v19 = vld [vmem:[%s2593_s1 + $0xa0] sm:$0xff]   ;;  %v2047_v23 = vld [vmem:[%s2593_s1 + $0xa8] sm:$0xff]  }
   0x9   :  { %1835 = vmatpush3.bf16.msra.mxu1 %v2031_v7  ;;  %1772 = vmatprep.subr.bf16.mxu0 %v2032_v8  ;;  %v2048_v24 = vld [vmem:[%s2593_s1 + $0x70] sm:$0xff]   ;;  %v2052_v28 = vld [vmem:[%s2593_s1 + $0x78] sm:$0xff]   ;;  %v37_v32 = vld [vmem:[%s2594_s0] sm:$0xff] }
   0xa   :  { %1836 = vmatprep.subr.bf16.mxu1 %v2033_v9  ;;  %v2049_v25 = vld [vmem:[%s2593_s1 + $0xf0] sm:$0xff]   ;;  %v2053_v29 = vld [vmem:[%s2593_s1 + $0xf8] sm:$0xff]   ;;  %v41_v33 = vld [vmem:[%s2594_s0 + $0x20] sm:$0xff] }
   0xb   :  { %v2050_v26 = vld [vmem:[%s2593_s1 + $0x30] sm:$0xff]   ;;  %v2054_v30 = vld [vmem:[%s2593_s1 + $0x38] sm:$0xff]   ;;  %v38_v34 = vld [vmem:[%s2594_s0 + $0x8] sm:$0xff]  ;;  %v1560_v35 = vcombine.low %v37_v32, %v41_v33  ;;  %v1561_v36 = vcombine.high %v37_v32, %v41_v33 }
   0xc   :  { %1773 = vmatpush3.bf16.msra.mxu0 %v2034_v10  ;;  %v2051_v27 = vld [vmem:[%s2593_s1 + $0xb0] sm:$0xff]   ;;  %v2055_v31 = vld [vmem:[%s2593_s1 + $0xb8] sm:$0xff]   ;;  %v42_v37 = vld [vmem:[%s2594_s0 + $0x28] sm:$0xff] }
   0xd   :  { %1837 = vmatpush3.bf16.msra.mxu1 %v2035_v11  ;;  %1774 = vmatprep.subr.bf16.mxu0 %v2036_v12  ;;  %v1562_v38 = vcombine.low %v38_v34, %v42_v37  ;;  %v1563_v39 = vcombine.high %v38_v34, %v42_v37  ;;  %v2056_v40 = vld [vmem:[%s2593_s1 + $0x140] sm:$0xff]   ;;  %v46_v47 = vld [vmem:[%s2594_s0 + $0x48] sm:$0xff]  ;;  %v2064_v62 = vld [vmem:[%s2593_s1 + $0x150] sm:$0xff]  }
   0xe   :  { %1838 = vmatprep.subr.bf16.mxu1 %v2037_v13  ;;  %981 = vmatprep.mubr.bf16.mxu0 %v1561_v36  ;;  %v2057_v41 = vld [vmem:[%s2593_s1 + $0x100] sm:$0xff]   ;;  %v50_v48 = vld [vmem:[%s2594_s0 + $0x68] sm:$0xff]  ;;  %v2065_v63 = vld [vmem:[%s2593_s1 + $0x110] sm:$0xff]  }
   0xf   :  { %1078 = vmatprep.mubr.bf16.mxu1 %v1563_v39  ;;  %v2058_v42 = vld [vmem:[%s2593_s1 + $0x1c0] sm:$0xff]   ;;  %v1571_v49 = vcombine.high %v46_v47, %v50_v48  ;;  %v2060_v50 = vld [vmem:[%s2593_s1 + $0x148] sm:$0xff]   ;;  %v1570_v53 = vcombine.low %v46_v47, %v50_v48  ;;  %v2066_v0 = vld [vmem:[%s2593_s1 + $0x1d0] sm:$0xff]  }
  0x10   :  { %1775 = vmatpush3.bf16.msra.mxu0 %v2038_v14  ;;  %v2059_v43 = vld [vmem:[%s2593_s1 + $0x180] sm:$0xff]   ;;  %v2061_v52 = vld [vmem:[%s2593_s1 + $0x108] sm:$0xff]   ;;  %v2067_v1 = vld [vmem:[%s2593_s1 + $0x190] sm:$0xff]  }
  0x11   :  { %1839 = vmatpush3.bf16.msra.mxu1 %v2039_v15  ;;  %1776 = vmatprep.subr.bf16.mxu0 %v2040_v16  ;;  %v45_v44 = vld [vmem:[%s2594_s0 + $0x40] sm:$0xff]  ;;  %v2062_v54 = vld [vmem:[%s2593_s1 + $0x1c8] sm:$0xff]   ;;  %v2068_v10 = vld [vmem:[%s2593_s1 + $0x158] sm:$0xff]  }
  0x12   :  { %1840 = vmatprep.subr.bf16.mxu1 %v2041_v17  ;;  %v49_v45 = vld [vmem:[%s2594_s0 + $0x60] sm:$0xff]  ;;  %v2063_v55 = vld [vmem:[%s2593_s1 + $0x188] sm:$0xff]   ;;  %v2069_v11 = vld [vmem:[%s2593_s1 + $0x118] sm:$0xff]  }
  0x13   :  { %v1569_v46 = vcombine.high %v45_v44, %v49_v45  ;;  %v1568_v51 = vcombine.low %v45_v44, %v49_v45  ;;  %v53_v56 = vld [vmem:[%s2594_s0 + $0x80] sm:$0xff]  ;;  %v54_v58 = vld [vmem:[%s2594_s0 + $0x88] sm:$0xff]  ;;  %v2070_v12 = vld [vmem:[%s2593_s1 + $0x1d8] sm:$0xff]  }
  0x14   :  { %1777 = vmatpush3.bf16.msra.mxu0 %v2042_v18  ;;  %v57_v57 = vld [vmem:[%s2594_s0 + $0xa0] sm:$0xff]  ;;  %v58_v59 = vld [vmem:[%s2594_s0 + $0xa8] sm:$0xff]  ;;  %v2071_v13 = vld [vmem:[%s2593_s1 + $0x198] sm:$0xff]  }
  0x15   :  { %1841 = vmatpush3.bf16.msra.mxu1 %v2043_v19  ;;  %1778 = vmatprep.subr.bf16.mxu0 %v2044_v20  ;;  %v1577_v60 = vcombine.high %v53_v56, %v57_v57  ;;  %v1579_v61 = vcombine.high %v54_v58, %v58_v59  ;;  %v1576_v2 = vcombine.low %v53_v56, %v57_v57  ;;  %v61_v3 = vld [vmem:[%s2594_s0 + $0xc0] sm:$0xff]  ;;  %v62_v5 = vld [vmem:[%s2594_s0 + $0xc8] sm:$0xff]  ;;  %v2081_v39 = vld [vmem:[%s2593_s1 + $0x130] sm:$0xff]  }
  0x16   :  { %1842 = vmatprep.subr.bf16.mxu1 %v2045_v21  ;;  %v65_v4 = vld [vmem:[%s2594_s0 + $0xe0] sm:$0xff]  ;;  %v1578_v6 = vcombine.low %v54_v58, %v58_v59  ;;  %v66_v8 = vld [vmem:[%s2594_s0 + $0xe8] sm:$0xff]  ;;  %v2085_v48 = vld [vmem:[%s2593_s1 + $0x138] sm:$0xff]  }
  0x17   :  { %v1585_v7 = vcombine.high %v61_v3, %v65_v4  ;;  %v1587_v9 = vcombine.high %v62_v5, %v66_v8  ;;  %v69_v14 = vld [vmem:[%s2594_s0 + $0x100] sm:$0xff]  ;;  %v70_v16 = vld [vmem:[%s2594_s0 + $0x108] sm:$0xff]  ;;  %v1584_v19 = vcombine.low %v61_v3, %v65_v4  ;;  %v1586_v21 = vcombine.low %v62_v5, %v66_v8  ;;  %v48_v8 = vld [vmem:[%s2594_s0 + $0x58] sm:$0xff] }
  0x18   :  { %1779 = vmatpush3.bf16.msra.mxu0 %v2046_v22  ;;  %v73_v15 = vld [vmem:[%s2594_s0 + $0x120] sm:$0xff]  ;;  %v74_v17 = vld [vmem:[%s2594_s0 + $0x128] sm:$0xff] }
  0x19   :  { %1843 = vmatpush3.bf16.msra.mxu1 %v2047_v23  ;;  %1780 = vmatprep.subr.bf16.mxu0 %v2048_v24  ;;  %v2072_v18 = vld [vmem:[%s2593_s1 + $0x160] sm:$0xff]   ;;  %v1593_v22 = vcombine.high %v69_v14, %v73_v15  ;;  %v1595_v24 = vcombine.high %v70_v16, %v74_v17  ;;  %v2078_v32 = vld [vmem:[%s2593_s1 + $0x1e8] sm:$0xff]   ;;  %v1592_v34 = vcombine.low %v69_v14, %v73_v15  ;;  %v55_v14 = vld [vmem:[%s2594_s0 + $0x90] sm:$0xff] }
  0x1a   :  { %1844 = vmatprep.subr.bf16.mxu1 %v2049_v25  ;;  %v2073_v20 = vld [vmem:[%s2593_s1 + $0x120] sm:$0xff]   ;;  %v2079_v33 = vld [vmem:[%s2593_s1 + $0x1a8] sm:$0xff]   ;;  %v59_v15 = vld [vmem:[%s2594_s0 + $0xb0] sm:$0xff] }
  0x1b   :  { %v2074_v23 = vld [vmem:[%s2593_s1 + $0x1e0] sm:$0xff]   ;;  %v86_v44 = vld [vmem:[%s2594_s0 + $0x188] sm:$0xff] }
  0x1c   :  { %1781 = vmatpush3.bf16.msra.mxu0 %v2050_v26  ;;  %v2075_v25 = vld [vmem:[%s2593_s1 + $0x1a0] sm:$0xff]   ;;  %v90_v45 = vld [vmem:[%s2594_s0 + $0x1a8] sm:$0xff] }
  0x1d   :  { %1845 = vmatpush3.bf16.msra.mxu1 %v2051_v27  ;;  %1782 = vmatprep.subr.bf16.mxu0 %v2052_v28  ;;  %v77_v26 = vld [vmem:[%s2594_s0 + $0x140] sm:$0xff]  ;;  %v2076_v28 = vld [vmem:[%s2593_s1 + $0x168] sm:$0xff]   ;;  %v1610_v59 = vcombine.low %v86_v44, %v90_v45 }
  0x1e   :  { %1846 = vmatprep.subr.bf16.mxu1 %v2053_v29  ;;  %v81_v27 = vld [vmem:[%s2594_s0 + $0x160] sm:$0xff]  ;;  %v78_v29 = vld [vmem:[%s2594_s0 + $0x148] sm:$0xff] }
  0x1f   :  { %v1601_v36 = vcombine.high %v77_v26, %v81_v27  ;;  %v1600_v47 = vcombine.low %v77_v26, %v81_v27  ;;  %v94_v56 = vld [vmem:[%s2594_s0 + $0x1c8] sm:$0xff]  ;;  %v1580_v26 = vcombine.low %v55_v14, %v59_v15 }
  0x20   :  { %1783 = vmatpush3.bf16.msra.mxu0 %v2054_v30  ;;  %v82_v30 = vld [vmem:[%s2594_s0 + $0x168] sm:$0xff] }
  0x21   :  { %1847 = vmatpush3.bf16.msra.mxu1 %v2055_v31  ;;  %1896 = vmatprep.subr.bf16.mxu0 %v2056_v40  ;;  %v2077_v31 = vld [vmem:[%s2593_s1 + $0x128] sm:$0xff]   ;;  %v1603_v37 = vcombine.high %v78_v29, %v82_v30  ;;  %v2082_v40 = vld [vmem:[%s2593_s1 + $0x1f0] sm:$0xff]  }
  0x22   :  { %1960 = vmatprep.subr.bf16.mxu1 %v2058_v42  ;;  %v89_v42 = vld [vmem:[%s2594_s0 + $0x1a0] sm:$0xff]  ;;  %v98_v57 = vld [vmem:[%s2594_s0 + $0x1e8] sm:$0xff] }
  0x23   :  { %982 = vmatmul.mubr.bf16.vlgmr.msra.gmra.mrb[0].mxu0 %v1560_v35  ;;  %v1594_v35 = vcombine.low %v70_v16, %v74_v17  ;;  %v1618_v3 = vcombine.low %v94_v56, %v98_v57  ;;  %v56_v16 = vld [vmem:[%s2594_s0 + $0x98] sm:$0xff] }
  0x24   :  { %1079 = vmatmul.mubr.bf16.vlgmr.msra.gmra.mrb[0].mxu1 %v1562_v38  ;;  %1897 = vmatpush3.bf16.msra.mxu0 %v2057_v41  ;;  %v2080_v38 = vld [vmem:[%s2593_s1 + $0x170] sm:$0xff]   ;;  %v85_v41 = vld [vmem:[%s2594_s0 + $0x180] sm:$0xff]  ;;  %v60_v17 = vld [vmem:[%s2594_s0 + $0xb8] sm:$0xff] }
  0x25   :  { %1961 = vmatpush3.bf16.msra.mxu1 %v2059_v43  ;;  %989 = vmatprep.mubr.bf16.mxu0 %v1569_v46  ;;  %v2083_v43 = vld [vmem:[%s2593_s1 + $0x1b0] sm:$0xff]   ;;  %v2084_v46 = vld [vmem:[%s2593_s1 + $0x178] sm:$0xff]   ;;  %v1608_v58 = vcombine.low %v85_v41, %v89_v42  ;;  %v1582_v27 = vcombine.low %v56_v16, %v60_v17 }
  0x26   :  { %1086 = vmatprep.mubr.bf16.mxu1 %v1571_v49  ;;  %1898 = vmatprep.subr.bf16.mxu0 %v2060_v50  ;;  %v1602_v49 = vcombine.low %v78_v29, %v82_v30  ;;  %v1609_v50 = vcombine.high %v85_v41, %v89_v42  ;;  %v71_v30 = vld [vmem:[%s2594_s0 + $0x110] sm:$0xff]  ;;  %v84_v41 = vld [vmem:[%s2594_s0 + $0x178] sm:$0xff] }
  0x27   :  { %1962 = vmatprep.subr.bf16.mxu1 %v2062_v54  ;;  %v93_v54 = vld [vmem:[%s2594_s0 + $0x1c0] sm:$0xff] }
  0x28   :  { %1899 = vmatpush3.bf16.msra.mxu0 %v2061_v52  ;;  %v1611_v52 = vcombine.high %v86_v44, %v90_v45 }
  0x29   :  { %1963 = vmatpush3.bf16.msra.mxu1 %v2063_v55  ;;  %1900 = vmatprep.subr.bf16.mxu0 %v2064_v62  ;;  %v97_v55 = vld [vmem:[%s2594_s0 + $0x1e0] sm:$0xff]  ;;  %v39_v62 = vld [vmem:[%s2594_s0 + $0x10] sm:$0xff] }
  0x2a   :  { %1964 = vmatprep.subr.bf16.mxu1 %v2066_v0  ;;  %v40_v0 = vld [vmem:[%s2594_s0 + $0x18] sm:$0xff] }
  0x2b   :  { %990 = vmatmul.mubr.bf16.gmra.mrb[4].mxu0 %v1568_v51  ;;  %v2086_v51 = vld [vmem:[%s2593_s1 + $0x1f8] sm:$0xff]  }
  0x2c   :  { %1087 = vmatmul.mubr.bf16.gmra.mrb[4].mxu1 %v1570_v53  ;;  %997 = vmatprep.mubr.bf16.mxu0 %v1577_v60  ;;  %v2087_v53 = vld [vmem:[%s2593_s1 + $0x1b8] sm:$0xff]   ;;  %v1617_v60 = vcombine.high %v93_v54, %v97_v55 }
  0x2d   :  { %1094 = vmatprep.mubr.bf16.mxu1 %v1579_v61  ;;  %1901 = vmatpush3.bf16.msra.mxu0 %v2065_v63  ;;  %v1619_v61 = vcombine.high %v94_v56, %v98_v57  ;;  %v43_v63 = vld [vmem:[%s2594_s0 + $0x30] sm:$0xff]  ;;  %v96_v56 = vld [vmem:[%s2594_s0 + $0x1d8] sm:$0xff] }
  0x2e   :  { %1965 = vmatpush3.bf16.msra.mxu1 %v2067_v1  ;;  %1902 = vmatprep.subr.bf16.mxu0 %v2068_v10  ;;  %v44_v1 = vld [vmem:[%s2594_s0 + $0x38] sm:$0xff]  ;;  %v1565_v4 = vcombine.high %v39_v62, %v43_v63  ;;  %v1564_v10 = vcombine.low %v39_v62, %v43_v63 }
  0x2f   :  { %1966 = vmatprep.subr.bf16.mxu1 %v2070_v12  ;;  %v1567_v5 = vcombine.high %v40_v0, %v44_v1  ;;  %v100_v57 = vld [vmem:[%s2594_s0 + $0x1f8] sm:$0xff] }
  0x30   :  { %v1622_v63 = vcombine.low %v96_v56, %v100_v57 }
  0x31   :  { %1903 = vmatpush3.bf16.msra.mxu0 %v2069_v11  ;;  %v1566_v11 = vcombine.low %v40_v0, %v44_v1 }
  0x32   :  { %1967 = vmatpush3.bf16.msra.mxu1 %v2071_v13  ;;  %1904 = vmatprep.subr.bf16.mxu0 %v2072_v18 }
  0x33   :  { %998 = vmatmul.mubr.bf16.gmra.mrb[8].mxu0 %v1576_v2  ;;  %1968 = vmatprep.subr.bf16.mxu1 %v2074_v23  ;;  %v1616_v2 = vcombine.low %v93_v54, %v97_v55  ;;  %v67_v23 = vld [vmem:[%s2594_s0 + $0xf0] sm:$0xff] }
  0x34   :  { %1095 = vmatmul.mubr.bf16.gmra.mrb[8].mxu1 %v1578_v6  ;;  %1005 = vmatprep.mubr.bf16.mxu0 %v1585_v7  ;;  %v47_v6 = vld [vmem:[%s2594_s0 + $0x50] sm:$0xff] }
  0x35   :  { %1102 = vmatprep.mubr.bf16.mxu1 %v1587_v9  ;;  %1905 = vmatpush3.bf16.msra.mxu0 %v2073_v20  ;;  %v51_v7 = vld [vmem:[%s2594_s0 + $0x70] sm:$0xff]  ;;  %v52_v9 = vld [vmem:[%s2594_s0 + $0x78] sm:$0xff]  ;;  %v1581_v20 = vcombine.high %v55_v14, %v59_v15 }
  0x36   :  { %1969 = vmatpush3.bf16.msra.mxu1 %v2075_v25  ;;  %1906 = vmatprep.subr.bf16.mxu0 %v2076_v28  ;;  %v1573_v12 = vcombine.high %v47_v6, %v51_v7  ;;  %v1575_v13 = vcombine.high %v48_v8, %v52_v9  ;;  %v1572_v18 = vcombine.low %v47_v6, %v51_v7  ;;  %v68_v25 = vld [vmem:[%s2594_s0 + $0xf8] sm:$0xff]  ;;  %v95_v54 = vld [vmem:[%s2594_s0 + $0x1d0] sm:$0xff] }
  0x37   :  { %1970 = vmatprep.subr.bf16.mxu1 %v2078_v32  ;;  %v72_v32 = vld [vmem:[%s2594_s0 + $0x118] sm:$0xff]  ;;  %v99_v55 = vld [vmem:[%s2594_s0 + $0x1f0] sm:$0xff] }
  0x38   :  { %v1620_v62 = vcombine.low %v95_v54, %v99_v55 }
  0x39   :  { %1907 = vmatpush3.bf16.msra.mxu0 %v2077_v31  ;;  %v75_v31 = vld [vmem:[%s2594_s0 + $0x130] sm:$0xff] }
  0x3a   :  { %1971 = vmatpush3.bf16.msra.mxu1 %v2079_v33  ;;  %1908 = vmatprep.subr.bf16.mxu0 %v2080_v38  ;;  %v76_v33 = vld [vmem:[%s2594_s0 + $0x138] sm:$0xff]  ;;  %v79_v38 = vld [vmem:[%s2594_s0 + $0x150] sm:$0xff]  ;;  %v1596_v42 = vcombine.low %v71_v30, %v75_v31 }
  0x3b   :  { %1006 = vmatmul.mubr.bf16.gmra.mrb[12].mxu0 %v1584_v19  ;;  %1972 = vmatprep.subr.bf16.mxu1 %v2082_v40  ;;  %v1574_v19 = vcombine.low %v48_v8, %v52_v9  ;;  %v80_v40 = vld [vmem:[%s2594_s0 + $0x158] sm:$0xff] }
  0x3c   :  { %1103 = vmatmul.mubr.bf16.gmra.mrb[12].mxu1 %v1586_v21  ;;  %1013 = vmatprep.mubr.bf16.mxu0 %v1593_v22  ;;  %v1583_v21 = vcombine.high %v56_v16, %v60_v17  ;;  %v63_v22 = vld [vmem:[%s2594_s0 + $0xd0] sm:$0xff]  ;;  %v1607_v45 = vcombine.high %v80_v40, %v84_v41 }
  0x3d   :  { %1110 = vmatprep.mubr.bf16.mxu1 %v1595_v24  ;;  %1909 = vmatpush3.bf16.msra.mxu0 %v2081_v39  ;;  %v64_v24 = vld [vmem:[%s2594_s0 + $0xd8] sm:$0xff]  ;;  %v1589_v28 = vcombine.high %v63_v22, %v67_v23  ;;  %v83_v39 = vld [vmem:[%s2594_s0 + $0x170] sm:$0xff] }
  0x3e   :  { %1973 = vmatpush3.bf16.msra.mxu1 %v2083_v43  ;;  %1910 = vmatprep.subr.bf16.mxu0 %v2084_v46  ;;  %v1591_v29 = vcombine.high %v64_v24, %v68_v25  ;;  %v1598_v43 = vcombine.low %v72_v32, %v76_v33  ;;  %v1605_v44 = vcombine.high %v79_v38, %v83_v39  ;;  %v87_v46 = vld [vmem:[%s2594_s0 + $0x190] sm:$0xff] }
  0x3f   :  { %1974 = vmatprep.subr.bf16.mxu1 %v2086_v51  ;;  %v1606_v51 = vcombine.low %v80_v40, %v84_v41 }
  0x41   :  { %1911 = vmatpush3.bf16.msra.mxu0 %v2085_v48  ;;  %v88_v48 = vld [vmem:[%s2594_s0 + $0x198] sm:$0xff] }
  0x42   :  { %1975 = vmatpush3.bf16.msra.mxu1 %v2087_v53 }
  0x43   :  { %1014 = vmatmul.mubr.bf16.gmra.mrb[16].mxu0 %v1592_v34  ;;  %v1588_v34 = vcombine.low %v63_v22, %v67_v23 }
  0x44   :  { %1111 = vmatmul.mubr.bf16.gmra.mrb[16].mxu1 %v1594_v35  ;;  %1021 = vmatprep.mubr.bf16.mxu0 %v1601_v36  ;;  %v1590_v35 = vcombine.low %v64_v24, %v68_v25  ;;  %v1597_v36 = vcombine.high %v71_v30, %v75_v31 }
  0x45   :  { %1118 = vmatprep.mubr.bf16.mxu1 %v1603_v37  ;;  %v1599_v37 = vcombine.high %v72_v32, %v76_v33 }
  0x4b   :  { %1022 = vmatmul.mubr.bf16.gmra.mrb[20].mxu0 %v1600_v47  ;;  %v91_v47 = vld [vmem:[%s2594_s0 + $0x1b0] sm:$0xff] }
  0x4c   :  { %1119 = vmatmul.mubr.bf16.gmra.mrb[20].mxu1 %v1602_v49  ;;  %1029 = vmatprep.mubr.bf16.mxu0 %v1609_v50  ;;  %v92_v49 = vld [vmem:[%s2594_s0 + $0x1b8] sm:$0xff]  ;;  %v1604_v50 = vcombine.low %v79_v38, %v83_v39 }
  0x4d   :  { %1126 = vmatprep.mubr.bf16.mxu1 %v1611_v52  ;;  %v1613_v52 = vcombine.high %v87_v46, %v91_v47  ;;  %v1615_v53 = vcombine.high %v88_v48, %v92_v49 }
  0x53   :  { %1030 = vmatmul.mubr.bf16.gmra.mrb[24].mxu0 %v1608_v58  ;;  %v1612_v58 = vcombine.low %v87_v46, %v91_v47 }
  0x54   :  { %1127 = vmatmul.mubr.bf16.gmra.mrb[24].mxu1 %v1610_v59  ;;  %1037 = vmatprep.mubr.bf16.mxu0 %v1617_v60  ;;  %v1614_v59 = vcombine.low %v88_v48, %v92_v49  ;;  %v1621_v60 = vcombine.high %v95_v54, %v99_v55 }
  0x55   :  { %1134 = vmatprep.mubr.bf16.mxu1 %v1619_v61  ;;  %v1623_v61 = vcombine.high %v96_v56, %v100_v57 }
  0x5b   :  { %1038 = vmatmul.mubr.bf16.gmra.mrb[28].mxu0 %v1616_v2 }
  0x5c   :  { %1135 = vmatmul.mubr.bf16.gmra.mrb[28].mxu1 %v1618_v3  ;;  %1175 = vmatprep.mubr.bf16.mxu0 %v1565_v4 }
  0x5d   :  { %1272 = vmatprep.mubr.bf16.mxu1 %v1567_v5 }
  0x63   :  { %1176 = vmatmul.mubr.bf16.vlgmr.msra.gmra.mrb[32].mxu0 %v1564_v10 }
  0x64   :  { %1273 = vmatmul.mubr.bf16.vlgmr.msra.gmra.mrb[32].mxu1 %v1566_v11  ;;  %1183 = vmatprep.mubr.bf16.mxu0 %v1573_v12 }
  0x65   :  { %1280 = vmatprep.mubr.bf16.mxu1 %v1575_v13 }
  0x6b   :  { %1184 = vmatmul.mubr.bf16.gmra.mrb[36].mxu0 %v1572_v18 }
  0x6c   :  { %1281 = vmatmul.mubr.bf16.gmra.mrb[36].mxu1 %v1574_v19  ;;  %1191 = vmatprep.mubr.bf16.mxu0 %v1581_v20 }
  0x6d   :  { %1288 = vmatprep.mubr.bf16.mxu1 %v1583_v21 }
  0x73   :  { %1192 = vmatmul.mubr.bf16.gmra.mrb[40].mxu0 %v1580_v26 }
  0x74   :  { %1289 = vmatmul.mubr.bf16.gmra.mrb[40].mxu1 %v1582_v27  ;;  %1199 = vmatprep.mubr.bf16.mxu0 %v1589_v28 }
  0x75   :  { %1296 = vmatprep.mubr.bf16.mxu1 %v1591_v29 }
  0x7b   :  { %1200 = vmatmul.mubr.bf16.gmra.mrb[44].mxu0 %v1588_v34 }
  0x7c   :  { %1297 = vmatmul.mubr.bf16.gmra.mrb[44].mxu1 %v1590_v35  ;;  %1207 = vmatprep.mubr.bf16.mxu0 %v1597_v36 }
  0x7d   :  { %1304 = vmatprep.mubr.bf16.mxu1 %v1599_v37 }
  0x83   :  { %1208 = vmatmul.mubr.bf16.gmra.mrb[48].mxu0 %v1596_v42 }
  0x84   :  { %1305 = vmatmul.mubr.bf16.gmra.mrb[48].mxu1 %v1598_v43  ;;  %1215 = vmatprep.mubr.bf16.mxu0 %v1605_v44 }
  0x85   :  { %1312 = vmatprep.mubr.bf16.mxu1 %v1607_v45 }
  0x8b   :  { %1216 = vmatmul.mubr.bf16.gmra.mrb[52].mxu0 %v1604_v50 }
  0x8c   :  { %1313 = vmatmul.mubr.bf16.gmra.mrb[52].mxu1 %v1606_v51  ;;  %1223 = vmatprep.mubr.bf16.mxu0 %v1613_v52 }
  0x8d   :  { %1320 = vmatprep.mubr.bf16.mxu1 %v1615_v53 }
  0x93   :  { %1224 = vmatmul.mubr.bf16.gmra.mrb[56].mxu0 %v1612_v58 }
  0x94   :  { %1321 = vmatmul.mubr.bf16.gmra.mrb[56].mxu1 %v1614_v59  ;;  %1231 = vmatprep.mubr.bf16.mxu0 %v1621_v60 }
  0x95   :  { %1328 = vmatprep.mubr.bf16.mxu1 %v1623_v61 }
  0x9b   :  { %1232 = vmatmul.mubr.bf16.gmra.mrb[60].mxu0 %v1620_v62 }
  0x9c   :  { %1329 = vmatmul.mubr.bf16.gmra.mrb[60].mxu1 %v1622_v63 }
  0xf6   :  { %v1784_v0 = vpop.f32.mrb[0].mxu0 }
  0xf7   :  { %v1848_v1 = vpop.f32.mrb[0].mxu1  ;;  %v1785_v2 = vpop.f32.mrb[1].mxu0 }
  0xf8   :  { %v1786_v3 = vadd.f32 %v1785_v2, %v1784_v0  ;;  %v1849_v4 = vpop.f32.mrb[1].mxu1  ;;  %v1787_v5 = vpop.f32.mrb[2].mxu0 }
  0xf9   :  { %v1850_v6 = vadd.f32 %v1849_v4, %v1848_v1  ;;  %v1851_v7 = vpop.f32.mrb[2].mxu1  ;;  %v1788_v8 = vpop.f32.mrb[3].mxu0 }
  0xfa   :  { %v1789_v9 = vadd.f32 %v1788_v8, %v1787_v5  ;;  %v1852_v10 = vpop.f32.mrb[3].mxu1 }
  0xfb   :  { %v2497_v11 = vadd.f32 %v1850_v6, %v1786_v3  ;;  %v1853_v12 = vadd.f32 %v1852_v10, %v1851_v7 }
  0xfd   :  { %v2499_v13 = vadd.f32 %v1853_v12, %v1789_v9 }
  0xfe   :  { %v1790_v14 = vpop.f32.mrb[4].mxu0 }
  0xff   :  { %v1854_v15 = vpop.f32.mrb[4].mxu1  ;;  %v1791_v16 = vpop.f32.mrb[5].mxu0 }
 0x100   :  { %v1792_v17 = vadd.f32 %v1791_v16, %v1790_v14  ;;  %v1855_v18 = vpop.f32.mrb[5].mxu1  ;;  %v1793_v19 = vpop.f32.mrb[6].mxu0 }
 0x101   :  { %v1856_v20 = vadd.f32 %v1855_v18, %v1854_v15  ;;  %v1857_v21 = vpop.f32.mrb[6].mxu1  ;;  %v1794_v22 = vpop.f32.mrb[7].mxu0 }
 0x102   :  { %v1795_v23 = vadd.f32 %v1794_v22, %v1793_v19  ;;  %v1858_v24 = vpop.f32.mrb[7].mxu1 }
 0x103   :  { %v2501_v25 = vadd.f32 %v1856_v20, %v1792_v17  ;;  %v1859_v26 = vadd.f32 %v1858_v24, %v1857_v21 }
 0x105   :  { %v2503_v27 = vadd.f32 %v1859_v26, %v1795_v23 }
 0x106   :  { %v1796_v28 = vpop.f32.mrb[8].mxu0 }
 0x107   :  { %v1860_v29 = vpop.f32.mrb[8].mxu1  ;;  %v1797_v30 = vpop.f32.mrb[9].mxu0 }
 0x108   :  { %v1798_v31 = vadd.f32 %v1797_v30, %v1796_v28  ;;  %v1861_v32 = vpop.f32.mrb[9].mxu1  ;;  %v1799_v33 = vpop.f32.mrb[10].mxu0 }
 0x109   :  { %v1862_v34 = vadd.f32 %v1861_v32, %v1860_v29  ;;  %v1863_v35 = vpop.f32.mrb[10].mxu1  ;;  %v1800_v36 = vpop.f32.mrb[11].mxu0 }
 0x10a   :  { %v1801_v37 = vadd.f32 %v1800_v36, %v1799_v33  ;;  %v1864_v38 = vpop.f32.mrb[11].mxu1 }
 0x10b   :  { %v2505_v39 = vadd.f32 %v1862_v34, %v1798_v31  ;;  %v1865_v40 = vadd.f32 %v1864_v38, %v1863_v35 }
 0x10d   :  { %v2507_v41 = vadd.f32 %v1865_v40, %v1801_v37 }
 0x10e   :  { %v1802_v42 = vpop.f32.mrb[12].mxu0 }
 0x10f   :  { %v1866_v43 = vpop.f32.mrb[12].mxu1  ;;  %v1803_v44 = vpop.f32.mrb[13].mxu0 }
 0x110   :  { %v1804_v45 = vadd.f32 %v1803_v44, %v1802_v42  ;;  %v1867_v46 = vpop.f32.mrb[13].mxu1  ;;  %v1805_v47 = vpop.f32.mrb[14].mxu0 }
 0x111   :  { %v1868_v48 = vadd.f32 %v1867_v46, %v1866_v43  ;;  %v1869_v49 = vpop.f32.mrb[14].mxu1  ;;  %v1806_v50 = vpop.f32.mrb[15].mxu0 }
 0x112   :  { %v1807_v51 = vadd.f32 %v1806_v50, %v1805_v47  ;;  %v1870_v52 = vpop.f32.mrb[15].mxu1 }
 0x113   :  { %v2509_v53 = vadd.f32 %v1868_v48, %v1804_v45  ;;  %v1871_v54 = vadd.f32 %v1870_v52, %v1869_v49 }
 0x115   :  { %v2511_v55 = vadd.f32 %v1871_v54, %v1807_v51 }
 0x116   :  { %v1808_v56 = vpop.f32.mrb[16].mxu0 }
 0x117   :  { %v1872_v57 = vpop.f32.mrb[16].mxu1  ;;  %v1809_v58 = vpop.f32.mrb[17].mxu0 }
 0x118   :  { %v1810_v59 = vadd.f32 %v1809_v58, %v1808_v56  ;;  %v1873_v60 = vpop.f32.mrb[17].mxu1  ;;  %v1811_v61 = vpop.f32.mrb[18].mxu0 }
 0x119   :  { %v1874_v62 = vadd.f32 %v1873_v60, %v1872_v57  ;;  %v1875_v63 = vpop.f32.mrb[18].mxu1  ;;  %v1812_v0 = vpop.f32.mrb[19].mxu0 }
 0x11a   :  { %v1813_v1 = vadd.f32 %v1812_v0, %v1811_v61  ;;  %v1876_v2 = vpop.f32.mrb[19].mxu1 }
 0x11b   :  { %v2513_v3 = vadd.f32 %v1874_v62, %v1810_v59  ;;  %v1877_v4 = vadd.f32 %v1876_v2, %v1875_v63 }
 0x11d   :  { %v2515_v5 = vadd.f32 %v1877_v4, %v1813_v1 }
 0x11e   :  { %v1814_v6 = vpop.f32.mrb[20].mxu0 }
 0x11f   :  { %v1878_v7 = vpop.f32.mrb[20].mxu1  ;;  %v1815_v8 = vpop.f32.mrb[21].mxu0 }
 0x120   :  { %v1816_v9 = vadd.f32 %v1815_v8, %v1814_v6  ;;  %v1879_v10 = vpop.f32.mrb[21].mxu1  ;;  %v1817_v12 = vpop.f32.mrb[22].mxu0  ;;  %v2533_v6 = vld [vmem:[%s2595_s2] ss:$0 sm:$0xff] }
 0x121   :  { %v1880_v14 = vadd.f32 %v1879_v10, %v1878_v7  ;;  %v1881_v15 = vpop.f32.mrb[22].mxu1  ;;  %v1818_v16 = vpop.f32.mrb[23].mxu0 }
 0x122   :  { %v1819_v17 = vadd.f32 %v1818_v16, %v1817_v12  ;;  %v1882_v18 = vpop.f32.mrb[23].mxu1 }
 0x123   :  { %v2517_v19 = vadd.f32 %v1880_v14, %v1816_v9  ;;  %v1883_v20 = vadd.f32 %v1882_v18, %v1881_v15 }
 0x125   :  { %v2519_v21 = vadd.f32 %v1883_v20, %v1819_v17 }
 0x126   :  { %v1820_v22 = vpop.f32.mrb[24].mxu0 }
 0x127   :  { %v1884_v23 = vpop.f32.mrb[24].mxu1  ;;  %v1821_v24 = vpop.f32.mrb[25].mxu0 }
 0x128   :  { %v1822_v26 = vadd.f32 %v1821_v24, %v1820_v22  ;;  %v1885_v28 = vpop.f32.mrb[25].mxu1  ;;  %v1823_v29 = vpop.f32.mrb[26].mxu0 }
 0x129   :  { %v1886_v30 = vadd.f32 %v1885_v28, %v1884_v23  ;;  %v1887_v31 = vpop.f32.mrb[26].mxu1  ;;  %v1824_v32 = vpop.f32.mrb[27].mxu0 }
 0x12a   :  { %v1825_v33 = vadd.f32 %v1824_v32, %v1823_v29  ;;  %v1888_v34 = vpop.f32.mrb[27].mxu1 }
 0x12b   :  { %v2521_v35 = vadd.f32 %v1886_v30, %v1822_v26  ;;  %v1889_v36 = vadd.f32 %v1888_v34, %v1887_v31 }
 0x12d   :  { %v2523_v37 = vadd.f32 %v1889_v36, %v1825_v33 }
 0x12e   :  { %v1826_v38 = vpop.f32.mrb[28].mxu0 }
 0x12f   :  { %v1890_v40 = vpop.f32.mrb[28].mxu1  ;;  %v1827_v42 = vpop.f32.mrb[29].mxu0 }
 0x130   :  { %v1828_v43 = vadd.f32 %v1827_v42, %v1826_v38  ;;  %v1891_v44 = vpop.f32.mrb[29].mxu1  ;;  %v1829_v45 = vpop.f32.mrb[30].mxu0 }
 0x131   :  { %v1892_v46 = vadd.f32 %v1891_v44, %v1890_v40  ;;  %v1893_v47 = vpop.f32.mrb[30].mxu1  ;;  %v1830_v48 = vpop.f32.mrb[31].mxu0 }
 0x132   :  { %v1831_v49 = vadd.f32 %v1830_v48, %v1829_v45  ;;  %v1894_v50 = vpop.f32.mrb[31].mxu1 }
 0x133   :  { %v2525_v51 = vadd.f32 %v1892_v46, %v1828_v43  ;;  %v1895_v52 = vadd.f32 %v1894_v50, %v1893_v47 }
 0x135   :  { %v2527_v54 = vadd.f32 %v1895_v52, %v1831_v49 }
 0x136   :  { %v1912_v56 = vpop.f32.mrb[32].mxu0 }
 0x137   :  { %v1976_v57 = vpop.f32.mrb[32].mxu1  ;;  %v1913_v58 = vpop.f32.mrb[33].mxu0 }
 0x138   :  { %v1914_v59 = vadd.f32 %v1913_v58, %v1912_v56  ;;  %v1977_v60 = vpop.f32.mrb[33].mxu1  ;;  %v1915_v61 = vpop.f32.mrb[34].mxu0 }
 0x139   :  { %v1978_v62 = vadd.f32 %v1977_v60, %v1976_v57  ;;  %v1979_v63 = vpop.f32.mrb[34].mxu1  ;;  %v1916_v0 = vpop.f32.mrb[35].mxu0 }
 0x13a   :  { %v1178_v1 = vadd.f32 %v1914_v59, %v2497_v11  ;;  %v1917_v2 = vadd.f32 %v1916_v0, %v1915_v61  ;;  %v1980_v4 = vpop.f32.mrb[35].mxu1 }
 0x13b   :  { %v1981_v7 = vadd.f32 %v1980_v4, %v1979_v63 }
 0x13c   :  { %v1275_v8 = vadd.f32 %v1978_v62, %v1178_v1  ;;  %v1181_v9 = vadd.f32 %v1917_v2, %v2499_v13 }
 0x13e   :  { %v1395_v10 = vadd.f32 %v2533_v6, %v1275_v8  ;;  %v1278_v12 = vadd.f32 %v1981_v7, %v1181_v9  ;;  %v1918_v14 = vpop.f32.mrb[36].mxu0 }
 0x13f   :  { %v1982_v15 = vpop.f32.mrb[36].mxu1  ;;  %v1919_v16 = vpop.f32.mrb[37].mxu0 }
 0x140   :  { %v1396_v17 = vadd.f32 %v2533_v6, %v1278_v12  ;;  %v1920_v11 = vadd.f32 %v1919_v16, %v1918_v14  ;;  %v1983_v18 = vpop.f32.mrb[37].mxu1  ;;  %v1921_v20 = vpop.f32.mrb[38].mxu0  ;;  %v1512_v22 = vmul.f32 %v1395_v10, %v1395_v10 }
 0x141   :  { %v1984_v23 = vadd.f32 %v1983_v18, %v1982_v15  ;;  %v1985_v24 = vpop.f32.mrb[38].mxu1  ;;  %v1922_v26 = vpop.f32.mrb[39].mxu0 }
 0x142   :  { %v1724_v28 = vpack.c.bf16 %v1396_v17, %v1395_v10  ;;  %v1491_v29 = vadd.f32 %v1396_v17, %v1395_v10  ;;  %v1513_v30 = vmul.f32 %v1396_v17, %v1396_v17  ;;  %v1186_v13 = vadd.f32 %v1920_v11, %v2501_v25  ;;  %v1986_v31 = vpop.f32.mrb[39].mxu1 }
 0x143   :  { %v1923_v32 = vadd.f32 %v1922_v26, %v1921_v20  ;;  %v1987_v33 = vadd.f32 %v1986_v31, %v1985_v24 }
 0x144   :  { %1725 = vst [vmem:[%s2596_s3] sm:$0xff] %v1724_v28   ;;  %v1528_v34 = vadd.f32 %v1513_v30, %v1512_v22  ;;  %v1283_v36 = vadd.f32 %v1984_v23, %v1186_v13 }
 0x145   :  { %v1189_v38 = vadd.f32 %v1923_v32, %v2503_v27 }
 0x146   :  { %v1397_v40 = vadd.f32 %v2533_v6, %v1283_v36  ;;  %v1924_v42 = vpop.f32.mrb[40].mxu0 }
 0x147   :  { %v1286_v43 = vadd.f32 %v1987_v33, %v1189_v38  ;;  %v1988_v44 = vpop.f32.mrb[40].mxu1  ;;  %v1925_v45 = vpop.f32.mrb[41].mxu0 }
 0x148   :  { %v1492_v46 = vadd.f32 %v1491_v29, %v1397_v40  ;;  %v1514_v47 = vmul.f32 %v1397_v40, %v1397_v40  ;;  %v1926_v25 = vadd.f32 %v1925_v45, %v1924_v42  ;;  %v1989_v48 = vpop.f32.mrb[41].mxu1  ;;  %v1927_v49 = vpop.f32.mrb[42].mxu0 }
 0x149   :  { %v1398_v50 = vadd.f32 %v2533_v6, %v1286_v43  ;;  %v1990_v52 = vadd.f32 %v1989_v48, %v1988_v44  ;;  %v1991_v56 = vpop.f32.mrb[42].mxu1  ;;  %v1928_v57 = vpop.f32.mrb[43].mxu0 }
 0x14a   :  { %v1529_v58 = vadd.f32 %v1528_v34, %v1514_v47  ;;  %v1194_v59 = vadd.f32 %v1926_v25, %v2505_v39  ;;  %v1929_v27 = vadd.f32 %v1928_v57, %v1927_v49  ;;  %v1992_v60 = vpop.f32.mrb[43].mxu1 }
 0x14b   :  { %v1729_v61 = vpack.c.bf16 %v1398_v50, %v1397_v40  ;;  %v1493_v62 = vadd.f32 %v1492_v46, %v1398_v50  ;;  %v1515_v63 = vmul.f32 %v1398_v50, %v1398_v50  ;;  %v1993_v0 = vadd.f32 %v1992_v60, %v1991_v56 }
 0x14c   :  { %v1291_v1 = vadd.f32 %v1990_v52, %v1194_v59  ;;  %v1197_v2 = vadd.f32 %v1929_v27, %v2507_v41 }
 0x14d   :  { %1761 = vst [vmem:[%s2596_s3 + $0x8] sm:$0xff] %v1729_v61   ;;  %v1530_v4 = vadd.f32 %v1529_v58, %v1515_v63 }
 0x14e   :  { %v1399_v7 = vadd.f32 %v2533_v6, %v1291_v1  ;;  %v1294_v8 = vadd.f32 %v1993_v0, %v1197_v2  ;;  %v1930_v9 = vpop.f32.mrb[44].mxu0 }
 0x14f   :  { %v1994_v10 = vpop.f32.mrb[44].mxu1  ;;  %v1931_v39 = vpop.f32.mrb[45].mxu0 }
 0x150   :  { %v1494_v12 = vadd.f32 %v1493_v62, %v1399_v7  ;;  %v1516_v14 = vmul.f32 %v1399_v7, %v1399_v7  ;;  %v1400_v15 = vadd.f32 %v2533_v6, %v1294_v8  ;;  %v1932_v16 = vadd.f32 %v1931_v39, %v1930_v9  ;;  %v1995_v17 = vpop.f32.mrb[45].mxu1  ;;  %v1933_v11 = vpop.f32.mrb[46].mxu0 }
 0x151   :  { %v1996_v18 = vadd.f32 %v1995_v17, %v1994_v10  ;;  %v1997_v41 = vpop.f32.mrb[46].mxu1  ;;  %v1934_v20 = vpop.f32.mrb[47].mxu0 }
 0x152   :  { %v1531_v22 = vadd.f32 %v1530_v4, %v1516_v14  ;;  %v1734_v23 = vpack.c.bf16 %v1400_v15, %v1399_v7  ;;  %v1495_v24 = vadd.f32 %v1494_v12, %v1400_v15  ;;  %v1517_v26 = vmul.f32 %v1400_v15, %v1400_v15  ;;  %v1998_v28 = vpop.f32.mrb[47].mxu1 }
 0x153   :  { %v1202_v29 = vadd.f32 %v1932_v16, %v2509_v53  ;;  %v1935_v30 = vadd.f32 %v1934_v20, %v1933_v11  ;;  %v1999_v13 = vadd.f32 %v1998_v28, %v1997_v41 }
 0x154   :  { %1762 = vst [vmem:[%s2596_s3 + $0x10] sm:$0xff] %v1734_v23   ;;  %v1532_v31 = vadd.f32 %v1531_v22, %v1517_v26 }
 0x155   :  { %v1299_v32 = vadd.f32 %v1996_v18, %v1202_v29  ;;  %v1205_v33 = vadd.f32 %v1935_v30, %v2511_v55 }
 0x156   :  { %v1936_v34 = vpop.f32.mrb[48].mxu0 }
 0x157   :  { %v1401_v36 = vadd.f32 %v2533_v6, %v1299_v32  ;;  %v1302_v38 = vadd.f32 %v1999_v13, %v1205_v33  ;;  %v2000_v40 = vpop.f32.mrb[48].mxu1  ;;  %v1937_v42 = vpop.f32.mrb[49].mxu0 }
 0x158   :  { %v1938_v43 = vadd.f32 %v1937_v42, %v1936_v34  ;;  %v2001_v44 = vpop.f32.mrb[49].mxu1  ;;  %v1939_v45 = vpop.f32.mrb[50].mxu0 }
 0x159   :  { %v1496_v53 = vadd.f32 %v1495_v24, %v1401_v36  ;;  %v1518_v46 = vmul.f32 %v1401_v36, %v1401_v36  ;;  %v1402_v47 = vadd.f32 %v2533_v6, %v1302_v38  ;;  %v2002_v25 = vadd.f32 %v2001_v44, %v2000_v40  ;;  %v2003_v48 = vpop.f32.mrb[50].mxu1  ;;  %v1940_v49 = vpop.f32.mrb[51].mxu0 }
 0x15a   :  { %v1210_v50 = vadd.f32 %v1938_v43, %v2513_v3  ;;  %v1941_v52 = vadd.f32 %v1940_v49, %v1939_v45  ;;  %v2004_v55 = vpop.f32.mrb[51].mxu1 }
 0x15b   :  { %v1533_v56 = vadd.f32 %v1532_v31, %v1518_v46  ;;  %v1739_v57 = vpack.c.bf16 %v1402_v47, %v1401_v36  ;;  %v1497_v58 = vadd.f32 %v1496_v53, %v1402_v47  ;;  %v1519_v59 = vmul.f32 %v1402_v47, %v1402_v47 }
 0x15c   :  { %v1307_v27 = vadd.f32 %v2002_v25, %v1210_v50  ;;  %v1213_v60 = vadd.f32 %v1941_v52, %v2515_v5  ;;  %v2005_v61 = vadd.f32 %v2004_v55, %v2003_v48 }
 0x15d   :  { %1763 = vst [vmem:[%s2596_s3 + $0x18] sm:$0xff] %v1739_v57   ;;  %v1534_v62 = vadd.f32 %v1533_v56, %v1519_v59 }
 0x15e   :  { %v1403_v63 = vadd.f32 %v2533_v6, %v1307_v27  ;;  %v1310_v0 = vadd.f32 %v2005_v61, %v1213_v60  ;;  %v1942_v1 = vpop.f32.mrb[52].mxu0 }
 0x15f   :  { %v2006_v3 = vpop.f32.mrb[52].mxu1  ;;  %v1943_v2 = vpop.f32.mrb[53].mxu0 }
 0x160   :  { %v1498_v4 = vadd.f32 %v1497_v58, %v1403_v63  ;;  %v1520_v7 = vmul.f32 %v1403_v63, %v1403_v63  ;;  %v1404_v8 = vadd.f32 %v2533_v6, %v1310_v0  ;;  %v1944_v9 = vadd.f32 %v1943_v2, %v1942_v1  ;;  %v2007_v10 = vpop.f32.mrb[53].mxu1  ;;  %v1945_v39 = vpop.f32.mrb[54].mxu0 }
 0x161   :  { %v2008_v5 = vadd.f32 %v2007_v10, %v2006_v3  ;;  %v2009_v12 = vpop.f32.mrb[54].mxu1  ;;  %v1946_v14 = vpop.f32.mrb[55].mxu0 }
 0x162   :  { %v1535_v15 = vadd.f32 %v1534_v62, %v1520_v7  ;;  %v1744_v16 = vpack.c.bf16 %v1404_v8, %v1403_v63  ;;  %v1499_v17 = vadd.f32 %v1498_v4, %v1404_v8  ;;  %v1521_v11 = vmul.f32 %v1404_v8, %v1404_v8  ;;  %v2010_v18 = vpop.f32.mrb[55].mxu1 }
 0x163   :  { %v1218_v41 = vadd.f32 %v1944_v9, %v2517_v19  ;;  %v1947_v20 = vadd.f32 %v1946_v14, %v1945_v39  ;;  %v2011_v22 = vadd.f32 %v2010_v18, %v2009_v12 }
 0x164   :  { %1764 = vst [vmem:[%s2596_s3 + $0x20] sm:$0xff] %v1744_v16   ;;  %v1536_v23 = vadd.f32 %v1535_v15, %v1521_v11 }
 0x165   :  { %v1315_v24 = vadd.f32 %v2008_v5, %v1218_v41  ;;  %v1221_v26 = vadd.f32 %v1947_v20, %v2519_v21 }
 0x166   :  { %v1948_v28 = vpop.f32.mrb[56].mxu0 }
 0x167   :  { %v1405_v29 = vadd.f32 %v2533_v6, %v1315_v24  ;;  %v1318_v30 = vadd.f32 %v2011_v22, %v1221_v26  ;;  %v2012_v13 = vpop.f32.mrb[56].mxu1  ;;  %v1949_v31 = vpop.f32.mrb[57].mxu0 }
 0x168   :  { %v1950_v32 = vadd.f32 %v1949_v31, %v1948_v28  ;;  %v2013_v33 = vpop.f32.mrb[57].mxu1  ;;  %v1951_v34 = vpop.f32.mrb[58].mxu0 }
 0x169   :  { %v1500_v19 = vadd.f32 %v1499_v17, %v1405_v29  ;;  %v1522_v36 = vmul.f32 %v1405_v29, %v1405_v29  ;;  %v1406_v38 = vadd.f32 %v2533_v6, %v1318_v30  ;;  %v2014_v40 = vadd.f32 %v2013_v33, %v2012_v13  ;;  %v2015_v42 = vpop.f32.mrb[58].mxu1  ;;  %v1952_v43 = vpop.f32.mrb[59].mxu0 }
 0x16a   :  { %v1226_v44 = vadd.f32 %v1950_v32, %v2521_v35  ;;  %v1953_v45 = vadd.f32 %v1952_v43, %v1951_v34  ;;  %v2016_v21 = vpop.f32.mrb[59].mxu1 }
 0x16b   :  { %v1537_v53 = vadd.f32 %v1536_v23, %v1522_v36  ;;  %v1749_v46 = vpack.c.bf16 %v1406_v38, %v1405_v29  ;;  %v1501_v47 = vadd.f32 %v1500_v19, %v1406_v38  ;;  %v1523_v25 = vmul.f32 %v1406_v38, %v1406_v38 }
 0x16c   :  { %v1323_v48 = vadd.f32 %v2014_v40, %v1226_v44  ;;  %v1229_v49 = vadd.f32 %v1953_v45, %v2523_v37  ;;  %v2017_v50 = vadd.f32 %v2016_v21, %v2015_v42 }
 0x16d   :  { %1765 = vst [vmem:[%s2596_s3 + $0x28] sm:$0xff] %v1749_v46   ;;  %v1538_v52 = vadd.f32 %v1537_v53, %v1523_v25 }
 0x16e   :  { %v1407_v55 = vadd.f32 %v2533_v6, %v1323_v48  ;;  %v1326_v56 = vadd.f32 %v2017_v50, %v1229_v49  ;;  %v1954_v57 = vpop.f32.mrb[60].mxu0 }
 0x16f   :  { %v2018_v35 = vpop.f32.mrb[60].mxu1  ;;  %v1955_v58 = vpop.f32.mrb[61].mxu0 }
 0x170   :  { %v1502_v59 = vadd.f32 %v1501_v47, %v1407_v55  ;;  %v1524_v27 = vmul.f32 %v1407_v55, %v1407_v55  ;;  %v1408_v60 = vadd.f32 %v2533_v6, %v1326_v56  ;;  %v1956_v61 = vadd.f32 %v1955_v58, %v1954_v57  ;;  %v2019_v62 = vpop.f32.mrb[61].mxu1  ;;  %v1957_v63 = vpop.f32.mrb[62].mxu0 }
 0x171   :  { %v2020_v37 = vadd.f32 %v2019_v62, %v2018_v35  ;;  %v2021_v0 = vpop.f32.mrb[62].mxu1  ;;  %v1958_v1 = vpop.f32.mrb[63].mxu0 }
 0x172   :  { %v1539_v3 = vadd.f32 %v1538_v52, %v1524_v27  ;;  %v1754_v2 = vpack.c.bf16 %v1408_v60, %v1407_v55  ;;  %v1503_v4 = vadd.f32 %v1502_v59, %v1408_v60  ;;  %v1525_v7 = vmul.f32 %v1408_v60, %v1408_v60  ;;  %v2022_v8 = vpop.f32.mrb[63].mxu1 }
 0x173   :  { %v1234_v9 = vadd.f32 %v1956_v61, %v2525_v51  ;;  %v1959_v10 = vadd.f32 %v1958_v1, %v1957_v63  ;;  %v2023_v39 = vadd.f32 %v2022_v8, %v2021_v0 }
 0x174   :  { %1766 = vst [vmem:[%s2596_s3 + $0x30] sm:$0xff] %v1754_v2   ;;  %v1540_v5 = vadd.f32 %v1539_v3, %v1525_v7 }
 0x175   :  { %v1331_v12 = vadd.f32 %v2020_v37, %v1234_v9  ;;  %v1237_v14 = vadd.f32 %v1959_v10, %v2527_v54 }
 0x177   :  { %v1409_v15 = vadd.f32 %v2533_v6, %v1331_v12  ;;  %v1334_v16 = vadd.f32 %v2023_v39, %v1237_v14 }
 0x179   :  { %v1504_v17 = vadd.f32 %v1503_v4, %v1409_v15  ;;  %v1526_v11 = vmul.f32 %v1409_v15, %v1409_v15  ;;  %v1410_v18 = vadd.f32 %v2533_v6, %v1334_v16 }
 0x17b   :  { %v1541_v41 = vadd.f32 %v1540_v5, %v1526_v11  ;;  %v1759_v20 = vpack.c.bf16 %v1410_v18, %v1409_v15  ;;  %v1505_v51 = vadd.f32 %v1504_v17, %v1410_v18  ;;  %v1527_v22 = vmul.f32 %v1410_v18, %v1410_v18 }
 0x17d   :  { %1767 = vst [vmem:[%s2596_s3 + $0x38] sm:$0xff] %v1759_v20   ;;  %v1506_v23 = vrot.slane %v1505_v51, 4  ;;  %v1542_v24 = vadd.f32 %v1541_v41, %v1527_v22 }
 0x17f   :  { %v1507_v26 = vadd.f32 %v1506_v23, %v1505_v51  ;;  %v1543_v28 = vrot.slane %v1542_v24, 4 }
 0x181   :  { %v1508_v54 = vrot.slane %v1507_v26, 2  ;;  %v1544_v29 = vadd.f32 %v1543_v28, %v1542_v24 }
 0x183   :  { %v1509_v30 = vadd.f32 %v1508_v54, %v1507_v26  ;;  %v1545_v13 = vrot.slane %v1544_v29, 2 }
 0x185   :  { %v1510_v31 = vrot.slane %v1509_v30, 1  ;;  %v1546_v32 = vadd.f32 %v1545_v13, %v1544_v29 }
 0x187   :  { %v1547_v33 = vrot.slane %v1546_v32, 1  ;;  %v1511_v6 = vadd.f32 %v1510_v31, %v1509_v30 }
 0x189   :  { %v1548_v34 = vadd.f32 %v1547_v33, %v1546_v32 }
 0x18b   :  { %v1550_v19 = vsel %vm1549_vm0, %v1511_v6, %v1548_v34 }
 0x18c   :  { %1551 = vst [vmem:[%s2597_s4] sm:$0x3] %v1550_v19 }

// kernel: tile.33
= control target key start
LH: loop header
LB: loop body
LE: loop exit
PB: predicated region body
PF: predicated region fallthrough
CT: control target
= control target key end

     0   :  { %s28_s0 = inlined_call_operand.vmem [shape: f32[128], index: 0, kind: input, shape index: {}]   ;;  %s29_s1 = inlined_call_operand.vmem [shape: f32[16,128], index: 1, kind: output, shape index: {}]  }
   0x1   :  { %v4_v0 = vld [vmem:[%s28_s0] ss:$0 sm:$0xff] }
   0x2   :  { %5 = vst [vmem:[%s29_s1] sm:$0xff] %v4_v0  ;;  %8 = vst [vmem:[%s29_s1 + $0x8] sm:$0xff] %v4_v0 }

// kernel: discriminator_forward.7
= control target key start
LH: loop header
LB: loop body
LE: loop exit
PB: predicated region body
PF: predicated region fallthrough
CT: control target
= control target key end

     0   :  { %s4433_s21 = smov 0   ;;  %s4435_s22 = smov 0   ;;  %s5598_s0 = inlined_call_operand.vmem [shape: bf16[32,2048], index: 0, kind: input, shape index: {}]   ;;  %s5599_s1 = inlined_call_operand.vmem [shape: bf16[2048,256], index: 1, kind: input, shape index: {}]   ;;  %s5600_s2 = inlined_call_operand.vmem [shape: f32[1,256], index: 2, kind: input, shape index: {}]   ;;  %s5601_s3 = inlined_call_operand.vmem [shape: f32[1,2048], index: 3, kind: input, shape index: {}]   ;;  %s5602_s4 = inlined_call_operand.vmem [shape: f32[1,2048], index: 4, kind: input, shape index: {}]   ;;  %s5603_s5 = inlined_call_operand.vmem [shape: bf16[32,256], index: 5, kind: output, shape index: {0}]   ;;  %s5604_s6 = inlined_call_operand.vmem [shape: f32[1,2,256], index: 6, kind: output, shape index: {1}]  }
   0x1   :  { %s4437_s23 = smov 0   ;;  %s4439_s24 = smov 0  }
   0x2   :  { %s4441_s25 = smov 0  }
   0x3 LB: > { %s32_s26 = sadd.s32 1, %s4392_s24  ;;  %s3801_s27 = sadd.s32 4294967295, %s4396_s25   ;;  %s4396_s25 = sphi %s4441_s25, %s17_s25   ;;  %s4392_s24 = sphi %s4439_s24, %s5609_s24   ;;  %s4388_s23 = sphi %s4437_s23, %s5608_s23   ;;  %s4384_s22 = sphi %s4435_s22, %s5607_s22   ;;  %s4380_s21 = sphi %s4433_s21, %s5606_s21  }
   0x4   : > { %p34_p0 = scmp.ge.s32.totalorder %s32_s26, 2  ;;  %p80_p1 = scmp.ne.s32.totalorder %s4384_s22, %s4380_s21 }
   0x5   : > { %p81_p2 = scmp.eq.s32.totalorder %s4396_s25, 0  ;;  %p190_p4 = scmp.eq.s32.totalorder %s3801_s27, 1 }
   0x6   : > { %s5611_s26 = smov (%p34_p0, %s32_s26), 0  ;;  %s73_s29 = sadd.s32 1, %s4384_s22 }
   0x7   : > { %p82_p3 = por %p81_p2, %p80_p1  ;;  %s69_s28 = ssub.s32 %s4392_s24, %s5611_s26 }
   0x8   : > { %p71_p5 = scmp.eq.s32.totalorder %s69_s28, 0  ;;  %p4468_p6 = por %p190_p4, %p80_p1 }
   0x9   : > { %p3807_p7 = scmp.ge.s32.totalorder %s4396_s25, 2 }
   0xa   : > { %s4473_s7 = scalar_select %p71_p5, %s4384_s22, %s73_s29  }
   0xb   : > { %271 = sbr.rel (%p3807_p7) target bundleno = 192 (0xc0), region = 28 }
  0x12   : > { %274 = sbr.rel (!%p82_p3) target bundleno = 192 (0xc0), region = 32  ;;  %s276_s8 = sand.u32 (%p82_p3), 1, %s4384_s22  }
  0x13   : > { %s3809_s9 = sshll.u32 (%p82_p3), %s4392_s24, 2  ;;  %s3808_s10 = sshll.u32 (%p82_p3), %s276_s8, 10 }
  0x14   : > { %s4481_s13 = scalar_lea.vmem (%p82_p3), %s5599_s1, %s3809_s9  ;;  %s4485_s14 = scalar_lea.vmem (%p82_p3), [#allocation3], %s3808_s10 }
  0x15   : > { %v299_v0 = vld [vmem:[%s4481_s13] sm:$0xf] (%p82_p3)  ;;  %v301_v1 = vld [vmem:[%s4481_s13 + $0x8] sm:$0xf] (%p82_p3)  ;;  %v303_v2 = vld [vmem:[%s4481_s13 + $0x10] sm:$0xf] (%p82_p3) }
  0x16   : > { %300 = vst [vmem:[%s4485_s14] sm:$0xf] (%p82_p3), %v299_v0  ;;  %302 = vst [vmem:[%s4485_s14 + $0x4] sm:$0xf] (%p82_p3), %v301_v1  ;;  %v305_v3 = vld [vmem:[%s4481_s13 + $0x18] sm:$0xf] (%p82_p3) }
  0x17   : > { %v307_v4 = vld [vmem:[%s4481_s13 + $0x20] sm:$0xf] (%p82_p3)  ;;  %304 = vst [vmem:[%s4485_s14 + $0x8] sm:$0xf] (%p82_p3), %v303_v2  ;;  %306 = vst [vmem:[%s4485_s14 + $0xc] sm:$0xf] (%p82_p3), %v305_v3 }
  0x18   : > { %308 = vst [vmem:[%s4485_s14 + $0x10] sm:$0xf] (%p82_p3), %v307_v4  ;;  %v309_v5 = vld [vmem:[%s4481_s13 + $0x28] sm:$0xf] (%p82_p3)  ;;  %v311_v6 = vld [vmem:[%s4481_s13 + $0x30] sm:$0xf] (%p82_p3) }
  0x19   : > { %v313_v7 = vld [vmem:[%s4481_s13 + $0x38] sm:$0xf]  ;;  %310 = vst [vmem:[%s4485_s14 + $0x14] sm:$0xf] %v309_v5  ;;  %312 = vst [vmem:[%s4485_s14 + $0x18] sm:$0xf] %v311_v6 }
  0x1a   : > { %314 = vst [vmem:[%s4485_s14 + $0x1c] sm:$0xf] %v313_v7  ;;  %v315_v8 = vld [vmem:[%s4481_s13 + $0x40] sm:$0xf]  ;;  %v317_v9 = vld [vmem:[%s4481_s13 + $0x48] sm:$0xf] }
  0x1b   : > { %v319_v10 = vld [vmem:[%s4481_s13 + $0x50] sm:$0xf]  ;;  %316 = vst [vmem:[%s4485_s14 + $0x20] sm:$0xf] %v315_v8  ;;  %318 = vst [vmem:[%s4485_s14 + $0x24] sm:$0xf] %v317_v9 }
  0x1c   : > { %320 = vst [vmem:[%s4485_s14 + $0x28] sm:$0xf] %v319_v10  ;;  %v321_v11 = vld [vmem:[%s4481_s13 + $0x58] sm:$0xf]  ;;  %v323_v12 = vld [vmem:[%s4481_s13 + $0x60] sm:$0xf] }
  0x1d   : > { %v325_v13 = vld [vmem:[%s4481_s13 + $0x68] sm:$0xf]  ;;  %322 = vst [vmem:[%s4485_s14 + $0x2c] sm:$0xf] %v321_v11  ;;  %324 = vst [vmem:[%s4485_s14 + $0x30] sm:$0xf] %v323_v12 }
  0x1e   : > { %326 = vst [vmem:[%s4485_s14 + $0x34] sm:$0xf] %v325_v13  ;;  %v327_v14 = vld [vmem:[%s4481_s13 + $0x70] sm:$0xf]  ;;  %v329_v15 = vld [vmem:[%s4481_s13 + $0x78] sm:$0xf] }
  0x1f   : > { %v331_v16 = vld [vmem:[%s4481_s13 + $0x80] sm:$0xf]  ;;  %328 = vst [vmem:[%s4485_s14 + $0x38] sm:$0xf] %v327_v14  ;;  %330 = vst [vmem:[%s4485_s14 + $0x3c] sm:$0xf] %v329_v15 }
  0x20   : > { %332 = vst [vmem:[%s4485_s14 + $0x40] sm:$0xf] %v331_v16  ;;  %v333_v17 = vld [vmem:[%s4481_s13 + $0x88] sm:$0xf]  ;;  %v335_v18 = vld [vmem:[%s4481_s13 + $0x90] sm:$0xf] }
  0x21   : > { %v337_v19 = vld [vmem:[%s4481_s13 + $0x98] sm:$0xf]  ;;  %334 = vst [vmem:[%s4485_s14 + $0x44] sm:$0xf] %v333_v17  ;;  %336 = vst [vmem:[%s4485_s14 + $0x48] sm:$0xf] %v335_v18 }
  0x22   : > { %338 = vst [vmem:[%s4485_s14 + $0x4c] sm:$0xf] %v337_v19  ;;  %v339_v20 = vld [vmem:[%s4481_s13 + $0xa0] sm:$0xf]  ;;  %v341_v21 = vld [vmem:[%s4481_s13 + $0xa8] sm:$0xf] }
  0x23   : > { %v343_v22 = vld [vmem:[%s4481_s13 + $0xb0] sm:$0xf]  ;;  %340 = vst [vmem:[%s4485_s14 + $0x50] sm:$0xf] %v339_v20  ;;  %342 = vst [vmem:[%s4485_s14 + $0x54] sm:$0xf] %v341_v21 }
  0x24   : > { %344 = vst [vmem:[%s4485_s14 + $0x58] sm:$0xf] %v343_v22  ;;  %v345_v23 = vld [vmem:[%s4481_s13 + $0xb8] sm:$0xf]  ;;  %v347_v24 = vld [vmem:[%s4481_s13 + $0xc0] sm:$0xf] }
  0x25   : > { %v349_v25 = vld [vmem:[%s4481_s13 + $0xc8] sm:$0xf]  ;;  %346 = vst [vmem:[%s4485_s14 + $0x5c] sm:$0xf] %v345_v23  ;;  %348 = vst [vmem:[%s4485_s14 + $0x60] sm:$0xf] %v347_v24 }
  0x26   : > { %350 = vst [vmem:[%s4485_s14 + $0x64] sm:$0xf] %v349_v25  ;;  %v351_v26 = vld [vmem:[%s4481_s13 + $0xd0] sm:$0xf]  ;;  %v353_v27 = vld [vmem:[%s4481_s13 + $0xd8] sm:$0xf] }
  0x27   : > { %v355_v28 = vld [vmem:[%s4481_s13 + $0xe0] sm:$0xf]  ;;  %352 = vst [vmem:[%s4485_s14 + $0x68] sm:$0xf] %v351_v26  ;;  %354 = vst [vmem:[%s4485_s14 + $0x6c] sm:$0xf] %v353_v27 }
  0x28   : > { %356 = vst [vmem:[%s4485_s14 + $0x70] sm:$0xf] %v355_v28  ;;  %v357_v29 = vld [vmem:[%s4481_s13 + $0xe8] sm:$0xf]  ;;  %v359_v30 = vld [vmem:[%s4481_s13 + $0xf0] sm:$0xf] }
  0x29   : > { %v361_v31 = vld [vmem:[%s4481_s13 + $0xf8] sm:$0xf]  ;;  %358 = vst [vmem:[%s4485_s14 + $0x74] sm:$0xf] %v357_v29  ;;  %360 = vst [vmem:[%s4485_s14 + $0x78] sm:$0xf] %v359_v30 }
  0x2a   : > { %362 = vst [vmem:[%s4485_s14 + $0x7c] sm:$0xf] %v361_v31  ;;  %v363_v32 = vld [vmem:[%s4481_s13 + $0x100] sm:$0xf]  ;;  %v365_v33 = vld [vmem:[%s4481_s13 + $0x108] sm:$0xf] }
  0x2b   : > { %v367_v34 = vld [vmem:[%s4481_s13 + $0x110] sm:$0xf]  ;;  %364 = vst [vmem:[%s4485_s14 + $0x80] sm:$0xf] %v363_v32  ;;  %366 = vst [vmem:[%s4485_s14 + $0x84] sm:$0xf] %v365_v33 }
  0x2c   : > { %368 = vst [vmem:[%s4485_s14 + $0x88] sm:$0xf] %v367_v34  ;;  %v369_v35 = vld [vmem:[%s4481_s13 + $0x118] sm:$0xf]  ;;  %v371_v36 = vld [vmem:[%s4481_s13 + $0x120] sm:$0xf] }
  0x2d   : > { %v373_v37 = vld [vmem:[%s4481_s13 + $0x128] sm:$0xf]  ;;  %370 = vst [vmem:[%s4485_s14 + $0x8c] sm:$0xf] %v369_v35  ;;  %372 = vst [vmem:[%s4485_s14 + $0x90] sm:$0xf] %v371_v36 }
  0x2e   : > { %374 = vst [vmem:[%s4485_s14 + $0x94] sm:$0xf] %v373_v37  ;;  %v375_v38 = vld [vmem:[%s4481_s13 + $0x130] sm:$0xf]  ;;  %v377_v39 = vld [vmem:[%s4481_s13 + $0x138] sm:$0xf] }
  0x2f   : > { %v379_v40 = vld [vmem:[%s4481_s13 + $0x140] sm:$0xf]  ;;  %376 = vst [vmem:[%s4485_s14 + $0x98] sm:$0xf] %v375_v38  ;;  %378 = vst [vmem:[%s4485_s14 + $0x9c] sm:$0xf] %v377_v39 }
  0x30   : > { %380 = vst [vmem:[%s4485_s14 + $0xa0] sm:$0xf] %v379_v40  ;;  %v381_v41 = vld [vmem:[%s4481_s13 + $0x148] sm:$0xf]  ;;  %v383_v42 = vld [vmem:[%s4481_s13 + $0x150] sm:$0xf] }
  0x31   : > { %v385_v43 = vld [vmem:[%s4481_s13 + $0x158] sm:$0xf]  ;;  %382 = vst [vmem:[%s4485_s14 + $0xa4] sm:$0xf] %v381_v41  ;;  %384 = vst [vmem:[%s4485_s14 + $0xa8] sm:$0xf] %v383_v42 }
  0x32   : > { %386 = vst [vmem:[%s4485_s14 + $0xac] sm:$0xf] %v385_v43  ;;  %v387_v44 = vld [vmem:[%s4481_s13 + $0x160] sm:$0xf]  ;;  %v389_v45 = vld [vmem:[%s4481_s13 + $0x168] sm:$0xf] }
  0x33   : > { %v391_v46 = vld [vmem:[%s4481_s13 + $0x170] sm:$0xf]  ;;  %388 = vst [vmem:[%s4485_s14 + $0xb0] sm:$0xf] %v387_v44  ;;  %390 = vst [vmem:[%s4485_s14 + $0xb4] sm:$0xf] %v389_v45 }
  0x34   : > { %392 = vst [vmem:[%s4485_s14 + $0xb8] sm:$0xf] %v391_v46  ;;  %v393_v47 = vld [vmem:[%s4481_s13 + $0x178] sm:$0xf]  ;;  %v395_v48 = vld [vmem:[%s4481_s13 + $0x180] sm:$0xf] }
  0x35   : > { %v397_v49 = vld [vmem:[%s4481_s13 + $0x188] sm:$0xf]  ;;  %394 = vst [vmem:[%s4485_s14 + $0xbc] sm:$0xf] %v393_v47  ;;  %396 = vst [vmem:[%s4485_s14 + $0xc0] sm:$0xf] %v395_v48 }
  0x36   : > { %398 = vst [vmem:[%s4485_s14 + $0xc4] sm:$0xf] %v397_v49  ;;  %v399_v50 = vld [vmem:[%s4481_s13 + $0x190] sm:$0xf]  ;;  %v401_v51 = vld [vmem:[%s4481_s13 + $0x198] sm:$0xf] }
  0x37   : > { %v403_v52 = vld [vmem:[%s4481_s13 + $0x1a0] sm:$0xf]  ;;  %400 = vst [vmem:[%s4485_s14 + $0xc8] sm:$0xf] %v399_v50  ;;  %402 = vst [vmem:[%s4485_s14 + $0xcc] sm:$0xf] %v401_v51 }
  0x38   : > { %404 = vst [vmem:[%s4485_s14 + $0xd0] sm:$0xf] %v403_v52  ;;  %v405_v53 = vld [vmem:[%s4481_s13 + $0x1a8] sm:$0xf]  ;;  %v407_v54 = vld [vmem:[%s4481_s13 + $0x1b0] sm:$0xf] }
  0x39   : > { %v409_v55 = vld [vmem:[%s4481_s13 + $0x1b8] sm:$0xf]  ;;  %406 = vst [vmem:[%s4485_s14 + $0xd4] sm:$0xf] %v405_v53  ;;  %408 = vst [vmem:[%s4485_s14 + $0xd8] sm:$0xf] %v407_v54 }
  0x3a   : > { %410 = vst [vmem:[%s4485_s14 + $0xdc] sm:$0xf] %v409_v55  ;;  %v411_v56 = vld [vmem:[%s4481_s13 + $0x1c0] sm:$0xf]  ;;  %v413_v57 = vld [vmem:[%s4481_s13 + $0x1c8] sm:$0xf] }
  0x3b   : > { %v415_v58 = vld [vmem:[%s4481_s13 + $0x1d0] sm:$0xf]  ;;  %412 = vst [vmem:[%s4485_s14 + $0xe0] sm:$0xf] %v411_v56  ;;  %414 = vst [vmem:[%s4485_s14 + $0xe4] sm:$0xf] %v413_v57 }
  0x3c   : > { %416 = vst [vmem:[%s4485_s14 + $0xe8] sm:$0xf] %v415_v58  ;;  %v417_v59 = vld [vmem:[%s4481_s13 + $0x1d8] sm:$0xf]  ;;  %v419_v60 = vld [vmem:[%s4481_s13 + $0x1e0] sm:$0xf] }
  0x3d   : > { %v421_v61 = vld [vmem:[%s4481_s13 + $0x1e8] sm:$0xf]  ;;  %418 = vst [vmem:[%s4485_s14 + $0xec] sm:$0xf] %v417_v59  ;;  %420 = vst [vmem:[%s4485_s14 + $0xf0] sm:$0xf] %v419_v60 }
  0x3e   : > { %422 = vst [vmem:[%s4485_s14 + $0xf4] sm:$0xf] %v421_v61  ;;  %v423_v62 = vld [vmem:[%s4481_s13 + $0x1f0] sm:$0xf]  ;;  %v425_v63 = vld [vmem:[%s4481_s13 + $0x1f8] sm:$0xf] }
  0x3f   : > { %v427_v0 = vld [vmem:[%s4481_s13 + $0x200] sm:$0xf]  ;;  %424 = vst [vmem:[%s4485_s14 + $0xf8] sm:$0xf] %v423_v62  ;;  %426 = vst [vmem:[%s4485_s14 + $0xfc] sm:$0xf] %v425_v63 }
  0x40   : > { %428 = vst [vmem:[%s4485_s14 + $0x100] sm:$0xf] %v427_v0  ;;  %v429_v1 = vld [vmem:[%s4481_s13 + $0x208] sm:$0xf]  ;;  %v431_v2 = vld [vmem:[%s4481_s13 + $0x210] sm:$0xf] }
  0x41   : > { %v433_v3 = vld [vmem:[%s4481_s13 + $0x218] sm:$0xf]  ;;  %430 = vst [vmem:[%s4485_s14 + $0x104] sm:$0xf] %v429_v1  ;;  %432 = vst [vmem:[%s4485_s14 + $0x108] sm:$0xf] %v431_v2 }
  0x42   : > { %434 = vst [vmem:[%s4485_s14 + $0x10c] sm:$0xf] %v433_v3  ;;  %v435_v4 = vld [vmem:[%s4481_s13 + $0x220] sm:$0xf]  ;;  %v437_v5 = vld [vmem:[%s4481_s13 + $0x228] sm:$0xf] }
  0x43   : > { %v439_v6 = vld [vmem:[%s4481_s13 + $0x230] sm:$0xf]  ;;  %436 = vst [vmem:[%s4485_s14 + $0x110] sm:$0xf] %v435_v4  ;;  %438 = vst [vmem:[%s4485_s14 + $0x114] sm:$0xf] %v437_v5 }
  0x44   : > { %440 = vst [vmem:[%s4485_s14 + $0x118] sm:$0xf] %v439_v6  ;;  %v441_v7 = vld [vmem:[%s4481_s13 + $0x238] sm:$0xf]  ;;  %v443_v8 = vld [vmem:[%s4481_s13 + $0x240] sm:$0xf] }
  0x45   : > { %v445_v9 = vld [vmem:[%s4481_s13 + $0x248] sm:$0xf]  ;;  %442 = vst [vmem:[%s4485_s14 + $0x11c] sm:$0xf] %v441_v7  ;;  %444 = vst [vmem:[%s4485_s14 + $0x120] sm:$0xf] %v443_v8 }
  0x46   : > { %446 = vst [vmem:[%s4485_s14 + $0x124] sm:$0xf] %v445_v9  ;;  %v447_v10 = vld [vmem:[%s4481_s13 + $0x250] sm:$0xf]  ;;  %v449_v11 = vld [vmem:[%s4481_s13 + $0x258] sm:$0xf] }
  0x47   : > { %v451_v12 = vld [vmem:[%s4481_s13 + $0x260] sm:$0xf]  ;;  %448 = vst [vmem:[%s4485_s14 + $0x128] sm:$0xf] %v447_v10  ;;  %450 = vst [vmem:[%s4485_s14 + $0x12c] sm:$0xf] %v449_v11 }
  0x48   : > { %452 = vst [vmem:[%s4485_s14 + $0x130] sm:$0xf] %v451_v12  ;;  %v453_v13 = vld [vmem:[%s4481_s13 + $0x268] sm:$0xf]  ;;  %v455_v14 = vld [vmem:[%s4481_s13 + $0x270] sm:$0xf] }
  0x49   : > { %v457_v15 = vld [vmem:[%s4481_s13 + $0x278] sm:$0xf]  ;;  %454 = vst [vmem:[%s4485_s14 + $0x134] sm:$0xf] %v453_v13  ;;  %456 = vst [vmem:[%s4485_s14 + $0x138] sm:$0xf] %v455_v14 }
  0x4a   : > { %458 = vst [vmem:[%s4485_s14 + $0x13c] sm:$0xf] %v457_v15  ;;  %v459_v16 = vld [vmem:[%s4481_s13 + $0x280] sm:$0xf]  ;;  %v461_v17 = vld [vmem:[%s4481_s13 + $0x288] sm:$0xf] }
  0x4b   : > { %v463_v18 = vld [vmem:[%s4481_s13 + $0x290] sm:$0xf]  ;;  %460 = vst [vmem:[%s4485_s14 + $0x140] sm:$0xf] %v459_v16  ;;  %462 = vst [vmem:[%s4485_s14 + $0x144] sm:$0xf] %v461_v17 }
  0x4c   : > { %464 = vst [vmem:[%s4485_s14 + $0x148] sm:$0xf] %v463_v18  ;;  %v465_v19 = vld [vmem:[%s4481_s13 + $0x298] sm:$0xf]  ;;  %v467_v20 = vld [vmem:[%s4481_s13 + $0x2a0] sm:$0xf] }
  0x4d   : > { %v469_v21 = vld [vmem:[%s4481_s13 + $0x2a8] sm:$0xf]  ;;  %466 = vst [vmem:[%s4485_s14 + $0x14c] sm:$0xf] %v465_v19  ;;  %468 = vst [vmem:[%s4485_s14 + $0x150] sm:$0xf] %v467_v20 }
  0x4e   : > { %470 = vst [vmem:[%s4485_s14 + $0x154] sm:$0xf] %v469_v21  ;;  %v471_v22 = vld [vmem:[%s4481_s13 + $0x2b0] sm:$0xf]  ;;  %v473_v23 = vld [vmem:[%s4481_s13 + $0x2b8] sm:$0xf] }
  0x4f   : > { %v475_v24 = vld [vmem:[%s4481_s13 + $0x2c0] sm:$0xf]  ;;  %472 = vst [vmem:[%s4485_s14 + $0x158] sm:$0xf] %v471_v22  ;;  %474 = vst [vmem:[%s4485_s14 + $0x15c] sm:$0xf] %v473_v23 }
  0x50   : > { %476 = vst [vmem:[%s4485_s14 + $0x160] sm:$0xf] %v475_v24  ;;  %v477_v25 = vld [vmem:[%s4481_s13 + $0x2c8] sm:$0xf]  ;;  %v479_v26 = vld [vmem:[%s4481_s13 + $0x2d0] sm:$0xf] }
  0x51   : > { %v481_v27 = vld [vmem:[%s4481_s13 + $0x2d8] sm:$0xf]  ;;  %478 = vst [vmem:[%s4485_s14 + $0x164] sm:$0xf] %v477_v25  ;;  %480 = vst [vmem:[%s4485_s14 + $0x168] sm:$0xf] %v479_v26 }
  0x52   : > { %482 = vst [vmem:[%s4485_s14 + $0x16c] sm:$0xf] %v481_v27  ;;  %v483_v28 = vld [vmem:[%s4481_s13 + $0x2e0] sm:$0xf]  ;;  %v485_v29 = vld [vmem:[%s4481_s13 + $0x2e8] sm:$0xf] }
  0x53   : > { %v487_v30 = vld [vmem:[%s4481_s13 + $0x2f0] sm:$0xf]  ;;  %484 = vst [vmem:[%s4485_s14 + $0x170] sm:$0xf] %v483_v28  ;;  %486 = vst [vmem:[%s4485_s14 + $0x174] sm:$0xf] %v485_v29 }
  0x54   : > { %488 = vst [vmem:[%s4485_s14 + $0x178] sm:$0xf] %v487_v30  ;;  %v489_v31 = vld [vmem:[%s4481_s13 + $0x2f8] sm:$0xf]  ;;  %v491_v32 = vld [vmem:[%s4481_s13 + $0x300] sm:$0xf] }
  0x55   : > { %v493_v33 = vld [vmem:[%s4481_s13 + $0x308] sm:$0xf]  ;;  %490 = vst [vmem:[%s4485_s14 + $0x17c] sm:$0xf] %v489_v31  ;;  %492 = vst [vmem:[%s4485_s14 + $0x180] sm:$0xf] %v491_v32 }
  0x56   : > { %494 = vst [vmem:[%s4485_s14 + $0x184] sm:$0xf] %v493_v33  ;;  %v495_v34 = vld [vmem:[%s4481_s13 + $0x310] sm:$0xf]  ;;  %v497_v35 = vld [vmem:[%s4481_s13 + $0x318] sm:$0xf] }
  0x57   : > { %v499_v36 = vld [vmem:[%s4481_s13 + $0x320] sm:$0xf]  ;;  %496 = vst [vmem:[%s4485_s14 + $0x188] sm:$0xf] %v495_v34  ;;  %498 = vst [vmem:[%s4485_s14 + $0x18c] sm:$0xf] %v497_v35 }
  0x58   : > { %500 = vst [vmem:[%s4485_s14 + $0x190] sm:$0xf] %v499_v36  ;;  %v501_v37 = vld [vmem:[%s4481_s13 + $0x328] sm:$0xf]  ;;  %v503_v38 = vld [vmem:[%s4481_s13 + $0x330] sm:$0xf] }
  0x59   : > { %v505_v39 = vld [vmem:[%s4481_s13 + $0x338] sm:$0xf]  ;;  %502 = vst [vmem:[%s4485_s14 + $0x194] sm:$0xf] %v501_v37  ;;  %504 = vst [vmem:[%s4485_s14 + $0x198] sm:$0xf] %v503_v38 }
  0x5a   : > { %506 = vst [vmem:[%s4485_s14 + $0x19c] sm:$0xf] %v505_v39  ;;  %v507_v40 = vld [vmem:[%s4481_s13 + $0x340] sm:$0xf]  ;;  %v509_v41 = vld [vmem:[%s4481_s13 + $0x348] sm:$0xf] }
  0x5b   : > { %v511_v42 = vld [vmem:[%s4481_s13 + $0x350] sm:$0xf]  ;;  %508 = vst [vmem:[%s4485_s14 + $0x1a0] sm:$0xf] %v507_v40  ;;  %510 = vst [vmem:[%s4485_s14 + $0x1a4] sm:$0xf] %v509_v41 }
  0x5c   : > { %512 = vst [vmem:[%s4485_s14 + $0x1a8] sm:$0xf] %v511_v42  ;;  %v513_v43 = vld [vmem:[%s4481_s13 + $0x358] sm:$0xf]  ;;  %v515_v44 = vld [vmem:[%s4481_s13 + $0x360] sm:$0xf] }
  0x5d   : > { %v517_v45 = vld [vmem:[%s4481_s13 + $0x368] sm:$0xf]  ;;  %514 = vst [vmem:[%s4485_s14 + $0x1ac] sm:$0xf] %v513_v43  ;;  %516 = vst [vmem:[%s4485_s14 + $0x1b0] sm:$0xf] %v515_v44 }
  0x5e   : > { %518 = vst [vmem:[%s4485_s14 + $0x1b4] sm:$0xf] %v517_v45  ;;  %v519_v46 = vld [vmem:[%s4481_s13 + $0x370] sm:$0xf]  ;;  %v521_v47 = vld [vmem:[%s4481_s13 + $0x378] sm:$0xf] }
  0x5f   : > { %v523_v48 = vld [vmem:[%s4481_s13 + $0x380] sm:$0xf]  ;;  %520 = vst [vmem:[%s4485_s14 + $0x1b8] sm:$0xf] %v519_v46  ;;  %522 = vst [vmem:[%s4485_s14 + $0x1bc] sm:$0xf] %v521_v47 }
  0x60   : > { %524 = vst [vmem:[%s4485_s14 + $0x1c0] sm:$0xf] %v523_v48  ;;  %v525_v49 = vld [vmem:[%s4481_s13 + $0x388] sm:$0xf]  ;;  %v527_v50 = vld [vmem:[%s4481_s13 + $0x390] sm:$0xf] }
  0x61   : > { %v529_v51 = vld [vmem:[%s4481_s13 + $0x398] sm:$0xf]  ;;  %526 = vst [vmem:[%s4485_s14 + $0x1c4] sm:$0xf] %v525_v49  ;;  %528 = vst [vmem:[%s4485_s14 + $0x1c8] sm:$0xf] %v527_v50 }
  0x62   : > { %530 = vst [vmem:[%s4485_s14 + $0x1cc] sm:$0xf] %v529_v51  ;;  %v531_v52 = vld [vmem:[%s4481_s13 + $0x3a0] sm:$0xf]  ;;  %v533_v53 = vld [vmem:[%s4481_s13 + $0x3a8] sm:$0xf] }
  0x63   : > { %v535_v54 = vld [vmem:[%s4481_s13 + $0x3b0] sm:$0xf]  ;;  %532 = vst [vmem:[%s4485_s14 + $0x1d0] sm:$0xf] %v531_v52  ;;  %534 = vst [vmem:[%s4485_s14 + $0x1d4] sm:$0xf] %v533_v53 }
  0x64   : > { %536 = vst [vmem:[%s4485_s14 + $0x1d8] sm:$0xf] %v535_v54  ;;  %v537_v55 = vld [vmem:[%s4481_s13 + $0x3b8] sm:$0xf]  ;;  %v539_v56 = vld [vmem:[%s4481_s13 + $0x3c0] sm:$0xf] }
  0x65   : > { %v541_v57 = vld [vmem:[%s4481_s13 + $0x3c8] sm:$0xf]  ;;  %538 = vst [vmem:[%s4485_s14 + $0x1dc] sm:$0xf] %v537_v55  ;;  %540 = vst [vmem:[%s4485_s14 + $0x1e0] sm:$0xf] %v539_v56 }
  0x66   : > { %542 = vst [vmem:[%s4485_s14 + $0x1e4] sm:$0xf] %v541_v57  ;;  %v543_v58 = vld [vmem:[%s4481_s13 + $0x3d0] sm:$0xf]  ;;  %v545_v59 = vld [vmem:[%s4481_s13 + $0x3d8] sm:$0xf] }
  0x67   : > { %v547_v60 = vld [vmem:[%s4481_s13 + $0x3e0] sm:$0xf]  ;;  %544 = vst [vmem:[%s4485_s14 + $0x1e8] sm:$0xf] %v543_v58  ;;  %546 = vst [vmem:[%s4485_s14 + $0x1ec] sm:$0xf] %v545_v59 }
  0x68   : > { %548 = vst [vmem:[%s4485_s14 + $0x1f0] sm:$0xf] %v547_v60  ;;  %v549_v61 = vld [vmem:[%s4481_s13 + $0x3e8] sm:$0xf]  ;;  %v551_v62 = vld [vmem:[%s4481_s13 + $0x3f0] sm:$0xf] }
  0x69   : > { %v553_v63 = vld [vmem:[%s4481_s13 + $0x3f8] sm:$0xf]  ;;  %550 = vst [vmem:[%s4485_s14 + $0x1f4] sm:$0xf] %v549_v61  ;;  %552 = vst [vmem:[%s4485_s14 + $0x1f8] sm:$0xf] %v551_v62 }
  0x6a   : > { %554 = vst [vmem:[%s4485_s14 + $0x1fc] sm:$0xf] %v553_v63  ;;  %v555_v0 = vld [vmem:[%s4481_s13 + $0x400] sm:$0xf]  ;;  %v557_v1 = vld [vmem:[%s4481_s13 + $0x408] sm:$0xf] }
  0x6b   : > { %v559_v2 = vld [vmem:[%s4481_s13 + $0x410] sm:$0xf]  ;;  %556 = vst [vmem:[%s4485_s14 + $0x200] sm:$0xf] %v555_v0  ;;  %558 = vst [vmem:[%s4485_s14 + $0x204] sm:$0xf] %v557_v1 }
  0x6c   : > { %560 = vst [vmem:[%s4485_s14 + $0x208] sm:$0xf] %v559_v2  ;;  %v561_v3 = vld [vmem:[%s4481_s13 + $0x418] sm:$0xf]  ;;  %v563_v4 = vld [vmem:[%s4481_s13 + $0x420] sm:$0xf] }
  0x6d   : > { %v565_v5 = vld [vmem:[%s4481_s13 + $0x428] sm:$0xf]  ;;  %562 = vst [vmem:[%s4485_s14 + $0x20c] sm:$0xf] %v561_v3  ;;  %564 = vst [vmem:[%s4485_s14 + $0x210] sm:$0xf] %v563_v4 }
  0x6e   : > { %566 = vst [vmem:[%s4485_s14 + $0x214] sm:$0xf] %v565_v5  ;;  %v567_v6 = vld [vmem:[%s4481_s13 + $0x430] sm:$0xf]  ;;  %v569_v7 = vld [vmem:[%s4481_s13 + $0x438] sm:$0xf] }
  0x6f   : > { %v571_v8 = vld [vmem:[%s4481_s13 + $0x440] sm:$0xf]  ;;  %568 = vst [vmem:[%s4485_s14 + $0x218] sm:$0xf] %v567_v6  ;;  %570 = vst [vmem:[%s4485_s14 + $0x21c] sm:$0xf] %v569_v7 }
  0x70   : > { %572 = vst [vmem:[%s4485_s14 + $0x220] sm:$0xf] %v571_v8  ;;  %v573_v9 = vld [vmem:[%s4481_s13 + $0x448] sm:$0xf]  ;;  %v575_v10 = vld [vmem:[%s4481_s13 + $0x450] sm:$0xf] }
  0x71   : > { %v577_v11 = vld [vmem:[%s4481_s13 + $0x458] sm:$0xf]  ;;  %574 = vst [vmem:[%s4485_s14 + $0x224] sm:$0xf] %v573_v9  ;;  %576 = vst [vmem:[%s4485_s14 + $0x228] sm:$0xf] %v575_v10 }
  0x72   : > { %578 = vst [vmem:[%s4485_s14 + $0x22c] sm:$0xf] %v577_v11  ;;  %v579_v12 = vld [vmem:[%s4481_s13 + $0x460] sm:$0xf]  ;;  %v581_v13 = vld [vmem:[%s4481_s13 + $0x468] sm:$0xf] }
  0x73   : > { %v583_v14 = vld [vmem:[%s4481_s13 + $0x470] sm:$0xf]  ;;  %580 = vst [vmem:[%s4485_s14 + $0x230] sm:$0xf] %v579_v12  ;;  %582 = vst [vmem:[%s4485_s14 + $0x234] sm:$0xf] %v581_v13 }
  0x74   : > { %584 = vst [vmem:[%s4485_s14 + $0x238] sm:$0xf] %v583_v14  ;;  %v585_v15 = vld [vmem:[%s4481_s13 + $0x478] sm:$0xf]  ;;  %v587_v16 = vld [vmem:[%s4481_s13 + $0x480] sm:$0xf] }
  0x75   : > { %v589_v17 = vld [vmem:[%s4481_s13 + $0x488] sm:$0xf]  ;;  %586 = vst [vmem:[%s4485_s14 + $0x23c] sm:$0xf] %v585_v15  ;;  %588 = vst [vmem:[%s4485_s14 + $0x240] sm:$0xf] %v587_v16 }
  0x76   : > { %590 = vst [vmem:[%s4485_s14 + $0x244] sm:$0xf] %v589_v17  ;;  %v591_v18 = vld [vmem:[%s4481_s13 + $0x490] sm:$0xf]  ;;  %v593_v19 = vld [vmem:[%s4481_s13 + $0x498] sm:$0xf] }
  0x77   : > { %v595_v20 = vld [vmem:[%s4481_s13 + $0x4a0] sm:$0xf]  ;;  %592 = vst [vmem:[%s4485_s14 + $0x248] sm:$0xf] %v591_v18  ;;  %594 = vst [vmem:[%s4485_s14 + $0x24c] sm:$0xf] %v593_v19 }
  0x78   : > { %596 = vst [vmem:[%s4485_s14 + $0x250] sm:$0xf] %v595_v20  ;;  %v597_v21 = vld [vmem:[%s4481_s13 + $0x4a8] sm:$0xf]  ;;  %v599_v22 = vld [vmem:[%s4481_s13 + $0x4b0] sm:$0xf] }
  0x79   : > { %v601_v23 = vld [vmem:[%s4481_s13 + $0x4b8] sm:$0xf]  ;;  %598 = vst [vmem:[%s4485_s14 + $0x254] sm:$0xf] %v597_v21  ;;  %600 = vst [vmem:[%s4485_s14 + $0x258] sm:$0xf] %v599_v22 }
  0x7a   : > { %602 = vst [vmem:[%s4485_s14 + $0x25c] sm:$0xf] %v601_v23  ;;  %v603_v24 = vld [vmem:[%s4481_s13 + $0x4c0] sm:$0xf]  ;;  %v605_v25 = vld [vmem:[%s4481_s13 + $0x4c8] sm:$0xf] }
  0x7b   : > { %v607_v26 = vld [vmem:[%s4481_s13 + $0x4d0] sm:$0xf]  ;;  %604 = vst [vmem:[%s4485_s14 + $0x260] sm:$0xf] %v603_v24  ;;  %606 = vst [vmem:[%s4485_s14 + $0x264] sm:$0xf] %v605_v25 }
  0x7c   : > { %608 = vst [vmem:[%s4485_s14 + $0x268] sm:$0xf] %v607_v26  ;;  %v609_v27 = vld [vmem:[%s4481_s13 + $0x4d8] sm:$0xf]  ;;  %v611_v28 = vld [vmem:[%s4481_s13 + $0x4e0] sm:$0xf] }
  0x7d   : > { %v613_v29 = vld [vmem:[%s4481_s13 + $0x4e8] sm:$0xf]  ;;  %610 = vst [vmem:[%s4485_s14 + $0x26c] sm:$0xf] %v609_v27  ;;  %612 = vst [vmem:[%s4485_s14 + $0x270] sm:$0xf] %v611_v28 }
  0x7e   : > { %614 = vst [vmem:[%s4485_s14 + $0x274] sm:$0xf] %v613_v29  ;;  %v615_v30 = vld [vmem:[%s4481_s13 + $0x4f0] sm:$0xf]  ;;  %v617_v31 = vld [vmem:[%s4481_s13 + $0x4f8] sm:$0xf] }
  0x7f   : > { %v619_v32 = vld [vmem:[%s4481_s13 + $0x500] sm:$0xf]  ;;  %616 = vst [vmem:[%s4485_s14 + $0x278] sm:$0xf] %v615_v30  ;;  %618 = vst [vmem:[%s4485_s14 + $0x27c] sm:$0xf] %v617_v31 }
  0x80   : > { %620 = vst [vmem:[%s4485_s14 + $0x280] sm:$0xf] %v619_v32  ;;  %v621_v33 = vld [vmem:[%s4481_s13 + $0x508] sm:$0xf]  ;;  %v623_v34 = vld [vmem:[%s4481_s13 + $0x510] sm:$0xf] }
  0x81   : > { %v625_v35 = vld [vmem:[%s4481_s13 + $0x518] sm:$0xf]  ;;  %622 = vst [vmem:[%s4485_s14 + $0x284] sm:$0xf] %v621_v33  ;;  %624 = vst [vmem:[%s4485_s14 + $0x288] sm:$0xf] %v623_v34 }
  0x82   : > { %626 = vst [vmem:[%s4485_s14 + $0x28c] sm:$0xf] %v625_v35  ;;  %v627_v36 = vld [vmem:[%s4481_s13 + $0x520] sm:$0xf]  ;;  %v629_v37 = vld [vmem:[%s4481_s13 + $0x528] sm:$0xf] }
  0x83   : > { %v631_v38 = vld [vmem:[%s4481_s13 + $0x530] sm:$0xf]  ;;  %628 = vst [vmem:[%s4485_s14 + $0x290] sm:$0xf] %v627_v36  ;;  %630 = vst [vmem:[%s4485_s14 + $0x294] sm:$0xf] %v629_v37 }
  0x84   : > { %632 = vst [vmem:[%s4485_s14 + $0x298] sm:$0xf] %v631_v38  ;;  %v633_v39 = vld [vmem:[%s4481_s13 + $0x538] sm:$0xf]  ;;  %v635_v40 = vld [vmem:[%s4481_s13 + $0x540] sm:$0xf] }
  0x85   : > { %v637_v41 = vld [vmem:[%s4481_s13 + $0x548] sm:$0xf]  ;;  %634 = vst [vmem:[%s4485_s14 + $0x29c] sm:$0xf] %v633_v39  ;;  %636 = vst [vmem:[%s4485_s14 + $0x2a0] sm:$0xf] %v635_v40 }
  0x86   : > { %638 = vst [vmem:[%s4485_s14 + $0x2a4] sm:$0xf] %v637_v41  ;;  %v639_v42 = vld [vmem:[%s4481_s13 + $0x550] sm:$0xf]  ;;  %v641_v43 = vld [vmem:[%s4481_s13 + $0x558] sm:$0xf] }
  0x87   : > { %v643_v44 = vld [vmem:[%s4481_s13 + $0x560] sm:$0xf]  ;;  %640 = vst [vmem:[%s4485_s14 + $0x2a8] sm:$0xf] %v639_v42  ;;  %642 = vst [vmem:[%s4485_s14 + $0x2ac] sm:$0xf] %v641_v43 }
  0x88   : > { %644 = vst [vmem:[%s4485_s14 + $0x2b0] sm:$0xf] %v643_v44  ;;  %v645_v45 = vld [vmem:[%s4481_s13 + $0x568] sm:$0xf]  ;;  %v647_v46 = vld [vmem:[%s4481_s13 + $0x570] sm:$0xf] }
  0x89   : > { %v649_v47 = vld [vmem:[%s4481_s13 + $0x578] sm:$0xf]  ;;  %646 = vst [vmem:[%s4485_s14 + $0x2b4] sm:$0xf] %v645_v45  ;;  %648 = vst [vmem:[%s4485_s14 + $0x2b8] sm:$0xf] %v647_v46 }
  0x8a   : > { %650 = vst [vmem:[%s4485_s14 + $0x2bc] sm:$0xf] %v649_v47  ;;  %v651_v48 = vld [vmem:[%s4481_s13 + $0x580] sm:$0xf]  ;;  %v653_v49 = vld [vmem:[%s4481_s13 + $0x588] sm:$0xf] }
  0x8b   : > { %v655_v50 = vld [vmem:[%s4481_s13 + $0x590] sm:$0xf]  ;;  %652 = vst [vmem:[%s4485_s14 + $0x2c0] sm:$0xf] %v651_v48  ;;  %654 = vst [vmem:[%s4485_s14 + $0x2c4] sm:$0xf] %v653_v49 }
  0x8c   : > { %656 = vst [vmem:[%s4485_s14 + $0x2c8] sm:$0xf] %v655_v50  ;;  %v657_v51 = vld [vmem:[%s4481_s13 + $0x598] sm:$0xf]  ;;  %v659_v52 = vld [vmem:[%s4481_s13 + $0x5a0] sm:$0xf] }
  0x8d   : > { %v661_v53 = vld [vmem:[%s4481_s13 + $0x5a8] sm:$0xf]  ;;  %658 = vst [vmem:[%s4485_s14 + $0x2cc] sm:$0xf] %v657_v51  ;;  %660 = vst [vmem:[%s4485_s14 + $0x2d0] sm:$0xf] %v659_v52 }
  0x8e   : > { %662 = vst [vmem:[%s4485_s14 + $0x2d4] sm:$0xf] %v661_v53  ;;  %v663_v54 = vld [vmem:[%s4481_s13 + $0x5b0] sm:$0xf]  ;;  %v665_v55 = vld [vmem:[%s4481_s13 + $0x5b8] sm:$0xf] }
  0x8f   : > { %v667_v56 = vld [vmem:[%s4481_s13 + $0x5c0] sm:$0xf]  ;;  %664 = vst [vmem:[%s4485_s14 + $0x2d8] sm:$0xf] %v663_v54  ;;  %666 = vst [vmem:[%s4485_s14 + $0x2dc] sm:$0xf] %v665_v55 }
  0x90   : > { %668 = vst [vmem:[%s4485_s14 + $0x2e0] sm:$0xf] %v667_v56  ;;  %v669_v57 = vld [vmem:[%s4481_s13 + $0x5c8] sm:$0xf]  ;;  %v671_v58 = vld [vmem:[%s4481_s13 + $0x5d0] sm:$0xf] }
  0x91   : > { %v673_v59 = vld [vmem:[%s4481_s13 + $0x5d8] sm:$0xf]  ;;  %670 = vst [vmem:[%s4485_s14 + $0x2e4] sm:$0xf] %v669_v57  ;;  %672 = vst [vmem:[%s4485_s14 + $0x2e8] sm:$0xf] %v671_v58 }
  0x92   : > { %674 = vst [vmem:[%s4485_s14 + $0x2ec] sm:$0xf] %v673_v59  ;;  %v675_v60 = vld [vmem:[%s4481_s13 + $0x5e0] sm:$0xf]  ;;  %v677_v61 = vld [vmem:[%s4481_s13 + $0x5e8] sm:$0xf] }
  0x93   : > { %v679_v62 = vld [vmem:[%s4481_s13 + $0x5f0] sm:$0xf]  ;;  %676 = vst [vmem:[%s4485_s14 + $0x2f0] sm:$0xf] %v675_v60  ;;  %678 = vst [vmem:[%s4485_s14 + $0x2f4] sm:$0xf] %v677_v61 }
  0x94   : > { %680 = vst [vmem:[%s4485_s14 + $0x2f8] sm:$0xf] %v679_v62  ;;  %v681_v63 = vld [vmem:[%s4481_s13 + $0x5f8] sm:$0xf]  ;;  %v683_v0 = vld [vmem:[%s4481_s13 + $0x600] sm:$0xf] }
  0x95   : > { %v685_v1 = vld [vmem:[%s4481_s13 + $0x608] sm:$0xf]  ;;  %682 = vst [vmem:[%s4485_s14 + $0x2fc] sm:$0xf] %v681_v63  ;;  %684 = vst [vmem:[%s4485_s14 + $0x300] sm:$0xf] %v683_v0 }
  0x96   : > { %686 = vst [vmem:[%s4485_s14 + $0x304] sm:$0xf] %v685_v1  ;;  %v687_v2 = vld [vmem:[%s4481_s13 + $0x610] sm:$0xf]  ;;  %v689_v3 = vld [vmem:[%s4481_s13 + $0x618] sm:$0xf] }
  0x97   : > { %v691_v4 = vld [vmem:[%s4481_s13 + $0x620] sm:$0xf]  ;;  %688 = vst [vmem:[%s4485_s14 + $0x308] sm:$0xf] %v687_v2  ;;  %690 = vst [vmem:[%s4485_s14 + $0x30c] sm:$0xf] %v689_v3 }
  0x98   : > { %692 = vst [vmem:[%s4485_s14 + $0x310] sm:$0xf] %v691_v4  ;;  %v693_v5 = vld [vmem:[%s4481_s13 + $0x628] sm:$0xf]  ;;  %v695_v6 = vld [vmem:[%s4481_s13 + $0x630] sm:$0xf] }
  0x99   : > { %v697_v7 = vld [vmem:[%s4481_s13 + $0x638] sm:$0xf]  ;;  %694 = vst [vmem:[%s4485_s14 + $0x314] sm:$0xf] %v693_v5  ;;  %696 = vst [vmem:[%s4485_s14 + $0x318] sm:$0xf] %v695_v6 }
  0x9a   : > { %698 = vst [vmem:[%s4485_s14 + $0x31c] sm:$0xf] %v697_v7  ;;  %v699_v8 = vld [vmem:[%s4481_s13 + $0x640] sm:$0xf]  ;;  %v701_v9 = vld [vmem:[%s4481_s13 + $0x648] sm:$0xf] }
  0x9b   : > { %v703_v10 = vld [vmem:[%s4481_s13 + $0x650] sm:$0xf]  ;;  %700 = vst [vmem:[%s4485_s14 + $0x320] sm:$0xf] %v699_v8  ;;  %702 = vst [vmem:[%s4485_s14 + $0x324] sm:$0xf] %v701_v9 }
  0x9c   : > { %704 = vst [vmem:[%s4485_s14 + $0x328] sm:$0xf] %v703_v10  ;;  %v705_v11 = vld [vmem:[%s4481_s13 + $0x658] sm:$0xf]  ;;  %v707_v12 = vld [vmem:[%s4481_s13 + $0x660] sm:$0xf] }
  0x9d   : > { %v709_v13 = vld [vmem:[%s4481_s13 + $0x668] sm:$0xf]  ;;  %706 = vst [vmem:[%s4485_s14 + $0x32c] sm:$0xf] %v705_v11  ;;  %708 = vst [vmem:[%s4485_s14 + $0x330] sm:$0xf] %v707_v12 }
  0x9e   : > { %710 = vst [vmem:[%s4485_s14 + $0x334] sm:$0xf] %v709_v13  ;;  %v711_v14 = vld [vmem:[%s4481_s13 + $0x670] sm:$0xf]  ;;  %v713_v15 = vld [vmem:[%s4481_s13 + $0x678] sm:$0xf] }
  0x9f   : > { %v715_v16 = vld [vmem:[%s4481_s13 + $0x680] sm:$0xf]  ;;  %712 = vst [vmem:[%s4485_s14 + $0x338] sm:$0xf] %v711_v14  ;;  %714 = vst [vmem:[%s4485_s14 + $0x33c] sm:$0xf] %v713_v15 }
  0xa0   : > { %716 = vst [vmem:[%s4485_s14 + $0x340] sm:$0xf] %v715_v16  ;;  %v717_v17 = vld [vmem:[%s4481_s13 + $0x688] sm:$0xf]  ;;  %v719_v18 = vld [vmem:[%s4481_s13 + $0x690] sm:$0xf] }
  0xa1   : > { %v721_v19 = vld [vmem:[%s4481_s13 + $0x698] sm:$0xf]  ;;  %718 = vst [vmem:[%s4485_s14 + $0x344] sm:$0xf] %v717_v17  ;;  %720 = vst [vmem:[%s4485_s14 + $0x348] sm:$0xf] %v719_v18 }
  0xa2   : > { %722 = vst [vmem:[%s4485_s14 + $0x34c] sm:$0xf] %v721_v19  ;;  %v723_v20 = vld [vmem:[%s4481_s13 + $0x6a0] sm:$0xf]  ;;  %v725_v21 = vld [vmem:[%s4481_s13 + $0x6a8] sm:$0xf] }
  0xa3   : > { %v727_v22 = vld [vmem:[%s4481_s13 + $0x6b0] sm:$0xf]  ;;  %724 = vst [vmem:[%s4485_s14 + $0x350] sm:$0xf] %v723_v20  ;;  %726 = vst [vmem:[%s4485_s14 + $0x354] sm:$0xf] %v725_v21 }
  0xa4   : > { %728 = vst [vmem:[%s4485_s14 + $0x358] sm:$0xf] %v727_v22  ;;  %v729_v23 = vld [vmem:[%s4481_s13 + $0x6b8] sm:$0xf]  ;;  %v731_v24 = vld [vmem:[%s4481_s13 + $0x6c0] sm:$0xf] }
  0xa5   : > { %v733_v25 = vld [vmem:[%s4481_s13 + $0x6c8] sm:$0xf]  ;;  %730 = vst [vmem:[%s4485_s14 + $0x35c] sm:$0xf] %v729_v23  ;;  %732 = vst [vmem:[%s4485_s14 + $0x360] sm:$0xf] %v731_v24 }
  0xa6   : > { %734 = vst [vmem:[%s4485_s14 + $0x364] sm:$0xf] %v733_v25  ;;  %v735_v26 = vld [vmem:[%s4481_s13 + $0x6d0] sm:$0xf]  ;;  %v737_v27 = vld [vmem:[%s4481_s13 + $0x6d8] sm:$0xf] }
  0xa7   : > { %v739_v28 = vld [vmem:[%s4481_s13 + $0x6e0] sm:$0xf]  ;;  %736 = vst [vmem:[%s4485_s14 + $0x368] sm:$0xf] %v735_v26  ;;  %738 = vst [vmem:[%s4485_s14 + $0x36c] sm:$0xf] %v737_v27 }
  0xa8   : > { %740 = vst [vmem:[%s4485_s14 + $0x370] sm:$0xf] %v739_v28  ;;  %v741_v29 = vld [vmem:[%s4481_s13 + $0x6e8] sm:$0xf]  ;;  %v743_v30 = vld [vmem:[%s4481_s13 + $0x6f0] sm:$0xf] }
  0xa9   : > { %v745_v31 = vld [vmem:[%s4481_s13 + $0x6f8] sm:$0xf]  ;;  %742 = vst [vmem:[%s4485_s14 + $0x374] sm:$0xf] %v741_v29  ;;  %744 = vst [vmem:[%s4485_s14 + $0x378] sm:$0xf] %v743_v30 }
  0xaa   : > { %746 = vst [vmem:[%s4485_s14 + $0x37c] sm:$0xf] %v745_v31  ;;  %v747_v32 = vld [vmem:[%s4481_s13 + $0x700] sm:$0xf]  ;;  %v749_v33 = vld [vmem:[%s4481_s13 + $0x708] sm:$0xf] }
  0xab   : > { %v751_v34 = vld [vmem:[%s4481_s13 + $0x710] sm:$0xf]  ;;  %748 = vst [vmem:[%s4485_s14 + $0x380] sm:$0xf] %v747_v32  ;;  %750 = vst [vmem:[%s4485_s14 + $0x384] sm:$0xf] %v749_v33 }
  0xac   : > { %752 = vst [vmem:[%s4485_s14 + $0x388] sm:$0xf] %v751_v34  ;;  %v753_v35 = vld [vmem:[%s4481_s13 + $0x718] sm:$0xf]  ;;  %v755_v36 = vld [vmem:[%s4481_s13 + $0x720] sm:$0xf] }
  0xad   : > { %v757_v37 = vld [vmem:[%s4481_s13 + $0x728] sm:$0xf]  ;;  %754 = vst [vmem:[%s4485_s14 + $0x38c] sm:$0xf] %v753_v35  ;;  %756 = vst [vmem:[%s4485_s14 + $0x390] sm:$0xf] %v755_v36 }
  0xae   : > { %758 = vst [vmem:[%s4485_s14 + $0x394] sm:$0xf] %v757_v37  ;;  %v759_v38 = vld [vmem:[%s4481_s13 + $0x730] sm:$0xf]  ;;  %v761_v39 = vld [vmem:[%s4481_s13 + $0x738] sm:$0xf] }
  0xaf   : > { %v763_v40 = vld [vmem:[%s4481_s13 + $0x740] sm:$0xf]  ;;  %760 = vst [vmem:[%s4485_s14 + $0x398] sm:$0xf] %v759_v38  ;;  %762 = vst [vmem:[%s4485_s14 + $0x39c] sm:$0xf] %v761_v39 }
  0xb0   : > { %764 = vst [vmem:[%s4485_s14 + $0x3a0] sm:$0xf] %v763_v40  ;;  %v765_v41 = vld [vmem:[%s4481_s13 + $0x748] sm:$0xf]  ;;  %v767_v42 = vld [vmem:[%s4481_s13 + $0x750] sm:$0xf] }
  0xb1   : > { %v769_v43 = vld [vmem:[%s4481_s13 + $0x758] sm:$0xf]  ;;  %766 = vst [vmem:[%s4485_s14 + $0x3a4] sm:$0xf] %v765_v41  ;;  %768 = vst [vmem:[%s4485_s14 + $0x3a8] sm:$0xf] %v767_v42 }
  0xb2   : > { %770 = vst [vmem:[%s4485_s14 + $0x3ac] sm:$0xf] %v769_v43  ;;  %v771_v44 = vld [vmem:[%s4481_s13 + $0x760] sm:$0xf]  ;;  %v773_v45 = vld [vmem:[%s4481_s13 + $0x768] sm:$0xf] }
  0xb3   : > { %v775_v46 = vld [vmem:[%s4481_s13 + $0x770] sm:$0xf]  ;;  %772 = vst [vmem:[%s4485_s14 + $0x3b0] sm:$0xf] %v771_v44  ;;  %774 = vst [vmem:[%s4485_s14 + $0x3b4] sm:$0xf] %v773_v45 }
  0xb4   : > { %776 = vst [vmem:[%s4485_s14 + $0x3b8] sm:$0xf] %v775_v46  ;;  %v777_v47 = vld [vmem:[%s4481_s13 + $0x778] sm:$0xf]  ;;  %v779_v48 = vld [vmem:[%s4481_s13 + $0x780] sm:$0xf] }
  0xb5   : > { %v781_v49 = vld [vmem:[%s4481_s13 + $0x788] sm:$0xf]  ;;  %778 = vst [vmem:[%s4485_s14 + $0x3bc] sm:$0xf] %v777_v47  ;;  %780 = vst [vmem:[%s4485_s14 + $0x3c0] sm:$0xf] %v779_v48 }
  0xb6   : > { %782 = vst [vmem:[%s4485_s14 + $0x3c4] sm:$0xf] %v781_v49  ;;  %v783_v50 = vld [vmem:[%s4481_s13 + $0x790] sm:$0xf]  ;;  %v785_v51 = vld [vmem:[%s4481_s13 + $0x798] sm:$0xf] }
  0xb7   : > { %v787_v52 = vld [vmem:[%s4481_s13 + $0x7a0] sm:$0xf]  ;;  %784 = vst [vmem:[%s4485_s14 + $0x3c8] sm:$0xf] %v783_v50  ;;  %786 = vst [vmem:[%s4485_s14 + $0x3cc] sm:$0xf] %v785_v51 }
  0xb8   : > { %788 = vst [vmem:[%s4485_s14 + $0x3d0] sm:$0xf] %v787_v52  ;;  %v789_v53 = vld [vmem:[%s4481_s13 + $0x7a8] sm:$0xf]  ;;  %v791_v54 = vld [vmem:[%s4481_s13 + $0x7b0] sm:$0xf] }
  0xb9   : > { %v793_v55 = vld [vmem:[%s4481_s13 + $0x7b8] sm:$0xf]  ;;  %790 = vst [vmem:[%s4485_s14 + $0x3d4] sm:$0xf] %v789_v53  ;;  %792 = vst [vmem:[%s4485_s14 + $0x3d8] sm:$0xf] %v791_v54 }
  0xba   : > { %794 = vst [vmem:[%s4485_s14 + $0x3dc] sm:$0xf] %v793_v55  ;;  %v795_v56 = vld [vmem:[%s4481_s13 + $0x7c0] sm:$0xf]  ;;  %v797_v57 = vld [vmem:[%s4481_s13 + $0x7c8] sm:$0xf] }
  0xbb   : > { %v799_v58 = vld [vmem:[%s4481_s13 + $0x7d0] sm:$0xf]  ;;  %796 = vst [vmem:[%s4485_s14 + $0x3e0] sm:$0xf] %v795_v56  ;;  %798 = vst [vmem:[%s4485_s14 + $0x3e4] sm:$0xf] %v797_v57 }
  0xbc   : > { %800 = vst [vmem:[%s4485_s14 + $0x3e8] sm:$0xf] %v799_v58  ;;  %v801_v59 = vld [vmem:[%s4481_s13 + $0x7d8] sm:$0xf]  ;;  %v803_v60 = vld [vmem:[%s4481_s13 + $0x7e0] sm:$0xf] }
  0xbd   : > { %v805_v61 = vld [vmem:[%s4481_s13 + $0x7e8] sm:$0xf]  ;;  %802 = vst [vmem:[%s4485_s14 + $0x3ec] sm:$0xf] %v801_v59  ;;  %804 = vst [vmem:[%s4485_s14 + $0x3f0] sm:$0xf] %v803_v60 }
  0xbe   : > { %806 = vst [vmem:[%s4485_s14 + $0x3f4] sm:$0xf] %v805_v61  ;;  %v807_v62 = vld [vmem:[%s4481_s13 + $0x7f0] sm:$0xf]  ;;  %v809_v63 = vld [vmem:[%s4481_s13 + $0x7f8] sm:$0xf] }
  0xbf   : > { %808 = vst [vmem:[%s4485_s14 + $0x3f8] sm:$0xf] %v807_v62  ;;  %810 = vst [vmem:[%s4485_s14 + $0x3fc] sm:$0xf] %v809_v63 }
  0xc0 PF: > { %p3810_p8 = scmp.ge.s32.totalorder %s4396_s25, 1  ;;  %p1350_p9 = scmp.lt.s32.totalorder %s4396_s25, 3 }
  0xc2   : > { %p1351_p10 = pnand %p3810_p8, %p1350_p9 }
  0xc3   : > { %s1357_s15 = sand.u32 (!%p1351_p10), 1, %s4380_s21   ;;  %v1558_v1 = vlaneseq (!%p1351_p10)  ;;  %v1458_v10 = vld [vmem:[%s5598_s0] sm:$0xff] (!%p1351_p10)  ;;  %v1459_v16 = vld [vmem:[%s5598_s0 + $0x8] sm:$0xff] (!%p1351_p10)  ;;  %p1427_p11 = scmp.lt.s32.totalorder (!%p1351_p10), %s4388_s23, 1 }
  0xc4   : > { %1354 = sbr.rel (%p1351_p10) target bundleno = 579 (0x243), region = 77  ;;  %s3811_s16 = sshll.u32 (!%p1351_p10), %s1357_s15, 10  ;;  %v5020_v11 = vld [vmem:[%s5601_s3] sm:$0xff] (!%p1351_p10)  ;;  %v1467_v18 = vld [vmem:[%s5598_s0 + $0x48] sm:$0xff] (!%p1351_p10)  ;;  %v1491_v23 = vunpack.c.h.bf16 (!%p1351_p10), %v1458_v10  ;;  %v1493_v29 = vunpack.c.h.bf16 (!%p1351_p10), %v1459_v16  ;;  %v1490_v35 = vunpack.c.l.bf16 (!%p1351_p10), %v1458_v10  ;;  %v1492_v43 = vunpack.c.l.bf16 (!%p1351_p10), %v1459_v16 }
  0xc5   : > { %s5002_s17 = scalar_lea.vmem (!%p1351_p10), [#allocation3], %s3811_s16  ;;  %v5009_v6 = vshrl.u32 (!%p1351_p10), %v1558_v1, 7  ;;  %v1466_v13 = vld [vmem:[%s5598_s0 + $0x40] sm:$0xff] (!%p1351_p10)  ;;  %v1509_v33 = vunpack.c.h.bf16 (!%p1351_p10), %v1467_v18  ;;  %v1508_v48 = vunpack.c.l.bf16 (!%p1351_p10), %v1467_v18  ;;  %s3812_s29 = sshll.u32 (!%p1351_p10), %s1357_s15, 4 }
  0xc6   : > { %v4230_v0 = vld [vmem:[%s5002_s17 + $0x40] sm:$0xff] (!%p1351_p10)   ;;  %v4234_v5 = vld [vmem:[%s5002_s17 + $0x48] sm:$0xff] (!%p1351_p10)   ;;  %v4238_v12 = vld [vmem:[%s5002_s17 + $0x50] sm:$0xff] (!%p1351_p10)   ;;  %v1507_v27 = vunpack.c.h.bf16 (!%p1351_p10), %v1466_v13  ;;  %v1506_v40 = vunpack.c.l.bf16 (!%p1351_p10), %v1466_v13  ;;  %s5565_s8 = scalar_lea.vmem (!%p1351_p10), [#allocation4], %s3812_s29 }
  0xc7   : > { %v4231_v2 = vld [vmem:[%s5002_s17 + $0xc0] sm:$0xff] (!%p1351_p10)   ;;  %3966 = vmatprep.subr.bf16.mxu0 (!%p1351_p10), %v4230_v0  ;;  %v4235_v7 = vld [vmem:[%s5002_s17 + $0xc8] sm:$0xff] (!%p1351_p10)   ;;  %v5027_v14 = vsub.s32 (!%p1351_p10), 1, %v5009_v6  ;;  %v4239_v15 = vld [vmem:[%s5002_s17 + $0xd0] sm:$0xff] (!%p1351_p10)   ;;  %v5038_v19 = vsub.s32 (!%p1351_p10), 3, %v5009_v6  ;;  %v5052_v25 = vsub.s32 (!%p1351_p10), 0, %v5009_v6 }
  0xc8   : > { %v4232_v3 = vld [vmem:[%s5002_s17] sm:$0xff] (!%p1351_p10)   ;;  %3994 = vmatprep.subr.bf16.mxu1 (!%p1351_p10), %v4231_v2  ;;  %v4236_v8 = vld [vmem:[%s5002_s17 + $0x8] sm:$0xff] (!%p1351_p10)   ;;  %v4240_v17 = vld [vmem:[%s5002_s17 + $0x10] sm:$0xff] (!%p1351_p10)   ;;  %v5061_v31 = vsub.s32 (!%p1351_p10), 2, %v5009_v6 }
  0xc9   : > { %v4233_v4 = vld [vmem:[%s5002_s17 + $0x80] sm:$0xff] (!%p1351_p10)   ;;  %3967 = vmatpush3.bf16.msra.mxu0 (!%p1351_p10), %v4232_v3  ;;  %v4237_v9 = vld [vmem:[%s5002_s17 + $0x88] sm:$0xff] (!%p1351_p10)   ;;  %v4241_v20 = vld [vmem:[%s5002_s17 + $0x90] sm:$0xff] (!%p1351_p10)   ;;  %v5049_v24 = vrot.slane (!%p1351_p10), %v5020_v11, %v5027_v14  ;;  %v5058_v30 = vrot.slane (!%p1351_p10), %v5020_v11, %v5038_v19  ;;  %v5072_v38 = vrot.slane (!%p1351_p10), %v5020_v11, %v5052_v25 }
  0xca   : > { %3995 = vmatpush3.bf16.msra.mxu1 (!%p1351_p10), %v4233_v4  ;;  %3968 = vmatprep.subr.bf16.mxu0 (!%p1351_p10), %v4234_v5  ;;  %v5044_v21 = vld [vmem:[%s5602_s4] sm:$0xff] (!%p1351_p10)  ;;  %v4242_v22 = vld [vmem:[%s5002_s17 + $0x58] sm:$0xff] (!%p1351_p10)   ;;  %v5084_v46 = vrot.slane (!%p1351_p10), %v5020_v11, %v5061_v31  ;;  %v4250_v50 = vld [vmem:[%s5002_s17 + $0x68] sm:$0xff] (!%p1351_p10)  }
  0xcb   : > { %3996 = vmatprep.subr.bf16.mxu1 %v4235_v7  ;;  %v4243_v26 = vld [vmem:[%s5002_s17 + $0xd8] sm:$0xff]   ;;  %v4246_v34 = vld [vmem:[%s5002_s17 + $0x60] sm:$0xff]   ;;  %v1639_v36 = vmul.f32 %v5049_v24, %v1491_v23  ;;  %v5068_v37 = vrot.slane %v5044_v21, %v5027_v14  ;;  %v1655_v41 = vmul.f32 %v5049_v24, %v1507_v27  ;;  %v1641_v44 = vmul.f32 %v5058_v30, %v1493_v29  ;;  %v4251_v54 = vld [vmem:[%s5002_s17 + $0xe8] sm:$0xff]   ;;  %s5557_s19 = scalar_select %p1427_p11, %s4388_s23, 1 }
  0xcc   : > { %v4244_v28 = vld [vmem:[%s5002_s17 + $0x18] sm:$0xff]   ;;  %v4247_v39 = vld [vmem:[%s5002_s17 + $0xe0] sm:$0xff]   ;;  %v5080_v45 = vrot.slane %v5044_v21, %v5038_v19  ;;  %v1657_v49 = vmul.f32 %v5058_v30, %v1509_v33  ;;  %v1638_v52 = vmul.f32 %v5072_v38, %v1490_v35  ;;  %v5093_v53 = vrot.slane %v5044_v21, %v5052_v25  ;;  %v4252_v57 = vld [vmem:[%s5002_s17 + $0x28] sm:$0xff]   ;;  %s3948_s10 = sshll.u32 (%p4468_p6), %s4388_s23, 2 }
  0xcd   : > { %3969 = vmatpush3.bf16.msra.mxu0 %v4236_v8  ;;  %v4245_v32 = vld [vmem:[%s5002_s17 + $0x98] sm:$0xff]   ;;  %v4248_v42 = vld [vmem:[%s5002_s17 + $0x20] sm:$0xff]   ;;  %v1787_v51 = vadd.f32 %v5068_v37, %v1639_v36  ;;  %v1803_v55 = vadd.f32 %v5068_v37, %v1655_v41  ;;  %v1654_v56 = vmul.f32 %v5072_v38, %v1506_v40  ;;  %v1640_v59 = vmul.f32 %v5084_v46, %v1492_v43  ;;  %v4253_v61 = vld [vmem:[%s5002_s17 + $0xa8] sm:$0xff]   ;;  %s1429_s28 = scalar_lea.vmem %s5600_s2, %s5557_s19  ;;  %s3813_s21 = sshll.u32 %s5557_s19, 1 }
  0xce   : > { %3997 = vmatpush3.bf16.msra.mxu1 %v4237_v9  ;;  %3970 = vmatprep.subr.bf16.mxu0 %v4238_v12  ;;  %v4249_v47 = vld [vmem:[%s5002_s17 + $0xa0] sm:$0xff]   ;;  %v1789_v58 = vadd.f32 %v5080_v45, %v1641_v44  ;;  %v5103_v60 = vrot.slane %v5044_v21, %v5061_v31  ;;  %v1805_v62 = vadd.f32 %v5080_v45, %v1657_v49  ;;  %v4254_v0 = vld [vmem:[%s5002_s17 + $0x70] sm:$0xff]   ;;  %v4258_v9 = vld [vmem:[%s5002_s17 + $0x78] sm:$0xff]   ;;  %s3584_s13 = scalar_lea.vmem (%p4468_p6), %s5603_s5, %s3948_s10 }
  0xcf   : > { %3998 = vmatprep.subr.bf16.mxu1 %v4239_v15  ;;  %v1656_v63 = vmul.f32 %v5084_v46, %v1508_v48  ;;  %vm1851_vm0 = vcmp.ge.f32.partialorder %v1787_v51, 0.0  ;;  %v1786_v1 = vadd.f32 %v5093_v53, %v1638_v52  ;;  %v4255_v2 = vld [vmem:[%s5002_s17 + $0xf0] sm:$0xff]   ;;  %vm1867_vm1 = vcmp.ge.f32.partialorder %v1803_v55, 0.0  ;;  %v4259_v10 = vld [vmem:[%s5002_s17 + $0xf8] sm:$0xff]   ;;  %v1474_v23 = vld [vmem:[%s5598_s0 + $0x80] sm:$0xff] }
  0xd0   : > { %v1802_v3 = vadd.f32 %v5093_v53, %v1654_v56  ;;  %v4256_v4 = vld [vmem:[%s5002_s17 + $0x30] sm:$0xff]   ;;  %vm1853_vm2 = vcmp.ge.f32.partialorder %v1789_v58, 0.0  ;;  %v1788_v5 = vadd.f32 %v5103_v60, %v1640_v59  ;;  %vm1869_vm3 = vcmp.ge.f32.partialorder %v1805_v62, 0.0  ;;  %v4260_v12 = vld [vmem:[%s5002_s17 + $0x38] sm:$0xff]   ;;  %v1475_v40 = vld [vmem:[%s5598_s0 + $0x88] sm:$0xff] }
  0xd1   : > { %3971 = vmatpush3.bf16.msra.mxu0 %v4240_v17  ;;  %v4257_v7 = vld [vmem:[%s5002_s17 + $0xb0] sm:$0xff]   ;;  %v1804_v8 = vadd.f32 %v5103_v60, %v1656_v63  ;;  %vm1850_vm4 = vcmp.ge.f32.partialorder %v1786_v1, 0.0  ;;  %v4261_v13 = vld [vmem:[%s5002_s17 + $0xb8] sm:$0xff]   ;;  %v1915_v15 = vmul.f32 0.2, %v1787_v51  ;;  %v4264_v48 = vld [vmem:[%s5002_s17 + $0x100] sm:$0xff]  }
  0xd2   : > { %3999 = vmatpush3.bf16.msra.mxu1 %v4241_v20  ;;  %3972 = vmatprep.subr.bf16.mxu0 %v4242_v22  ;;  %vm1866_vm5 = vcmp.ge.f32.partialorder %v1802_v3, 0.0  ;;  %vm1852_vm6 = vcmp.ge.f32.partialorder %v1788_v5, 0.0  ;;  %v1931_v16 = vmul.f32 0.2, %v1803_v55  ;;  %v1917_v17 = vmul.f32 0.2, %v1789_v58 }
  0xd3   : > { %4000 = vmatprep.subr.bf16.mxu1 %v4243_v26  ;;  %vm1868_vm7 = vcmp.ge.f32.partialorder %v1804_v8, 0.0  ;;  %v1933_v18 = vmul.f32 0.2, %v1805_v62  ;;  %v1914_v20 = vmul.f32 0.2, %v1786_v1  ;;  %v1979_v26 = vsel %vm1851_vm0, %v1787_v51, %v1915_v15  ;;  %v4267_v56 = vld [vmem:[%s5002_s17 + $0x1c8] sm:$0xff]  }
  0xd4   : > { %v1930_v22 = vmul.f32 0.2, %v1802_v3  ;;  %v1995_v27 = vsel %vm1867_vm1, %v1803_v55, %v1931_v16  ;;  %v1916_v29 = vmul.f32 0.2, %v1788_v5  ;;  %v1932_v43 = vmul.f32 0.2, %v1804_v8 }
  0xd5   : > { %3973 = vmatpush3.bf16.msra.mxu0 %v4244_v28  ;;  %v1981_v28 = vsel %vm1853_vm2, %v1789_v58, %v1917_v17  ;;  %v2043_v33 = vpack.c.bf16 %v1995_v27, %v1979_v26  ;;  %v1978_v35 = vsel %vm1850_vm4, %v1786_v1, %v1914_v20  ;;  %v1523_v51 = vunpack.c.h.bf16 %v1474_v23  ;;  %v4268_v59 = vld [vmem:[%s5002_s17 + $0x108] sm:$0xff]   ;;  %v4270_v1 = vld [vmem:[%s5002_s17 + $0x150] sm:$0xff]   ;;  %v4275_v15 = vld [vmem:[%s5002_s17 + $0x1d8] sm:$0xff]  }
  0xd6   : > { %4001 = vmatpush3.bf16.msra.mxu1 %v4245_v32  ;;  %3974 = vmatprep.subr.bf16.mxu0 %v4246_v34  ;;  %v1482_v32 = vld [vmem:[%s5598_s0 + $0xc0] sm:$0xff]  ;;  %v1997_v34 = vsel %vm1869_vm3, %v1805_v62, %v1933_v18  ;;  %v1994_v36 = vsel %vm1866_vm5, %v1802_v3, %v1930_v22  ;;  %v1980_v44 = vsel %vm1852_vm6, %v1788_v5, %v1916_v29  ;;  %v1522_v58 = vunpack.c.l.bf16 %v1474_v23  ;;  %v4269_v62 = vld [vmem:[%s5002_s17 + $0x188] sm:$0xff]   ;;  %v4271_v3 = vld [vmem:[%s5002_s17 + $0x1d0] sm:$0xff]  }
  0xd7   : > { %4002 = vmatprep.subr.bf16.mxu1 %v4247_v39  ;;  %v4262_v39 = vld [vmem:[%s5002_s17 + $0x140] sm:$0xff]   ;;  %v2045_v41 = vpack.c.bf16 %v1997_v34, %v1981_v28  ;;  %3134 = vmatprep.mubr.bf16.mxu0 %v2043_v33  ;;  %v1996_v49 = vsel %vm1868_vm7, %v1804_v8, %v1932_v43  ;;  %v1539_v55 = vunpack.c.h.bf16 %v1482_v32  ;;  %v1671_v63 = vmul.f32 %v5049_v24, %v1523_v51  ;;  %v4276_v17 = vld [vmem:[%s5002_s17 + $0x118] sm:$0xff]   ;;  %v4282_v27 = vld [vmem:[%s5002_s17 + $0x168] sm:$0xff]  }
  0xd8   : > { %v2044_v52 = vpack.c.bf16 %v1996_v49, %v1980_v44  ;;  %v1670_v5 = vmul.f32 %v5072_v38, %v1522_v58  ;;  %v4277_v20 = vld [vmem:[%s5002_s17 + $0x198] sm:$0xff]   ;;  %v4279_v23 = vld [vmem:[%s5002_s17 + $0x1e0] sm:$0xff]   ;;  %v5174_v28 = vsub.s32 4, %v5009_v6  ;;  %v4283_v29 = vld [vmem:[%s5002_s17 + $0x1e8] sm:$0xff]   ;;  %v5185_v43 = vsub.s32 5, %v5009_v6 }
  0xd9   : > { %3975 = vmatpush3.bf16.msra.mxu0 %v4248_v42  ;;  %v2042_v42 = vpack.c.bf16 %v1994_v36, %v1978_v35  ;;  %3183 = vmatprep.mubr.bf16.mxu1 %v2045_v41  ;;  %v4280_v26 = vld [vmem:[%s5002_s17 + $0x120] sm:$0xff]   ;;  %v1483_v34 = vld [vmem:[%s5598_s0 + $0xc8] sm:$0xff]  ;;  %v5195_v58 = vsub.s32 6, %v5009_v6 }
  0xda   : > { %4003 = vmatpush3.bf16.msra.mxu1 %v4249_v47  ;;  %3976 = vmatprep.subr.bf16.mxu0 %v4250_v50  ;;  %v4263_v47 = vld [vmem:[%s5002_s17 + $0x1c0] sm:$0xff]   ;;  %v1541_v35 = vunpack.c.h.bf16 %v1483_v34 }
  0xdb   : > { %4004 = vmatprep.subr.bf16.mxu1 %v4251_v54  ;;  %v4265_v50 = vld [vmem:[%s5002_s17 + $0x180] sm:$0xff]   ;;  %v4266_v54 = vld [vmem:[%s5002_s17 + $0x148] sm:$0xff]  }
  0xdd   : > { %3977 = vmatpush3.bf16.msra.mxu0 %v4252_v57  ;;  %v1525_v57 = vunpack.c.h.bf16 %v1475_v40 }
  0xde   : > { %4005 = vmatpush3.bf16.msra.mxu1 %v4253_v61  ;;  %3978 = vmatprep.subr.bf16.mxu0 %v4254_v0  ;;  %v1538_v61 = vunpack.c.l.bf16 %v1482_v32  ;;  %v1524_v0 = vunpack.c.l.bf16 %v1475_v40 }
  0xdf   : > { %4006 = vmatprep.subr.bf16.mxu1 %v4255_v2  ;;  %v1687_v2 = vmul.f32 %v5049_v24, %v1539_v55  ;;  %v4274_v24 = vld [vmem:[%s5002_s17 + $0x158] sm:$0xff]  }
  0xe0   : > { %v1686_v8 = vmul.f32 %v5072_v38, %v1538_v61  ;;  %v1818_v38 = vadd.f32 %v5093_v53, %v1670_v5  ;;  %v4288_v61 = vld [vmem:[%s5002_s17 + $0x130] sm:$0xff]   ;;  %v4291_v5 = vld [vmem:[%s5002_s17 + $0x1f8] sm:$0xff]  }
  0xe1   : > { %3979 = vmatpush3.bf16.msra.mxu0 %v4256_v4  ;;  %v1673_v4 = vmul.f32 %v5058_v30, %v1525_v57  ;;  %v4287_v57 = vld [vmem:[%s5002_s17 + $0x1f0] sm:$0xff]  }
  0xe2   : > { %4007 = vmatpush3.bf16.msra.mxu1 %v4257_v7  ;;  %3980 = vmatprep.subr.bf16.mxu0 %v4258_v9  ;;  %v4272_v7 = vld [vmem:[%s5002_s17 + $0x110] sm:$0xff]   ;;  %v1834_v18 = vadd.f32 %v5093_v53, %v1686_v8  ;;  %vm1882_vm11 = vcmp.ge.f32.partialorder %v1818_v38, 0.0  ;;  %v4281_v53 = vld [vmem:[%s5002_s17 + $0x1a0] sm:$0xff]   ;;  %v1946_v49 = vmul.f32 0.2, %v1818_v38  ;;  %v4292_v8 = vld [vmem:[%s5002_s17 + $0x138] sm:$0xff]  }
  0xe3   : > { %4008 = vmatprep.subr.bf16.mxu1 %v4259_v10  ;;  %v4273_v9 = vld [vmem:[%s5002_s17 + $0x190] sm:$0xff]   ;;  %v1819_v10 = vadd.f32 %v5068_v37, %v1671_v63  ;;  %v5160_v16 = vadd.f32 %v5080_v45, %v1673_v4 }
  0xe4   : > { %vm1898_vm12 = vcmp.ge.f32.partialorder %v1834_v18, 0.0  ;;  %v1962_v51 = vmul.f32 0.2, %v1834_v18 }
  0xe5   : > { %3981 = vmatpush3.bf16.msra.mxu0 %v4260_v12  ;;  %v1672_v12 = vmul.f32 %v5084_v46, %v1524_v0  ;;  %vm1883_vm8 = vcmp.ge.f32.partialorder %v1819_v10, 0.0  ;;  %vm1885_vm10 = vcmp.ge.f32.partialorder %v5160_v16, 0.0  ;;  %v1947_v32 = vmul.f32 0.2, %v1819_v10  ;;  %v4289_v0 = vld [vmem:[%s5002_s17 + $0x1b0] sm:$0xff]  }
  0xe6   : > { %4009 = vmatpush3.bf16.msra.mxu1 %v4261_v13  ;;  %4022 = vmatprep.subr.bf16.mxu0 %v4262_v39  ;;  %v1835_v13 = vadd.f32 %v5068_v37, %v1687_v2  ;;  %v4278_v37 = vld [vmem:[%s5002_s17 + $0x160] sm:$0xff]   ;;  %v1949_v36 = vmul.f32 0.2, %v5160_v16  ;;  %v1540_v39 = vunpack.c.l.bf16 %v1483_v34 }
  0xe7   : > { %4050 = vmatprep.subr.bf16.mxu1 %v4263_v47  ;;  %v1820_v22 = vadd.f32 %v5103_v60, %v1672_v12  ;;  %v2011_v40 = vsel %vm1883_vm8, %v1819_v10, %v1947_v32  ;;  %v1689_v47 = vmul.f32 %v5058_v30, %v1541_v35  ;;  %v2026_v30 = vsel %vm1898_vm12, %v1834_v18, %v1962_v51  ;;  %v4294_v32 = vld [vmem:[%s5002_s17 + $0x240] sm:$0xff]  }
  0xe8   : > { %3135 = vmatmul.mubr.bf16.vlgmr.msra.gmra.mrb[0].mxu0 %v2042_v42  ;;  %vm1899_vm9 = vcmp.ge.f32.partialorder %v1835_v13, 0.0  ;;  %v1963_v33 = vmul.f32 0.2, %v1835_v13  ;;  %v4284_v42 = vld [vmem:[%s5002_s17 + $0x128] sm:$0xff]   ;;  %v5217_v10 = vrot.slane %v5020_v11, %v5185_v43  ;;  %v5221_v12 = vrot.slane %v5044_v21, %v5174_v28 }
  0xe9   : > { %4023 = vmatpush3.bf16.msra.mxu0 %v4264_v48  ;;  %3184 = vmatmul.mubr.bf16.vlgmr.msra.gmra.mrb[0].mxu1 %v2044_v52  ;;  %vm1884_vm13 = vcmp.ge.f32.partialorder %v1820_v22, 0.0  ;;  %v4285_v48 = vld [vmem:[%s5002_s17 + $0x1a8] sm:$0xff]   ;;  %v1688_v52 = vmul.f32 %v5084_v46, %v1540_v39  ;;  %v1837_v55 = vadd.f32 %v5080_v45, %v1689_v47  ;;  %v5201_v46 = vsub.s32 7, %v5009_v6  ;;  %v4295_v39 = vld [vmem:[%s5002_s17 + $0x2c0] sm:$0xff]  }
  0xea   : > { %4024 = vmatprep.subr.bf16.mxu0 %v4266_v54  ;;  %4051 = vmatpush3.bf16.msra.mxu1 %v4265_v50  ;;  %v2027_v41 = vsel %vm1899_vm9, %v1835_v13, %v1963_v33  ;;  %v4286_v50 = vld [vmem:[%s5002_s17 + $0x170] sm:$0xff]   ;;  %v1948_v54 = vmul.f32 0.2, %v1820_v22  ;;  %v2013_v45 = vsel %vm1885_vm10, %v5160_v16, %v1949_v36  ;;  %v5233_v16 = vrot.slane %v5020_v11, %v5195_v58 }
  0xeb   : > { %4052 = vmatprep.subr.bf16.mxu1 %v4267_v56  ;;  %v2059_v44 = vpack.c.bf16 %v2027_v41, %v2011_v40  ;;  %v2010_v56 = vsel %vm1882_vm11, %v1818_v38, %v1946_v49  ;;  %vm1901_vm14 = vcmp.ge.f32.partialorder %v1837_v55, 0.0  ;;  %v1460_v13 = vld [vmem:[%s5598_s0 + $0x10] sm:$0xff]  ;;  %v5237_v38 = vrot.slane %v5020_v11, %v5201_v46 }
  0xec   : > { %v2058_v63 = vpack.c.bf16 %v2026_v30, %v2010_v56  ;;  %v2012_v2 = vsel %vm1884_vm13, %v1820_v22, %v1948_v54  ;;  %v1494_v18 = vunpack.c.l.bf16 %v1460_v13  ;;  %v1461_v22 = vld [vmem:[%s5598_s0 + $0x18] sm:$0xff] }
  0xed   : > { %4025 = vmatpush3.bf16.msra.mxu0 %v4268_v59  ;;  %3142 = vmatprep.mubr.bf16.mxu0 %v2059_v44  ;;  %v1836_v59 = vadd.f32 %v5103_v60, %v1688_v52  ;;  %v4290_v60 = vld [vmem:[%s5002_s17 + $0x178] sm:$0xff]  }
  0xee   : > { %4026 = vmatprep.subr.bf16.mxu0 %v4270_v1  ;;  %4053 = vmatpush3.bf16.msra.mxu1 %v4269_v62  ;;  %v1965_v62 = vmul.f32 0.2, %v1837_v55 }
  0xef   : > { %4054 = vmatprep.subr.bf16.mxu1 %v4271_v3  ;;  %vm1900_vm15 = vcmp.ge.f32.partialorder %v1836_v59, 0.0  ;;  %v1964_v1 = vmul.f32 0.2, %v1836_v59 }
  0xf0   : > { %v2029_v6 = vsel %vm1901_vm14, %v1837_v55, %v1965_v62  ;;  %3143 = vmatmul.mubr.bf16.gmra.mrb[4].mxu0 %v2058_v63 }
  0xf1   : > { %4027 = vmatpush3.bf16.msra.mxu0 %v4272_v7  ;;  %v2061_v3 = vpack.c.bf16 %v2029_v6, %v2013_v45  ;;  %v2028_v4 = vsel %vm1900_vm15, %v1836_v59, %v1964_v1  ;;  %v4296_v6 = vld [vmem:[%s5002_s17 + $0x200] sm:$0xff]  }
  0xf2   : > { %4028 = vmatprep.subr.bf16.mxu0 %v4274_v24  ;;  %4055 = vmatpush3.bf16.msra.mxu1 %v4273_v9  ;;  %v2060_v7 = vpack.c.bf16 %v2028_v4, %v2012_v2  ;;  %v5213_v9 = vrot.slane %v5020_v11, %v5174_v28  ;;  %v4293_v24 = vld [vmem:[%s5002_s17 + $0x1b8] sm:$0xff]   ;;  %v5250_v11 = vrot.slane %v5044_v21, %v5201_v46 }
  0xf3   : > { %4056 = vmatprep.subr.bf16.mxu1 %v4275_v15  ;;  %3191 = vmatprep.mubr.bf16.mxu1 %v2061_v3  ;;  %v5229_v15 = vrot.slane %v5044_v21, %v5185_v43 }
  0xf4   : > { %3192 = vmatmul.mubr.bf16.gmra.mrb[4].mxu1 %v2060_v7  ;;  %v1642_v33 = vmul.f32 %v5213_v9, %v1494_v18  ;;  %v1476_v18 = vld [vmem:[%s5598_s0 + $0x90] sm:$0xff] }
  0xf5   : > { %4029 = vmatpush3.bf16.msra.mxu0 %v4276_v17  ;;  %v1468_v17 = vld [vmem:[%s5598_s0 + $0x50] sm:$0xff] }
  0xf6   : > { %4030 = vmatprep.subr.bf16.mxu0 %v4278_v37  ;;  %4057 = vmatpush3.bf16.msra.mxu1 %v4277_v20  ;;  %v1495_v20 = vunpack.c.h.bf16 %v1460_v13  ;;  %v1469_v37 = vld [vmem:[%s5598_s0 + $0x58] sm:$0xff]  ;;  %v1790_v49 = vadd.f32 %v5221_v12, %v1642_v33  ;;  %v4297_v13 = vld [vmem:[%s5002_s17 + $0x280] sm:$0xff]  }
  0xf7   : > { %4058 = vmatprep.subr.bf16.mxu1 %v4279_v23  ;;  %v5254_v23 = vrot.slane %v5044_v21, %v5195_v58  ;;  %v1512_v35 = vunpack.c.l.bf16 %v1469_v37  ;;  %v1513_v36 = vunpack.c.h.bf16 %v1469_v37  ;;  %v4299_v37 = vld [vmem:[%s5002_s17 + $0x2c8] sm:$0xff]  }
  0xf8   : > { %v1643_v34 = vmul.f32 %v5217_v10, %v1495_v20  ;;  %vm1854_vm1 = vcmp.ge.f32.partialorder %v1790_v49, 0.0  ;;  %v1918_v63 = vmul.f32 0.2, %v1790_v49  ;;  %v1484_v20 = vld [vmem:[%s5598_s0 + $0xd0] sm:$0xff] }
  0xf9   : > { %4031 = vmatpush3.bf16.msra.mxu0 %v4280_v26  ;;  %v1510_v26 = vunpack.c.l.bf16 %v1468_v17  ;;  %v1660_v47 = vmul.f32 %v5233_v16, %v1512_v35  ;;  %v1542_v33 = vunpack.c.l.bf16 %v1484_v20 }
  0xfa   : > { %4032 = vmatprep.subr.bf16.mxu0 %v4282_v27  ;;  %4059 = vmatpush3.bf16.msra.mxu1 %v4281_v53  ;;  %v1511_v53 = vunpack.c.h.bf16 %v1468_v17  ;;  %v1496_v27 = vunpack.c.l.bf16 %v1461_v22  ;;  %v1791_v44 = vadd.f32 %v5229_v15, %v1643_v34  ;;  %v1982_v4 = vsel %vm1854_vm1, %v1790_v49, %v1918_v63  ;;  %v4298_v17 = vld [vmem:[%s5002_s17 + $0x248] sm:$0xff]   ;;  %v1477_v34 = vld [vmem:[%s5598_s0 + $0x98] sm:$0xff] }
  0xfb   : > { %4060 = vmatprep.subr.bf16.mxu1 %v4283_v29  ;;  %v1497_v29 = vunpack.c.h.bf16 %v1461_v22  ;;  %v1658_v40 = vmul.f32 %v5213_v9, %v1510_v26  ;;  %v1527_v26 = vunpack.c.h.bf16 %v1476_v18  ;;  %v1528_v49 = vunpack.c.l.bf16 %v1477_v34 }
  0xfc   : > { %v1659_v41 = vmul.f32 %v5217_v10, %v1511_v53  ;;  %v1644_v21 = vmul.f32 %v5233_v16, %v1496_v27  ;;  %vm1855_vm0 = vcmp.ge.f32.partialorder %v1791_v44, 0.0  ;;  %v1919_v55 = vmul.f32 0.2, %v1791_v44 }
  0xfd   : > { %4033 = vmatpush3.bf16.msra.mxu0 %v4284_v42  ;;  %v1645_v42 = vmul.f32 %v5237_v38, %v1497_v29  ;;  %v1806_v52 = vadd.f32 %v5221_v12, %v1658_v40  ;;  %v1543_v53 = vunpack.c.h.bf16 %v1484_v20  ;;  %v1526_v27 = vunpack.c.l.bf16 %v1476_v18  ;;  %v4309_v18 = vld [vmem:[%s5002_s17 + $0x298] sm:$0xff]  }
  0xfe   : > { %4034 = vmatprep.subr.bf16.mxu0 %v4286_v50  ;;  %4061 = vmatpush3.bf16.msra.mxu1 %v4285_v48  ;;  %v1661_v48 = vmul.f32 %v5237_v38, %v1513_v36  ;;  %v1807_v50 = vadd.f32 %v5229_v15, %v1659_v41  ;;  %v1792_v54 = vadd.f32 %v5254_v23, %v1644_v21  ;;  %v1485_v41 = vld [vmem:[%s5598_s0 + $0xd8] sm:$0xff]  ;;  %v4301_v21 = vld [vmem:[%s5002_s17 + $0x288] sm:$0xff]  }
  0xff   : > { %4062 = vmatprep.subr.bf16.mxu1 %v4287_v57  ;;  %v1793_v51 = vadd.f32 %v5250_v11, %v1645_v42  ;;  %v1983_v59 = vsel %vm1855_vm0, %v1791_v44, %v1919_v55  ;;  %vm1870_vm5 = vcmp.ge.f32.partialorder %v1806_v52, 0.0  ;;  %v1675_v36 = vmul.f32 %v5217_v10, %v1527_v26  ;;  %v4302_v44 = vld [vmem:[%s5002_s17 + $0x250] sm:$0xff]  }
 0x100   : > { %v1809_v56 = vadd.f32 %v5250_v11, %v1661_v48  ;;  %vm1871_vm2 = vcmp.ge.f32.partialorder %v1807_v50, 0.0  ;;  %v1935_v57 = vmul.f32 0.2, %v1807_v50  ;;  %vm1856_vm6 = vcmp.ge.f32.partialorder %v1792_v54, 0.0 }
 0x101   : > { %4035 = vmatpush3.bf16.msra.mxu0 %v4288_v61  ;;  %vm1857_vm3 = vcmp.ge.f32.partialorder %v1793_v51, 0.0  ;;  %v1921_v30 = vmul.f32 0.2, %v1793_v51  ;;  %v1920_v7 = vmul.f32 0.2, %v1792_v54  ;;  %v1674_v40 = vmul.f32 %v5213_v9, %v1526_v27 }
 0x102   : > { %4063 = vmatpush3.bf16.msra.mxu1 %v4289_v0  ;;  %4036 = vmatprep.subr.bf16.mxu0 %v4290_v60  ;;  %vm1873_vm4 = vcmp.ge.f32.partialorder %v1809_v56, 0.0  ;;  %v1937_v61 = vmul.f32 0.2, %v1809_v56  ;;  %v1999_v62 = vsel %vm1871_vm2, %v1807_v50, %v1935_v57  ;;  %v1934_v0 = vmul.f32 0.2, %v1806_v52 }
 0x103   : > { %4064 = vmatprep.subr.bf16.mxu1 %v4291_v5  ;;  %v1985_v45 = vsel %vm1857_vm3, %v1793_v51, %v1921_v30  ;;  %v2047_v1 = vpack.c.bf16 %v1999_v62, %v1983_v59  ;;  %v1808_v60 = vadd.f32 %v5254_v23, %v1660_v47  ;;  %v1984_v22 = vsel %vm1856_vm6, %v1792_v54, %v1920_v7  ;;  %v4304_v54 = vld [vmem:[%s5002_s17 + $0x210] sm:$0xff]   ;;  %v4306_v59 = vld [vmem:[%s5002_s17 + $0x258] sm:$0xff]  }
 0x104   : > { %v2001_v2 = vsel %vm1873_vm4, %v1809_v56, %v1937_v61  ;;  %v1998_v5 = vsel %vm1870_vm5, %v1806_v52, %v1934_v0  ;;  %v1690_v42 = vmul.f32 %v5213_v9, %v1542_v33  ;;  %v1529_v47 = vunpack.c.h.bf16 %v1477_v34  ;;  %v4303_v52 = vld [vmem:[%s5002_s17 + $0x2d0] sm:$0xff]   ;;  %v4314_v33 = vld [vmem:[%s5002_s17 + $0x268] sm:$0xff]  }
 0x105   : > { %4037 = vmatpush3.bf16.msra.mxu0 %v4292_v8  ;;  %v2049_v3 = vpack.c.bf16 %v2001_v2, %v1985_v45  ;;  %3232 = vmatprep.mubr.bf16.mxu0 %v2047_v1  ;;  %v2046_v8 = vpack.c.bf16 %v1998_v5, %v1982_v4  ;;  %vm1872_vm7 = vcmp.ge.f32.partialorder %v1808_v60, 0.0  ;;  %v1545_v48 = vunpack.c.h.bf16 %v1485_v41  ;;  %v4305_v1 = vld [vmem:[%s5002_s17 + $0x290] sm:$0xff]   ;;  %v4307_v4 = vld [vmem:[%s5002_s17 + $0x2d8] sm:$0xff]  }
 0x106   : > { %4065 = vmatpush3.bf16.msra.mxu1 %v4293_v24  ;;  %4078 = vmatprep.subr.bf16.mxu0 %v4294_v32  ;;  %v1936_v24 = vmul.f32 0.2, %v1808_v60  ;;  %v4300_v32 = vld [vmem:[%s5002_s17 + $0x208] sm:$0xff]   ;;  %v1823_v50 = vadd.f32 %v5229_v15, %v1675_v36  ;;  %v1822_v51 = vadd.f32 %v5221_v12, %v1674_v40  ;;  %v1544_v55 = vunpack.c.l.bf16 %v1485_v41  ;;  %v4318_v40 = vld [vmem:[%s5002_s17 + $0x270] sm:$0xff]  }
 0x107   : > { %4106 = vmatprep.subr.bf16.mxu1 %v4295_v39  ;;  %3281 = vmatprep.mubr.bf16.mxu1 %v2049_v3  ;;  %v1691_v39 = vmul.f32 %v5217_v10, %v1543_v53  ;;  %v1838_v56 = vadd.f32 %v5221_v12, %v1690_v42  ;;  %v1677_v9 = vmul.f32 %v5237_v38, %v1529_v47  ;;  %v4311_v53 = vld [vmem:[%s5002_s17 + $0x2e0] sm:$0xff]   ;;  %v4316_v36 = vld [vmem:[%s5002_s17 + $0x228] sm:$0xff]   ;;  %v4319_v41 = vld [vmem:[%s5002_s17 + $0x2f0] sm:$0xff]  }
 0x108   : > { %3233 = vmatmul.mubr.bf16.vlgmr.msra.gmra.mrb[8].mxu0 %v2046_v8  ;;  %v2000_v29 = vsel %vm1872_vm7, %v1808_v60, %v1936_v24  ;;  %v1693_v57 = vmul.f32 %v5237_v38, %v1545_v48  ;;  %v1676_v30 = vmul.f32 %v5233_v16, %v1528_v49  ;;  %vm1887_vm8 = vcmp.ge.f32.partialorder %v1823_v50, 0.0  ;;  %v4308_v8 = vld [vmem:[%s5002_s17 + $0x218] sm:$0xff]   ;;  %v4310_v24 = vld [vmem:[%s5002_s17 + $0x260] sm:$0xff]   ;;  %v4321_v42 = vld [vmem:[%s5002_s17 + $0x2b0] sm:$0xff]  }
 0x109   : > { %v2048_v35 = vpack.c.bf16 %v2000_v29, %v1984_v22  ;;  %4079 = vmatpush3.bf16.msra.mxu0 %v4296_v6  ;;  %v1839_v10 = vadd.f32 %v5229_v15, %v1691_v39  ;;  %v1951_v15 = vmul.f32 0.2, %v1823_v50  ;;  %vm1886_vm10 = vcmp.ge.f32.partialorder %v1822_v51, 0.0  ;;  %v4313_v29 = vld [vmem:[%s5002_s17 + $0x2a0] sm:$0xff]   ;;  %v4317_v39 = vld [vmem:[%s5002_s17 + $0x2a8] sm:$0xff]   ;;  %v4323_v47 = vld [vmem:[%s5002_s17 + $0x2f8] sm:$0xff]  }
 0x10a   : > { %4080 = vmatprep.subr.bf16.mxu0 %v4298_v17  ;;  %vm1902_vm11 = vcmp.ge.f32.partialorder %v1838_v56, 0.0  ;;  %v1950_v62 = vmul.f32 0.2, %v1822_v51  ;;  %v1966_v45 = vmul.f32 0.2, %v1838_v56  ;;  %v1825_v38 = vadd.f32 %v5250_v11, %v1677_v9  ;;  %v4324_v48 = vld [vmem:[%s5002_s17 + $0x238] sm:$0xff]  }
 0x10b   : > { %3282 = vmatmul.mubr.bf16.vlgmr.msra.gmra.mrb[8].mxu1 %v2048_v35  ;;  %vm1903_vm9 = vcmp.ge.f32.partialorder %v1839_v10, 0.0  ;;  %v1967_v61 = vmul.f32 0.2, %v1839_v10  ;;  %v2015_v12 = vsel %vm1887_vm8, %v1823_v50, %v1951_v15  ;;  %v1841_v0 = vadd.f32 %v5250_v11, %v1693_v57  ;;  %v4315_v35 = vld [vmem:[%s5002_s17 + $0x2e8] sm:$0xff]   ;;  %v4325_v49 = vld [vmem:[%s5002_s17 + $0x2b8] sm:$0xff]   ;;  %v1462_v50 = vld [vmem:[%s5598_s0 + $0x20] sm:$0xff] }
 0x10c   : > { %4107 = vmatpush3.bf16.msra.mxu1 %v4297_v13  ;;  %v2014_v60 = vsel %vm1886_vm10, %v1822_v51, %v1950_v62  ;;  %v2030_v6 = vsel %vm1902_vm11, %v1838_v56, %v1966_v45  ;;  %v1692_v3 = vmul.f32 %v5233_v16, %v1544_v55  ;;  %vm1889_vm12 = vcmp.ge.f32.partialorder %v1825_v38, 0.0  ;;  %v5347_v55 = vld [vmem:[%s5602_s4 + $0x8] sm:$0xff] }
 0x10d   : > { %4108 = vmatprep.subr.bf16.mxu1 %v4299_v37  ;;  %4081 = vmatpush3.bf16.msra.mxu0 %v4300_v32  ;;  %v2031_v63 = vsel %vm1903_vm9, %v1839_v10, %v1967_v61  ;;  %v2062_v5 = vpack.c.bf16 %v2030_v6, %v2014_v60  ;;  %vm1905_vm13 = vcmp.ge.f32.partialorder %v1841_v0, 0.0  ;;  %v1953_v7 = vmul.f32 0.2, %v1825_v38  ;;  %v1470_v10 = vld [vmem:[%s5598_s0 + $0x60] sm:$0xff]  ;;  %v1471_v15 = vld [vmem:[%s5598_s0 + $0x68] sm:$0xff] }
 0x10e   : > { %4082 = vmatprep.subr.bf16.mxu0 %v4302_v44  ;;  %v2063_v2 = vpack.c.bf16 %v2031_v63, %v2015_v12  ;;  %v1969_v13 = vmul.f32 0.2, %v1841_v0  ;;  %v1824_v11 = vadd.f32 %v5254_v23, %v1676_v30  ;;  %v1840_v17 = vadd.f32 %v5254_v23, %v1692_v3  ;;  %v4312_v23 = vld [vmem:[%s5002_s17 + $0x220] sm:$0xff]   ;;  %v4322_v44 = vld [vmem:[%s5002_s17 + $0x278] sm:$0xff]  }
 0x10f   : > { %v2017_v16 = vsel %vm1889_vm12, %v1825_v38, %v1953_v7  ;;  %v1498_v51 = vunpack.c.l.bf16 %v1462_v50  ;;  %v1514_v56 = vunpack.c.l.bf16 %v1470_v10  ;;  %v1515_v9 = vunpack.c.h.bf16 %v1470_v10  ;;  %v4326_v63 = vld [vmem:[%s5002_s17 + $0x340] sm:$0xff]  }
 0x110   : > { %4109 = vmatpush3.bf16.msra.mxu1 %v4301_v21  ;;  %3240 = vmatprep.mubr.bf16.mxu0 %v2063_v2  ;;  %v2033_v20 = vsel %vm1905_vm13, %v1841_v0, %v1969_v13  ;;  %vm1888_vm14 = vcmp.ge.f32.partialorder %v1824_v11, 0.0  ;;  %vm1904_vm15 = vcmp.ge.f32.partialorder %v1840_v17, 0.0  ;;  %v1952_v22 = vmul.f32 0.2, %v1824_v11  ;;  %v4320_v21 = vld [vmem:[%s5002_s17 + $0x230] sm:$0xff]   ;;  %v4327_v60 = vld [vmem:[%s5002_s17 + $0x3c0] sm:$0xff]  }
 0x111   : > { %4110 = vmatprep.subr.bf16.mxu1 %v4303_v52  ;;  %4083 = vmatpush3.bf16.msra.mxu0 %v4304_v54  ;;  %v2065_v37 = vpack.c.bf16 %v2033_v20, %v2017_v16  ;;  %v1968_v26 = vmul.f32 0.2, %v1840_v17  ;;  %v1499_v52 = vunpack.c.h.bf16 %v1462_v50  ;;  %v5342_v54 = vld [vmem:[%s5601_s3 + $0x8] sm:$0xff]  ;;  %v5365_v61 = vrot.slane %v5347_v55, %v5027_v14 }
 0x112   : > { %4084 = vmatprep.subr.bf16.mxu0 %v4306_v59  ;;  %3241 = vmatmul.mubr.bf16.gmra.mrb[12].mxu0 %v2062_v5  ;;  %v2016_v27 = vsel %vm1888_vm14, %v1824_v11, %v1952_v22  ;;  %v5351_v57 = vrot.slane %v5342_v54, %v5052_v25  ;;  %v5355_v30 = vrot.slane %v5342_v54, %v5027_v14  ;;  %v1463_v59 = vld [vmem:[%s5598_s0 + $0x28] sm:$0xff]  ;;  %v1516_v12 = vunpack.c.l.bf16 %v1471_v15 }
 0x113   : > { %3289 = vmatprep.mubr.bf16.mxu1 %v2065_v37  ;;  %v2032_v32 = vsel %vm1904_vm15, %v1840_v17, %v1968_v26  ;;  %v1500_v62 = vunpack.c.l.bf16 %v1463_v59  ;;  %v1501_v45 = vunpack.c.h.bf16 %v1463_v59  ;;  %v1517_v6 = vunpack.c.h.bf16 %v1471_v15  ;;  %v4331_v59 = vld [vmem:[%s5002_s17 + $0x3c8] sm:$0xff]  }
 0x114   : > { %4111 = vmatpush3.bf16.msra.mxu1 %v4305_v1  ;;  %v2064_v34 = vpack.c.bf16 %v2032_v32, %v2016_v27  ;;  %v1646_v38 = vmul.f32 %v5351_v57, %v1498_v51  ;;  %v1647_v0 = vmul.f32 %v5355_v30, %v1499_v52  ;;  %v1662_v1 = vmul.f32 %v5351_v57, %v1514_v56 }
 0x115   : > { %4112 = vmatprep.subr.bf16.mxu1 %v4307_v4  ;;  %4085 = vmatpush3.bf16.msra.mxu0 %v4308_v8  ;;  %v1663_v2 = vmul.f32 %v5355_v30, %v1515_v9  ;;  %v5375_v3 = vrot.slane %v5342_v54, %v5061_v31  ;;  %v5379_v14 = vrot.slane %v5342_v54, %v5038_v19 }
 0x116   : > { %4086 = vmatprep.subr.bf16.mxu0 %v4310_v24  ;;  %3290 = vmatmul.mubr.bf16.gmra.mrb[12].mxu1 %v2064_v34  ;;  %v5383_v4 = vrot.slane %v5347_v55, %v5038_v19  ;;  %v1795_v5 = vadd.f32 %v5365_v61, %v1647_v0  ;;  %v5389_v8 = vrot.slane %v5347_v55, %v5052_v25 }
 0x117   : > { %v1811_v7 = vadd.f32 %v5365_v61, %v1663_v2  ;;  %v5393_v24 = vrot.slane %v5347_v55, %v5061_v31  ;;  %v1648_v13 = vmul.f32 %v5375_v3, %v1500_v62  ;;  %v1649_v11 = vmul.f32 %v5379_v14, %v1501_v45  ;;  %v1479_v62 = vld [vmem:[%s5598_s0 + $0xa8] sm:$0xff] }
 0x118   : > { %4113 = vmatpush3.bf16.msra.mxu1 %v4309_v18  ;;  %v1664_v19 = vmul.f32 %v5375_v3, %v1516_v12  ;;  %v1665_v17 = vmul.f32 %v5379_v14, %v1517_v6  ;;  %vm1859_vm0 = vcmp.ge.f32.partialorder %v1795_v5, 0.0  ;;  %v1923_v16 = vmul.f32 0.2, %v1795_v5  ;;  %v4332_v12 = vld [vmem:[%s5002_s17 + $0x308] sm:$0xff]  }
 0x119   : > { %4114 = vmatprep.subr.bf16.mxu1 %v4311_v53  ;;  %4087 = vmatpush3.bf16.msra.mxu0 %v4312_v23  ;;  %vm1875_vm1 = vcmp.ge.f32.partialorder %v1811_v7, 0.0  ;;  %v1939_v18 = vmul.f32 0.2, %v1811_v7  ;;  %v1797_v25 = vadd.f32 %v5383_v4, %v1649_v11  ;;  %v1794_v31 = vadd.f32 %v5389_v8, %v1646_v38  ;;  %v4333_v2 = vld [vmem:[%s5002_s17 + $0x388] sm:$0xff]   ;;  %v4334_v11 = vld [vmem:[%s5002_s17 + $0x350] sm:$0xff]  }
 0x11a   : > { %4088 = vmatprep.subr.bf16.mxu0 %v4314_v33  ;;  %v1813_v20 = vadd.f32 %v5383_v4, %v1665_v17  ;;  %v1810_v22 = vadd.f32 %v5389_v8, %v1662_v1  ;;  %v1987_v37 = vsel %vm1859_vm0, %v1795_v5, %v1923_v16  ;;  %v1796_v53 = vadd.f32 %v5393_v24, %v1648_v13  ;;  %v1487_v1 = vld [vmem:[%s5598_s0 + $0xe8] sm:$0xff]  ;;  %v4335_v16 = vld [vmem:[%s5002_s17 + $0x3d0] sm:$0xff]  }
 0x11b   : > { %v2003_v26 = vsel %vm1875_vm1, %v1811_v7, %v1939_v18  ;;  %v1812_v23 = vadd.f32 %v5393_v24, %v1664_v19  ;;  %vm1861_vm2 = vcmp.ge.f32.partialorder %v1797_v25, 0.0  ;;  %vm1858_vm4 = vcmp.ge.f32.partialorder %v1794_v31, 0.0 }
 0x11c   : > { %4115 = vmatpush3.bf16.msra.mxu1 %v4313_v29  ;;  %v2051_v27 = vpack.c.bf16 %v2003_v26, %v1987_v37  ;;  %vm1877_vm3 = vcmp.ge.f32.partialorder %v1813_v20, 0.0  ;;  %v1925_v29 = vmul.f32 0.2, %v1797_v25  ;;  %v1941_v32 = vmul.f32 0.2, %v1813_v20 }
 0x11d   : > { %4116 = vmatprep.subr.bf16.mxu1 %v4315_v35  ;;  %4089 = vmatpush3.bf16.msra.mxu0 %v4316_v36  ;;  %vm1874_vm5 = vcmp.ge.f32.partialorder %v1810_v22, 0.0  ;;  %v1922_v33 = vmul.f32 0.2, %v1794_v31  ;;  %v1938_v35 = vmul.f32 0.2, %v1810_v22  ;;  %vm1860_vm6 = vcmp.ge.f32.partialorder %v1796_v53, 0.0 }
 0x11e   : > { %4090 = vmatprep.subr.bf16.mxu0 %v4318_v40  ;;  %3330 = vmatprep.mubr.bf16.mxu0 %v2051_v27  ;;  %v1989_v34 = vsel %vm1861_vm2, %v1797_v25, %v1925_v29  ;;  %vm1876_vm7 = vcmp.ge.f32.partialorder %v1812_v23, 0.0  ;;  %v4328_v36 = vld [vmem:[%s5002_s17 + $0x300] sm:$0xff]   ;;  %v2005_v40 = vsel %vm1877_vm3, %v1813_v20, %v1941_v32  ;;  %v1533_v6 = vunpack.c.h.bf16 %v1479_v62  ;;  %v4338_v32 = vld [vmem:[%s5002_s17 + $0x358] sm:$0xff]  }
 0x11f   : > { %v2002_v50 = vsel %vm1874_vm5, %v1810_v22, %v1938_v35  ;;  %v1549_v5 = vunpack.c.h.bf16 %v1487_v1  ;;  %v1532_v19 = vunpack.c.l.bf16 %v1479_v62  ;;  %v1548_v20 = vunpack.c.l.bf16 %v1487_v1  ;;  %v4339_v35 = vld [vmem:[%s5002_s17 + $0x3d8] sm:$0xff]   ;;  %v4352_v1 = vld [vmem:[%s5002_s17 + $0x330] sm:$0xff]  }
 0x120   : > { %4117 = vmatpush3.bf16.msra.mxu1 %v4317_v39  ;;  %v1478_v39 = vld [vmem:[%s5598_s0 + $0xa0] sm:$0xff]  ;;  %v1681_v18 = vmul.f32 %v5379_v14, %v1533_v6  ;;  %v4355_v6 = vld [vmem:[%s5002_s17 + $0x3f8] sm:$0xff]  }
 0x121   : > { %4118 = vmatprep.subr.bf16.mxu1 %v4319_v41  ;;  %4091 = vmatpush3.bf16.msra.mxu0 %v4320_v21  ;;  %v1986_v41 = vsel %vm1858_vm4, %v1794_v31, %v1922_v33  ;;  %v1924_v21 = vmul.f32 0.2, %v1796_v53  ;;  %v1531_v10 = vunpack.c.h.bf16 %v1478_v39  ;;  %v1530_v15 = vunpack.c.l.bf16 %v1478_v39 }
 0x122   : > { %4092 = vmatprep.subr.bf16.mxu0 %v4322_v44  ;;  %v4329_v44 = vld [vmem:[%s5002_s17 + $0x380] sm:$0xff]   ;;  %v2050_v52 = vpack.c.bf16 %v2002_v50, %v1986_v41  ;;  %v1697_v25 = vmul.f32 %v5379_v14, %v1549_v5  ;;  %v1829_v26 = vadd.f32 %v5383_v4, %v1681_v18  ;;  %v1680_v29 = vmul.f32 %v5375_v3, %v1532_v19  ;;  %v1472_v18 = vld [vmem:[%s5598_s0 + $0x70] sm:$0xff] }
 0x123   : > { %v1988_v56 = vsel %vm1860_vm6, %v1796_v53, %v1924_v21  ;;  %v4337_v53 = vld [vmem:[%s5002_s17 + $0x390] sm:$0xff]   ;;  %v1696_v41 = vmul.f32 %v5375_v3, %v1548_v20  ;;  %v5466_v5 = vrot.slane %v5342_v54, %v5174_v28  ;;  %v5482_v19 = vrot.slane %v5342_v54, %v5195_v58  ;;  %v1465_v20 = vld [vmem:[%s5598_s0 + $0x38] sm:$0xff] }
 0x124   : > { %4119 = vmatpush3.bf16.msra.mxu1 %v4321_v42  ;;  %v1940_v42 = vmul.f32 0.2, %v1812_v23  ;;  %v1845_v14 = vadd.f32 %v5383_v4, %v1697_v25  ;;  %vm1893_vm12 = vcmp.ge.f32.partialorder %v1829_v26, 0.0  ;;  %v1828_v21 = vadd.f32 %v5393_v24, %v1680_v29 }
 0x125   : > { %4120 = vmatprep.subr.bf16.mxu1 %v4323_v47  ;;  %4093 = vmatpush3.bf16.msra.mxu0 %v4324_v48  ;;  %v4330_v47 = vld [vmem:[%s5002_s17 + $0x348] sm:$0xff]   ;;  %v1486_v48 = vld [vmem:[%s5598_s0 + $0xe0] sm:$0xff] }
 0x126   : > { %4134 = vmatprep.subr.bf16.mxu0 %v4326_v63  ;;  %v1547_v51 = vunpack.c.h.bf16 %v1486_v48  ;;  %v2004_v9 = vsel %vm1876_vm7, %v1812_v23, %v1940_v42  ;;  %v1679_v63 = vmul.f32 %v5355_v30, %v1531_v10  ;;  %v1546_v0 = vunpack.c.l.bf16 %v1486_v48  ;;  %v4341_v42 = vld [vmem:[%s5002_s17 + $0x398] sm:$0xff]  }
 0x127   : > { %v2052_v45 = vpack.c.bf16 %v2004_v9, %v1988_v56  ;;  %vm1909_vm13 = vcmp.ge.f32.partialorder %v1845_v14, 0.0  ;;  %v1973_v39 = vmul.f32 0.2, %v1845_v14  ;;  %v1844_v10 = vadd.f32 %v5393_v24, %v1696_v41  ;;  %v4344_v9 = vld [vmem:[%s5002_s17 + $0x320] sm:$0xff]  }
 0x128   : > { %4121 = vmatpush3.bf16.msra.mxu1 %v4325_v49  ;;  %v2053_v49 = vpack.c.bf16 %v2005_v40, %v1989_v34  ;;  %v1695_v38 = vmul.f32 %v5355_v30, %v1547_v51  ;;  %3331 = vmatmul.mubr.bf16.vlgmr.msra.gmra.mrb[16].mxu0 %v2050_v52  ;;  %v1827_v7 = vadd.f32 %v5365_v61, %v1679_v63  ;;  %v4340_v40 = vld [vmem:[%s5002_s17 + $0x318] sm:$0xff]   ;;  %vm1892_vm14 = vcmp.ge.f32.partialorder %v1828_v21, 0.0  ;;  %v4343_v52 = vld [vmem:[%s5002_s17 + $0x3e0] sm:$0xff]   ;;  %v4349_v63 = vld [vmem:[%s5002_s17 + $0x3a8] sm:$0xff]  }
 0x129   : > { %4162 = vmatprep.subr.bf16.mxu1 %v4327_v60  ;;  %v1678_v60 = vmul.f32 %v5351_v57, %v1530_v15  ;;  %4135 = vmatpush3.bf16.msra.mxu0 %v4328_v36  ;;  %v1694_v30 = vmul.f32 %v5351_v57, %v1546_v0  ;;  %v4336_v57 = vld [vmem:[%s5002_s17 + $0x310] sm:$0xff]   ;;  %v1957_v36 = vmul.f32 0.2, %v1829_v26  ;;  %v2037_v48 = vsel %vm1909_vm13, %v1845_v14, %v1973_v39  ;;  %v4346_v15 = vld [vmem:[%s5002_s17 + $0x368] sm:$0xff]  }
 0x12a   : > { %3379 = vmatprep.mubr.bf16.mxu1 %v2053_v49  ;;  %v1843_v13 = vadd.f32 %v5365_v61, %v1695_v38  ;;  %4136 = vmatprep.subr.bf16.mxu0 %v4330_v47  ;;  %vm1891_vm8 = vcmp.ge.f32.partialorder %v1827_v7, 0.0  ;;  %v1955_v61 = vmul.f32 0.2, %v1827_v7  ;;  %v4342_v49 = vld [vmem:[%s5002_s17 + $0x360] sm:$0xff]   ;;  %v1956_v51 = vmul.f32 0.2, %v1828_v21 }
 0x12b   : > { %3380 = vmatmul.mubr.bf16.vlgmr.msra.gmra.mrb[16].mxu1 %v2052_v45  ;;  %v1826_v17 = vadd.f32 %v5389_v8, %v1678_v60  ;;  %v1842_v22 = vadd.f32 %v5389_v8, %v1694_v30  ;;  %v2021_v47 = vsel %vm1893_vm12, %v1829_v26, %v1957_v36  ;;  %vm1908_vm15 = vcmp.ge.f32.partialorder %v1844_v10, 0.0  ;;  %v4347_v45 = vld [vmem:[%s5002_s17 + $0x3e8] sm:$0xff]   ;;  %v4350_v38 = vld [vmem:[%s5002_s17 + $0x370] sm:$0xff]   ;;  %v4354_v60 = vld [vmem:[%s5002_s17 + $0x378] sm:$0xff]  }
 0x12c   : > { %4163 = vmatpush3.bf16.msra.mxu1 %v4329_v44  ;;  %vm1907_vm9 = vcmp.ge.f32.partialorder %v1843_v13, 0.0  ;;  %v1971_v31 = vmul.f32 0.2, %v1843_v13  ;;  %v2019_v23 = vsel %vm1891_vm8, %v1827_v7, %v1955_v61  ;;  %v2069_v50 = vpack.c.bf16 %v2037_v48, %v2021_v47  ;;  %v4351_v0 = vld [vmem:[%s5002_s17 + $0x3f0] sm:$0xff]  }
 0x12d   : > { %4164 = vmatprep.subr.bf16.mxu1 %v4331_v59  ;;  %vm1890_vm10 = vcmp.ge.f32.partialorder %v1826_v17, 0.0  ;;  %v1954_v37 = vmul.f32 0.2, %v1826_v17  ;;  %4137 = vmatpush3.bf16.msra.mxu0 %v4332_v12  ;;  %vm1906_vm11 = vcmp.ge.f32.partialorder %v1842_v22, 0.0  ;;  %v1970_v8 = vmul.f32 0.2, %v1842_v22 }
 0x12e   : > { %v2035_v27 = vsel %vm1907_vm9, %v1843_v13, %v1971_v31  ;;  %4138 = vmatprep.subr.bf16.mxu0 %v4334_v11  ;;  %3387 = vmatprep.mubr.bf16.mxu1 %v2069_v50  ;;  %v1972_v3 = vmul.f32 0.2, %v1844_v10  ;;  %v2020_v56 = vsel %vm1892_vm14, %v1828_v21, %v1956_v51  ;;  %v4345_v59 = vld [vmem:[%s5002_s17 + $0x3a0] sm:$0xff]   ;;  %v4348_v12 = vld [vmem:[%s5002_s17 + $0x328] sm:$0xff]   ;;  %v5470_v7 = vrot.slane %v5342_v54, %v5185_v43  ;;  %v4356_v13 = vld [vmem:[%s5002_s17 + $0x338] sm:$0xff]  }
 0x12f   : > { %v2067_v33 = vpack.c.bf16 %v2035_v27, %v2019_v23  ;;  %v2018_v34 = vsel %vm1890_vm10, %v1826_v17, %v1954_v37  ;;  %v2034_v4 = vsel %vm1906_vm11, %v1842_v22, %v1970_v8  ;;  %v1464_v30 = vld [vmem:[%s5598_s0 + $0x30] sm:$0xff]  ;;  %v5478_v11 = vrot.slane %v5347_v55, %v5185_v43  ;;  %v4357_v31 = vld [vmem:[%s5002_s17 + $0x3b8] sm:$0xff]  }
 0x130   : > { %4165 = vmatpush3.bf16.msra.mxu1 %v4333_v2  ;;  %v2066_v44 = vpack.c.bf16 %v2034_v4, %v2018_v34  ;;  %v2036_v24 = vsel %vm1908_vm15, %v1844_v10, %v1972_v3  ;;  %v4353_v2 = vld [vmem:[%s5002_s17 + $0x3b0] sm:$0xff]   ;;  %v5486_v17 = vrot.slane %v5342_v54, %v5201_v46  ;;  %v1502_v25 = vunpack.c.l.bf16 %v1464_v30  ;;  %v1473_v54 = vld [vmem:[%s5598_s0 + $0x78] sm:$0xff]  ;;  %s1448_s17 = scalar_lea.vmem %s5604_s6, %s3813_s21 }
 0x131   : > { %4166 = vmatprep.subr.bf16.mxu1 %v4335_v16  ;;  %3338 = vmatprep.mubr.bf16.mxu0 %v2067_v33  ;;  %v2068_v62 = vpack.c.bf16 %v2036_v24, %v2020_v56  ;;  %v5490_v16 = vrot.slane %v5347_v55, %v5201_v46  ;;  %v1503_v43 = vunpack.c.h.bf16 %v1464_v30  ;;  %v5503_v61 = vrot.slane %v5347_v55, %v5174_v28  ;;  %v1480_v51 = vld [vmem:[%s5598_s0 + $0xb0] sm:$0xff]  ;;  %v1489_v24 = vld [vmem:[%s5598_s0 + $0xf8] sm:$0xff] }
 0x132   : > { %4139 = vmatpush3.bf16.msra.mxu0 %v4336_v57  ;;  %v5507_v46 = vrot.slane %v5347_v55, %v5195_v58  ;;  %v1518_v57 = vunpack.c.l.bf16 %v1472_v18  ;;  %v1519_v22 = vunpack.c.h.bf16 %v1472_v18  ;;  %v1504_v37 = vunpack.c.l.bf16 %v1465_v20 }
 0x133   : > { %4140 = vmatprep.subr.bf16.mxu0 %v4338_v32  ;;  %3339 = vmatmul.mubr.bf16.gmra.mrb[20].mxu0 %v2066_v44  ;;  %v1505_v26 = vunpack.c.h.bf16 %v1465_v20  ;;  %v1651_v23 = vmul.f32 %v5470_v7, %v1503_v43  ;;  %v1520_v27 = vunpack.c.l.bf16 %v1473_v54  ;;  %v1521_v14 = vunpack.c.h.bf16 %v1473_v54 }
 0x134   : > { %4167 = vmatpush3.bf16.msra.mxu1 %v4337_v53  ;;  %v1650_v53 = vmul.f32 %v5466_v5, %v1502_v25  ;;  %v1666_v28 = vmul.f32 %v5466_v5, %v1518_v57  ;;  %v1667_v29 = vmul.f32 %v5470_v7, %v1519_v22  ;;  %v1652_v58 = vmul.f32 %v5482_v19, %v1504_v37 }
 0x135   : > { %4168 = vmatprep.subr.bf16.mxu1 %v4339_v35  ;;  %3388 = vmatmul.mubr.bf16.gmra.mrb[20].mxu1 %v2068_v62  ;;  %v1653_v55 = vmul.f32 %v5486_v17, %v1505_v26  ;;  %v1799_v32 = vadd.f32 %v5478_v11, %v1651_v23  ;;  %v1668_v33 = vmul.f32 %v5482_v19, %v1520_v27  ;;  %v1534_v18 = vunpack.c.l.bf16 %v1480_v51 }
 0x136   : > { %4141 = vmatpush3.bf16.msra.mxu0 %v4340_v40  ;;  %v1669_v8 = vmul.f32 %v5486_v17, %v1521_v14  ;;  %v1798_v34 = vadd.f32 %v5503_v61, %v1650_v53  ;;  %v1815_v35 = vadd.f32 %v5478_v11, %v1667_v29  ;;  %v1814_v39 = vadd.f32 %v5503_v61, %v1666_v28 }
 0x137   : > { %4142 = vmatprep.subr.bf16.mxu0 %v4342_v49  ;;  %v1801_v36 = vadd.f32 %v5490_v16, %v1653_v55  ;;  %v1800_v40 = vadd.f32 %v5507_v46, %v1652_v58  ;;  %vm1863_vm0 = vcmp.ge.f32.partialorder %v1799_v32, 0.0  ;;  %v1927_v4 = vmul.f32 0.2, %v1799_v32 }
 0x138   : > { %4169 = vmatpush3.bf16.msra.mxu1 %v4341_v42  ;;  %v1817_v41 = vadd.f32 %v5490_v16, %v1669_v8  ;;  %vm1862_vm1 = vcmp.ge.f32.partialorder %v1798_v34, 0.0  ;;  %vm1879_vm2 = vcmp.ge.f32.partialorder %v1815_v35, 0.0  ;;  %v1943_v21 = vmul.f32 0.2, %v1815_v35 }
 0x139   : > { %4170 = vmatprep.subr.bf16.mxu1 %v4343_v52  ;;  %vm1865_vm3 = vcmp.ge.f32.partialorder %v1801_v36, 0.0  ;;  %v1929_v42 = vmul.f32 0.2, %v1801_v36  ;;  %v1991_v44 = vsel %vm1863_vm0, %v1799_v32, %v1927_v4  ;;  %vm1878_vm5 = vcmp.ge.f32.partialorder %v1814_v39, 0.0 }
 0x13a   : > { %4143 = vmatpush3.bf16.msra.mxu0 %v4344_v9  ;;  %vm1881_vm4 = vcmp.ge.f32.partialorder %v1817_v41, 0.0  ;;  %v1945_v47 = vmul.f32 0.2, %v1817_v41  ;;  %v2007_v48 = vsel %vm1879_vm2, %v1815_v35, %v1943_v21  ;;  %v1926_v50 = vmul.f32 0.2, %v1798_v34  ;;  %v1488_v9 = vld [vmem:[%s5598_s0 + $0xf0] sm:$0xff] }
 0x13b   : > { %4144 = vmatprep.subr.bf16.mxu0 %v4346_v15  ;;  %v1993_v49 = vsel %vm1865_vm3, %v1801_v36, %v1929_v42  ;;  %v1942_v10 = vmul.f32 0.2, %v1814_v39  ;;  %v2055_v52 = vpack.c.bf16 %v2007_v48, %v1991_v44  ;;  %v1816_v56 = vadd.f32 %v5507_v46, %v1668_v33 }
 0x13c   : > { %4171 = vmatpush3.bf16.msra.mxu1 %v4345_v59  ;;  %v2009_v3 = vsel %vm1881_vm4, %v1817_v41, %v1945_v47  ;;  %vm1864_vm6 = vcmp.ge.f32.partialorder %v1800_v40, 0.0  ;;  %v1481_v59 = vld [vmem:[%s5598_s0 + $0xb8] sm:$0xff]  ;;  %v1990_v62 = vsel %vm1862_vm1, %v1798_v34, %v1926_v50  ;;  %v1550_v25 = vunpack.c.l.bf16 %v1488_v9 }
 0x13d   : > { %4172 = vmatprep.subr.bf16.mxu1 %v4347_v45  ;;  %v2057_v15 = vpack.c.bf16 %v2009_v3, %v1993_v49  ;;  %v2006_v45 = vsel %vm1878_vm5, %v1814_v39, %v1942_v10  ;;  %3428 = vmatprep.mubr.bf16.mxu0 %v2055_v52  ;;  %vm1880_vm7 = vcmp.ge.f32.partialorder %v1816_v56, 0.0  ;;  %v1682_v22 = vmul.f32 %v5466_v5, %v1534_v18 }
 0x13e   : > { %4145 = vmatpush3.bf16.msra.mxu0 %v4348_v12  ;;  %v1928_v12 = vmul.f32 0.2, %v1800_v40  ;;  %v1698_v37 = vmul.f32 %v5466_v5, %v1550_v25  ;;  %v1536_v26 = vunpack.c.l.bf16 %v1481_v59  ;;  %v1552_v14 = vunpack.c.l.bf16 %v1489_v24 }
 0x13f   : > { %4146 = vmatprep.subr.bf16.mxu0 %v4350_v38  ;;  %v1944_v38 = vmul.f32 0.2, %v1816_v56  ;;  %3477 = vmatprep.mubr.bf16.mxu1 %v2057_v15  ;;  %v1830_v28 = vadd.f32 %v5503_v61, %v1682_v22  ;;  %vm3562_vm0 = vcmask 1040384  }
 0x140   : > { %4173 = vmatpush3.bf16.msra.mxu1 %v4349_v63  ;;  %v2054_v63 = vpack.c.bf16 %v2006_v45, %v1990_v62  ;;  %v1684_v35 = vmul.f32 %v5482_v19, %v1536_v26 }
 0x141   : > { %4174 = vmatprep.subr.bf16.mxu1 %v4351_v0  ;;  %v1535_v0 = vunpack.c.h.bf16 %v1480_v51  ;;  %vm1894_vm12 = vcmp.ge.f32.partialorder %v1830_v28, 0.0  ;;  %v1958_v32 = vmul.f32 0.2, %v1830_v28 }
 0x142   : > { %4147 = vmatpush3.bf16.msra.mxu0 %v4352_v1  ;;  %v1992_v1 = vsel %vm1864_vm6, %v1800_v40, %v1928_v12  ;;  %v1700_v40 = vmul.f32 %v5482_v19, %v1552_v14  ;;  %v1832_v41 = vadd.f32 %v5507_v46, %v1684_v35 }
 0x143   : > { %4148 = vmatprep.subr.bf16.mxu0 %v4354_v60  ;;  %v1537_v60 = vunpack.c.h.bf16 %v1481_v59  ;;  %v1683_v30 = vmul.f32 %v5470_v7, %v1535_v0  ;;  %v2022_v39 = vsel %vm1894_vm12, %v1830_v28, %v1958_v32 }
 0x144   : > { %4175 = vmatpush3.bf16.msra.mxu1 %v4353_v2  ;;  %v1551_v2 = vunpack.c.h.bf16 %v1488_v9  ;;  %v1848_v21 = vadd.f32 %v5507_v46, %v1700_v40  ;;  %vm1896_vm14 = vcmp.ge.f32.partialorder %v1832_v41, 0.0  ;;  %v1960_v42 = vmul.f32 0.2, %v1832_v41 }
 0x145   : > { %4176 = vmatprep.subr.bf16.mxu1 %v4355_v6  ;;  %v1553_v6 = vunpack.c.h.bf16 %v1489_v24  ;;  %v1685_v54 = vmul.f32 %v5486_v17, %v1537_v60  ;;  %v1831_v57 = vadd.f32 %v5478_v11, %v1683_v30 }
 0x146   : > { %4149 = vmatpush3.bf16.msra.mxu0 %v4356_v13  ;;  %v2008_v13 = vsel %vm1880_vm7, %v1816_v56, %v1944_v38  ;;  %v1699_v20 = vmul.f32 %v5470_v7, %v1551_v2  ;;  %vm1912_vm15 = vcmp.ge.f32.partialorder %v1848_v21, 0.0  ;;  %v1976_v44 = vmul.f32 0.2, %v1848_v21 }
 0x147   : > { %v2056_v43 = vpack.c.bf16 %v2008_v13, %v1992_v1  ;;  %v1833_v23 = vadd.f32 %v5490_v16, %v1685_v54  ;;  %vm1895_vm8 = vcmp.ge.f32.partialorder %v1831_v57, 0.0  ;;  %v1959_v7 = vmul.f32 0.2, %v1831_v57 }
 0x148   : > { %4177 = vmatpush3.bf16.msra.mxu1 %v4357_v31  ;;  %v1701_v31 = vmul.f32 %v5486_v17, %v1553_v6  ;;  %v1847_v53 = vadd.f32 %v5478_v11, %v1699_v20  ;;  %v1846_v17 = vadd.f32 %v5503_v61, %v1698_v37  ;;  %v2024_v47 = vsel %vm1896_vm14, %v1832_v41, %v1960_v42 }
 0x149   : > { %3429 = vmatmul.mubr.bf16.vlgmr.msra.gmra.mrb[24].mxu0 %v2054_v63  ;;  %vm1897_vm10 = vcmp.ge.f32.partialorder %v1833_v23, 0.0  ;;  %v2023_v5 = vsel %vm1895_vm8, %v1831_v57, %v1959_v7  ;;  %v1961_v58 = vmul.f32 0.2, %v1833_v23  ;;  %v2040_v48 = vsel %vm1912_vm15, %v1848_v21, %v1976_v44 }
 0x14a   : > { %v1849_v27 = vadd.f32 %v5490_v16, %v1701_v31  ;;  %vm1911_vm9 = vcmp.ge.f32.partialorder %v1847_v53, 0.0  ;;  %v1975_v29 = vmul.f32 0.2, %v1847_v53  ;;  %vm1910_vm13 = vcmp.ge.f32.partialorder %v1846_v17, 0.0 }
 0x14b   : > { %3478 = vmatmul.mubr.bf16.vlgmr.msra.gmra.mrb[24].mxu1 %v2056_v43  ;;  %v1974_v33 = vmul.f32 0.2, %v1846_v17  ;;  %v2025_v8 = vsel %vm1897_vm10, %v1833_v23, %v1961_v58  ;;  %v2072_v49 = vpack.c.bf16 %v2040_v48, %v2024_v47 }
 0x14c   : > { %vm1913_vm11 = vcmp.ge.f32.partialorder %v1849_v27, 0.0  ;;  %v1977_v55 = vmul.f32 0.2, %v1849_v27  ;;  %v2039_v11 = vsel %vm1911_vm9, %v1847_v53, %v1975_v29 }
 0x14d   : > { %v2071_v16 = vpack.c.bf16 %v2039_v11, %v2023_v5  ;;  %v2038_v61 = vsel %vm1910_vm13, %v1846_v17, %v1974_v33 }
 0x14e   : > { %v2041_v34 = vsel %vm1913_vm11, %v1849_v27, %v1977_v55  ;;  %v2070_v4 = vpack.c.bf16 %v2038_v61, %v2022_v39 }
 0x14f   : > { %v2073_v36 = vpack.c.bf16 %v2041_v34, %v2025_v8  ;;  %3436 = vmatprep.mubr.bf16.mxu0 %v2071_v16 }
 0x151   : > { %3485 = vmatprep.mubr.bf16.mxu1 %v2073_v36  ;;  %3437 = vmatmul.mubr.bf16.gmra.mrb[28].mxu0 %v2070_v4 }
 0x153   : > { %3486 = vmatmul.mubr.bf16.gmra.mrb[28].mxu1 %v2072_v49 }
 0x1bb   : > { %v3982_v50 = vpop.f32.mrb[0].mxu0 }
 0x1bc   : > { %v3983_v10 = vpop.f32.mrb[1].mxu0  ;;  %v4010_v52 = vpop.f32.mrb[0].mxu1 }
 0x1bd   : > { %v3984_v51 = vadd.f32 %v3983_v10, %v3982_v50  ;;  %v3985_v19 = vpop.f32.mrb[2].mxu0  ;;  %v4011_v56 = vpop.f32.mrb[1].mxu1 }
 0x1be   : > { %v3986_v3 = vpop.f32.mrb[3].mxu0  ;;  %v4012_v59 = vadd.f32 %v4011_v56, %v4010_v52  ;;  %v4013_v24 = vpop.f32.mrb[2].mxu1 }
 0x1bf   : > { %v3987_v9 = vadd.f32 %v3986_v3, %v3985_v19  ;;  %v4014_v46 = vpop.f32.mrb[3].mxu1 }
 0x1c0   : > { %v3186_v15 = vadd.f32 %v4012_v59, %v3984_v51  ;;  %v4015_v62 = vadd.f32 %v4014_v46, %v4013_v24 }
 0x1c2   : > { %v3189_v45 = vadd.f32 %v4015_v62, %v3987_v9 }
 0x1c3   : > { %v3988_v12 = vpop.f32.mrb[4].mxu0 }
 0x1c4   : > { %v3989_v63 = vpop.f32.mrb[5].mxu0 }
 0x1c5   : > { %v3990_v38 = vadd.f32 %v3989_v63, %v3988_v12  ;;  %v3991_v0 = vpop.f32.mrb[6].mxu0 }
 0x1c6   : > { %v3992_v1 = vpop.f32.mrb[7].mxu0 }
 0x1c7   : > { %v4016_v2 = vpop.f32.mrb[4].mxu1  ;;  %v3993_v60 = vadd.f32 %v3992_v1, %v3991_v0 }
 0x1c8   : > { %v4017_v6 = vpop.f32.mrb[5].mxu1 }
 0x1c9   : > { %v4018_v13 = vadd.f32 %v4017_v6, %v4016_v2  ;;  %v4019_v30 = vpop.f32.mrb[6].mxu1 }
 0x1ca   : > { %v4020_v18 = vpop.f32.mrb[7].mxu1 }
 0x1cb   : > { %v3194_v25 = vadd.f32 %v4018_v13, %v3990_v38  ;;  %v4021_v43 = vadd.f32 %v4020_v18, %v4019_v30 }
 0x1cd   : > { %v3197_v20 = vadd.f32 %v4021_v43, %v3993_v60 }
 0x1db   : > { %v4038_v54 = vpop.f32.mrb[8].mxu0 }
 0x1dc   : > { %v4039_v31 = vpop.f32.mrb[9].mxu0 }
 0x1dd   : > { %v4040_v57 = vadd.f32 %v4039_v31, %v4038_v54  ;;  %v4041_v22 = vpop.f32.mrb[10].mxu0 }
 0x1de   : > { %v4066_v37 = vpop.f32.mrb[8].mxu1  ;;  %v4042_v26 = vpop.f32.mrb[11].mxu0 }
 0x1df   : > { %v3235_v53 = vadd.f32 %v4040_v57, %v3186_v15  ;;  %v4067_v23 = vpop.f32.mrb[9].mxu1  ;;  %v4043_v27 = vadd.f32 %v4042_v26, %v4041_v22 }
 0x1e0   : > { %v4068_v14 = vadd.f32 %v4067_v23, %v4066_v37  ;;  %v4069_v7 = vpop.f32.mrb[10].mxu1 }
 0x1e1   : > { %v3238_v28 = vadd.f32 %v4043_v27, %v3189_v45  ;;  %v4070_v17 = vpop.f32.mrb[11].mxu1 }
 0x1e2   : > { %v3284_v29 = vadd.f32 %v4068_v14, %v3235_v53  ;;  %v4071_v5 = vadd.f32 %v4070_v17, %v4069_v7 }
 0x1e4   : > { %v3287_v58 = vadd.f32 %v4071_v5, %v3238_v28  ;;  %v3942_v28 = vld [vmem:[%s1429_s28] ss:$0 sm:$0xff] }
 0x1e5   : > { %v4044_v55 = vpop.f32.mrb[12].mxu0 }
 0x1e6   : > { %v4045_v11 = vpop.f32.mrb[13].mxu0 }
 0x1e7   : > { %v4046_v32 = vadd.f32 %v4045_v11, %v4044_v55  ;;  %v4047_v33 = vpop.f32.mrb[14].mxu0 }
 0x1e8   : > { %v4048_v16 = vpop.f32.mrb[15].mxu0 }
 0x1e9   : > { %v3243_v8 = vadd.f32 %v4046_v32, %v3194_v25  ;;  %v4049_v34 = vadd.f32 %v4048_v16, %v4047_v33  ;;  %v4072_v36 = vpop.f32.mrb[12].mxu1 }
 0x1ea   : > { %v4073_v39 = vpop.f32.mrb[13].mxu1 }
 0x1eb   : > { %v3246_v35 = vadd.f32 %v4049_v34, %v3197_v20  ;;  %v4074_v61 = vadd.f32 %v4073_v39, %v4072_v36  ;;  %v4075_v40 = vpop.f32.mrb[14].mxu1 }
 0x1ec   : > { %v4076_v4 = vpop.f32.mrb[15].mxu1 }
 0x1ed   : > { %v3292_v41 = vadd.f32 %v4074_v61, %v3243_v8  ;;  %v4077_v21 = vadd.f32 %v4076_v4, %v4075_v40 }
 0x1ef   : > { %v3295_v42 = vadd.f32 %v4077_v21, %v3246_v35 }
 0x1fb   : > { %v4094_v44 = vpop.f32.mrb[16].mxu0 }
 0x1fc   : > { %v4095_v48 = vpop.f32.mrb[17].mxu0 }
 0x1fd   : > { %v4096_v49 = vadd.f32 %v4095_v48, %v4094_v44  ;;  %v4097_v10 = vpop.f32.mrb[18].mxu0 }
 0x1fe   : > { %v4122_v47 = vpop.f32.mrb[16].mxu1  ;;  %v4098_v52 = vpop.f32.mrb[19].mxu0 }
 0x1ff   : > { %v4123_v50 = vpop.f32.mrb[17].mxu1  ;;  %v3333_v3 = vadd.f32 %v4096_v49, %v3284_v29  ;;  %v4099_v56 = vadd.f32 %v4098_v52, %v4097_v10 }
 0x200   : > { %v4124_v51 = vadd.f32 %v4123_v50, %v4122_v47  ;;  %v4125_v19 = vpop.f32.mrb[18].mxu1 }
 0x201   : > { %v4126_v9 = vpop.f32.mrb[19].mxu1  ;;  %v3336_v46 = vadd.f32 %v4099_v56, %v3287_v58 }
 0x202   : > { %v4127_v59 = vadd.f32 %v4126_v9, %v4125_v19  ;;  %v3382_v24 = vadd.f32 %v4124_v51, %v3333_v3 }
 0x204   : > { %v3385_v15 = vadd.f32 %v4127_v59, %v3336_v46 }
 0x206   : > { %v4100_v62 = vpop.f32.mrb[20].mxu0 }
 0x207   : > { %v4101_v45 = vpop.f32.mrb[21].mxu0 }
 0x208   : > { %v4102_v12 = vadd.f32 %v4101_v45, %v4100_v62  ;;  %v4103_v63 = vpop.f32.mrb[22].mxu0  ;;  %v4128_v2 = vpop.f32.mrb[20].mxu1 }
 0x209   : > { %v4104_v38 = vpop.f32.mrb[23].mxu0  ;;  %v4129_v6 = vpop.f32.mrb[21].mxu1 }
 0x20a   : > { %v3341_v0 = vadd.f32 %v4102_v12, %v3292_v41  ;;  %v4105_v1 = vadd.f32 %v4104_v38, %v4103_v63  ;;  %v4130_v13 = vadd.f32 %v4129_v6, %v4128_v2  ;;  %v4131_v30 = vpop.f32.mrb[22].mxu1 }
 0x20b   : > { %v4132_v18 = vpop.f32.mrb[23].mxu1 }
 0x20c   : > { %v3344_v60 = vadd.f32 %v4105_v1, %v3295_v42  ;;  %v3390_v25 = vadd.f32 %v4130_v13, %v3341_v0  ;;  %v4133_v43 = vadd.f32 %v4132_v18, %v4131_v30 }
 0x20e   : > { %v3393_v20 = vadd.f32 %v4133_v43, %v3344_v60 }
 0x21c   : > { %v4150_v54 = vpop.f32.mrb[24].mxu0 }
 0x21d   : > { %v4151_v31 = vpop.f32.mrb[25].mxu0 }
 0x21e   : > { %v4152_v57 = vadd.f32 %v4151_v31, %v4150_v54  ;;  %v4153_v22 = vpop.f32.mrb[26].mxu0  ;;  %v4178_v37 = vpop.f32.mrb[24].mxu1 }
 0x21f   : > { %v4154_v26 = vpop.f32.mrb[27].mxu0  ;;  %v4179_v23 = vpop.f32.mrb[25].mxu1 }
 0x220   : > { %v3431_v53 = vadd.f32 %v4152_v57, %v3382_v24  ;;  %v4155_v27 = vadd.f32 %v4154_v26, %v4153_v22  ;;  %v4180_v14 = vadd.f32 %v4179_v23, %v4178_v37  ;;  %v4181_v7 = vpop.f32.mrb[26].mxu1 }
 0x221   : > { %v4182_v29 = vpop.f32.mrb[27].mxu1 }
 0x222   : > { %v3434_v17 = vadd.f32 %v4155_v27, %v3385_v15  ;;  %v3480_v5 = vadd.f32 %v4180_v14, %v3431_v53  ;;  %v4183_v58 = vadd.f32 %v4182_v29, %v4181_v7 }
 0x224   : > { %v3516_v55 = vadd.f32 %v3942_v28, %v3480_v5  ;;  %v3483_v11 = vadd.f32 %v4183_v58, %v3434_v17  ;;  %v4156_v33 = vpop.f32.mrb[28].mxu0 }
 0x225   : > { %v4157_v36 = vpop.f32.mrb[29].mxu0 }
 0x226   : > { %v3517_v32 = vadd.f32 %v3942_v28, %v3483_v11  ;;  %v3549_v16 = vmul.f32 %v3516_v55, %v3516_v55  ;;  %v4158_v39 = vadd.f32 %v4157_v36, %v4156_v33  ;;  %v4159_v61 = vpop.f32.mrb[30].mxu0  ;;  %v4184_v42 = vpop.f32.mrb[28].mxu1 }
 0x227   : > { %v4160_v4 = vpop.f32.mrb[31].mxu0  ;;  %v4185_v47 = vpop.f32.mrb[29].mxu1 }
 0x228   : > { %v3958_v8 = vpack.c.bf16 %v3517_v32, %v3516_v55  ;;  %v3540_v34 = vadd.f32 %v3517_v32, %v3516_v55  ;;  %v3550_v35 = vmul.f32 %v3517_v32, %v3517_v32  ;;  %v3439_v41 = vadd.f32 %v4158_v39, %v3390_v25  ;;  %v4187_v49 = vpop.f32.mrb[30].mxu1 }
 0x229   : > { %v4161_v21 = vadd.f32 %v4160_v4, %v4159_v61  ;;  %v4186_v48 = vadd.f32 %v4185_v47, %v4184_v42  ;;  %v4188_v50 = vpop.f32.mrb[31].mxu1 }
 0x22a   : > { %3959 = vst [vmem:[%s5565_s8] sm:$0xff] %v3958_v8   ;;  %v3553_v40 = vadd.f32 %v3550_v35, %v3549_v16  ;;  %v4189_v51 = vadd.f32 %v4188_v50, %v4187_v49 }
 0x22b   : > { %v3442_v44 = vadd.f32 %v4161_v21, %v3393_v20  ;;  %v3488_v10 = vadd.f32 %v4186_v48, %v3439_v41 }
 0x22d   : > { %v3518_v19 = vadd.f32 %v3942_v28, %v3488_v10  ;;  %v3491_v52 = vadd.f32 %v4189_v51, %v3442_v44 }
 0x22f   : > { %v3541_v3 = vadd.f32 %v3540_v34, %v3518_v19  ;;  %v3551_v56 = vmul.f32 %v3518_v19, %v3518_v19  ;;  %v3519_v9 = vadd.f32 %v3942_v28, %v3491_v52 }
 0x231   : > { %v3554_v59 = vadd.f32 %v3553_v40, %v3551_v56  ;;  %v3963_v24 = vpack.c.bf16 %v3519_v9, %v3518_v19  ;;  %v3542_v46 = vadd.f32 %v3541_v3, %v3519_v9  ;;  %v3552_v15 = vmul.f32 %v3519_v9, %v3519_v9  ;;  %v3600_v43 = vld [vmem:[%s5565_s8] sm:$0xf] (%p4468_p6)  ;;  %v3602_v20 = vld [vmem:[%s5565_s8 + $0x4] sm:$0xf] (%p4468_p6) }
 0x232   : > { %3601 = vst [vmem:[%s3584_s13] sm:$0xf] (%p4468_p6), %v3600_v43  ;;  %3603 = vst [vmem:[%s3584_s13 + $0x8] sm:$0xf] (%p4468_p6), %v3602_v20 }
 0x233   : > { %3965 = vst [vmem:[%s5565_s8 + $0x8] sm:$0xff] %v3963_v24   ;;  %v3543_v62 = vrot.slane %v3542_v46, 4  ;;  %v3555_v45 = vadd.f32 %v3554_v59, %v3552_v15 }
 0x235   : > { %v3544_v12 = vadd.f32 %v3543_v62, %v3542_v46  ;;  %v3556_v63 = vrot.slane %v3555_v45, 4 }
 0x237   : > { %v3545_v38 = vrot.slane %v3544_v12, 2  ;;  %v3557_v0 = vadd.f32 %v3556_v63, %v3555_v45 }
 0x239   : > { %v3546_v1 = vadd.f32 %v3545_v38, %v3544_v12  ;;  %v3558_v2 = vrot.slane %v3557_v0, 2 }
 0x23a   : > { %v3604_v54 = vld [vmem:[%s5565_s8 + $0x8] sm:$0xf] (%p4468_p6)  ;;  %v3606_v31 = vld [vmem:[%s5565_s8 + $0xc] sm:$0xf] (%p4468_p6) }
 0x23b   : > { %v3547_v60 = vrot.slane %v3546_v1, 1  ;;  %v3559_v6 = vadd.f32 %v3558_v2, %v3557_v0  ;;  %3605 = vst [vmem:[%s3584_s13 + $0x10] sm:$0xf] (%p4468_p6), %v3604_v54  ;;  %3607 = vst [vmem:[%s3584_s13 + $0x18] sm:$0xf] (%p4468_p6), %v3606_v31 }
 0x23c   : > { %3579 = sbr.rel (!%p4468_p6) target bundleno = 579 (0x243), region = 93 }
 0x23d   : > { %v3560_v13 = vrot.slane %v3559_v6, 1  ;;  %v3548_v30 = vadd.f32 %v3547_v60, %v3546_v1 }
 0x23f   : > { %v3561_v18 = vadd.f32 %v3560_v13, %v3559_v6 }
 0x241   : > { %v3563_v25 = vsel %vm3562_vm0, %v3548_v30, %v3561_v18 }
 0x242   : > { %3564 = vst [vmem:[%s1448_s17] sm:$0x3] %v3563_v25 }
 0x243 PF: > { %s17_s25 = sadd.s32 1, %s4396_s25   ;;  %s5606_s21 = smov %s4384_s22 }
 0x244   : > { %p14_p12 = scmp.ge.s32.totalorder %s17_s25, 4   ;;  %s5607_s22 = smov %s4473_s7 }
 0x245   : > { %s5608_s23 = smov %s4392_s24  ;;  %s5609_s24 = smov %s5611_s26 }
 0x246   :  { %16 = sbr.rel (!%p14_p12) target bundleno = 3 (0x3), region = 189 }

// kernel: discriminator_forward.8
= control target key start
LH: loop header
LB: loop body
LE: loop exit
PB: predicated region body
PF: predicated region fallthrough
CT: control target
= control target key end

     0   :  { %s5745_s0 = inlined_call_operand.vmem [shape: bf16[8,4096], index: 0, kind: input, shape index: {}]   ;;  %s5746_s1 = inlined_call_operand.vmem [shape: bf16[4096,512], index: 1, kind: input, shape index: {}]   ;;  %s5747_s2 = inlined_call_operand.vmem [shape: f32[1,512], index: 2, kind: input, shape index: {}]   ;;  %s5748_s3 = inlined_call_operand.vmem [shape: f32[1,4096], index: 3, kind: input, shape index: {}]   ;;  %s5749_s4 = inlined_call_operand.vmem [shape: f32[1,4096], index: 4, kind: input, shape index: {}]   ;;  %s5750_s5 = inlined_call_operand.vmem [shape: bf16[8,512], index: 5, kind: output, shape index: {0}]   ;;  %s5751_s6 = inlined_call_operand.vmem [shape: f32[1,2,512], index: 6, kind: output, shape index: {1}]  }
   0x1   :  { %5752 = sst [smem:[#allocation4_spill]] %s5746_s1 }
   0x2   :  { %s4703_s21 = smov 0   ;;  %s4705_s22 = smov 0  }
   0x3   :  { %s4707_s23 = smov 0   ;;  %s4709_s24 = smov 0  }
   0x4   :  { %s4711_s25 = smov 0   ;;  %s4713_s26 = smov 0  }
   0x5   :  { %s4715_s27 = smov 0  }
   0x6 LB: > { %s29_s28 = sadd.s32 1, %s4657_s25  ;;  %s32_s29 = sadd.s32 1, %s4661_s26  ;;  %s4665_s27 = sphi %s4715_s27, %s17_s27   ;;  %s4661_s26 = sphi %s4713_s26, %s5759_s26   ;;  %s4657_s25 = sphi %s4711_s25, %s5758_s25   ;;  %s4653_s24 = sphi %s4709_s24, %s5757_s24   ;;  %s4649_s23 = sphi %s4707_s23, %s5756_s23   ;;  %s4645_s22 = sphi %s4705_s22, %s5755_s22   ;;  %s4641_s21 = sphi %s4703_s21, %s5754_s21  }
   0x7   : > { %p30_p0 = scmp.ge.s32.totalorder %s29_s28, 2  ;;  %p80_p1 = scmp.ne.s32.totalorder %s4645_s22, %s4641_s21 }
   0x8   : > { %p81_p2 = scmp.eq.s32.totalorder %s4665_s27, 0  ;;  %s73_s9 = sadd.s32 1, %s4645_s22 }
   0x9   : > { %s5761_s28 = smov (%p30_p0, %s29_s28), 0  ;;  %s5763_s29 = smov (!%p30_p0, %s32_s29), %s4661_s26 }
   0xa   : > { %p82_p3 = por %p81_p2, %p80_p1  ;;  %p34_p4 = scmp.ge.s32.totalorder %s5763_s29, 2 }
   0xb   : > { %s68_s30 = ssub.s32 %s4657_s25, %s5761_s28  ;;  %p3889_p6 = scmp.ge.s32.totalorder %s4665_s27, 4 }
   0xc   : > { %s5765_s29 = smov (%p34_p4, %s5763_s29), 0 }
   0xd   : > { %s69_s7 = ssub.s32 %s4661_s26, %s5765_s29  ;;  %240 = sbr.rel (%p3889_p6) target bundleno = 158 (0x9e), region = 16 }
   0xe   : > { %s70_s8 = sor.u32 %s69_s7, %s68_s30 }
   0xf   : > { %p71_p5 = scmp.eq.s32.totalorder %s70_s8, 0 }
  0x11   : > { %s4754_s10 = scalar_select %p71_p5, %s4645_s22, %s73_s9  }
  0x14   : > { %256 = sbr.rel (!%p82_p3) target bundleno = 158 (0x9e), region = 24  ;;  %s258_s11 = sand.u32 (%p82_p3), 1, %s4645_s22  }
  0x15   : > { %s3892_s12 = sshll.u32 (%p82_p3), %s4661_s26, 1  ;;  %s3890_s13 = sshll.u32 (%p82_p3), %s258_s11, 11 }
  0x16   : > { %s4168_s14 = sshll.u32 (%p82_p3), %s4657_s25, 10  ;;  %s5753_s1 = sld [smem:[#allocation4_spill]] (%p82_p3) }
  0x17   : > { %s264_s15 = sadd.s32 (%p82_p3), %s4168_s14, %s3892_s12  ;;  %s4768_s20 = scalar_lea.vmem (%p82_p3), [#allocation3], %s3890_s13 }
  0x18   : > { %s3894_s16 = sshll.u32 (%p82_p3), %s264_s15, 2 }
  0x1c   : > { %s4763_s19 = scalar_lea.vmem %s5753_s1, %s3894_s16 }
  0x1d   : > { %v804_v0 = vld [vmem:[%s4763_s19] sm:$0xff]  ;;  %v806_v1 = vld [vmem:[%s4763_s19 + $0x10] sm:$0xff] }
  0x1e   : > { %v808_v2 = vld [vmem:[%s4763_s19 + $0x20] sm:$0xff]  ;;  %805 = vst [vmem:[%s4768_s20] sm:$0xff] %v804_v0  ;;  %807 = vst [vmem:[%s4768_s20 + $0x8] sm:$0xff] %v806_v1  ;;  %v810_v3 = vld [vmem:[%s4763_s19 + $0x30] sm:$0xff] }
  0x1f   : > { %809 = vst [vmem:[%s4768_s20 + $0x10] sm:$0xff] %v808_v2  ;;  %v812_v4 = vld [vmem:[%s4763_s19 + $0x40] sm:$0xff]  ;;  %v814_v5 = vld [vmem:[%s4763_s19 + $0x50] sm:$0xff]  ;;  %811 = vst [vmem:[%s4768_s20 + $0x18] sm:$0xff] %v810_v3 }
  0x20   : > { %813 = vst [vmem:[%s4768_s20 + $0x20] sm:$0xff] %v812_v4  ;;  %815 = vst [vmem:[%s4768_s20 + $0x28] sm:$0xff] %v814_v5  ;;  %v816_v6 = vld [vmem:[%s4763_s19 + $0x60] sm:$0xff]  ;;  %v818_v7 = vld [vmem:[%s4763_s19 + $0x70] sm:$0xff] }
  0x21   : > { %v820_v8 = vld [vmem:[%s4763_s19 + $0x80] sm:$0xff]  ;;  %817 = vst [vmem:[%s4768_s20 + $0x30] sm:$0xff] %v816_v6  ;;  %819 = vst [vmem:[%s4768_s20 + $0x38] sm:$0xff] %v818_v7  ;;  %v822_v9 = vld [vmem:[%s4763_s19 + $0x90] sm:$0xff] }
  0x22   : > { %821 = vst [vmem:[%s4768_s20 + $0x40] sm:$0xff] %v820_v8  ;;  %v824_v10 = vld [vmem:[%s4763_s19 + $0xa0] sm:$0xff]  ;;  %v826_v11 = vld [vmem:[%s4763_s19 + $0xb0] sm:$0xff]  ;;  %823 = vst [vmem:[%s4768_s20 + $0x48] sm:$0xff] %v822_v9 }
  0x23   : > { %825 = vst [vmem:[%s4768_s20 + $0x50] sm:$0xff] %v824_v10  ;;  %827 = vst [vmem:[%s4768_s20 + $0x58] sm:$0xff] %v826_v11  ;;  %v828_v12 = vld [vmem:[%s4763_s19 + $0xc0] sm:$0xff]  ;;  %v830_v13 = vld [vmem:[%s4763_s19 + $0xd0] sm:$0xff] }
  0x24   : > { %v832_v14 = vld [vmem:[%s4763_s19 + $0xe0] sm:$0xff]  ;;  %829 = vst [vmem:[%s4768_s20 + $0x60] sm:$0xff] %v828_v12  ;;  %831 = vst [vmem:[%s4768_s20 + $0x68] sm:$0xff] %v830_v13  ;;  %v834_v15 = vld [vmem:[%s4763_s19 + $0xf0] sm:$0xff] }
  0x25   : > { %833 = vst [vmem:[%s4768_s20 + $0x70] sm:$0xff] %v832_v14  ;;  %v836_v16 = vld [vmem:[%s4763_s19 + $0x100] sm:$0xff]  ;;  %v838_v17 = vld [vmem:[%s4763_s19 + $0x110] sm:$0xff]  ;;  %835 = vst [vmem:[%s4768_s20 + $0x78] sm:$0xff] %v834_v15 }
  0x26   : > { %837 = vst [vmem:[%s4768_s20 + $0x80] sm:$0xff] %v836_v16  ;;  %839 = vst [vmem:[%s4768_s20 + $0x88] sm:$0xff] %v838_v17  ;;  %v840_v18 = vld [vmem:[%s4763_s19 + $0x120] sm:$0xff]  ;;  %v842_v19 = vld [vmem:[%s4763_s19 + $0x130] sm:$0xff] }
  0x27   : > { %v844_v20 = vld [vmem:[%s4763_s19 + $0x140] sm:$0xff]  ;;  %841 = vst [vmem:[%s4768_s20 + $0x90] sm:$0xff] %v840_v18  ;;  %843 = vst [vmem:[%s4768_s20 + $0x98] sm:$0xff] %v842_v19  ;;  %v846_v21 = vld [vmem:[%s4763_s19 + $0x150] sm:$0xff] }
  0x28   : > { %845 = vst [vmem:[%s4768_s20 + $0xa0] sm:$0xff] %v844_v20  ;;  %v848_v22 = vld [vmem:[%s4763_s19 + $0x160] sm:$0xff]  ;;  %v850_v23 = vld [vmem:[%s4763_s19 + $0x170] sm:$0xff]  ;;  %847 = vst [vmem:[%s4768_s20 + $0xa8] sm:$0xff] %v846_v21 }
  0x29   : > { %849 = vst [vmem:[%s4768_s20 + $0xb0] sm:$0xff] %v848_v22  ;;  %851 = vst [vmem:[%s4768_s20 + $0xb8] sm:$0xff] %v850_v23  ;;  %v852_v24 = vld [vmem:[%s4763_s19 + $0x180] sm:$0xff]  ;;  %v854_v25 = vld [vmem:[%s4763_s19 + $0x190] sm:$0xff] }
  0x2a   : > { %v856_v26 = vld [vmem:[%s4763_s19 + $0x1a0] sm:$0xff]  ;;  %853 = vst [vmem:[%s4768_s20 + $0xc0] sm:$0xff] %v852_v24  ;;  %855 = vst [vmem:[%s4768_s20 + $0xc8] sm:$0xff] %v854_v25  ;;  %v858_v27 = vld [vmem:[%s4763_s19 + $0x1b0] sm:$0xff] }
  0x2b   : > { %857 = vst [vmem:[%s4768_s20 + $0xd0] sm:$0xff] %v856_v26  ;;  %v860_v28 = vld [vmem:[%s4763_s19 + $0x1c0] sm:$0xff]  ;;  %v862_v29 = vld [vmem:[%s4763_s19 + $0x1d0] sm:$0xff]  ;;  %859 = vst [vmem:[%s4768_s20 + $0xd8] sm:$0xff] %v858_v27 }
  0x2c   : > { %861 = vst [vmem:[%s4768_s20 + $0xe0] sm:$0xff] %v860_v28  ;;  %863 = vst [vmem:[%s4768_s20 + $0xe8] sm:$0xff] %v862_v29  ;;  %v864_v30 = vld [vmem:[%s4763_s19 + $0x1e0] sm:$0xff]  ;;  %v866_v31 = vld [vmem:[%s4763_s19 + $0x1f0] sm:$0xff] }
  0x2d   : > { %v868_v32 = vld [vmem:[%s4763_s19 + $0x200] sm:$0xff]  ;;  %865 = vst [vmem:[%s4768_s20 + $0xf0] sm:$0xff] %v864_v30  ;;  %867 = vst [vmem:[%s4768_s20 + $0xf8] sm:$0xff] %v866_v31  ;;  %v870_v33 = vld [vmem:[%s4763_s19 + $0x210] sm:$0xff] }
  0x2e   : > { %869 = vst [vmem:[%s4768_s20 + $0x100] sm:$0xff] %v868_v32  ;;  %v872_v34 = vld [vmem:[%s4763_s19 + $0x220] sm:$0xff]  ;;  %v874_v35 = vld [vmem:[%s4763_s19 + $0x230] sm:$0xff]  ;;  %871 = vst [vmem:[%s4768_s20 + $0x108] sm:$0xff] %v870_v33 }
  0x2f   : > { %873 = vst [vmem:[%s4768_s20 + $0x110] sm:$0xff] %v872_v34  ;;  %875 = vst [vmem:[%s4768_s20 + $0x118] sm:$0xff] %v874_v35  ;;  %v876_v36 = vld [vmem:[%s4763_s19 + $0x240] sm:$0xff]  ;;  %v878_v37 = vld [vmem:[%s4763_s19 + $0x250] sm:$0xff] }
  0x30   : > { %v880_v38 = vld [vmem:[%s4763_s19 + $0x260] sm:$0xff]  ;;  %877 = vst [vmem:[%s4768_s20 + $0x120] sm:$0xff] %v876_v36  ;;  %879 = vst [vmem:[%s4768_s20 + $0x128] sm:$0xff] %v878_v37  ;;  %v882_v39 = vld [vmem:[%s4763_s19 + $0x270] sm:$0xff] }
  0x31   : > { %881 = vst [vmem:[%s4768_s20 + $0x130] sm:$0xff] %v880_v38  ;;  %v884_v40 = vld [vmem:[%s4763_s19 + $0x280] sm:$0xff]  ;;  %v886_v41 = vld [vmem:[%s4763_s19 + $0x290] sm:$0xff]  ;;  %883 = vst [vmem:[%s4768_s20 + $0x138] sm:$0xff] %v882_v39 }
  0x32   : > { %885 = vst [vmem:[%s4768_s20 + $0x140] sm:$0xff] %v884_v40  ;;  %887 = vst [vmem:[%s4768_s20 + $0x148] sm:$0xff] %v886_v41  ;;  %v888_v42 = vld [vmem:[%s4763_s19 + $0x2a0] sm:$0xff]  ;;  %v890_v43 = vld [vmem:[%s4763_s19 + $0x2b0] sm:$0xff] }
  0x33   : > { %v892_v44 = vld [vmem:[%s4763_s19 + $0x2c0] sm:$0xff]  ;;  %889 = vst [vmem:[%s4768_s20 + $0x150] sm:$0xff] %v888_v42  ;;  %891 = vst [vmem:[%s4768_s20 + $0x158] sm:$0xff] %v890_v43  ;;  %v894_v45 = vld [vmem:[%s4763_s19 + $0x2d0] sm:$0xff] }
  0x34   : > { %893 = vst [vmem:[%s4768_s20 + $0x160] sm:$0xff] %v892_v44  ;;  %v896_v46 = vld [vmem:[%s4763_s19 + $0x2e0] sm:$0xff]  ;;  %v898_v47 = vld [vmem:[%s4763_s19 + $0x2f0] sm:$0xff]  ;;  %895 = vst [vmem:[%s4768_s20 + $0x168] sm:$0xff] %v894_v45 }
  0x35   : > { %897 = vst [vmem:[%s4768_s20 + $0x170] sm:$0xff] %v896_v46  ;;  %899 = vst [vmem:[%s4768_s20 + $0x178] sm:$0xff] %v898_v47  ;;  %v900_v48 = vld [vmem:[%s4763_s19 + $0x300] sm:$0xff]  ;;  %v902_v49 = vld [vmem:[%s4763_s19 + $0x310] sm:$0xff] }
  0x36   : > { %v904_v50 = vld [vmem:[%s4763_s19 + $0x320] sm:$0xff]  ;;  %901 = vst [vmem:[%s4768_s20 + $0x180] sm:$0xff] %v900_v48  ;;  %903 = vst [vmem:[%s4768_s20 + $0x188] sm:$0xff] %v902_v49  ;;  %v906_v51 = vld [vmem:[%s4763_s19 + $0x330] sm:$0xff] }
  0x37   : > { %905 = vst [vmem:[%s4768_s20 + $0x190] sm:$0xff] %v904_v50  ;;  %v908_v52 = vld [vmem:[%s4763_s19 + $0x340] sm:$0xff]  ;;  %v910_v53 = vld [vmem:[%s4763_s19 + $0x350] sm:$0xff]  ;;  %907 = vst [vmem:[%s4768_s20 + $0x198] sm:$0xff] %v906_v51 }
  0x38   : > { %909 = vst [vmem:[%s4768_s20 + $0x1a0] sm:$0xff] %v908_v52  ;;  %911 = vst [vmem:[%s4768_s20 + $0x1a8] sm:$0xff] %v910_v53  ;;  %v912_v54 = vld [vmem:[%s4763_s19 + $0x360] sm:$0xff]  ;;  %v914_v55 = vld [vmem:[%s4763_s19 + $0x370] sm:$0xff] }
  0x39   : > { %v916_v56 = vld [vmem:[%s4763_s19 + $0x380] sm:$0xff]  ;;  %913 = vst [vmem:[%s4768_s20 + $0x1b0] sm:$0xff] %v912_v54  ;;  %915 = vst [vmem:[%s4768_s20 + $0x1b8] sm:$0xff] %v914_v55  ;;  %v918_v57 = vld [vmem:[%s4763_s19 + $0x390] sm:$0xff] }
  0x3a   : > { %917 = vst [vmem:[%s4768_s20 + $0x1c0] sm:$0xff] %v916_v56  ;;  %v920_v58 = vld [vmem:[%s4763_s19 + $0x3a0] sm:$0xff]  ;;  %v922_v59 = vld [vmem:[%s4763_s19 + $0x3b0] sm:$0xff]  ;;  %919 = vst [vmem:[%s4768_s20 + $0x1c8] sm:$0xff] %v918_v57 }
  0x3b   : > { %921 = vst [vmem:[%s4768_s20 + $0x1d0] sm:$0xff] %v920_v58  ;;  %923 = vst [vmem:[%s4768_s20 + $0x1d8] sm:$0xff] %v922_v59  ;;  %v924_v60 = vld [vmem:[%s4763_s19 + $0x3c0] sm:$0xff]  ;;  %v926_v61 = vld [vmem:[%s4763_s19 + $0x3d0] sm:$0xff] }
  0x3c   : > { %v928_v62 = vld [vmem:[%s4763_s19 + $0x3e0] sm:$0xff]  ;;  %925 = vst [vmem:[%s4768_s20 + $0x1e0] sm:$0xff] %v924_v60  ;;  %927 = vst [vmem:[%s4768_s20 + $0x1e8] sm:$0xff] %v926_v61  ;;  %v930_v63 = vld [vmem:[%s4763_s19 + $0x3f0] sm:$0xff] }
  0x3d   : > { %929 = vst [vmem:[%s4768_s20 + $0x1f0] sm:$0xff] %v928_v62  ;;  %v932_v0 = vld [vmem:[%s4763_s19 + $0x400] sm:$0xff]  ;;  %v934_v1 = vld [vmem:[%s4763_s19 + $0x410] sm:$0xff]  ;;  %931 = vst [vmem:[%s4768_s20 + $0x1f8] sm:$0xff] %v930_v63 }
  0x3e   : > { %933 = vst [vmem:[%s4768_s20 + $0x200] sm:$0xff] %v932_v0  ;;  %935 = vst [vmem:[%s4768_s20 + $0x208] sm:$0xff] %v934_v1  ;;  %v936_v2 = vld [vmem:[%s4763_s19 + $0x420] sm:$0xff]  ;;  %v938_v3 = vld [vmem:[%s4763_s19 + $0x430] sm:$0xff] }
  0x3f   : > { %v940_v4 = vld [vmem:[%s4763_s19 + $0x440] sm:$0xff]  ;;  %937 = vst [vmem:[%s4768_s20 + $0x210] sm:$0xff] %v936_v2  ;;  %939 = vst [vmem:[%s4768_s20 + $0x218] sm:$0xff] %v938_v3  ;;  %v942_v5 = vld [vmem:[%s4763_s19 + $0x450] sm:$0xff] }
  0x40   : > { %941 = vst [vmem:[%s4768_s20 + $0x220] sm:$0xff] %v940_v4  ;;  %v944_v6 = vld [vmem:[%s4763_s19 + $0x460] sm:$0xff]  ;;  %v946_v7 = vld [vmem:[%s4763_s19 + $0x470] sm:$0xff]  ;;  %943 = vst [vmem:[%s4768_s20 + $0x228] sm:$0xff] %v942_v5 }
  0x41   : > { %945 = vst [vmem:[%s4768_s20 + $0x230] sm:$0xff] %v944_v6  ;;  %947 = vst [vmem:[%s4768_s20 + $0x238] sm:$0xff] %v946_v7  ;;  %v948_v8 = vld [vmem:[%s4763_s19 + $0x480] sm:$0xff]  ;;  %v950_v9 = vld [vmem:[%s4763_s19 + $0x490] sm:$0xff] }
  0x42   : > { %v952_v10 = vld [vmem:[%s4763_s19 + $0x4a0] sm:$0xff]  ;;  %949 = vst [vmem:[%s4768_s20 + $0x240] sm:$0xff] %v948_v8  ;;  %951 = vst [vmem:[%s4768_s20 + $0x248] sm:$0xff] %v950_v9  ;;  %v954_v11 = vld [vmem:[%s4763_s19 + $0x4b0] sm:$0xff] }
  0x43   : > { %953 = vst [vmem:[%s4768_s20 + $0x250] sm:$0xff] %v952_v10  ;;  %v956_v12 = vld [vmem:[%s4763_s19 + $0x4c0] sm:$0xff]  ;;  %v958_v13 = vld [vmem:[%s4763_s19 + $0x4d0] sm:$0xff]  ;;  %955 = vst [vmem:[%s4768_s20 + $0x258] sm:$0xff] %v954_v11 }
  0x44   : > { %957 = vst [vmem:[%s4768_s20 + $0x260] sm:$0xff] %v956_v12  ;;  %959 = vst [vmem:[%s4768_s20 + $0x268] sm:$0xff] %v958_v13  ;;  %v960_v14 = vld [vmem:[%s4763_s19 + $0x4e0] sm:$0xff]  ;;  %v962_v15 = vld [vmem:[%s4763_s19 + $0x4f0] sm:$0xff] }
  0x45   : > { %v964_v16 = vld [vmem:[%s4763_s19 + $0x500] sm:$0xff]  ;;  %961 = vst [vmem:[%s4768_s20 + $0x270] sm:$0xff] %v960_v14  ;;  %963 = vst [vmem:[%s4768_s20 + $0x278] sm:$0xff] %v962_v15  ;;  %v966_v17 = vld [vmem:[%s4763_s19 + $0x510] sm:$0xff] }
  0x46   : > { %965 = vst [vmem:[%s4768_s20 + $0x280] sm:$0xff] %v964_v16  ;;  %v968_v18 = vld [vmem:[%s4763_s19 + $0x520] sm:$0xff]  ;;  %v970_v19 = vld [vmem:[%s4763_s19 + $0x530] sm:$0xff]  ;;  %967 = vst [vmem:[%s4768_s20 + $0x288] sm:$0xff] %v966_v17 }
  0x47   : > { %969 = vst [vmem:[%s4768_s20 + $0x290] sm:$0xff] %v968_v18  ;;  %971 = vst [vmem:[%s4768_s20 + $0x298] sm:$0xff] %v970_v19  ;;  %v972_v20 = vld [vmem:[%s4763_s19 + $0x540] sm:$0xff]  ;;  %v974_v21 = vld [vmem:[%s4763_s19 + $0x550] sm:$0xff] }
  0x48   : > { %v976_v22 = vld [vmem:[%s4763_s19 + $0x560] sm:$0xff]  ;;  %973 = vst [vmem:[%s4768_s20 + $0x2a0] sm:$0xff] %v972_v20  ;;  %975 = vst [vmem:[%s4768_s20 + $0x2a8] sm:$0xff] %v974_v21  ;;  %v978_v23 = vld [vmem:[%s4763_s19 + $0x570] sm:$0xff] }
  0x49   : > { %977 = vst [vmem:[%s4768_s20 + $0x2b0] sm:$0xff] %v976_v22  ;;  %v980_v24 = vld [vmem:[%s4763_s19 + $0x580] sm:$0xff]  ;;  %v982_v25 = vld [vmem:[%s4763_s19 + $0x590] sm:$0xff]  ;;  %979 = vst [vmem:[%s4768_s20 + $0x2b8] sm:$0xff] %v978_v23 }
  0x4a   : > { %981 = vst [vmem:[%s4768_s20 + $0x2c0] sm:$0xff] %v980_v24  ;;  %983 = vst [vmem:[%s4768_s20 + $0x2c8] sm:$0xff] %v982_v25  ;;  %v984_v26 = vld [vmem:[%s4763_s19 + $0x5a0] sm:$0xff]  ;;  %v986_v27 = vld [vmem:[%s4763_s19 + $0x5b0] sm:$0xff] }
  0x4b   : > { %v988_v28 = vld [vmem:[%s4763_s19 + $0x5c0] sm:$0xff]  ;;  %985 = vst [vmem:[%s4768_s20 + $0x2d0] sm:$0xff] %v984_v26  ;;  %987 = vst [vmem:[%s4768_s20 + $0x2d8] sm:$0xff] %v986_v27  ;;  %v990_v29 = vld [vmem:[%s4763_s19 + $0x5d0] sm:$0xff] }
  0x4c   : > { %989 = vst [vmem:[%s4768_s20 + $0x2e0] sm:$0xff] %v988_v28  ;;  %v992_v30 = vld [vmem:[%s4763_s19 + $0x5e0] sm:$0xff]  ;;  %v994_v31 = vld [vmem:[%s4763_s19 + $0x5f0] sm:$0xff]  ;;  %991 = vst [vmem:[%s4768_s20 + $0x2e8] sm:$0xff] %v990_v29 }
  0x4d   : > { %993 = vst [vmem:[%s4768_s20 + $0x2f0] sm:$0xff] %v992_v30  ;;  %995 = vst [vmem:[%s4768_s20 + $0x2f8] sm:$0xff] %v994_v31  ;;  %v996_v32 = vld [vmem:[%s4763_s19 + $0x600] sm:$0xff]  ;;  %v998_v33 = vld [vmem:[%s4763_s19 + $0x610] sm:$0xff] }
  0x4e   : > { %v1000_v34 = vld [vmem:[%s4763_s19 + $0x620] sm:$0xff]  ;;  %997 = vst [vmem:[%s4768_s20 + $0x300] sm:$0xff] %v996_v32  ;;  %999 = vst [vmem:[%s4768_s20 + $0x308] sm:$0xff] %v998_v33  ;;  %v1002_v35 = vld [vmem:[%s4763_s19 + $0x630] sm:$0xff] }
  0x4f   : > { %1001 = vst [vmem:[%s4768_s20 + $0x310] sm:$0xff] %v1000_v34  ;;  %v1004_v36 = vld [vmem:[%s4763_s19 + $0x640] sm:$0xff]  ;;  %v1006_v37 = vld [vmem:[%s4763_s19 + $0x650] sm:$0xff]  ;;  %1003 = vst [vmem:[%s4768_s20 + $0x318] sm:$0xff] %v1002_v35 }
  0x50   : > { %1005 = vst [vmem:[%s4768_s20 + $0x320] sm:$0xff] %v1004_v36  ;;  %1007 = vst [vmem:[%s4768_s20 + $0x328] sm:$0xff] %v1006_v37  ;;  %v1008_v38 = vld [vmem:[%s4763_s19 + $0x660] sm:$0xff]  ;;  %v1010_v39 = vld [vmem:[%s4763_s19 + $0x670] sm:$0xff] }
  0x51   : > { %v1012_v40 = vld [vmem:[%s4763_s19 + $0x680] sm:$0xff]  ;;  %1009 = vst [vmem:[%s4768_s20 + $0x330] sm:$0xff] %v1008_v38  ;;  %1011 = vst [vmem:[%s4768_s20 + $0x338] sm:$0xff] %v1010_v39  ;;  %v1014_v41 = vld [vmem:[%s4763_s19 + $0x690] sm:$0xff] }
  0x52   : > { %1013 = vst [vmem:[%s4768_s20 + $0x340] sm:$0xff] %v1012_v40  ;;  %v1016_v42 = vld [vmem:[%s4763_s19 + $0x6a0] sm:$0xff]  ;;  %v1018_v43 = vld [vmem:[%s4763_s19 + $0x6b0] sm:$0xff]  ;;  %1015 = vst [vmem:[%s4768_s20 + $0x348] sm:$0xff] %v1014_v41 }
  0x53   : > { %1017 = vst [vmem:[%s4768_s20 + $0x350] sm:$0xff] %v1016_v42  ;;  %1019 = vst [vmem:[%s4768_s20 + $0x358] sm:$0xff] %v1018_v43  ;;  %v1020_v44 = vld [vmem:[%s4763_s19 + $0x6c0] sm:$0xff]  ;;  %v1022_v45 = vld [vmem:[%s4763_s19 + $0x6d0] sm:$0xff] }
  0x54   : > { %v1024_v46 = vld [vmem:[%s4763_s19 + $0x6e0] sm:$0xff]  ;;  %1021 = vst [vmem:[%s4768_s20 + $0x360] sm:$0xff] %v1020_v44  ;;  %1023 = vst [vmem:[%s4768_s20 + $0x368] sm:$0xff] %v1022_v45  ;;  %v1026_v47 = vld [vmem:[%s4763_s19 + $0x6f0] sm:$0xff] }
  0x55   : > { %1025 = vst [vmem:[%s4768_s20 + $0x370] sm:$0xff] %v1024_v46  ;;  %v1028_v48 = vld [vmem:[%s4763_s19 + $0x700] sm:$0xff]  ;;  %v1030_v49 = vld [vmem:[%s4763_s19 + $0x710] sm:$0xff]  ;;  %1027 = vst [vmem:[%s4768_s20 + $0x378] sm:$0xff] %v1026_v47 }
  0x56   : > { %1029 = vst [vmem:[%s4768_s20 + $0x380] sm:$0xff] %v1028_v48  ;;  %1031 = vst [vmem:[%s4768_s20 + $0x388] sm:$0xff] %v1030_v49  ;;  %v1032_v50 = vld [vmem:[%s4763_s19 + $0x720] sm:$0xff]  ;;  %v1034_v51 = vld [vmem:[%s4763_s19 + $0x730] sm:$0xff] }
  0x57   : > { %v1036_v52 = vld [vmem:[%s4763_s19 + $0x740] sm:$0xff]  ;;  %1033 = vst [vmem:[%s4768_s20 + $0x390] sm:$0xff] %v1032_v50  ;;  %1035 = vst [vmem:[%s4768_s20 + $0x398] sm:$0xff] %v1034_v51  ;;  %v1038_v53 = vld [vmem:[%s4763_s19 + $0x750] sm:$0xff] }
  0x58   : > { %1037 = vst [vmem:[%s4768_s20 + $0x3a0] sm:$0xff] %v1036_v52  ;;  %v1040_v54 = vld [vmem:[%s4763_s19 + $0x760] sm:$0xff]  ;;  %v1042_v55 = vld [vmem:[%s4763_s19 + $0x770] sm:$0xff]  ;;  %1039 = vst [vmem:[%s4768_s20 + $0x3a8] sm:$0xff] %v1038_v53 }
  0x59   : > { %1041 = vst [vmem:[%s4768_s20 + $0x3b0] sm:$0xff] %v1040_v54  ;;  %1043 = vst [vmem:[%s4768_s20 + $0x3b8] sm:$0xff] %v1042_v55  ;;  %v1044_v56 = vld [vmem:[%s4763_s19 + $0x780] sm:$0xff]  ;;  %v1046_v57 = vld [vmem:[%s4763_s19 + $0x790] sm:$0xff] }
  0x5a   : > { %v1048_v58 = vld [vmem:[%s4763_s19 + $0x7a0] sm:$0xff]  ;;  %1045 = vst [vmem:[%s4768_s20 + $0x3c0] sm:$0xff] %v1044_v56  ;;  %1047 = vst [vmem:[%s4768_s20 + $0x3c8] sm:$0xff] %v1046_v57  ;;  %v1050_v59 = vld [vmem:[%s4763_s19 + $0x7b0] sm:$0xff] }
  0x5b   : > { %1049 = vst [vmem:[%s4768_s20 + $0x3d0] sm:$0xff] %v1048_v58  ;;  %v1052_v60 = vld [vmem:[%s4763_s19 + $0x7c0] sm:$0xff]  ;;  %v1054_v61 = vld [vmem:[%s4763_s19 + $0x7d0] sm:$0xff]  ;;  %1051 = vst [vmem:[%s4768_s20 + $0x3d8] sm:$0xff] %v1050_v59 }
  0x5c   : > { %1053 = vst [vmem:[%s4768_s20 + $0x3e0] sm:$0xff] %v1052_v60  ;;  %1055 = vst [vmem:[%s4768_s20 + $0x3e8] sm:$0xff] %v1054_v61  ;;  %v1056_v62 = vld [vmem:[%s4763_s19 + $0x7e0] sm:$0xff]  ;;  %v1058_v63 = vld [vmem:[%s4763_s19 + $0x7f0] sm:$0xff] }
  0x5d   : > { %v1060_v0 = vld [vmem:[%s4763_s19 + $0x800] sm:$0xff]  ;;  %1057 = vst [vmem:[%s4768_s20 + $0x3f0] sm:$0xff] %v1056_v62  ;;  %1059 = vst [vmem:[%s4768_s20 + $0x3f8] sm:$0xff] %v1058_v63  ;;  %v1062_v1 = vld [vmem:[%s4763_s19 + $0x810] sm:$0xff] }
  0x5e   : > { %1061 = vst [vmem:[%s4768_s20 + $0x400] sm:$0xff] %v1060_v0  ;;  %v1064_v2 = vld [vmem:[%s4763_s19 + $0x820] sm:$0xff]  ;;  %v1066_v3 = vld [vmem:[%s4763_s19 + $0x830] sm:$0xff]  ;;  %1063 = vst [vmem:[%s4768_s20 + $0x408] sm:$0xff] %v1062_v1 }
  0x5f   : > { %1065 = vst [vmem:[%s4768_s20 + $0x410] sm:$0xff] %v1064_v2  ;;  %1067 = vst [vmem:[%s4768_s20 + $0x418] sm:$0xff] %v1066_v3  ;;  %v1068_v4 = vld [vmem:[%s4763_s19 + $0x840] sm:$0xff]  ;;  %v1070_v5 = vld [vmem:[%s4763_s19 + $0x850] sm:$0xff] }
  0x60   : > { %v1072_v6 = vld [vmem:[%s4763_s19 + $0x860] sm:$0xff]  ;;  %1069 = vst [vmem:[%s4768_s20 + $0x420] sm:$0xff] %v1068_v4  ;;  %1071 = vst [vmem:[%s4768_s20 + $0x428] sm:$0xff] %v1070_v5  ;;  %v1074_v7 = vld [vmem:[%s4763_s19 + $0x870] sm:$0xff] }
  0x61   : > { %1073 = vst [vmem:[%s4768_s20 + $0x430] sm:$0xff] %v1072_v6  ;;  %v1076_v8 = vld [vmem:[%s4763_s19 + $0x880] sm:$0xff]  ;;  %v1078_v9 = vld [vmem:[%s4763_s19 + $0x890] sm:$0xff]  ;;  %1075 = vst [vmem:[%s4768_s20 + $0x438] sm:$0xff] %v1074_v7 }
  0x62   : > { %1077 = vst [vmem:[%s4768_s20 + $0x440] sm:$0xff] %v1076_v8  ;;  %1079 = vst [vmem:[%s4768_s20 + $0x448] sm:$0xff] %v1078_v9  ;;  %v1080_v10 = vld [vmem:[%s4763_s19 + $0x8a0] sm:$0xff]  ;;  %v1082_v11 = vld [vmem:[%s4763_s19 + $0x8b0] sm:$0xff] }
  0x63   : > { %v1084_v12 = vld [vmem:[%s4763_s19 + $0x8c0] sm:$0xff]  ;;  %1081 = vst [vmem:[%s4768_s20 + $0x450] sm:$0xff] %v1080_v10  ;;  %1083 = vst [vmem:[%s4768_s20 + $0x458] sm:$0xff] %v1082_v11  ;;  %v1086_v13 = vld [vmem:[%s4763_s19 + $0x8d0] sm:$0xff] }
  0x64   : > { %1085 = vst [vmem:[%s4768_s20 + $0x460] sm:$0xff] %v1084_v12  ;;  %v1088_v14 = vld [vmem:[%s4763_s19 + $0x8e0] sm:$0xff]  ;;  %v1090_v15 = vld [vmem:[%s4763_s19 + $0x8f0] sm:$0xff]  ;;  %1087 = vst [vmem:[%s4768_s20 + $0x468] sm:$0xff] %v1086_v13 }
  0x65   : > { %1089 = vst [vmem:[%s4768_s20 + $0x470] sm:$0xff] %v1088_v14  ;;  %1091 = vst [vmem:[%s4768_s20 + $0x478] sm:$0xff] %v1090_v15  ;;  %v1092_v16 = vld [vmem:[%s4763_s19 + $0x900] sm:$0xff]  ;;  %v1094_v17 = vld [vmem:[%s4763_s19 + $0x910] sm:$0xff] }
  0x66   : > { %v1096_v18 = vld [vmem:[%s4763_s19 + $0x920] sm:$0xff]  ;;  %1093 = vst [vmem:[%s4768_s20 + $0x480] sm:$0xff] %v1092_v16  ;;  %1095 = vst [vmem:[%s4768_s20 + $0x488] sm:$0xff] %v1094_v17  ;;  %v1098_v19 = vld [vmem:[%s4763_s19 + $0x930] sm:$0xff] }
  0x67   : > { %1097 = vst [vmem:[%s4768_s20 + $0x490] sm:$0xff] %v1096_v18  ;;  %v1100_v20 = vld [vmem:[%s4763_s19 + $0x940] sm:$0xff]  ;;  %v1102_v21 = vld [vmem:[%s4763_s19 + $0x950] sm:$0xff]  ;;  %1099 = vst [vmem:[%s4768_s20 + $0x498] sm:$0xff] %v1098_v19 }
  0x68   : > { %1101 = vst [vmem:[%s4768_s20 + $0x4a0] sm:$0xff] %v1100_v20  ;;  %1103 = vst [vmem:[%s4768_s20 + $0x4a8] sm:$0xff] %v1102_v21  ;;  %v1104_v22 = vld [vmem:[%s4763_s19 + $0x960] sm:$0xff]  ;;  %v1106_v23 = vld [vmem:[%s4763_s19 + $0x970] sm:$0xff] }
  0x69   : > { %v1108_v24 = vld [vmem:[%s4763_s19 + $0x980] sm:$0xff]  ;;  %1105 = vst [vmem:[%s4768_s20 + $0x4b0] sm:$0xff] %v1104_v22  ;;  %1107 = vst [vmem:[%s4768_s20 + $0x4b8] sm:$0xff] %v1106_v23  ;;  %v1110_v25 = vld [vmem:[%s4763_s19 + $0x990] sm:$0xff] }
  0x6a   : > { %1109 = vst [vmem:[%s4768_s20 + $0x4c0] sm:$0xff] %v1108_v24  ;;  %v1112_v26 = vld [vmem:[%s4763_s19 + $0x9a0] sm:$0xff]  ;;  %v1114_v27 = vld [vmem:[%s4763_s19 + $0x9b0] sm:$0xff]  ;;  %1111 = vst [vmem:[%s4768_s20 + $0x4c8] sm:$0xff] %v1110_v25 }
  0x6b   : > { %1113 = vst [vmem:[%s4768_s20 + $0x4d0] sm:$0xff] %v1112_v26  ;;  %1115 = vst [vmem:[%s4768_s20 + $0x4d8] sm:$0xff] %v1114_v27  ;;  %v1116_v28 = vld [vmem:[%s4763_s19 + $0x9c0] sm:$0xff]  ;;  %v1118_v29 = vld [vmem:[%s4763_s19 + $0x9d0] sm:$0xff] }
  0x6c   : > { %v1120_v30 = vld [vmem:[%s4763_s19 + $0x9e0] sm:$0xff]  ;;  %1117 = vst [vmem:[%s4768_s20 + $0x4e0] sm:$0xff] %v1116_v28  ;;  %1119 = vst [vmem:[%s4768_s20 + $0x4e8] sm:$0xff] %v1118_v29  ;;  %v1122_v31 = vld [vmem:[%s4763_s19 + $0x9f0] sm:$0xff] }
  0x6d   : > { %1121 = vst [vmem:[%s4768_s20 + $0x4f0] sm:$0xff] %v1120_v30  ;;  %v1124_v32 = vld [vmem:[%s4763_s19 + $0xa00] sm:$0xff]  ;;  %v1126_v33 = vld [vmem:[%s4763_s19 + $0xa10] sm:$0xff]  ;;  %1123 = vst [vmem:[%s4768_s20 + $0x4f8] sm:$0xff] %v1122_v31 }
  0x6e   : > { %1125 = vst [vmem:[%s4768_s20 + $0x500] sm:$0xff] %v1124_v32  ;;  %1127 = vst [vmem:[%s4768_s20 + $0x508] sm:$0xff] %v1126_v33  ;;  %v1128_v34 = vld [vmem:[%s4763_s19 + $0xa20] sm:$0xff]  ;;  %v1130_v35 = vld [vmem:[%s4763_s19 + $0xa30] sm:$0xff] }
  0x6f   : > { %v1132_v36 = vld [vmem:[%s4763_s19 + $0xa40] sm:$0xff]  ;;  %1129 = vst [vmem:[%s4768_s20 + $0x510] sm:$0xff] %v1128_v34  ;;  %1131 = vst [vmem:[%s4768_s20 + $0x518] sm:$0xff] %v1130_v35  ;;  %v1134_v37 = vld [vmem:[%s4763_s19 + $0xa50] sm:$0xff] }
  0x70   : > { %1133 = vst [vmem:[%s4768_s20 + $0x520] sm:$0xff] %v1132_v36  ;;  %v1136_v38 = vld [vmem:[%s4763_s19 + $0xa60] sm:$0xff]  ;;  %v1138_v39 = vld [vmem:[%s4763_s19 + $0xa70] sm:$0xff]  ;;  %1135 = vst [vmem:[%s4768_s20 + $0x528] sm:$0xff] %v1134_v37 }
  0x71   : > { %1137 = vst [vmem:[%s4768_s20 + $0x530] sm:$0xff] %v1136_v38  ;;  %1139 = vst [vmem:[%s4768_s20 + $0x538] sm:$0xff] %v1138_v39  ;;  %v1140_v40 = vld [vmem:[%s4763_s19 + $0xa80] sm:$0xff]  ;;  %v1142_v41 = vld [vmem:[%s4763_s19 + $0xa90] sm:$0xff] }
  0x72   : > { %v1144_v42 = vld [vmem:[%s4763_s19 + $0xaa0] sm:$0xff]  ;;  %1141 = vst [vmem:[%s4768_s20 + $0x540] sm:$0xff] %v1140_v40  ;;  %1143 = vst [vmem:[%s4768_s20 + $0x548] sm:$0xff] %v1142_v41  ;;  %v1146_v43 = vld [vmem:[%s4763_s19 + $0xab0] sm:$0xff] }
  0x73   : > { %1145 = vst [vmem:[%s4768_s20 + $0x550] sm:$0xff] %v1144_v42  ;;  %v1148_v44 = vld [vmem:[%s4763_s19 + $0xac0] sm:$0xff]  ;;  %v1150_v45 = vld [vmem:[%s4763_s19 + $0xad0] sm:$0xff]  ;;  %1147 = vst [vmem:[%s4768_s20 + $0x558] sm:$0xff] %v1146_v43 }
  0x74   : > { %1149 = vst [vmem:[%s4768_s20 + $0x560] sm:$0xff] %v1148_v44  ;;  %1151 = vst [vmem:[%s4768_s20 + $0x568] sm:$0xff] %v1150_v45  ;;  %v1152_v46 = vld [vmem:[%s4763_s19 + $0xae0] sm:$0xff]  ;;  %v1154_v47 = vld [vmem:[%s4763_s19 + $0xaf0] sm:$0xff] }
  0x75   : > { %v1156_v48 = vld [vmem:[%s4763_s19 + $0xb00] sm:$0xff]  ;;  %1153 = vst [vmem:[%s4768_s20 + $0x570] sm:$0xff] %v1152_v46  ;;  %1155 = vst [vmem:[%s4768_s20 + $0x578] sm:$0xff] %v1154_v47  ;;  %v1158_v49 = vld [vmem:[%s4763_s19 + $0xb10] sm:$0xff] }
  0x76   : > { %1157 = vst [vmem:[%s4768_s20 + $0x580] sm:$0xff] %v1156_v48  ;;  %v1160_v50 = vld [vmem:[%s4763_s19 + $0xb20] sm:$0xff]  ;;  %v1162_v51 = vld [vmem:[%s4763_s19 + $0xb30] sm:$0xff]  ;;  %1159 = vst [vmem:[%s4768_s20 + $0x588] sm:$0xff] %v1158_v49 }
  0x77   : > { %1161 = vst [vmem:[%s4768_s20 + $0x590] sm:$0xff] %v1160_v50  ;;  %1163 = vst [vmem:[%s4768_s20 + $0x598] sm:$0xff] %v1162_v51  ;;  %v1164_v52 = vld [vmem:[%s4763_s19 + $0xb40] sm:$0xff]  ;;  %v1166_v53 = vld [vmem:[%s4763_s19 + $0xb50] sm:$0xff] }
  0x78   : > { %v1168_v54 = vld [vmem:[%s4763_s19 + $0xb60] sm:$0xff]  ;;  %1165 = vst [vmem:[%s4768_s20 + $0x5a0] sm:$0xff] %v1164_v52  ;;  %1167 = vst [vmem:[%s4768_s20 + $0x5a8] sm:$0xff] %v1166_v53  ;;  %v1170_v55 = vld [vmem:[%s4763_s19 + $0xb70] sm:$0xff] }
  0x79   : > { %1169 = vst [vmem:[%s4768_s20 + $0x5b0] sm:$0xff] %v1168_v54  ;;  %v1172_v56 = vld [vmem:[%s4763_s19 + $0xb80] sm:$0xff]  ;;  %v1174_v57 = vld [vmem:[%s4763_s19 + $0xb90] sm:$0xff]  ;;  %1171 = vst [vmem:[%s4768_s20 + $0x5b8] sm:$0xff] %v1170_v55 }
  0x7a   : > { %1173 = vst [vmem:[%s4768_s20 + $0x5c0] sm:$0xff] %v1172_v56  ;;  %1175 = vst [vmem:[%s4768_s20 + $0x5c8] sm:$0xff] %v1174_v57  ;;  %v1176_v58 = vld [vmem:[%s4763_s19 + $0xba0] sm:$0xff]  ;;  %v1178_v59 = vld [vmem:[%s4763_s19 + $0xbb0] sm:$0xff] }
  0x7b   : > { %v1180_v60 = vld [vmem:[%s4763_s19 + $0xbc0] sm:$0xff]  ;;  %1177 = vst [vmem:[%s4768_s20 + $0x5d0] sm:$0xff] %v1176_v58  ;;  %1179 = vst [vmem:[%s4768_s20 + $0x5d8] sm:$0xff] %v1178_v59  ;;  %v1182_v61 = vld [vmem:[%s4763_s19 + $0xbd0] sm:$0xff] }
  0x7c   : > { %1181 = vst [vmem:[%s4768_s20 + $0x5e0] sm:$0xff] %v1180_v60  ;;  %v1184_v62 = vld [vmem:[%s4763_s19 + $0xbe0] sm:$0xff]  ;;  %v1186_v63 = vld [vmem:[%s4763_s19 + $0xbf0] sm:$0xff]  ;;  %1183 = vst [vmem:[%s4768_s20 + $0x5e8] sm:$0xff] %v1182_v61 }
  0x7d   : > { %1185 = vst [vmem:[%s4768_s20 + $0x5f0] sm:$0xff] %v1184_v62  ;;  %1187 = vst [vmem:[%s4768_s20 + $0x5f8] sm:$0xff] %v1186_v63  ;;  %v1188_v0 = vld [vmem:[%s4763_s19 + $0xc00] sm:$0xff]  ;;  %v1190_v1 = vld [vmem:[%s4763_s19 + $0xc10] sm:$0xff] }
  0x7e   : > { %v1192_v2 = vld [vmem:[%s4763_s19 + $0xc20] sm:$0xff]  ;;  %1189 = vst [vmem:[%s4768_s20 + $0x600] sm:$0xff] %v1188_v0  ;;  %1191 = vst [vmem:[%s4768_s20 + $0x608] sm:$0xff] %v1190_v1  ;;  %v1194_v3 = vld [vmem:[%s4763_s19 + $0xc30] sm:$0xff] }
  0x7f   : > { %1193 = vst [vmem:[%s4768_s20 + $0x610] sm:$0xff] %v1192_v2  ;;  %v1196_v4 = vld [vmem:[%s4763_s19 + $0xc40] sm:$0xff]  ;;  %v1198_v5 = vld [vmem:[%s4763_s19 + $0xc50] sm:$0xff]  ;;  %1195 = vst [vmem:[%s4768_s20 + $0x618] sm:$0xff] %v1194_v3 }
  0x80   : > { %1197 = vst [vmem:[%s4768_s20 + $0x620] sm:$0xff] %v1196_v4  ;;  %1199 = vst [vmem:[%s4768_s20 + $0x628] sm:$0xff] %v1198_v5  ;;  %v1200_v6 = vld [vmem:[%s4763_s19 + $0xc60] sm:$0xff]  ;;  %v1202_v7 = vld [vmem:[%s4763_s19 + $0xc70] sm:$0xff] }
  0x81   : > { %v1204_v8 = vld [vmem:[%s4763_s19 + $0xc80] sm:$0xff]  ;;  %1201 = vst [vmem:[%s4768_s20 + $0x630] sm:$0xff] %v1200_v6  ;;  %1203 = vst [vmem:[%s4768_s20 + $0x638] sm:$0xff] %v1202_v7  ;;  %v1206_v9 = vld [vmem:[%s4763_s19 + $0xc90] sm:$0xff] }
  0x82   : > { %1205 = vst [vmem:[%s4768_s20 + $0x640] sm:$0xff] %v1204_v8  ;;  %v1208_v10 = vld [vmem:[%s4763_s19 + $0xca0] sm:$0xff]  ;;  %v1210_v11 = vld [vmem:[%s4763_s19 + $0xcb0] sm:$0xff]  ;;  %1207 = vst [vmem:[%s4768_s20 + $0x648] sm:$0xff] %v1206_v9 }
  0x83   : > { %1209 = vst [vmem:[%s4768_s20 + $0x650] sm:$0xff] %v1208_v10  ;;  %1211 = vst [vmem:[%s4768_s20 + $0x658] sm:$0xff] %v1210_v11  ;;  %v1212_v12 = vld [vmem:[%s4763_s19 + $0xcc0] sm:$0xff]  ;;  %v1214_v13 = vld [vmem:[%s4763_s19 + $0xcd0] sm:$0xff] }
  0x84   : > { %v1216_v14 = vld [vmem:[%s4763_s19 + $0xce0] sm:$0xff]  ;;  %1213 = vst [vmem:[%s4768_s20 + $0x660] sm:$0xff] %v1212_v12  ;;  %1215 = vst [vmem:[%s4768_s20 + $0x668] sm:$0xff] %v1214_v13  ;;  %v1218_v15 = vld [vmem:[%s4763_s19 + $0xcf0] sm:$0xff] }
  0x85   : > { %1217 = vst [vmem:[%s4768_s20 + $0x670] sm:$0xff] %v1216_v14  ;;  %v1220_v16 = vld [vmem:[%s4763_s19 + $0xd00] sm:$0xff]  ;;  %v1222_v17 = vld [vmem:[%s4763_s19 + $0xd10] sm:$0xff]  ;;  %1219 = vst [vmem:[%s4768_s20 + $0x678] sm:$0xff] %v1218_v15 }
  0x86   : > { %1221 = vst [vmem:[%s4768_s20 + $0x680] sm:$0xff] %v1220_v16  ;;  %1223 = vst [vmem:[%s4768_s20 + $0x688] sm:$0xff] %v1222_v17  ;;  %v1224_v18 = vld [vmem:[%s4763_s19 + $0xd20] sm:$0xff]  ;;  %v1226_v19 = vld [vmem:[%s4763_s19 + $0xd30] sm:$0xff] }
  0x87   : > { %v1228_v20 = vld [vmem:[%s4763_s19 + $0xd40] sm:$0xff]  ;;  %1225 = vst [vmem:[%s4768_s20 + $0x690] sm:$0xff] %v1224_v18  ;;  %1227 = vst [vmem:[%s4768_s20 + $0x698] sm:$0xff] %v1226_v19  ;;  %v1230_v21 = vld [vmem:[%s4763_s19 + $0xd50] sm:$0xff] }
  0x88   : > { %1229 = vst [vmem:[%s4768_s20 + $0x6a0] sm:$0xff] %v1228_v20  ;;  %v1232_v22 = vld [vmem:[%s4763_s19 + $0xd60] sm:$0xff]  ;;  %v1234_v23 = vld [vmem:[%s4763_s19 + $0xd70] sm:$0xff]  ;;  %1231 = vst [vmem:[%s4768_s20 + $0x6a8] sm:$0xff] %v1230_v21 }
  0x89   : > { %1233 = vst [vmem:[%s4768_s20 + $0x6b0] sm:$0xff] %v1232_v22  ;;  %1235 = vst [vmem:[%s4768_s20 + $0x6b8] sm:$0xff] %v1234_v23  ;;  %v1236_v24 = vld [vmem:[%s4763_s19 + $0xd80] sm:$0xff]  ;;  %v1238_v25 = vld [vmem:[%s4763_s19 + $0xd90] sm:$0xff] }
  0x8a   : > { %v1240_v26 = vld [vmem:[%s4763_s19 + $0xda0] sm:$0xff]  ;;  %1237 = vst [vmem:[%s4768_s20 + $0x6c0] sm:$0xff] %v1236_v24  ;;  %1239 = vst [vmem:[%s4768_s20 + $0x6c8] sm:$0xff] %v1238_v25  ;;  %v1242_v27 = vld [vmem:[%s4763_s19 + $0xdb0] sm:$0xff] }
  0x8b   : > { %1241 = vst [vmem:[%s4768_s20 + $0x6d0] sm:$0xff] %v1240_v26  ;;  %v1244_v28 = vld [vmem:[%s4763_s19 + $0xdc0] sm:$0xff]  ;;  %v1246_v29 = vld [vmem:[%s4763_s19 + $0xdd0] sm:$0xff]  ;;  %1243 = vst [vmem:[%s4768_s20 + $0x6d8] sm:$0xff] %v1242_v27 }
  0x8c   : > { %1245 = vst [vmem:[%s4768_s20 + $0x6e0] sm:$0xff] %v1244_v28  ;;  %1247 = vst [vmem:[%s4768_s20 + $0x6e8] sm:$0xff] %v1246_v29  ;;  %v1248_v30 = vld [vmem:[%s4763_s19 + $0xde0] sm:$0xff]  ;;  %v1250_v31 = vld [vmem:[%s4763_s19 + $0xdf0] sm:$0xff] }
  0x8d   : > { %v1252_v32 = vld [vmem:[%s4763_s19 + $0xe00] sm:$0xff]  ;;  %1249 = vst [vmem:[%s4768_s20 + $0x6f0] sm:$0xff] %v1248_v30  ;;  %1251 = vst [vmem:[%s4768_s20 + $0x6f8] sm:$0xff] %v1250_v31  ;;  %v1254_v33 = vld [vmem:[%s4763_s19 + $0xe10] sm:$0xff] }
  0x8e   : > { %1253 = vst [vmem:[%s4768_s20 + $0x700] sm:$0xff] %v1252_v32  ;;  %v1256_v34 = vld [vmem:[%s4763_s19 + $0xe20] sm:$0xff]  ;;  %v1258_v35 = vld [vmem:[%s4763_s19 + $0xe30] sm:$0xff]  ;;  %1255 = vst [vmem:[%s4768_s20 + $0x708] sm:$0xff] %v1254_v33 }
  0x8f   : > { %1257 = vst [vmem:[%s4768_s20 + $0x710] sm:$0xff] %v1256_v34  ;;  %1259 = vst [vmem:[%s4768_s20 + $0x718] sm:$0xff] %v1258_v35  ;;  %v1260_v36 = vld [vmem:[%s4763_s19 + $0xe40] sm:$0xff]  ;;  %v1262_v37 = vld [vmem:[%s4763_s19 + $0xe50] sm:$0xff] }
  0x90   : > { %v1264_v38 = vld [vmem:[%s4763_s19 + $0xe60] sm:$0xff]  ;;  %1261 = vst [vmem:[%s4768_s20 + $0x720] sm:$0xff] %v1260_v36  ;;  %1263 = vst [vmem:[%s4768_s20 + $0x728] sm:$0xff] %v1262_v37  ;;  %v1266_v39 = vld [vmem:[%s4763_s19 + $0xe70] sm:$0xff] }
  0x91   : > { %1265 = vst [vmem:[%s4768_s20 + $0x730] sm:$0xff] %v1264_v38  ;;  %v1268_v40 = vld [vmem:[%s4763_s19 + $0xe80] sm:$0xff]  ;;  %v1270_v41 = vld [vmem:[%s4763_s19 + $0xe90] sm:$0xff]  ;;  %1267 = vst [vmem:[%s4768_s20 + $0x738] sm:$0xff] %v1266_v39 }
  0x92   : > { %1269 = vst [vmem:[%s4768_s20 + $0x740] sm:$0xff] %v1268_v40  ;;  %1271 = vst [vmem:[%s4768_s20 + $0x748] sm:$0xff] %v1270_v41  ;;  %v1272_v42 = vld [vmem:[%s4763_s19 + $0xea0] sm:$0xff]  ;;  %v1274_v43 = vld [vmem:[%s4763_s19 + $0xeb0] sm:$0xff] }
  0x93   : > { %v1276_v44 = vld [vmem:[%s4763_s19 + $0xec0] sm:$0xff]  ;;  %1273 = vst [vmem:[%s4768_s20 + $0x750] sm:$0xff] %v1272_v42  ;;  %1275 = vst [vmem:[%s4768_s20 + $0x758] sm:$0xff] %v1274_v43  ;;  %v1278_v45 = vld [vmem:[%s4763_s19 + $0xed0] sm:$0xff] }
  0x94   : > { %1277 = vst [vmem:[%s4768_s20 + $0x760] sm:$0xff] %v1276_v44  ;;  %v1280_v46 = vld [vmem:[%s4763_s19 + $0xee0] sm:$0xff]  ;;  %v1282_v47 = vld [vmem:[%s4763_s19 + $0xef0] sm:$0xff]  ;;  %1279 = vst [vmem:[%s4768_s20 + $0x768] sm:$0xff] %v1278_v45 }
  0x95   : > { %1281 = vst [vmem:[%s4768_s20 + $0x770] sm:$0xff] %v1280_v46  ;;  %1283 = vst [vmem:[%s4768_s20 + $0x778] sm:$0xff] %v1282_v47  ;;  %v1284_v48 = vld [vmem:[%s4763_s19 + $0xf00] sm:$0xff]  ;;  %v1286_v49 = vld [vmem:[%s4763_s19 + $0xf10] sm:$0xff] }
  0x96   : > { %v1288_v50 = vld [vmem:[%s4763_s19 + $0xf20] sm:$0xff]  ;;  %1285 = vst [vmem:[%s4768_s20 + $0x780] sm:$0xff] %v1284_v48  ;;  %1287 = vst [vmem:[%s4768_s20 + $0x788] sm:$0xff] %v1286_v49  ;;  %v1290_v51 = vld [vmem:[%s4763_s19 + $0xf30] sm:$0xff] }
  0x97   : > { %1289 = vst [vmem:[%s4768_s20 + $0x790] sm:$0xff] %v1288_v50  ;;  %v1292_v52 = vld [vmem:[%s4763_s19 + $0xf40] sm:$0xff]  ;;  %v1294_v53 = vld [vmem:[%s4763_s19 + $0xf50] sm:$0xff]  ;;  %1291 = vst [vmem:[%s4768_s20 + $0x798] sm:$0xff] %v1290_v51 }
  0x98   : > { %1293 = vst [vmem:[%s4768_s20 + $0x7a0] sm:$0xff] %v1292_v52  ;;  %1295 = vst [vmem:[%s4768_s20 + $0x7a8] sm:$0xff] %v1294_v53  ;;  %v1296_v54 = vld [vmem:[%s4763_s19 + $0xf60] sm:$0xff]  ;;  %v1298_v55 = vld [vmem:[%s4763_s19 + $0xf70] sm:$0xff] }
  0x99   : > { %v1300_v56 = vld [vmem:[%s4763_s19 + $0xf80] sm:$0xff]  ;;  %1297 = vst [vmem:[%s4768_s20 + $0x7b0] sm:$0xff] %v1296_v54  ;;  %1299 = vst [vmem:[%s4768_s20 + $0x7b8] sm:$0xff] %v1298_v55  ;;  %v1302_v57 = vld [vmem:[%s4763_s19 + $0xf90] sm:$0xff] }
  0x9a   : > { %1301 = vst [vmem:[%s4768_s20 + $0x7c0] sm:$0xff] %v1300_v56  ;;  %v1304_v58 = vld [vmem:[%s4763_s19 + $0xfa0] sm:$0xff]  ;;  %v1306_v59 = vld [vmem:[%s4763_s19 + $0xfb0] sm:$0xff]  ;;  %1303 = vst [vmem:[%s4768_s20 + $0x7c8] sm:$0xff] %v1302_v57 }
  0x9b   : > { %1305 = vst [vmem:[%s4768_s20 + $0x7d0] sm:$0xff] %v1304_v58  ;;  %1307 = vst [vmem:[%s4768_s20 + $0x7d8] sm:$0xff] %v1306_v59  ;;  %v1308_v60 = vld [vmem:[%s4763_s19 + $0xfc0] sm:$0xff]  ;;  %v1310_v61 = vld [vmem:[%s4763_s19 + $0xfd0] sm:$0xff] }
  0x9c   : > { %v1312_v62 = vld [vmem:[%s4763_s19 + $0xfe0] sm:$0xff]  ;;  %1309 = vst [vmem:[%s4768_s20 + $0x7e0] sm:$0xff] %v1308_v60  ;;  %1311 = vst [vmem:[%s4768_s20 + $0x7e8] sm:$0xff] %v1310_v61  ;;  %v1314_v63 = vld [vmem:[%s4763_s19 + $0xff0] sm:$0xff] }
  0x9d   : > { %1313 = vst [vmem:[%s4768_s20 + $0x7f0] sm:$0xff] %v1312_v62  ;;  %1315 = vst [vmem:[%s4768_s20 + $0x7f8] sm:$0xff] %v1314_v63 }
  0x9e PF: > { %p3895_p7 = scmp.ge.s32.totalorder %s4665_s27, 1  ;;  %p1344_p8 = scmp.lt.s32.totalorder %s4665_s27, 5 }
  0xa0   : > { %p1345_p9 = pnand %p3895_p7, %p1344_p8 }
  0xa1   : > { %s1351_s30 = sand.u32 (!%p1345_p9), 1, %s4641_s21   ;;  %s3897_s7 = sshll.u32 (!%p1345_p9), %s4649_s23, 4 }
  0xa2   : > { %1348 = sbr.rel (%p1345_p9) target bundleno = 685 (0x2ad), region = 74  ;;  %s3896_s8 = sshll.u32 (!%p1345_p9), %s1351_s30, 11 }
  0xa3   : > { %p1417_p10 = scmp.lt.s32.totalorder (!%p1345_p9), %s3897_s7, 31  ;;  %s3899_s9 = sshll.u32 (!%p1345_p9), %s4653_s24, 1 }
  0xa4   : > { %p1427_p11 = scmp.lt.s32.totalorder (!%p1345_p9), %s3899_s9, 3  ;;  %s5317_s19 = scalar_lea.vmem (!%p1345_p9), [#allocation3], %s3896_s8 }
  0xa5   : > { %p3906_p12 = scmp.ne.s32.totalorder (!%p1345_p9), %s4649_s23, 0 }
  0xa9   : > { %s5767_s7 = smov (!%p1417_p10, %s3897_s7), 31  ;;  %s5769_s9 = smov (!%p1427_p11, %s3899_s9), 3 }
  0xaa   : > { %s3898_s11 = sshll.u32 %s5767_s7, 2  ;;  %s5287_s14 = scalar_lea.vmem %s5748_s3, %s5767_s7  ;;  %v4667_v0 = vmov (!%p3906_p12), 0.0  }
  0xab   : > { %s5292_s17 = scalar_lea.vmem %s5745_s0, %s3898_s11  ;;  %s5297_s21 = scalar_lea.vmem %s5749_s4, %s5767_s7  ;;  %1465 = vst [vmem:[#allocation2] sm:$0xff] (!%p3906_p12), %v4667_v0  ;;  %1466 = vst [vmem:[#allocation2 + $0x8] sm:$0xff] (!%p3906_p12), %v4667_v0 }
  0xac   : > { %s1429_s30 = scalar_lea.vmem %s5747_s2, %s5769_s9  ;;  %s3903_s12 = sshll.u32 %s5769_s9, 2 }
  0xad   : > { %s5309_s11 = scalar_lea.vmem %s5750_s5, %s3903_s12  ;;  %s3905_s15 = sshll.u32 %s5769_s9, 1 }
  0xae   : > { %s5315_s7 = scalar_lea.vmem %s5751_s6, %s3905_s15  ;;  %1464 = sbr.rel (%p3906_p12) target bundleno = 181 (0xb5), region = 82 }
  0xb5 PF: > { %v4227_v1 = vld [vmem:[%s5317_s19 + $0x4] ss:$8 sps:$4 sm:$0xff]   ;;  %v4231_v3 = vld [vmem:[%s5317_s19] ss:$8 sps:$4 sm:$0xff]   ;;  %v4233_v5 = vld [vmem:[%s5317_s19 + $0x14] ss:$8 sps:$4 sm:$0xff]   ;;  %v1495_v38 = vlaneseq }
  0xb6   : > { %v4229_v2 = vld [vmem:[%s5317_s19 + $0x104] ss:$8 sps:$4 sm:$0xff]   ;;  %3293 = vmatprep.subr.bf16.mxu0 %v4227_v1  ;;  %v4232_v4 = vld [vmem:[%s5317_s19 + $0x100] ss:$8 sps:$4 sm:$0xff]   ;;  %v4235_v6 = vld [vmem:[%s5317_s19 + $0x114] ss:$8 sps:$4 sm:$0xff]  }
  0xb7   : > { %3334 = vmatprep.subr.bf16.mxu1 %v4229_v2  ;;  %3294 = vmatpush1.bf16.msra.mxu0 %v4231_v3  ;;  %v4237_v7 = vld [vmem:[%s5317_s19 + $0x10] ss:$8 sps:$4 sm:$0xff]   ;;  %v4239_v9 = vld [vmem:[%s5317_s19 + $0x24] ss:$8 sps:$4 sm:$0xff]   ;;  %v4243_v11 = vld [vmem:[%s5317_s19 + $0x20] ss:$8 sps:$4 sm:$0xff]  }
  0xb8   : > { %3335 = vmatpush1.bf16.msra.mxu1 %v4232_v4  ;;  %3295 = vmatprep.subr.bf16.mxu0 %v4233_v5  ;;  %v4238_v8 = vld [vmem:[%s5317_s19 + $0x110] ss:$8 sps:$4 sm:$0xff]   ;;  %v4241_v10 = vld [vmem:[%s5317_s19 + $0x124] ss:$8 sps:$4 sm:$0xff]   ;;  %v4244_v12 = vld [vmem:[%s5317_s19 + $0x120] ss:$8 sps:$4 sm:$0xff]  }
  0xb9   : > { %3336 = vmatprep.subr.bf16.mxu1 %v4235_v6  ;;  %v4245_v13 = vld [vmem:[%s5317_s19 + $0x34] ss:$8 sps:$4 sm:$0xff]   ;;  %v4249_v15 = vld [vmem:[%s5317_s19 + $0x30] ss:$8 sps:$4 sm:$0xff]   ;;  %v4251_v17 = vld [vmem:[%s5317_s19 + $0x44] ss:$8 sps:$4 sm:$0xff]  }
  0xba   : > { %v4247_v14 = vld [vmem:[%s5317_s19 + $0x134] ss:$8 sps:$4 sm:$0xff]   ;;  %v4250_v16 = vld [vmem:[%s5317_s19 + $0x130] ss:$8 sps:$4 sm:$0xff]   ;;  %v4253_v18 = vld [vmem:[%s5317_s19 + $0x144] ss:$8 sps:$4 sm:$0xff]  }
  0xbb   : > { %3296 = vmatpush1.bf16.msra.mxu0 %v4237_v7  ;;  %v4255_v19 = vld [vmem:[%s5317_s19 + $0x40] ss:$8 sps:$4 sm:$0xff]   ;;  %v4257_v21 = vld [vmem:[%s5317_s19 + $0x54] ss:$8 sps:$4 sm:$0xff]   ;;  %v4261_v23 = vld [vmem:[%s5317_s19 + $0x50] ss:$8 sps:$4 sm:$0xff]  }
  0xbc   : > { %3337 = vmatpush1.bf16.msra.mxu1 %v4238_v8  ;;  %3297 = vmatprep.subr.bf16.mxu0 %v4239_v9  ;;  %v4256_v20 = vld [vmem:[%s5317_s19 + $0x140] ss:$8 sps:$4 sm:$0xff]   ;;  %v4259_v22 = vld [vmem:[%s5317_s19 + $0x154] ss:$8 sps:$4 sm:$0xff]   ;;  %v4262_v24 = vld [vmem:[%s5317_s19 + $0x150] ss:$8 sps:$4 sm:$0xff]  }
  0xbd   : > { %3338 = vmatprep.subr.bf16.mxu1 %v4241_v10  ;;  %v4263_v25 = vld [vmem:[%s5317_s19 + $0x64] ss:$8 sps:$4 sm:$0xff]   ;;  %v4267_v27 = vld [vmem:[%s5317_s19 + $0x60] ss:$8 sps:$4 sm:$0xff]   ;;  %v4269_v29 = vld [vmem:[%s5317_s19 + $0x74] ss:$8 sps:$4 sm:$0xff]  }
  0xbe   : > { %v4265_v26 = vld [vmem:[%s5317_s19 + $0x164] ss:$8 sps:$4 sm:$0xff]   ;;  %v4268_v28 = vld [vmem:[%s5317_s19 + $0x160] ss:$8 sps:$4 sm:$0xff]   ;;  %v4271_v30 = vld [vmem:[%s5317_s19 + $0x174] ss:$8 sps:$4 sm:$0xff]  }
  0xbf   : > { %3298 = vmatpush1.bf16.msra.mxu0 %v4243_v11  ;;  %v4273_v31 = vld [vmem:[%s5317_s19 + $0x70] ss:$8 sps:$4 sm:$0xff]   ;;  %v4275_v33 = vld [vmem:[%s5317_s19 + $0x84] ss:$8 sps:$4 sm:$0xff]   ;;  %v4279_v35 = vld [vmem:[%s5317_s19 + $0x80] ss:$8 sps:$4 sm:$0xff]  }
  0xc0   : > { %3339 = vmatpush1.bf16.msra.mxu1 %v4244_v12  ;;  %3299 = vmatprep.subr.bf16.mxu0 %v4245_v13  ;;  %v4274_v32 = vld [vmem:[%s5317_s19 + $0x170] ss:$8 sps:$4 sm:$0xff]   ;;  %v4277_v34 = vld [vmem:[%s5317_s19 + $0x184] ss:$8 sps:$4 sm:$0xff]   ;;  %v4280_v36 = vld [vmem:[%s5317_s19 + $0x180] ss:$8 sps:$4 sm:$0xff]  }
  0xc1   : > { %3340 = vmatprep.subr.bf16.mxu1 %v4247_v14  ;;  %v4281_v37 = vld [vmem:[%s5317_s19 + $0x94] ss:$8 sps:$4 sm:$0xff]   ;;  %v4285_v40 = vld [vmem:[%s5317_s19 + $0x90] ss:$8 sps:$4 sm:$0xff]   ;;  %v4287_v42 = vld [vmem:[%s5317_s19 + $0xa4] ss:$8 sps:$4 sm:$0xff]  }
  0xc2   : > { %v4283_v39 = vld [vmem:[%s5317_s19 + $0x194] ss:$8 sps:$4 sm:$0xff]   ;;  %v4286_v41 = vld [vmem:[%s5317_s19 + $0x190] ss:$8 sps:$4 sm:$0xff]   ;;  %v5361_v43 = vshrl.u32 %v1495_v38, 7  ;;  %p4163_p13 = scmp.ne.s32.totalorder %s4649_s23, 1 }
  0xc3   : > { %3300 = vmatpush1.bf16.msra.mxu0 %v4249_v15  ;;  %v4289_v44 = vld [vmem:[%s5317_s19 + $0x1a4] ss:$8 sps:$4 sm:$0xff]   ;;  %v4291_v45 = vld [vmem:[%s5317_s19 + $0xa0] ss:$8 sps:$4 sm:$0xff]   ;;  %v4293_v47 = vld [vmem:[%s5317_s19 + $0xb4] ss:$8 sps:$4 sm:$0xff]  }
  0xc4   : > { %3341 = vmatpush1.bf16.msra.mxu1 %v4250_v16  ;;  %3301 = vmatprep.subr.bf16.mxu0 %v4251_v17  ;;  %v4292_v46 = vld [vmem:[%s5317_s19 + $0x1a0] ss:$8 sps:$4 sm:$0xff]   ;;  %v5368_v48 = vsub.s32 1, %v5361_v43  ;;  %v4295_v49 = vld [vmem:[%s5317_s19 + $0x1b4] ss:$8 sps:$4 sm:$0xff]   ;;  %v5372_v50 = vsub.s32 3, %v5361_v43 }
  0xc5   : > { %3342 = vmatprep.subr.bf16.mxu1 %v4253_v18  ;;  %v5375_v51 = vsub.s32 0, %v5361_v43  ;;  %v4297_v52 = vld [vmem:[%s5317_s19 + $0xb0] ss:$8 sps:$4 sm:$0xff]   ;;  %v5381_v55 = vsub.s32 2, %v5361_v43  ;;  %v4299_v61 = vld [vmem:[%s5317_s19 + $0xc4] ss:$8 sps:$4 sm:$0xff]  }
  0xc6   : > { %v4298_v53 = vld [vmem:[%s5317_s19 + $0x1b0] ss:$8 sps:$4 sm:$0xff]   ;;  %v4301_v2 = vld [vmem:[%s5317_s19 + $0x1c4] ss:$8 sps:$4 sm:$0xff]   ;;  %v4303_v8 = vld [vmem:[%s5317_s19 + $0xc0] ss:$8 sps:$4 sm:$0xff]  }
  0xc7   : > { %3302 = vmatpush1.bf16.msra.mxu0 %v4255_v19  ;;  %v1467_v54 = vld [vmem:[%s5292_s17] sm:$0xff]  ;;  %v1468_v60 = vld [vmem:[%s5292_s17 + $0x8] sm:$0xff]  ;;  %v4304_v9 = vld [vmem:[%s5317_s19 + $0x1c0] ss:$8 sps:$4 sm:$0xff]  }
  0xc8   : > { %3343 = vmatpush1.bf16.msra.mxu1 %v4256_v20  ;;  %3303 = vmatprep.subr.bf16.mxu0 %v4257_v21  ;;  %v1475_v56 = vunpack.c.l.bf16 %v1467_v54  ;;  %v1476_v57 = vunpack.c.h.bf16 %v1467_v54  ;;  %v5384_v58 = vld [vmem:[%s5287_s14] sm:$0xff]  ;;  %v1477_v0 = vunpack.c.l.bf16 %v1468_v60  ;;  %v1478_v1 = vunpack.c.h.bf16 %v1468_v60  ;;  %v4335_v60 = vld [vmem:[%s5317_s19 + $0x220] ss:$8 sps:$4 sm:$0xff]  }
  0xc9   : > { %3344 = vmatprep.subr.bf16.mxu1 %v4259_v22  ;;  %v5387_v59 = vld [vmem:[%s5297_s21] sm:$0xff]  ;;  %v1502_v62 = vrot.slane %v5384_v58, %v5368_v48  ;;  %v1510_v3 = vrot.slane %v5384_v58, %v5372_v50  ;;  %v1498_v5 = vrot.slane %v5384_v58, %v5375_v51  ;;  %v1506_v7 = vrot.slane %v5384_v58, %v5381_v55 }
  0xca   : > { %v1602_v63 = vrot.slane %v5387_v59, %v5368_v48  ;;  %v1610_v4 = vrot.slane %v5387_v59, %v5372_v50  ;;  %v1598_v11 = vrot.slane %v5387_v59, %v5375_v51  ;;  %v1606_v12 = vrot.slane %v5387_v59, %v5381_v55  ;;  %v4305_v13 = vld [vmem:[%s5317_s19 + $0xd4] ss:$8 sps:$4 sm:$0xff]   ;;  %v4309_v21 = vld [vmem:[%s5317_s19 + $0xd0] ss:$8 sps:$4 sm:$0xff]  }
  0xcb   : > { %3304 = vmatpush1.bf16.msra.mxu0 %v4261_v23  ;;  %v1576_v6 = vmul.f32 %v1502_v62, %v1476_v57  ;;  %v1578_v10 = vmul.f32 %v1510_v3, %v1478_v1  ;;  %v1575_v15 = vmul.f32 %v1498_v5, %v1475_v56  ;;  %v1577_v16 = vmul.f32 %v1506_v7, %v1477_v0  ;;  %v4307_v17 = vld [vmem:[%s5317_s19 + $0x1d4] ss:$8 sps:$4 sm:$0xff]   ;;  %v4310_v22 = vld [vmem:[%s5317_s19 + $0x1d0] ss:$8 sps:$4 sm:$0xff]   ;;  %v4337_v56 = vld [vmem:[%s5317_s19 + $0x224] ss:$8 sps:$4 sm:$0xff]  }
  0xcc   : > { %3345 = vmatpush1.bf16.msra.mxu1 %v4262_v24  ;;  %3305 = vmatprep.subr.bf16.mxu0 %v4263_v25  ;;  %v4322_v38 = vld [vmem:[%s5317_s19 + $0x1f0] ss:$8 sps:$4 sm:$0xff]   ;;  %v4340_v57 = vld [vmem:[%s5317_s19 + $0x324] ss:$8 sps:$4 sm:$0xff]   ;;  %v4343_v62 = vld [vmem:[%s5317_s19 + $0x234] ss:$8 sps:$4 sm:$0xff]  }
  0xcd   : > { %3346 = vmatprep.subr.bf16.mxu1 %v4265_v26  ;;  %v1676_v14 = vadd.f32 %v1602_v63, %v1576_v6  ;;  %v1678_v18 = vadd.f32 %v1610_v4, %v1578_v10  ;;  %v1675_v24 = vadd.f32 %v1598_v11, %v1575_v15  ;;  %v1677_v25 = vadd.f32 %v1606_v12, %v1577_v16  ;;  %v4311_v26 = vld [vmem:[%s5317_s19 + $0xe4] ss:$8 sps:$4 sm:$0xff]   ;;  %v4332_v54 = vld [vmem:[%s5317_s19 + $0x310] ss:$8 sps:$4 sm:$0xff]   ;;  %v4346_v63 = vld [vmem:[%s5317_s19 + $0x334] ss:$8 sps:$4 sm:$0xff]  }
  0xce   : > { %v4341_v0 = vld [vmem:[%s5317_s19 + $0x230] ss:$8 sps:$4 sm:$0xff]   ;;  %v4352_v3 = vld [vmem:[%s5317_s19 + $0x344] ss:$8 sps:$4 sm:$0xff]   ;;  %v4347_v4 = vld [vmem:[%s5317_s19 + $0x240] ss:$8 sps:$4 sm:$0xff]  }
  0xcf   : > { %3306 = vmatpush1.bf16.msra.mxu0 %v4267_v27  ;;  %vm1692_vm0 = vcmp.ge.f32.partialorder %v1676_v14, 0.0  ;;  %v1708_v19 = vmul.f32 0.2, %v1676_v14  ;;  %vm1694_vm1 = vcmp.ge.f32.partialorder %v1678_v18, 0.0  ;;  %v1710_v20 = vmul.f32 0.2, %v1678_v18 }
  0xd0   : > { %3347 = vmatpush1.bf16.msra.mxu1 %v4268_v28  ;;  %3307 = vmatprep.subr.bf16.mxu0 %v4269_v29  ;;  %v4313_v27 = vld [vmem:[%s5317_s19 + $0x1e4] ss:$8 sps:$4 sm:$0xff]   ;;  %vm1691_vm2 = vcmp.ge.f32.partialorder %v1675_v24, 0.0  ;;  %vm1693_vm3 = vcmp.ge.f32.partialorder %v1677_v25, 0.0  ;;  %v4344_v1 = vld [vmem:[%s5317_s19 + $0x330] ss:$8 sps:$4 sm:$0xff]  }
  0xd1   : > { %3348 = vmatprep.subr.bf16.mxu1 %v4271_v30  ;;  %v1724_v23 = vsel %vm1692_vm0, %v1676_v14, %v1708_v19  ;;  %v1726_v29 = vsel %vm1694_vm1, %v1678_v18, %v1710_v20  ;;  %v4315_v30 = vld [vmem:[%s5317_s19 + $0xe0] ss:$8 sps:$4 sm:$0xff]   ;;  %v4355_v6 = vld [vmem:[%s5317_s19 + $0x254] ss:$8 sps:$4 sm:$0xff]   ;;  %v4353_v10 = vld [vmem:[%s5317_s19 + $0x250] ss:$8 sps:$4 sm:$0xff]  }
  0xd2   : > { %v1740_v28 = vpack.c.bf16 %v1724_v23, %v1724_v23  ;;  %v4350_v5 = vld [vmem:[%s5317_s19 + $0x340] ss:$8 sps:$4 sm:$0xff]   ;;  %v4358_v7 = vld [vmem:[%s5317_s19 + $0x354] ss:$8 sps:$4 sm:$0xff]   ;;  %v5452_v11 = vsub.s32 4, %v5361_v43  ;;  %v5455_v12 = vsub.s32 6, %v5361_v43 }
  0xd3   : > { %3308 = vmatpush1.bf16.msra.mxu0 %v4273_v31  ;;  %v4316_v31 = vld [vmem:[%s5317_s19 + $0x1e0] ss:$8 sps:$4 sm:$0xff]   ;;  %v4361_v14 = vld [vmem:[%s5317_s19 + $0x264] ss:$8 sps:$4 sm:$0xff]   ;;  %vm3680_vm0 = vcmask (!%p4163_p13), 1040384  }
  0xd4   : > { %3349 = vmatpush1.bf16.msra.mxu1 %v4274_v32  ;;  %3309 = vmatprep.subr.bf16.mxu0 %v4275_v33  ;;  %v1742_v32 = vpack.c.bf16 %v1726_v29, %v1726_v29  ;;  %v4317_v33 = vld [vmem:[%s5317_s19 + $0xf4] ss:$8 sps:$4 sm:$0xff]   ;;  %v4364_v15 = vld [vmem:[%s5317_s19 + $0x364] ss:$8 sps:$4 sm:$0xff]   ;;  %v4359_v16 = vld [vmem:[%s5317_s19 + $0x260] ss:$8 sps:$4 sm:$0xff]   ;;  %v1514_v19 = vrot.slane %v5384_v58, %v5452_v11  ;;  %v1522_v20 = vrot.slane %v5384_v58, %v5455_v12 }
  0xd5   : > { %3350 = vmatprep.subr.bf16.mxu1 %v4277_v34  ;;  %3325 = vmatprep.mubr.bf16.mxu0 %v1740_v28  ;;  %v1707_v34 = vmul.f32 0.2, %v1675_v24 }
  0xd6   : > { %3366 = vmatprep.mubr.bf16.mxu1 %v1742_v32  ;;  %v4365_v32 = vld [vmem:[%s5317_s19 + $0x270] ss:$8 sps:$4 sm:$0xff]  }
  0xd7   : > { %3310 = vmatpush1.bf16.msra.mxu0 %v4279_v35  ;;  %v1709_v35 = vmul.f32 0.2, %v1677_v25 }
  0xd8   : > { %3351 = vmatpush1.bf16.msra.mxu1 %v4280_v36  ;;  %3311 = vmatprep.subr.bf16.mxu0 %v4281_v37  ;;  %v4319_v36 = vld [vmem:[%s5317_s19 + $0x1f4] ss:$8 sps:$4 sm:$0xff]   ;;  %v4321_v37 = vld [vmem:[%s5317_s19 + $0xf0] ss:$8 sps:$4 sm:$0xff]  }
  0xd9   : > { %3352 = vmatprep.subr.bf16.mxu1 %v4283_v39  ;;  %v1723_v39 = vsel %vm1691_vm2, %v1675_v24, %v1707_v34  ;;  %v1470_v24 = vld [vmem:[%s5292_s17 + $0x18] sm:$0xff] }
  0xda   : > { %v1481_v29 = vunpack.c.l.bf16 %v1470_v24 }
  0xdb   : > { %3312 = vmatpush1.bf16.msra.mxu0 %v4285_v40  ;;  %v1725_v40 = vsel %vm1693_vm3, %v1677_v25, %v1709_v35 }
  0xdc   : > { %3353 = vmatpush1.bf16.msra.mxu1 %v4286_v41  ;;  %3313 = vmatprep.subr.bf16.mxu0 %v4287_v42  ;;  %v4325_v41 = vld [vmem:[%s5317_s19 + $0x204] ss:$8 sps:$4 sm:$0xff]  }
  0xdd   : > { %3354 = vmatprep.subr.bf16.mxu1 %v4289_v44  ;;  %v4328_v42 = vld [vmem:[%s5317_s19 + $0x304] ss:$8 sps:$4 sm:$0xff]   ;;  %v1739_v44 = vpack.c.bf16 %v1723_v39, %v1723_v39 }
  0xde   : > { %v4376_v39 = vld [vmem:[%s5317_s19 + $0x384] ss:$8 sps:$4 sm:$0xff]  }
  0xdf   : > { %3314 = vmatpush1.bf16.msra.mxu0 %v4291_v45  ;;  %v1741_v45 = vpack.c.bf16 %v1725_v40, %v1725_v40 }
  0xe0   : > { %3355 = vmatpush1.bf16.msra.mxu1 %v4292_v46  ;;  %3315 = vmatprep.subr.bf16.mxu0 %v4293_v47  ;;  %v4323_v46 = vld [vmem:[%s5317_s19 + $0x200] ss:$8 sps:$4 sm:$0xff]  }
  0xe1   : > { %3356 = vmatprep.subr.bf16.mxu1 %v4295_v49  ;;  %v4326_v47 = vld [vmem:[%s5317_s19 + $0x300] ss:$8 sps:$4 sm:$0xff]   ;;  %v4331_v49 = vld [vmem:[%s5317_s19 + $0x214] ss:$8 sps:$4 sm:$0xff]  }
  0xe3   : > { %3316 = vmatpush1.bf16.msra.mxu0 %v4297_v52  ;;  %v4334_v52 = vld [vmem:[%s5317_s19 + $0x314] ss:$8 sps:$4 sm:$0xff]  }
  0xe4   : > { %3357 = vmatpush1.bf16.msra.mxu1 %v4298_v53  ;;  %3317 = vmatprep.subr.bf16.mxu0 %v4299_v61  ;;  %v4329_v53 = vld [vmem:[%s5317_s19 + $0x210] ss:$8 sps:$4 sm:$0xff]   ;;  %v4338_v61 = vld [vmem:[%s5317_s19 + $0x320] ss:$8 sps:$4 sm:$0xff]  }
  0xe5   : > { %3358 = vmatprep.subr.bf16.mxu1 %v4301_v2  ;;  %v4349_v2 = vld [vmem:[%s5317_s19 + $0x244] ss:$8 sps:$4 sm:$0xff]  }
  0xe7   : > { %3318 = vmatpush1.bf16.msra.mxu0 %v4303_v8  ;;  %v5445_v8 = vsub.s32 5, %v5361_v43 }
  0xe8   : > { %3359 = vmatpush1.bf16.msra.mxu1 %v4304_v9  ;;  %3319 = vmatprep.subr.bf16.mxu0 %v4305_v13  ;;  %v5448_v9 = vsub.s32 7, %v5361_v43  ;;  %v4356_v13 = vld [vmem:[%s5317_s19 + $0x350] ss:$8 sps:$4 sm:$0xff]  }
  0xe9   : > { %3360 = vmatprep.subr.bf16.mxu1 %v4307_v17  ;;  %v4362_v17 = vld [vmem:[%s5317_s19 + $0x360] ss:$8 sps:$4 sm:$0xff]   ;;  %v1518_v18 = vrot.slane %v5384_v58, %v5445_v8  ;;  %v1618_v23 = vrot.slane %v5387_v59, %v5445_v8 }
  0xea   : > { %v1526_v43 = vrot.slane %v5384_v58, %v5448_v9  ;;  %v1626_v25 = vrot.slane %v5387_v59, %v5448_v9  ;;  %v4370_v58 = vld [vmem:[%s5317_s19 + $0x374] ss:$8 sps:$4 sm:$0xff]  }
  0xeb   : > { %3320 = vmatpush1.bf16.msra.mxu0 %v4309_v21  ;;  %v4367_v21 = vld [vmem:[%s5317_s19 + $0x274] ss:$8 sps:$4 sm:$0xff]  }
  0xec   : > { %3361 = vmatpush1.bf16.msra.mxu1 %v4310_v22  ;;  %3321 = vmatprep.subr.bf16.mxu0 %v4311_v26  ;;  %v1469_v22 = vld [vmem:[%s5292_s17 + $0x10] sm:$0xff]  ;;  %v1614_v26 = vrot.slane %v5387_v59, %v5452_v11 }
  0xed   : > { %3362 = vmatprep.subr.bf16.mxu1 %v4313_v27  ;;  %v1479_v27 = vunpack.c.l.bf16 %v1469_v22  ;;  %v1480_v28 = vunpack.c.h.bf16 %v1469_v22 }
  0xef   : > { %3322 = vmatpush1.bf16.msra.mxu0 %v4315_v30  ;;  %v1482_v30 = vunpack.c.h.bf16 %v1470_v24  ;;  %v1579_v35 = vmul.f32 %v1514_v19, %v1479_v27  ;;  %v4407_v19 = vld [vmem:[%s5317_s19 + $0x2e0] ss:$8 sps:$4 sm:$0xff]   ;;  %v4418_v24 = vld [vmem:[%s5317_s19 + $0x3f4] ss:$8 sps:$4 sm:$0xff]  }
  0xf0   : > { %3363 = vmatpush1.bf16.msra.mxu1 %v4316_v31  ;;  %3323 = vmatprep.subr.bf16.mxu0 %v4317_v33  ;;  %v1622_v31 = vrot.slane %v5387_v59, %v5455_v12  ;;  %v1580_v33 = vmul.f32 %v1518_v18, %v1480_v28  ;;  %v4409_v18 = vld [vmem:[%s5317_s19 + $0x2e4] ss:$8 sps:$4 sm:$0xff]  }
  0xf1   : > { %3364 = vmatprep.subr.bf16.mxu1 %v4319_v36  ;;  %v1582_v34 = vmul.f32 %v1526_v43, %v1482_v30  ;;  %v1581_v36 = vmul.f32 %v1522_v20, %v1481_v29  ;;  %v4412_v43 = vld [vmem:[%s5317_s19 + $0x3e4] ss:$8 sps:$4 sm:$0xff]   ;;  %v4410_v20 = vld [vmem:[%s5317_s19 + $0x3e0] ss:$8 sps:$4 sm:$0xff]  }
  0xf2   : > { %v1680_v40 = vadd.f32 %v1618_v23, %v1580_v33  ;;  %v4421_v28 = vld [vmem:[%s5317_s19 + $0x404] ss:$8 sps:$4 sm:$0xff]   ;;  %v4422_v33 = vld [vmem:[%s5317_s19 + $0x500] ss:$8 sps:$4 sm:$0xff]  }
  0xf3   : > { %3324 = vmatpush1.bf16.msra.mxu0 %v4321_v37  ;;  %v4368_v37 = vld [vmem:[%s5317_s19 + $0x370] ss:$8 sps:$4 sm:$0xff]   ;;  %v5488_v59 = vadd.f32 %v1622_v31, %v1581_v36  ;;  %v4424_v29 = vld [vmem:[%s5317_s19 + $0x504] ss:$8 sps:$4 sm:$0xff]  }
  0xf4   : > { %3365 = vmatpush1.bf16.msra.mxu1 %v4322_v38  ;;  %3375 = vmatprep.subr.bf16.mxu0 %v4325_v41  ;;  %v4373_v38 = vld [vmem:[%s5317_s19 + $0x284] ss:$8 sps:$4 sm:$0xff]   ;;  %v1682_v41 = vadd.f32 %v1626_v25, %v1582_v34  ;;  %vm1696_vm4 = vcmp.ge.f32.partialorder %v1680_v40, 0.0  ;;  %v4413_v25 = vld [vmem:[%s5317_s19 + $0x2f0] ss:$8 sps:$4 sm:$0xff]  }
  0xf5   : > { %3416 = vmatprep.subr.bf16.mxu1 %v4328_v42  ;;  %v5486_v42 = vadd.f32 %v1614_v26, %v1579_v35  ;;  %v1713_v23 = vmul.f32 0.2, %v5488_v59  ;;  %vm1697_vm7 = vcmp.ge.f32.partialorder %v5488_v59, 0.0  ;;  %v4416_v26 = vld [vmem:[%s5317_s19 + $0x3f0] ss:$8 sps:$4 sm:$0xff]  }
  0xf6   : > { %3326 = vmatmul.mubr.bf16.vlgmr.msra.gmra.mrb[0].mxu0 %v1739_v44  ;;  %v1712_v44 = vmul.f32 0.2, %v1680_v40  ;;  %vm1698_vm5 = vcmp.ge.f32.partialorder %v1682_v41, 0.0  ;;  %v4427_v34 = vld [vmem:[%s5317_s19 + $0x414] ss:$8 sps:$4 sm:$0xff]  }
  0xf7   : > { %3367 = vmatmul.mubr.bf16.vlgmr.msra.gmra.mrb[0].mxu1 %v1741_v45  ;;  %3376 = vmatpush1.bf16.msra.mxu0 %v4323_v46  ;;  %v1714_v45 = vmul.f32 0.2, %v1682_v41  ;;  %v4371_v46 = vld [vmem:[%s5317_s19 + $0x280] ss:$8 sps:$4 sm:$0xff]   ;;  %v1711_v22 = vmul.f32 0.2, %v5486_v42  ;;  %v1729_v27 = vsel %vm1697_vm7, %v5488_v59, %v1713_v23 }
  0xf8   : > { %3417 = vmatpush1.bf16.msra.mxu1 %v4326_v47  ;;  %3377 = vmatprep.subr.bf16.mxu0 %v4331_v49  ;;  %v4374_v47 = vld [vmem:[%s5317_s19 + $0x380] ss:$8 sps:$4 sm:$0xff]   ;;  %v4379_v49 = vld [vmem:[%s5317_s19 + $0x294] ss:$8 sps:$4 sm:$0xff]   ;;  %vm1695_vm6 = vcmp.ge.f32.partialorder %v5486_v42, 0.0  ;;  %v1745_v31 = vpack.c.bf16 %v1729_v27, %v1729_v27 }
  0xf9   : > { %3418 = vmatprep.subr.bf16.mxu1 %v4334_v52  ;;  %v4382_v52 = vld [vmem:[%s5317_s19 + $0x394] ss:$8 sps:$4 sm:$0xff]   ;;  %v4425_v36 = vld [vmem:[%s5317_s19 + $0x410] ss:$8 sps:$4 sm:$0xff]   ;;  %v4467_v27 = vld [vmem:[%s5317_s19 + $0x480] ss:$8 sps:$4 sm:$0xff]  }
  0xfa   : > { %v4430_v35 = vld [vmem:[%s5317_s19 + $0x514] ss:$8 sps:$4 sm:$0xff]  }
  0xfb   : > { %3378 = vmatpush1.bf16.msra.mxu0 %v4329_v53  ;;  %v1728_v53 = vsel %vm1696_vm4, %v1680_v40, %v1712_v44  ;;  %v5537_v40 = vld [vmem:[%s5292_s17 + $0x20] sm:$0xff]  ;;  %v5544_v59 = vld [vmem:[%s5297_s21 + $0x8] sm:$0xff] }
  0xfc   : > { %3419 = vmatpush1.bf16.msra.mxu1 %v4332_v54  ;;  %3379 = vmatprep.subr.bf16.mxu0 %v4337_v56  ;;  %v1730_v54 = vsel %vm1698_vm5, %v1682_v41, %v1714_v45  ;;  %v1744_v56 = vpack.c.bf16 %v1728_v53, %v1728_v53  ;;  %v1484_v41 = vunpack.c.h.bf16 %v5537_v40  ;;  %v5547_v44 = vld [vmem:[%s5292_s17 + $0x28] sm:$0xff]  ;;  %v4431_v45 = vld [vmem:[%s5317_s19 + $0x420] ss:$8 sps:$4 sm:$0xff]  }
  0xfd   : > { %3420 = vmatprep.subr.bf16.mxu1 %v4340_v57  ;;  %v1746_v57 = vpack.c.bf16 %v1730_v54, %v1730_v54  ;;  %v1642_v54 = vrot.slane %v5544_v59, %v5372_v50  ;;  %v4466_v23 = vld [vmem:[%s5317_s19 + $0x574] ss:$8 sps:$4 sm:$0xff]  }
  0xfe   : > { %3407 = vmatprep.mubr.bf16.mxu0 %v1744_v56  ;;  %v4439_v56 = vld [vmem:[%s5317_s19 + $0x434] ss:$8 sps:$4 sm:$0xff]  }
  0xff   : > { %3380 = vmatpush1.bf16.msra.mxu0 %v4335_v60  ;;  %v4377_v60 = vld [vmem:[%s5317_s19 + $0x290] ss:$8 sps:$4 sm:$0xff]   ;;  %3448 = vmatprep.mubr.bf16.mxu1 %v1746_v57  ;;  %v4442_v57 = vld [vmem:[%s5317_s19 + $0x534] ss:$8 sps:$4 sm:$0xff]  }
 0x100   : > { %3421 = vmatpush1.bf16.msra.mxu1 %v4338_v61  ;;  %3381 = vmatprep.subr.bf16.mxu0 %v4343_v62  ;;  %v4380_v61 = vld [vmem:[%s5317_s19 + $0x390] ss:$8 sps:$4 sm:$0xff]   ;;  %v4385_v62 = vld [vmem:[%s5317_s19 + $0x2a4] ss:$8 sps:$4 sm:$0xff]  }
 0x101   : > { %3422 = vmatprep.subr.bf16.mxu1 %v4346_v63  ;;  %v4388_v63 = vld [vmem:[%s5317_s19 + $0x3a4] ss:$8 sps:$4 sm:$0xff]  }
 0x103   : > { %3382 = vmatpush1.bf16.msra.mxu0 %v4341_v0  ;;  %v4383_v0 = vld [vmem:[%s5317_s19 + $0x2a0] ss:$8 sps:$4 sm:$0xff]  }
 0x104   : > { %3423 = vmatpush1.bf16.msra.mxu1 %v4344_v1  ;;  %3383 = vmatprep.subr.bf16.mxu0 %v4349_v2  ;;  %v4386_v1 = vld [vmem:[%s5317_s19 + $0x3a0] ss:$8 sps:$4 sm:$0xff]   ;;  %v4391_v2 = vld [vmem:[%s5317_s19 + $0x2b4] ss:$8 sps:$4 sm:$0xff]  }
 0x105   : > { %3424 = vmatprep.subr.bf16.mxu1 %v4352_v3  ;;  %v4394_v3 = vld [vmem:[%s5317_s19 + $0x3b4] ss:$8 sps:$4 sm:$0xff]  }
 0x107   : > { %3384 = vmatpush1.bf16.msra.mxu0 %v4347_v4  ;;  %v4389_v4 = vld [vmem:[%s5317_s19 + $0x2b0] ss:$8 sps:$4 sm:$0xff]  }
 0x108   : > { %3425 = vmatpush1.bf16.msra.mxu1 %v4350_v5  ;;  %3385 = vmatprep.subr.bf16.mxu0 %v4355_v6  ;;  %v4392_v5 = vld [vmem:[%s5317_s19 + $0x3b0] ss:$8 sps:$4 sm:$0xff]   ;;  %v4397_v6 = vld [vmem:[%s5317_s19 + $0x2c4] ss:$8 sps:$4 sm:$0xff]  }
 0x109   : > { %3426 = vmatprep.subr.bf16.mxu1 %v4358_v7  ;;  %v4400_v7 = vld [vmem:[%s5317_s19 + $0x3c4] ss:$8 sps:$4 sm:$0xff]  }
 0x10b   : > { %3386 = vmatpush1.bf16.msra.mxu0 %v4353_v10  ;;  %v4395_v10 = vld [vmem:[%s5317_s19 + $0x2c0] ss:$8 sps:$4 sm:$0xff]  }
 0x10c   : > { %3427 = vmatpush1.bf16.msra.mxu1 %v4356_v13  ;;  %3387 = vmatprep.subr.bf16.mxu0 %v4361_v14  ;;  %v4398_v13 = vld [vmem:[%s5317_s19 + $0x3c0] ss:$8 sps:$4 sm:$0xff]   ;;  %v4403_v14 = vld [vmem:[%s5317_s19 + $0x2d4] ss:$8 sps:$4 sm:$0xff]  }
 0x10d   : > { %3428 = vmatprep.subr.bf16.mxu1 %v4364_v15  ;;  %v4406_v15 = vld [vmem:[%s5317_s19 + $0x3d4] ss:$8 sps:$4 sm:$0xff]  }
 0x10f   : > { %3388 = vmatpush1.bf16.msra.mxu0 %v4359_v16  ;;  %v4401_v16 = vld [vmem:[%s5317_s19 + $0x2d0] ss:$8 sps:$4 sm:$0xff]  }
 0x110   : > { %3429 = vmatpush1.bf16.msra.mxu1 %v4362_v17  ;;  %3389 = vmatprep.subr.bf16.mxu0 %v4367_v21  ;;  %v4404_v17 = vld [vmem:[%s5317_s19 + $0x3d0] ss:$8 sps:$4 sm:$0xff]   ;;  %v4415_v21 = vld [vmem:[%s5317_s19 + $0x2f4] ss:$8 sps:$4 sm:$0xff]  }
 0x111   : > { %3430 = vmatprep.subr.bf16.mxu1 %v4370_v58  ;;  %v1727_v58 = vsel %vm1695_vm6, %v5486_v42, %v1711_v22  ;;  %v5541_v42 = vld [vmem:[%s5287_s14 + $0x8] sm:$0xff] }
 0x112   : > { %v1743_v30 = vpack.c.bf16 %v1727_v58, %v1727_v58  ;;  %v1542_v53 = vrot.slane %v5541_v42, %v5372_v50  ;;  %v4448_v50 = vld [vmem:[%s5317_s19 + $0x544] ss:$8 sps:$4 sm:$0xff]   ;;  %v4463_v22 = vld [vmem:[%s5317_s19 + $0x474] ss:$8 sps:$4 sm:$0xff]  }
 0x113   : > { %3390 = vmatpush1.bf16.msra.mxu0 %v4365_v32  ;;  %v4419_v32 = vld [vmem:[%s5317_s19 + $0x400] ss:$8 sps:$4 sm:$0xff]   ;;  %v4472_v58 = vld [vmem:[%s5317_s19 + $0x584] ss:$8 sps:$4 sm:$0xff]  }
 0x114   : > { %3431 = vmatpush1.bf16.msra.mxu1 %v4368_v37  ;;  %3391 = vmatprep.subr.bf16.mxu0 %v4373_v38  ;;  %v4428_v37 = vld [vmem:[%s5317_s19 + $0x510] ss:$8 sps:$4 sm:$0xff]   ;;  %v4433_v38 = vld [vmem:[%s5317_s19 + $0x424] ss:$8 sps:$4 sm:$0xff]  }
 0x115   : > { %3432 = vmatprep.subr.bf16.mxu1 %v4376_v39  ;;  %v4436_v39 = vld [vmem:[%s5317_s19 + $0x524] ss:$8 sps:$4 sm:$0xff]  }
 0x117   : > { %3392 = vmatpush1.bf16.msra.mxu0 %v4371_v46  ;;  %v1534_v46 = vrot.slane %v5541_v42, %v5368_v48 }
 0x118   : > { %3433 = vmatpush1.bf16.msra.mxu1 %v4374_v47  ;;  %3393 = vmatprep.subr.bf16.mxu0 %v4379_v49  ;;  %v1634_v47 = vrot.slane %v5544_v59, %v5368_v48  ;;  %v1486_v49 = vunpack.c.h.bf16 %v5547_v44 }
 0x119   : > { %3434 = vmatprep.subr.bf16.mxu1 %v4382_v52  ;;  %v4434_v52 = vld [vmem:[%s5317_s19 + $0x520] ss:$8 sps:$4 sm:$0xff]  }
 0x11b   : > { %3394 = vmatpush1.bf16.msra.mxu0 %v4377_v60  ;;  %v1584_v60 = vmul.f32 %v1534_v46, %v1484_v41  ;;  %v1485_v41 = vunpack.c.l.bf16 %v5547_v44  ;;  %v1538_v46 = vrot.slane %v5541_v42, %v5381_v55  ;;  %v1630_v44 = vrot.slane %v5544_v59, %v5375_v51 }
 0x11c   : > { %3435 = vmatpush1.bf16.msra.mxu1 %v4380_v61  ;;  %3395 = vmatprep.subr.bf16.mxu0 %v4385_v62  ;;  %v4437_v61 = vld [vmem:[%s5317_s19 + $0x430] ss:$8 sps:$4 sm:$0xff]   ;;  %v1586_v62 = vmul.f32 %v1542_v53, %v1486_v49 }
 0x11d   : > { %3436 = vmatprep.subr.bf16.mxu1 %v4388_v63  ;;  %v4440_v63 = vld [vmem:[%s5317_s19 + $0x530] ss:$8 sps:$4 sm:$0xff]  }
 0x11e   : > { %v4488_v49 = vld [vmem:[%s5317_s19 + $0x5b0] ss:$8 sps:$4 sm:$0xff]  }
 0x11f   : > { %3396 = vmatpush1.bf16.msra.mxu0 %v4383_v0  ;;  %v1684_v0 = vadd.f32 %v1634_v47, %v1584_v60  ;;  %v4485_v47 = vld [vmem:[%s5317_s19 + $0x4b0] ss:$8 sps:$4 sm:$0xff]   ;;  %v4494_v60 = vld [vmem:[%s5317_s19 + $0x5c0] ss:$8 sps:$4 sm:$0xff]  }
 0x120   : > { %3437 = vmatpush1.bf16.msra.mxu1 %v4386_v1  ;;  %3397 = vmatprep.subr.bf16.mxu0 %v4391_v2  ;;  %v4445_v1 = vld [vmem:[%s5317_s19 + $0x444] ss:$8 sps:$4 sm:$0xff]   ;;  %v1686_v2 = vadd.f32 %v1642_v54, %v1586_v62  ;;  %v1585_v54 = vmul.f32 %v1538_v46, %v1485_v41  ;;  %v4502_v62 = vld [vmem:[%s5317_s19 + $0x5d4] ss:$8 sps:$4 sm:$0xff]   ;;  %v4518_v41 = vld [vmem:[%s5317_s19 + $0x700] ss:$8 sps:$4 sm:$0xff]  }
 0x121   : > { %3438 = vmatprep.subr.bf16.mxu1 %v4394_v3  ;;  %vm1700_vm8 = vcmp.ge.f32.partialorder %v1684_v0, 0.0  ;;  %v1716_v3 = vmul.f32 0.2, %v1684_v0  ;;  %v4526_v46 = vld [vmem:[%s5317_s19 + $0x714] ss:$8 sps:$4 sm:$0xff]  }
 0x122   : > { %vm1702_vm9 = vcmp.ge.f32.partialorder %v1686_v2, 0.0 }
 0x123   : > { %3398 = vmatpush1.bf16.msra.mxu0 %v4389_v4  ;;  %v1718_v4 = vmul.f32 0.2, %v1686_v2 }
 0x124   : > { %3439 = vmatpush1.bf16.msra.mxu1 %v4392_v5  ;;  %3399 = vmatprep.subr.bf16.mxu0 %v4397_v6  ;;  %v1732_v5 = vsel %vm1700_vm8, %v1684_v0, %v1716_v3  ;;  %v4443_v6 = vld [vmem:[%s5317_s19 + $0x440] ss:$8 sps:$4 sm:$0xff]   ;;  %v1650_v0 = vrot.slane %v5544_v59, %v5445_v8 }
 0x125   : > { %3440 = vmatprep.subr.bf16.mxu1 %v4400_v7  ;;  %v4446_v7 = vld [vmem:[%s5317_s19 + $0x540] ss:$8 sps:$4 sm:$0xff]  }
 0x127   : > { %3400 = vmatpush1.bf16.msra.mxu0 %v4395_v10  ;;  %v1748_v10 = vpack.c.bf16 %v1732_v5, %v1732_v5  ;;  %v1474_v5 = vld [vmem:[%s5292_s17 + $0x38] sm:$0xff] }
 0x128   : > { %3441 = vmatpush1.bf16.msra.mxu1 %v4398_v13  ;;  %3401 = vmatprep.subr.bf16.mxu0 %v4403_v14  ;;  %v1734_v13 = vsel %vm1702_vm9, %v1686_v2, %v1718_v4  ;;  %v4451_v14 = vld [vmem:[%s5317_s19 + $0x454] ss:$8 sps:$4 sm:$0xff]   ;;  %v1554_v2 = vrot.slane %v5541_v42, %v5455_v12  ;;  %v1473_v4 = vld [vmem:[%s5292_s17 + $0x30] sm:$0xff] }
 0x129   : > { %3442 = vmatprep.subr.bf16.mxu1 %v4406_v15  ;;  %v4454_v15 = vld [vmem:[%s5317_s19 + $0x554] ss:$8 sps:$4 sm:$0xff]  }
 0x12b   : > { %3402 = vmatpush1.bf16.msra.mxu0 %v4401_v16  ;;  %v1750_v16 = vpack.c.bf16 %v1734_v13, %v1734_v13  ;;  %v1487_v13 = vunpack.c.l.bf16 %v1473_v4 }
 0x12c   : > { %3443 = vmatpush1.bf16.msra.mxu1 %v4404_v17  ;;  %3403 = vmatprep.subr.bf16.mxu0 %v4409_v18  ;;  %v4449_v17 = vld [vmem:[%s5317_s19 + $0x450] ss:$8 sps:$4 sm:$0xff]  }
 0x12d   : > { %3444 = vmatprep.subr.bf16.mxu1 %v4412_v43  ;;  %v4452_v18 = vld [vmem:[%s5317_s19 + $0x550] ss:$8 sps:$4 sm:$0xff]   ;;  %v4457_v43 = vld [vmem:[%s5317_s19 + $0x464] ss:$8 sps:$4 sm:$0xff]  }
 0x12f   : > { %3404 = vmatpush1.bf16.msra.mxu0 %v4407_v19  ;;  %v4460_v19 = vld [vmem:[%s5317_s19 + $0x564] ss:$8 sps:$4 sm:$0xff]  }
 0x130   : > { %3445 = vmatpush1.bf16.msra.mxu1 %v4410_v20  ;;  %3405 = vmatprep.subr.bf16.mxu0 %v4415_v21  ;;  %v4455_v20 = vld [vmem:[%s5317_s19 + $0x460] ss:$8 sps:$4 sm:$0xff]  }
 0x131   : > { %3446 = vmatprep.subr.bf16.mxu1 %v4418_v24  ;;  %v4458_v21 = vld [vmem:[%s5317_s19 + $0x560] ss:$8 sps:$4 sm:$0xff]   ;;  %v4461_v24 = vld [vmem:[%s5317_s19 + $0x470] ss:$8 sps:$4 sm:$0xff]  }
 0x133   : > { %3406 = vmatpush1.bf16.msra.mxu0 %v4413_v25  ;;  %v4464_v25 = vld [vmem:[%s5317_s19 + $0x570] ss:$8 sps:$4 sm:$0xff]  }
 0x134   : > { %3447 = vmatpush1.bf16.msra.mxu1 %v4416_v26  ;;  %3457 = vmatprep.subr.bf16.mxu0 %v4421_v28  ;;  %v4469_v26 = vld [vmem:[%s5317_s19 + $0x484] ss:$8 sps:$4 sm:$0xff]   ;;  %v4470_v28 = vld [vmem:[%s5317_s19 + $0x580] ss:$8 sps:$4 sm:$0xff]  }
 0x135   : > { %3498 = vmatprep.subr.bf16.mxu1 %v4424_v29  ;;  %v4475_v29 = vld [vmem:[%s5317_s19 + $0x494] ss:$8 sps:$4 sm:$0xff]  }
 0x136   : > { %3408 = vmatmul.mubr.bf16.vlgmr.msra.gmra.mrb[4].mxu0 %v1743_v30  ;;  %v4478_v30 = vld [vmem:[%s5317_s19 + $0x594] ss:$8 sps:$4 sm:$0xff]  }
 0x137   : > { %3449 = vmatmul.mubr.bf16.vlgmr.msra.gmra.mrb[4].mxu1 %v1745_v31  ;;  %3458 = vmatpush1.bf16.msra.mxu0 %v4419_v32  ;;  %v4473_v31 = vld [vmem:[%s5317_s19 + $0x490] ss:$8 sps:$4 sm:$0xff]  }
 0x138   : > { %3499 = vmatpush1.bf16.msra.mxu1 %v4422_v33  ;;  %3459 = vmatprep.subr.bf16.mxu0 %v4427_v34  ;;  %v4476_v32 = vld [vmem:[%s5317_s19 + $0x590] ss:$8 sps:$4 sm:$0xff]   ;;  %v4481_v33 = vld [vmem:[%s5317_s19 + $0x4a4] ss:$8 sps:$4 sm:$0xff]  }
 0x139   : > { %3500 = vmatprep.subr.bf16.mxu1 %v4430_v35  ;;  %3489 = vmatprep.mubr.bf16.mxu0 %v1748_v10  ;;  %v4484_v34 = vld [vmem:[%s5317_s19 + $0x5a4] ss:$8 sps:$4 sm:$0xff]   ;;  %v4479_v35 = vld [vmem:[%s5317_s19 + $0x4a0] ss:$8 sps:$4 sm:$0xff]   ;;  %v4500_v10 = vld [vmem:[%s5317_s19 + $0x5d0] ss:$8 sps:$4 sm:$0xff]  }
 0x13a   : > { %3530 = vmatprep.mubr.bf16.mxu1 %v1750_v16  ;;  %v4505_v16 = vld [vmem:[%s5317_s19 + $0x4e4] ss:$8 sps:$4 sm:$0xff]  }
 0x13b   : > { %3460 = vmatpush1.bf16.msra.mxu0 %v4425_v36  ;;  %v4482_v36 = vld [vmem:[%s5317_s19 + $0x5a0] ss:$8 sps:$4 sm:$0xff]  }
 0x13c   : > { %3501 = vmatpush1.bf16.msra.mxu1 %v4428_v37  ;;  %3461 = vmatprep.subr.bf16.mxu0 %v4433_v38  ;;  %v4487_v37 = vld [vmem:[%s5317_s19 + $0x4b4] ss:$8 sps:$4 sm:$0xff]  }
 0x13d   : > { %3502 = vmatprep.subr.bf16.mxu1 %v4436_v39  ;;  %v4490_v38 = vld [vmem:[%s5317_s19 + $0x5b4] ss:$8 sps:$4 sm:$0xff]   ;;  %v1483_v39 = vunpack.c.l.bf16 %v5537_v40  ;;  %v4496_v40 = vld [vmem:[%s5317_s19 + $0x5c4] ss:$8 sps:$4 sm:$0xff]  }
 0x13f   : > { %3462 = vmatpush1.bf16.msra.mxu0 %v4431_v45  ;;  %v1530_v45 = vrot.slane %v5541_v42, %v5375_v51 }
 0x140   : > { %3503 = vmatpush1.bf16.msra.mxu1 %v4434_v52  ;;  %3463 = vmatprep.subr.bf16.mxu0 %v4439_v56  ;;  %v4493_v52 = vld [vmem:[%s5317_s19 + $0x4c4] ss:$8 sps:$4 sm:$0xff]   ;;  %v1638_v56 = vrot.slane %v5544_v59, %v5381_v55  ;;  %v1558_v55 = vrot.slane %v5541_v42, %v5448_v9 }
 0x141   : > { %3504 = vmatprep.subr.bf16.mxu1 %v4442_v57  ;;  %v1583_v53 = vmul.f32 %v1530_v45, %v1483_v39  ;;  %v4491_v57 = vld [vmem:[%s5317_s19 + $0x4c0] ss:$8 sps:$4 sm:$0xff]   ;;  %v4523_v45 = vld [vmem:[%s5317_s19 + $0x614] ss:$8 sps:$4 sm:$0xff]  }
 0x142   : > { %v1685_v3 = vadd.f32 %v1638_v56, %v1585_v54  ;;  %v4515_v39 = vld [vmem:[%s5317_s19 + $0x600] ss:$8 sps:$4 sm:$0xff]  }
 0x143   : > { %3464 = vmatpush1.bf16.msra.mxu0 %v4437_v61  ;;  %v4499_v61 = vld [vmem:[%s5317_s19 + $0x4d4] ss:$8 sps:$4 sm:$0xff]   ;;  %v4527_v54 = vld [vmem:[%s5317_s19 + $0x620] ss:$8 sps:$4 sm:$0xff]  }
 0x144   : > { %3505 = vmatpush1.bf16.msra.mxu1 %v4440_v63  ;;  %3465 = vmatprep.subr.bf16.mxu0 %v4445_v1  ;;  %v1550_v63 = vrot.slane %v5541_v42, %v5445_v8  ;;  %v1546_v1 = vrot.slane %v5541_v42, %v5452_v11  ;;  %v1646_v8 = vrot.slane %v5544_v59, %v5452_v11  ;;  %v1489_v42 = vunpack.c.l.bf16 %v1474_v5  ;;  %v4530_v56 = vld [vmem:[%s5317_s19 + $0x720] ss:$8 sps:$4 sm:$0xff]  }
 0x145   : > { %3506 = vmatprep.subr.bf16.mxu1 %v4448_v50  ;;  %v1683_v50 = vadd.f32 %v1630_v44, %v1583_v53  ;;  %vm1701_vm11 = vcmp.ge.f32.partialorder %v1685_v3, 0.0  ;;  %v4529_v53 = vld [vmem:[%s5317_s19 + $0x624] ss:$8 sps:$4 sm:$0xff]  }
 0x146   : > { %v4532_v44 = vld [vmem:[%s5317_s19 + $0x724] ss:$8 sps:$4 sm:$0xff]  }
 0x147   : > { %3466 = vmatpush1.bf16.msra.mxu0 %v4443_v6  ;;  %v1658_v6 = vrot.slane %v5544_v59, %v5448_v9  ;;  %v1654_v9 = vrot.slane %v5544_v59, %v5455_v12  ;;  %v4511_v12 = vld [vmem:[%s5317_s19 + $0x4f4] ss:$8 sps:$4 sm:$0xff]   ;;  %vm1699_vm10 = vcmp.ge.f32.partialorder %v1683_v50, 0.0 }
 0x148   : > { %3507 = vmatpush1.bf16.msra.mxu1 %v4446_v7  ;;  %3467 = vmatprep.subr.bf16.mxu0 %v4451_v14  ;;  %v4497_v7 = vld [vmem:[%s5317_s19 + $0x4d0] ss:$8 sps:$4 sm:$0xff]   ;;  %v1488_v14 = vunpack.c.h.bf16 %v1473_v4  ;;  %v4514_v59 = vld [vmem:[%s5317_s19 + $0x5f4] ss:$8 sps:$4 sm:$0xff]  }
 0x149   : > { %3508 = vmatprep.subr.bf16.mxu1 %v4454_v15  ;;  %v1490_v15 = vunpack.c.h.bf16 %v1474_v5  ;;  %v4548_v4 = vld [vmem:[%s5317_s19 + $0x750] ss:$8 sps:$4 sm:$0xff]   ;;  %v4553_v5 = vld [vmem:[%s5317_s19 + $0x664] ss:$8 sps:$4 sm:$0xff]  }
 0x14b   : > { %3468 = vmatpush1.bf16.msra.mxu0 %v4449_v17  ;;  %v4508_v17 = vld [vmem:[%s5317_s19 + $0x5e4] ss:$8 sps:$4 sm:$0xff]   ;;  %v1590_v11 = vmul.f32 %v1558_v55, %v1490_v15  ;;  %v4539_v55 = vld [vmem:[%s5317_s19 + $0x640] ss:$8 sps:$4 sm:$0xff]  }
 0x14c   : > { %3509 = vmatpush1.bf16.msra.mxu1 %v4452_v18  ;;  %3469 = vmatprep.subr.bf16.mxu0 %v4457_v43  ;;  %v1588_v18 = vmul.f32 %v1550_v63, %v1488_v14  ;;  %v1587_v43 = vmul.f32 %v1546_v1, %v1487_v13  ;;  %v4541_v63 = vld [vmem:[%s5317_s19 + $0x644] ss:$8 sps:$4 sm:$0xff]   ;;  %v4542_v1 = vld [vmem:[%s5317_s19 + $0x740] ss:$8 sps:$4 sm:$0xff]   ;;  %v4562_v13 = vld [vmem:[%s5317_s19 + $0x774] ss:$8 sps:$4 sm:$0xff]  }
 0x14d   : > { %3510 = vmatprep.subr.bf16.mxu1 %v4460_v19  ;;  %v1589_v19 = vmul.f32 %v1554_v2, %v1489_v42  ;;  %v4547_v2 = vld [vmem:[%s5317_s19 + $0x654] ss:$8 sps:$4 sm:$0xff]   ;;  %v4557_v14 = vld [vmem:[%s5317_s19 + $0x670] ss:$8 sps:$4 sm:$0xff]   ;;  %v4565_v15 = vld [vmem:[%s5317_s19 + $0x684] ss:$8 sps:$4 sm:$0xff]  }
 0x14e   : > { %v4560_v42 = vld [vmem:[%s5317_s19 + $0x770] ss:$8 sps:$4 sm:$0xff]  }
 0x14f   : > { %3470 = vmatpush1.bf16.msra.mxu0 %v4455_v20  ;;  %v1715_v20 = vmul.f32 0.2, %v1683_v50 }
 0x150   : > { %3511 = vmatpush1.bf16.msra.mxu1 %v4458_v21  ;;  %3471 = vmatprep.subr.bf16.mxu0 %v4463_v22  ;;  %v4503_v21 = vld [vmem:[%s5317_s19 + $0x4e0] ss:$8 sps:$4 sm:$0xff]  }
 0x151   : > { %3512 = vmatprep.subr.bf16.mxu1 %v4466_v23  ;;  %v4506_v22 = vld [vmem:[%s5317_s19 + $0x5e0] ss:$8 sps:$4 sm:$0xff]   ;;  %v1717_v23 = vmul.f32 0.2, %v1685_v3 }
 0x153   : > { %3472 = vmatpush1.bf16.msra.mxu0 %v4461_v24  ;;  %v1688_v24 = vadd.f32 %v1650_v0, %v1588_v18  ;;  %v4544_v0 = vld [vmem:[%s5317_s19 + $0x744] ss:$8 sps:$4 sm:$0xff]   ;;  %v4571_v18 = vld [vmem:[%s5317_s19 + $0x694] ss:$8 sps:$4 sm:$0xff]  }
 0x154   : > { %3513 = vmatpush1.bf16.msra.mxu1 %v4464_v25  ;;  %3473 = vmatprep.subr.bf16.mxu0 %v4469_v26  ;;  %v1690_v25 = vadd.f32 %v1658_v6, %v1590_v11  ;;  %v5636_v26 = vadd.f32 %v1646_v8, %v1587_v43  ;;  %v4556_v6 = vld [vmem:[%s5317_s19 + $0x764] ss:$8 sps:$4 sm:$0xff]   ;;  %v4551_v8 = vld [vmem:[%s5317_s19 + $0x660] ss:$8 sps:$4 sm:$0xff]   ;;  %v4574_v11 = vld [vmem:[%s5317_s19 + $0x794] ss:$8 sps:$4 sm:$0xff]  }
 0x155   : > { %3514 = vmatprep.subr.bf16.mxu1 %v4472_v58  ;;  %v5640_v58 = vadd.f32 %v1654_v9, %v1589_v19  ;;  %vm1704_vm12 = vcmp.ge.f32.partialorder %v1688_v24, 0.0  ;;  %v4566_v9 = vld [vmem:[%s5317_s19 + $0x780] ss:$8 sps:$4 sm:$0xff]   ;;  %v4569_v43 = vld [vmem:[%s5317_s19 + $0x690] ss:$8 sps:$4 sm:$0xff]  }
 0x156   : > { %vm1706_vm13 = vcmp.ge.f32.partialorder %v1690_v25, 0.0  ;;  %v4572_v19 = vld [vmem:[%s5317_s19 + $0x790] ss:$8 sps:$4 sm:$0xff]   ;;  %vm1703_vm14 = vcmp.ge.f32.partialorder %v5636_v26, 0.0 }
 0x157   : > { %3474 = vmatpush1.bf16.msra.mxu0 %v4467_v27  ;;  %v1720_v27 = vmul.f32 0.2, %v1688_v24  ;;  %vm1705_vm15 = vcmp.ge.f32.partialorder %v5640_v58, 0.0 }
 0x158   : > { %3515 = vmatpush1.bf16.msra.mxu1 %v4470_v28  ;;  %3475 = vmatprep.subr.bf16.mxu0 %v4475_v29  ;;  %v1722_v28 = vmul.f32 0.2, %v1690_v25  ;;  %v4509_v29 = vld [vmem:[%s5317_s19 + $0x4f0] ss:$8 sps:$4 sm:$0xff]  }
 0x159   : > { %3516 = vmatprep.subr.bf16.mxu1 %v4478_v30  ;;  %v4512_v30 = vld [vmem:[%s5317_s19 + $0x5f0] ss:$8 sps:$4 sm:$0xff]  }
 0x15b   : > { %3476 = vmatpush1.bf16.msra.mxu0 %v4473_v31  ;;  %v1731_v31 = vsel %vm1699_vm10, %v1683_v50, %v1715_v20  ;;  %v4550_v50 = vld [vmem:[%s5317_s19 + $0x754] ss:$8 sps:$4 sm:$0xff]   ;;  %v4577_v20 = vld [vmem:[%s5317_s19 + $0x6a4] ss:$8 sps:$4 sm:$0xff]  }
 0x15c   : > { %3517 = vmatpush1.bf16.msra.mxu1 %v4476_v32  ;;  %3477 = vmatprep.subr.bf16.mxu0 %v4481_v33  ;;  %v1733_v32 = vsel %vm1701_vm11, %v1685_v3, %v1717_v23  ;;  %v4517_v33 = vld [vmem:[%s5317_s19 + $0x604] ss:$8 sps:$4 sm:$0xff]   ;;  %v4545_v3 = vld [vmem:[%s5317_s19 + $0x650] ss:$8 sps:$4 sm:$0xff]   ;;  %v4578_v23 = vld [vmem:[%s5317_s19 + $0x7a0] ss:$8 sps:$4 sm:$0xff]  }
 0x15d   : > { %3518 = vmatprep.subr.bf16.mxu1 %v4484_v34  ;;  %v4520_v34 = vld [vmem:[%s5317_s19 + $0x704] ss:$8 sps:$4 sm:$0xff]  }
 0x15f   : > { %3478 = vmatpush1.bf16.msra.mxu0 %v4479_v35  ;;  %v1747_v35 = vpack.c.bf16 %v1731_v31, %v1731_v31  ;;  %v4595_v31 = vld [vmem:[%s5317_s19 + $0x6d4] ss:$8 sps:$4 sm:$0xff]  }
 0x160   : > { %3519 = vmatpush1.bf16.msra.mxu1 %v4482_v36  ;;  %3479 = vmatprep.subr.bf16.mxu0 %v4487_v37  ;;  %v1749_v36 = vpack.c.bf16 %v1733_v32, %v1733_v32  ;;  %v1736_v37 = vsel %vm1704_vm12, %v1688_v24, %v1720_v27  ;;  %v4583_v24 = vld [vmem:[%s5317_s19 + $0x6b4] ss:$8 sps:$4 sm:$0xff]   ;;  %v4589_v27 = vld [vmem:[%s5317_s19 + $0x6c4] ss:$8 sps:$4 sm:$0xff]  }
 0x161   : > { %3520 = vmatprep.subr.bf16.mxu1 %v4490_v38  ;;  %v1738_v38 = vsel %vm1706_vm13, %v1690_v25, %v1722_v28  ;;  %v4586_v25 = vld [vmem:[%s5317_s19 + $0x7b4] ss:$8 sps:$4 sm:$0xff]   ;;  %v4592_v28 = vld [vmem:[%s5317_s19 + $0x7c4] ss:$8 sps:$4 sm:$0xff]  }
 0x162   : > { %v4598_v32 = vld [vmem:[%s5317_s19 + $0x7d4] ss:$8 sps:$4 sm:$0xff]  }
 0x163   : > { %3480 = vmatpush1.bf16.msra.mxu0 %v4485_v47  ;;  %v1752_v47 = vpack.c.bf16 %v1736_v37, %v1736_v37  ;;  %v4599_v37 = vld [vmem:[%s5317_s19 + $0x6e0] ss:$8 sps:$4 sm:$0xff]  }
 0x164   : > { %3521 = vmatpush1.bf16.msra.mxu1 %v4488_v49  ;;  %3481 = vmatprep.subr.bf16.mxu0 %v4493_v52  ;;  %v1754_v49 = vpack.c.bf16 %v1738_v38, %v1738_v38  ;;  %v4521_v52 = vld [vmem:[%s5317_s19 + $0x610] ss:$8 sps:$4 sm:$0xff]   ;;  %v4602_v38 = vld [vmem:[%s5317_s19 + $0x7e0] ss:$8 sps:$4 sm:$0xff]  }
 0x165   : > { %3522 = vmatprep.subr.bf16.mxu1 %v4496_v40  ;;  %v4524_v40 = vld [vmem:[%s5317_s19 + $0x710] ss:$8 sps:$4 sm:$0xff]  }
 0x167   : > { %3482 = vmatpush1.bf16.msra.mxu0 %v4491_v57  ;;  %v4535_v57 = vld [vmem:[%s5317_s19 + $0x634] ss:$8 sps:$4 sm:$0xff]  }
 0x168   : > { %3523 = vmatpush1.bf16.msra.mxu1 %v4494_v60  ;;  %3483 = vmatprep.subr.bf16.mxu0 %v4499_v61  ;;  %v4538_v60 = vld [vmem:[%s5317_s19 + $0x734] ss:$8 sps:$4 sm:$0xff]   ;;  %v4533_v61 = vld [vmem:[%s5317_s19 + $0x630] ss:$8 sps:$4 sm:$0xff]  }
 0x169   : > { %3524 = vmatprep.subr.bf16.mxu1 %v4502_v62  ;;  %v4536_v62 = vld [vmem:[%s5317_s19 + $0x730] ss:$8 sps:$4 sm:$0xff]  }
 0x16b   : > { %3484 = vmatpush1.bf16.msra.mxu0 %v4497_v7  ;;  %v4554_v7 = vld [vmem:[%s5317_s19 + $0x760] ss:$8 sps:$4 sm:$0xff]  }
 0x16c   : > { %3525 = vmatpush1.bf16.msra.mxu1 %v4500_v10  ;;  %3485 = vmatprep.subr.bf16.mxu0 %v4505_v16  ;;  %v4559_v10 = vld [vmem:[%s5317_s19 + $0x674] ss:$8 sps:$4 sm:$0xff]   ;;  %v4568_v16 = vld [vmem:[%s5317_s19 + $0x784] ss:$8 sps:$4 sm:$0xff]  }
 0x16d   : > { %3526 = vmatprep.subr.bf16.mxu1 %v4508_v17  ;;  %v4563_v17 = vld [vmem:[%s5317_s19 + $0x680] ss:$8 sps:$4 sm:$0xff]  }
 0x16f   : > { %3486 = vmatpush1.bf16.msra.mxu0 %v4503_v21  ;;  %v4580_v21 = vld [vmem:[%s5317_s19 + $0x7a4] ss:$8 sps:$4 sm:$0xff]  }
 0x170   : > { %3527 = vmatpush1.bf16.msra.mxu1 %v4506_v22  ;;  %3487 = vmatprep.subr.bf16.mxu0 %v4511_v12  ;;  %v4575_v22 = vld [vmem:[%s5317_s19 + $0x6a0] ss:$8 sps:$4 sm:$0xff]   ;;  %v4581_v12 = vld [vmem:[%s5317_s19 + $0x6b0] ss:$8 sps:$4 sm:$0xff]  }
 0x171   : > { %3528 = vmatprep.subr.bf16.mxu1 %v4514_v59  ;;  %v4584_v59 = vld [vmem:[%s5317_s19 + $0x7b0] ss:$8 sps:$4 sm:$0xff]  }
 0x173   : > { %3488 = vmatpush1.bf16.msra.mxu0 %v4509_v29  ;;  %v4587_v29 = vld [vmem:[%s5317_s19 + $0x6c0] ss:$8 sps:$4 sm:$0xff]  }
 0x174   : > { %3529 = vmatpush1.bf16.msra.mxu1 %v4512_v30  ;;  %3539 = vmatprep.subr.bf16.mxu0 %v4517_v33  ;;  %v4590_v30 = vld [vmem:[%s5317_s19 + $0x7c0] ss:$8 sps:$4 sm:$0xff]   ;;  %v4593_v33 = vld [vmem:[%s5317_s19 + $0x6d0] ss:$8 sps:$4 sm:$0xff]  }
 0x175   : > { %3580 = vmatprep.subr.bf16.mxu1 %v4520_v34  ;;  %v4596_v34 = vld [vmem:[%s5317_s19 + $0x7d0] ss:$8 sps:$4 sm:$0xff]  }
 0x176   : > { %3490 = vmatmul.mubr.bf16.vlgmr.msra.gmra.mrb[8].mxu0 %v1747_v35  ;;  %v4601_v35 = vld [vmem:[%s5317_s19 + $0x6e4] ss:$8 sps:$4 sm:$0xff]  }
 0x177   : > { %3531 = vmatmul.mubr.bf16.vlgmr.msra.gmra.mrb[8].mxu1 %v1749_v36  ;;  %3540 = vmatpush1.bf16.msra.mxu0 %v4515_v39  ;;  %v4604_v36 = vld [vmem:[%s5317_s19 + $0x7e4] ss:$8 sps:$4 sm:$0xff]   ;;  %v1719_v39 = vmul.f32 0.2, %v5636_v26 }
 0x178   : > { %3581 = vmatpush1.bf16.msra.mxu1 %v4518_v41  ;;  %3541 = vmatprep.subr.bf16.mxu0 %v4523_v45  ;;  %v1721_v41 = vmul.f32 0.2, %v5640_v58  ;;  %v4607_v45 = vld [vmem:[%s5317_s19 + $0x6f4] ss:$8 sps:$4 sm:$0xff]  }
 0x179   : > { %3582 = vmatprep.subr.bf16.mxu1 %v4526_v46  ;;  %3571 = vmatprep.mubr.bf16.mxu0 %v1752_v47  ;;  %v4610_v46 = vld [vmem:[%s5317_s19 + $0x7f4] ss:$8 sps:$4 sm:$0xff]   ;;  %v4605_v47 = vld [vmem:[%s5317_s19 + $0x6f0] ss:$8 sps:$4 sm:$0xff]  }
 0x17a   : > { %3612 = vmatprep.mubr.bf16.mxu1 %v1754_v49  ;;  %v4608_v49 = vld [vmem:[%s5317_s19 + $0x7f0] ss:$8 sps:$4 sm:$0xff]  }
 0x17b   : > { %3542 = vmatpush1.bf16.msra.mxu0 %v4521_v52  ;;  %v1735_v52 = vsel %vm1703_vm14, %v5636_v26, %v1719_v39  ;;  %v3631_v39 = vld [vmem:[%s1429_s30] sm:$0x3] (!%p4163_p13) }
 0x17c   : > { %3583 = vmatpush1.bf16.msra.mxu1 %v4524_v40  ;;  %3543 = vmatprep.subr.bf16.mxu0 %v4529_v53  ;;  %v1737_v40 = vsel %vm1705_vm15, %v5640_v58, %v1721_v41  ;;  %v1751_v53 = vpack.c.bf16 %v1735_v52, %v1735_v52  ;;  %v3636_v41 = vrot.slane (!%p4163_p13), %v3631_v39, %v5375_v51 }
 0x17d   : > { %3584 = vmatprep.subr.bf16.mxu1 %v4532_v44  ;;  %v1753_v44 = vpack.c.bf16 %v1737_v40, %v1737_v40 }
 0x17f   : > { %3544 = vmatpush1.bf16.msra.mxu0 %v4527_v54 }
 0x180   : > { %3585 = vmatpush1.bf16.msra.mxu1 %v4530_v56  ;;  %3545 = vmatprep.subr.bf16.mxu0 %v4535_v57 }
 0x181   : > { %3586 = vmatprep.subr.bf16.mxu1 %v4538_v60 }
 0x183   : > { %3546 = vmatpush1.bf16.msra.mxu0 %v4533_v61 }
 0x184   : > { %3587 = vmatpush1.bf16.msra.mxu1 %v4536_v62  ;;  %3547 = vmatprep.subr.bf16.mxu0 %v4541_v63 }
 0x185   : > { %3588 = vmatprep.subr.bf16.mxu1 %v4544_v0 }
 0x187   : > { %3548 = vmatpush1.bf16.msra.mxu0 %v4539_v55 }
 0x188   : > { %3589 = vmatpush1.bf16.msra.mxu1 %v4542_v1  ;;  %3549 = vmatprep.subr.bf16.mxu0 %v4547_v2 }
 0x189   : > { %3590 = vmatprep.subr.bf16.mxu1 %v4550_v50 }
 0x18b   : > { %3550 = vmatpush1.bf16.msra.mxu0 %v4545_v3 }
 0x18c   : > { %3591 = vmatpush1.bf16.msra.mxu1 %v4548_v4  ;;  %3551 = vmatprep.subr.bf16.mxu0 %v4553_v5 }
 0x18d   : > { %3592 = vmatprep.subr.bf16.mxu1 %v4556_v6 }
 0x18f   : > { %3552 = vmatpush1.bf16.msra.mxu0 %v4551_v8 }
 0x190   : > { %3593 = vmatpush1.bf16.msra.mxu1 %v4554_v7  ;;  %3553 = vmatprep.subr.bf16.mxu0 %v4559_v10 }
 0x191   : > { %3594 = vmatprep.subr.bf16.mxu1 %v4562_v13 }
 0x193   : > { %3554 = vmatpush1.bf16.msra.mxu0 %v4557_v14 }
 0x194   : > { %3595 = vmatpush1.bf16.msra.mxu1 %v4560_v42  ;;  %3555 = vmatprep.subr.bf16.mxu0 %v4565_v15 }
 0x195   : > { %3596 = vmatprep.subr.bf16.mxu1 %v4568_v16 }
 0x197   : > { %3556 = vmatpush1.bf16.msra.mxu0 %v4563_v17 }
 0x198   : > { %3597 = vmatpush1.bf16.msra.mxu1 %v4566_v9  ;;  %3557 = vmatprep.subr.bf16.mxu0 %v4571_v18 }
 0x199   : > { %3598 = vmatprep.subr.bf16.mxu1 %v4574_v11 }
 0x19b   : > { %3558 = vmatpush1.bf16.msra.mxu0 %v4569_v43 }
 0x19c   : > { %3599 = vmatpush1.bf16.msra.mxu1 %v4572_v19  ;;  %3559 = vmatprep.subr.bf16.mxu0 %v4577_v20 }
 0x19d   : > { %3600 = vmatprep.subr.bf16.mxu1 %v4580_v21 }
 0x19f   : > { %3560 = vmatpush1.bf16.msra.mxu0 %v4575_v22 }
 0x1a0   : > { %3601 = vmatpush1.bf16.msra.mxu1 %v4578_v23  ;;  %3561 = vmatprep.subr.bf16.mxu0 %v4583_v24 }
 0x1a1   : > { %3602 = vmatprep.subr.bf16.mxu1 %v4586_v25 }
 0x1a3   : > { %3562 = vmatpush1.bf16.msra.mxu0 %v4581_v12 }
 0x1a4   : > { %3603 = vmatpush1.bf16.msra.mxu1 %v4584_v59  ;;  %3563 = vmatprep.subr.bf16.mxu0 %v4589_v27  ;;  %v1755_v59 = vld [vmem:[#allocation2] sm:$0xff] }
 0x1a5   : > { %3604 = vmatprep.subr.bf16.mxu1 %v4592_v28 }
 0x1a7   : > { %3564 = vmatpush1.bf16.msra.mxu0 %v4587_v29 }
 0x1a8   : > { %3605 = vmatpush1.bf16.msra.mxu1 %v4590_v30  ;;  %3565 = vmatprep.subr.bf16.mxu0 %v4595_v31  ;;  %v1756_v31 = vld [vmem:[#allocation2 + $0x8] sm:$0xff] }
 0x1a9   : > { %3606 = vmatprep.subr.bf16.mxu1 %v4598_v32 }
 0x1ab   : > { %3566 = vmatpush1.bf16.msra.mxu0 %v4593_v33 }
 0x1ac   : > { %3607 = vmatpush1.bf16.msra.mxu1 %v4596_v34  ;;  %3567 = vmatprep.subr.bf16.mxu0 %v4601_v35 }
 0x1ad   : > { %3608 = vmatprep.subr.bf16.mxu1 %v4604_v36 }
 0x1af   : > { %3568 = vmatpush1.bf16.msra.mxu0 %v4599_v37 }
 0x1b0   : > { %3609 = vmatpush1.bf16.msra.mxu1 %v4602_v38  ;;  %3569 = vmatprep.subr.bf16.mxu0 %v4607_v45  ;;  %v3640_v45 = vrot.slane (!%p4163_p13), %v3631_v39, %v5368_v48 }
 0x1b1   : > { %3610 = vmatprep.subr.bf16.mxu1 %v4610_v46 }
 0x1b3   : > { %3570 = vmatpush1.bf16.msra.mxu0 %v4605_v47 }
 0x1b4   : > { %3611 = vmatpush1.bf16.msra.mxu1 %v4608_v49 }
 0x1b6   : > { %3572 = vmatmul.mubr.bf16.vlgmr.msra.gmra.mrb[12].mxu0 %v1751_v53 }
 0x1b7   : > { %3613 = vmatmul.mubr.bf16.vlgmr.msra.gmra.mrb[12].mxu1 %v1753_v44 }
 0x1c9   : > { %v3327_v54 = vpop.f32.mrb[0].mxu0 }
 0x1ca   : > { %v3368_v56 = vpop.f32.mrb[0].mxu1  ;;  %v3329_v60 = vpop.f32.mrb[1].mxu0 }
 0x1cb   : > { %v3369_v57 = vadd.f32 %v3368_v56, %v3327_v54  ;;  %v3370_v61 = vpop.f32.mrb[1].mxu1  ;;  %v3331_v63 = vpop.f32.mrb[2].mxu0 }
 0x1cc   : > { %v3371_v62 = vadd.f32 %v3370_v61, %v3329_v60  ;;  %v3372_v0 = vpop.f32.mrb[2].mxu1  ;;  %v3332_v55 = vpop.f32.mrb[3].mxu0 }
 0x1cd   : > { %v3373_v26 = vpop.f32.mrb[3].mxu1 }
 0x209   : > { %v3409_v1 = vpop.f32.mrb[4].mxu0 }
 0x20a   : > { %v3450_v58 = vpop.f32.mrb[4].mxu1  ;;  %v3410_v2 = vadd.f32 %v3409_v1, %v3369_v57  ;;  %v3411_v50 = vpop.f32.mrb[5].mxu0 }
 0x20b   : > { %v3452_v3 = vpop.f32.mrb[5].mxu1  ;;  %v3412_v4 = vadd.f32 %v3411_v50, %v3371_v62  ;;  %v3413_v5 = vpop.f32.mrb[6].mxu0 }
 0x20c   : > { %v3454_v6 = vpop.f32.mrb[6].mxu1  ;;  %v3451_v8 = vadd.f32 %v3450_v58, %v3410_v2  ;;  %v3414_v7 = vpop.f32.mrb[7].mxu0 }
 0x20d   : > { %v3455_v10 = vpop.f32.mrb[7].mxu1  ;;  %v3453_v13 = vadd.f32 %v3452_v3, %v3412_v4 }
 0x249   : > { %v3491_v14 = vpop.f32.mrb[8].mxu0 }
 0x24a   : > { %v3532_v42 = vpop.f32.mrb[8].mxu1  ;;  %v3492_v15 = vadd.f32 %v3491_v14, %v3451_v8  ;;  %v3493_v16 = vpop.f32.mrb[9].mxu0 }
 0x24b   : > { %v3534_v17 = vpop.f32.mrb[9].mxu1  ;;  %v3494_v9 = vadd.f32 %v3493_v16, %v3453_v13  ;;  %v3495_v18 = vpop.f32.mrb[10].mxu0 }
 0x24c   : > { %v3536_v11 = vpop.f32.mrb[10].mxu1  ;;  %v3533_v43 = vadd.f32 %v3532_v42, %v3492_v15  ;;  %v3496_v19 = vpop.f32.mrb[11].mxu0 }
 0x24d   : > { %v3537_v20 = vpop.f32.mrb[11].mxu1  ;;  %v3535_v21 = vadd.f32 %v3534_v17, %v3494_v9 }
 0x289   : > { %v3573_v22 = vpop.f32.mrb[12].mxu0 }
 0x28a   : > { %v3614_v23 = vpop.f32.mrb[12].mxu1  ;;  %v3574_v24 = vadd.f32 %v3573_v22, %v3533_v43  ;;  %v3575_v25 = vpop.f32.mrb[13].mxu0 }
 0x28b   : > { %v3616_v12 = vpop.f32.mrb[13].mxu1  ;;  %v3576_v27 = vadd.f32 %v3575_v25, %v3535_v21  ;;  %v3577_v28 = vpop.f32.mrb[14].mxu0  ;;  %3628 = sbr.rel (%p4163_p13) target bundleno = 685 (0x2ad), region = 86 }
 0x28c   : > { %v3618_v29 = vpop.f32.mrb[14].mxu1  ;;  %v3615_v30 = vadd.f32 %v3614_v23, %v3574_v24  ;;  %v3578_v32 = vpop.f32.mrb[15].mxu0 }
 0x28d   : > { %v3619_v33 = vpop.f32.mrb[15].mxu1  ;;  %v3617_v34 = vadd.f32 %v3616_v12, %v3576_v27 }
 0x28e   : > { %v3621_v35 = vadd.f32 %v3615_v30, %v1755_v59 }
 0x28f   : > { %v3622_v36 = vadd.f32 %v3617_v34, %v1756_v31 }
 0x290   : > { %3623 = vst [vmem:[#allocation2] sm:$0xff] %v3621_v35 }
 0x291   : > { %3624 = vst [vmem:[#allocation2 + $0x8] sm:$0xff] %v3622_v36 }
 0x297   : > { %v3629_v37 = vld [vmem:[#allocation2] sm:$0xff] }
 0x298   : > { %v3630_v38 = vld [vmem:[#allocation2 + $0x8] sm:$0xff]  ;;  %v3643_v46 = vadd.f32 %v3636_v41, %v3629_v37 }
 0x299   : > { %v3644_v47 = vadd.f32 %v3640_v45, %v3630_v38 }
 0x29a   : > { %v3654_v52 = vrot.slane %v3643_v46, 4  ;;  %v3666_v53 = vmul.f32 %v3643_v46, %v3643_v46 }
 0x29b   : > { %v4169_v49 = vpack.c.bf16 %v3644_v47, %v3643_v46  ;;  %v3660_v40 = vrot.slane %v3644_v47, 4  ;;  %v3667_v44 = vmul.f32 %v3644_v47, %v3644_v47 }
 0x29c   : > { %v3655_v54 = vadd.f32 %v3654_v52, %v3643_v46  ;;  %v3668_v57 = vrot.slane %v3666_v53, 4 }
 0x29d   : > { %3653 = vst [vmem:[%s5309_s11] sm:$0xff] %v4169_v49  ;;  %v3661_v56 = vadd.f32 %v3660_v40, %v3644_v47  ;;  %v3674_v60 = vrot.slane %v3667_v44, 4 }
 0x29e   : > { %v3656_v61 = vrot.slane %v3655_v54, 2  ;;  %v3669_v63 = vadd.f32 %v3668_v57, %v3666_v53 }
 0x29f   : > { %v3662_v62 = vrot.slane %v3661_v56, 2  ;;  %v3675_v0 = vadd.f32 %v3674_v60, %v3667_v44 }
 0x2a0   : > { %v3657_v55 = vadd.f32 %v3656_v61, %v3655_v54  ;;  %v3670_v26 = vrot.slane %v3669_v63, 2 }
 0x2a1   : > { %v3663_v51 = vadd.f32 %v3662_v62, %v3661_v56  ;;  %v3676_v48 = vrot.slane %v3675_v0, 2 }
 0x2a2   : > { %v3658_v1 = vrot.slane %v3657_v55, 1  ;;  %v3671_v2 = vadd.f32 %v3670_v26, %v3669_v63 }
 0x2a3   : > { %v3664_v58 = vrot.slane %v3663_v51, 1  ;;  %v3677_v50 = vadd.f32 %v3676_v48, %v3675_v0 }
 0x2a4   : > { %v3659_v3 = vadd.f32 %v3658_v1, %v3657_v55  ;;  %v3672_v4 = vrot.slane %v3671_v2, 1 }
 0x2a5   : > { %v3665_v5 = vadd.f32 %v3664_v58, %v3663_v51  ;;  %v3678_v6 = vrot.slane %v3677_v50, 1 }
 0x2a6   : > { %v3673_v8 = vadd.f32 %v3672_v4, %v3671_v2 }
 0x2a7   : > { %v3679_v7 = vadd.f32 %v3678_v6, %v3677_v50 }
 0x2a8   : > { %v3681_v10 = vsel %vm3680_vm0, %v3659_v3, %v3673_v8 }
 0x2a9   : > { %v3682_v13 = vsel %vm3680_vm0, %v3665_v5, %v3679_v7 }
 0x2aa   : > { %v3685_v14 = vcombine.low %v3681_v10, %v3682_v13 }
 0x2ac   : > { %4165 = vst.sshfl [vmem:[%s5315_s7] sm:$0x33 pattern:$0x76325410] %v3685_v14 }
 0x2ad PF: > { %s17_s27 = sadd.s32 1, %s4665_s27   ;;  %s5754_s21 = smov %s4645_s22 }
 0x2ae   : > { %p14_p0 = scmp.ge.s32.totalorder %s17_s27, 6   ;;  %s5755_s22 = smov %s4754_s10 }
 0x2af   : > { %s5756_s23 = smov %s4657_s25  ;;  %s5757_s24 = smov %s4661_s26 }
 0x2b0   : > { %s5758_s25 = smov %s5761_s28  ;;  %s5759_s26 = smov %s5765_s29 }
 0x2b1   :  { %16 = sbr.rel (!%p14_p0) target bundleno = 6 (0x6), region = 145 }

// kernel: discriminator_forward.9
= control target key start
LH: loop header
LB: loop body
LE: loop exit
PB: predicated region body
PF: predicated region fallthrough
CT: control target
= control target key end

     0   :  { %12 = vsyncpa [#allocation4], 0  ;;  %s2902_s21 = smov 0   ;;  %s2904_s22 = smov 0   ;;  %s3212_s0 = inlined_call_operand.vmem [shape: bf16[2,8192], index: 0, kind: input, shape index: {}]   ;;  %s3213_s1 = inlined_call_operand.vmem [shape: bf16[8192,128], index: 1, kind: input, shape index: {}]   ;;  %s3214_s2 = inlined_call_operand.vmem [shape: f32[1,128], index: 2, kind: input, shape index: {}]   ;;  %s3215_s3 = inlined_call_operand.vmem [shape: f32[1,8192], index: 3, kind: input, shape index: {}]   ;;  %s3216_s4 = inlined_call_operand.vmem [shape: f32[1,8192], index: 4, kind: input, shape index: {}]   ;;  %s3217_s5 = inlined_call_operand.vmem [shape: f32[2,128], index: 5, kind: output, shape index: {0}]   ;;  %s3218_s6 = inlined_call_operand.hbm [shape: f32[1,2,128], index: 6, kind: output, shape index: {1}]  }
   0x1   :  { %s2906_s23 = smov 0  }
   0x2 LB: > { %s2327_s24 = sadd.s32 4294967295, %s2862_s23   ;;  %s30_s25 = sadd.s32 1, %s2858_s22  ;;  %s2862_s23 = sphi %s2906_s23, %s18_s23   ;;  %s2858_s22 = sphi %s2904_s22, %s3221_s22   ;;  %s2854_s21 = sphi %s2902_s21, %s3220_s21  }
   0x3   : > { %p31_p0 = scmp.ge.s32.totalorder %s30_s25, 4  ;;  %p2331_p1 = scmp.ge.s32.totalorder %s2862_s23, 1 }
   0x4   : > { %p289_p2 = scmp.lt.s32.totalorder %s2862_s23, 5 }
   0x5   : > { %s3223_s25 = smov (%p31_p0, %s30_s25), 0 }
   0x6   : > { %p290_p3 = pnand %p2331_p1, %p289_p2 }
   0x7   : > { %s2332_s26 = sshll.u32 (!%p290_p3), %s2854_s21, 4  ;;  %s2333_s27 = sshll.u32 (!%p290_p3), %s2854_s21, 8 }
   0x8   : > { %293 = sbr.rel (%p290_p3) target bundleno = 428 (0x1ac), region = 40  ;;  %p346_p4 = scmp.lt.s32.totalorder (!%p290_p3), %s2332_s26, 63 }
   0x9   : > { %p353_p5 = scmp.lt.s32.totalorder (!%p290_p3), %s2333_s27, 1023  ;;  %p2337_p6 = scmp.ne.s32.totalorder (!%p290_p3), %s2854_s21, 0 }
   0xf   : > { %s3225_s26 = smov (!%p346_p4, %s2332_s26), 63  ;;  %s3227_s27 = smov (!%p353_p5, %s2333_s27), 1023 }
  0x10   : > { %s2928_s30 = scalar_lea.vmem %s3212_s0, %s3225_s26  ;;  %s2933_s9 = scalar_lea.vmem %s3215_s3, %s3225_s26  ;;  %v2864_v0 = vmov (!%p2337_p6), 0.0  }
  0x11   : > { %s2334_s10 = sshll.u32 %s3227_s27, 2  ;;  %s2938_s13 = scalar_lea.vmem %s3216_s4, %s3225_s26  ;;  %386 = vst [vmem:[#allocation2] sm:$0x3] (!%p2337_p6), %v2864_v0 }
  0x12   : > { %s2943_s16 = scalar_lea.vmem %s3213_s1, %s2334_s10  ;;  %385 = sbr.rel (%p2337_p6) target bundleno = 25 (0x19), region = 44 }
  0x19 PF: > { %v2682_v1 = vld [vmem:[%s2943_s16 + $0x40] sm:$0xff]   ;;  %v2686_v5 = vld [vmem:[%s2943_s16 + $0x48] sm:$0xff]   ;;  %v2690_v9 = vld [vmem:[%s2943_s16 + $0x50] sm:$0xff]   ;;  %v397_v21 = vlaneseq  ;;  %v2865_v49 = vmov 1983009808   ;;  %p2466_p7 = scmp.ne.s32.totalorder %s2854_s21, 3 }
  0x1a   : > { %v2683_v2 = vld [vmem:[%s2943_s16 + $0xc0] sm:$0xff]   ;;  %2473 = vmatprep.subr.bf16.mxu0 %v2682_v1  ;;  %v2687_v6 = vld [vmem:[%s2943_s16 + $0xc8] sm:$0xff]   ;;  %v2691_v10 = vld [vmem:[%s2943_s16 + $0xd0] sm:$0xff]   ;;  %v464_v50 = vunpack.c.l.s4 %v2865_v49  ;;  %vm2158_vm4 = vcmask (!%p2466_p7), 1041408   ;;  %vm2174_vm5 = vcmask (!%p2466_p7), 1040384  }
  0x1b   : > { %v2684_v3 = vld [vmem:[%s2943_s16] sm:$0xff]   ;;  %2495 = vmatprep.subr.bf16.mxu1 %v2683_v2  ;;  %v2688_v7 = vld [vmem:[%s2943_s16 + $0x8] sm:$0xff]   ;;  %v2692_v11 = vld [vmem:[%s2943_s16 + $0x10] sm:$0xff]   ;;  %v398_v26 = vshrl.u32 %v397_v21, 7 }
  0x1c   : > { %v2685_v4 = vld [vmem:[%s2943_s16 + $0x80] sm:$0xff]   ;;  %2474 = vmatpush3.bf16.msra.mxu0 %v2684_v3  ;;  %v2689_v8 = vld [vmem:[%s2943_s16 + $0x88] sm:$0xff]   ;;  %v2693_v12 = vld [vmem:[%s2943_s16 + $0x90] sm:$0xff]   ;;  %v465_v60 = vunpack.c.0.s8 %v464_v50 }
  0x1d   : > { %2496 = vmatpush3.bf16.msra.mxu1 %v2685_v4  ;;  %2475 = vmatprep.subr.bf16.mxu0 %v2686_v5  ;;  %v2694_v13 = vld [vmem:[%s2943_s16 + $0x58] sm:$0xff]   ;;  %v2698_v17 = vld [vmem:[%s2943_s16 + $0x60] sm:$0xff]   ;;  %v2702_v22 = vld [vmem:[%s2943_s16 + $0x68] sm:$0xff]   ;;  %v2974_v31 = vsub.s32 0, %v398_v26  ;;  %v2977_v33 = vsub.s32 1, %v398_v26  ;;  %v2980_v35 = vsub.s32 2, %v398_v26 }
  0x1e   : > { %2497 = vmatprep.subr.bf16.mxu1 %v2687_v6  ;;  %v2695_v14 = vld [vmem:[%s2943_s16 + $0xd8] sm:$0xff]   ;;  %v2699_v18 = vld [vmem:[%s2943_s16 + $0xe0] sm:$0xff]   ;;  %v2703_v23 = vld [vmem:[%s2943_s16 + $0xe8] sm:$0xff]   ;;  %v2983_v37 = vsub.s32 3, %v398_v26  ;;  %v2988_v41 = vsub.s32 4, %v398_v26  ;;  %v2990_v42 = vsub.s32 5, %v398_v26  ;;  %v3007_v0 = vsub.s32 %v465_v60, %v398_v26 }
  0x1f   : > { %v2696_v15 = vld [vmem:[%s2943_s16 + $0x18] sm:$0xff]   ;;  %v2700_v19 = vld [vmem:[%s2943_s16 + $0x20] sm:$0xff]   ;;  %v2704_v24 = vld [vmem:[%s2943_s16 + $0x28] sm:$0xff]   ;;  %v2995_v46 = vsub.s32 6, %v398_v26  ;;  %v3005_v57 = vsub.s32 7, %v398_v26 }
  0x20   : > { %2476 = vmatpush3.bf16.msra.mxu0 %v2688_v7  ;;  %v2697_v16 = vld [vmem:[%s2943_s16 + $0x98] sm:$0xff]   ;;  %v2701_v20 = vld [vmem:[%s2943_s16 + $0xa0] sm:$0xff]   ;;  %v2705_v25 = vld [vmem:[%s2943_s16 + $0xa8] sm:$0xff]  }
  0x21   : > { %2498 = vmatpush3.bf16.msra.mxu1 %v2689_v8  ;;  %2477 = vmatprep.subr.bf16.mxu0 %v2690_v9  ;;  %v2706_v27 = vld [vmem:[%s2943_s16 + $0x70] sm:$0xff]   ;;  %v2710_v32 = vld [vmem:[%s2943_s16 + $0x78] sm:$0xff]   ;;  %v393_v39 = vld [vmem:[%s2933_s9] sm:$0xff] }
  0x22   : > { %2499 = vmatprep.subr.bf16.mxu1 %v2691_v10  ;;  %v2707_v28 = vld [vmem:[%s2943_s16 + $0xf0] sm:$0xff]   ;;  %v2711_v34 = vld [vmem:[%s2943_s16 + $0xf8] sm:$0xff]   ;;  %v537_v40 = vld [vmem:[%s2938_s13] sm:$0xff]  ;;  %v400_v43 = vrot.slane %v393_v39, %v2974_v31  ;;  %v404_v44 = vrot.slane %v393_v39, %v2977_v33  ;;  %v408_v47 = vrot.slane %v393_v39, %v2980_v35  ;;  %v412_v48 = vrot.slane %v393_v39, %v2983_v37 }
  0x23   : > { %v2708_v29 = vld [vmem:[%s2943_s16 + $0x30] sm:$0xff]   ;;  %v2712_v36 = vld [vmem:[%s2943_s16 + $0x38] sm:$0xff]   ;;  %v2714_v45 = vld [vmem:[%s2943_s16 + $0x140] sm:$0xff]   ;;  %v544_v51 = vrot.slane %v537_v40, %v2974_v31  ;;  %v548_v54 = vrot.slane %v537_v40, %v2977_v33  ;;  %v552_v55 = vrot.slane %v537_v40, %v2980_v35  ;;  %v556_v56 = vrot.slane %v537_v40, %v2983_v37 }
  0x24   : > { %2478 = vmatpush3.bf16.msra.mxu0 %v2692_v11  ;;  %v2709_v30 = vld [vmem:[%s2943_s16 + $0xb0] sm:$0xff]   ;;  %v2713_v38 = vld [vmem:[%s2943_s16 + $0xb8] sm:$0xff]   ;;  %v2715_v52 = vld [vmem:[%s2943_s16 + $0x1c0] sm:$0xff]   ;;  %v461_v58 = vcombine.low %v400_v43, %v404_v44  ;;  %v462_v59 = vcombine.low %v408_v47, %v412_v48  ;;  %v416_v1 = vrot.slane %v393_v39, %v2988_v41  ;;  %v420_v2 = vrot.slane %v393_v39, %v2990_v42 }
  0x25   : > { %2500 = vmatpush3.bf16.msra.mxu1 %v2693_v12  ;;  %2479 = vmatprep.subr.bf16.mxu0 %v2694_v13  ;;  %v387_v53 = vld [vmem:[%s2928_s30] sm:$0xff]  ;;  %v605_v61 = vcombine.low %v544_v51, %v548_v54  ;;  %v606_v62 = vcombine.low %v552_v55, %v556_v56  ;;  %v424_v3 = vrot.slane %v393_v39, %v2995_v46  ;;  %v2719_v50 = vld [vmem:[%s2943_s16 + $0x1c8] sm:$0xff]   ;;  %v2723_v55 = vld [vmem:[%s2943_s16 + $0x1d0] sm:$0xff]  }
  0x26   : > { %2501 = vmatprep.subr.bf16.mxu1 %v2695_v14  ;;  %v389_v63 = vunpack.c.l.bf16 %v387_v53  ;;  %v428_v4 = vrot.slane %v393_v39, %v3005_v57  ;;  %v469_v5 = vrot.slane %v461_v58, %v3007_v0  ;;  %v476_v6 = vrot.slane %v462_v59, %v3007_v0  ;;  %v2717_v43 = vld [vmem:[%s2943_s16 + $0x180] sm:$0xff]   ;;  %v2720_v51 = vld [vmem:[%s2943_s16 + $0x108] sm:$0xff]   ;;  %v2724_v56 = vld [vmem:[%s2943_s16 + $0x110] sm:$0xff]  }
  0x27   : > { %v613_v7 = vrot.slane %v605_v61, %v3007_v0  ;;  %v620_v8 = vrot.slane %v606_v62, %v3007_v0  ;;  %v478_v11 = vcombine.low %v416_v1, %v420_v2  ;;  %v560_v13 = vrot.slane %v537_v40, %v2988_v41  ;;  %v2725_v58 = vld [vmem:[%s2943_s16 + $0x190] sm:$0xff]   ;;  %v2726_v59 = vld [vmem:[%s2943_s16 + $0x158] sm:$0xff]   ;;  %v2730_v2 = vld [vmem:[%s2943_s16 + $0x160] sm:$0xff]  }
  0x28   : > { %2480 = vmatpush3.bf16.msra.mxu0 %v2696_v15  ;;  %v477_v9 = vcombine.low %v469_v5, %v476_v6  ;;  %v479_v12 = vcombine.low %v424_v3, %v428_v4  ;;  %v564_v15 = vrot.slane %v537_v40, %v2990_v42  ;;  %v2727_v60 = vld [vmem:[%s2943_s16 + $0x1d8] sm:$0xff]   ;;  %v2731_v5 = vld [vmem:[%s2943_s16 + $0x1e0] sm:$0xff]  }
  0x29   : > { %2502 = vmatpush3.bf16.msra.mxu1 %v2697_v16  ;;  %2481 = vmatprep.subr.bf16.mxu0 %v2698_v17  ;;  %v621_v10 = vcombine.low %v613_v7, %v620_v8  ;;  %v568_v16 = vrot.slane %v537_v40, %v2995_v46  ;;  %v572_v17 = vrot.slane %v537_v40, %v3005_v57  ;;  %v2728_v61 = vld [vmem:[%s2943_s16 + $0x118] sm:$0xff]   ;;  %v2732_v6 = vld [vmem:[%s2943_s16 + $0x120] sm:$0xff]  }
  0x2a   : > { %2503 = vmatprep.subr.bf16.mxu1 %v2699_v18  ;;  %v533_v14 = vmul.f32 %v477_v9, %v389_v63  ;;  %v2729_v63 = vld [vmem:[%s2943_s16 + $0x198] sm:$0xff]   ;;  %v2733_v9 = vld [vmem:[%s2943_s16 + $0x1a0] sm:$0xff]  }
  0x2c   : > { %2482 = vmatpush3.bf16.msra.mxu0 %v2700_v19  ;;  %v677_v18 = vadd.f32 %v621_v10, %v533_v14  ;;  %v486_v19 = vrot.slane %v478_v11, %v3007_v0  ;;  %v2734_v10 = vld [vmem:[%s2943_s16 + $0x168] sm:$0xff]  }
  0x2d   : > { %2504 = vmatpush3.bf16.msra.mxu1 %v2701_v20  ;;  %2483 = vmatprep.subr.bf16.mxu0 %v2702_v22  ;;  %v493_v20 = vrot.slane %v479_v12, %v3007_v0  ;;  %v622_v22 = vcombine.low %v560_v13, %v564_v15  ;;  %v2735_v13 = vld [vmem:[%s2943_s16 + $0x1e8] sm:$0xff]  }
  0x2e   : > { %2505 = vmatprep.subr.bf16.mxu1 %v2703_v23  ;;  %vm681_vm0 = vcmp.ge.f32.partialorder %v677_v18, 0.0  ;;  %v685_v21 = vmul.f32 0.2, %v677_v18  ;;  %v623_v23 = vcombine.low %v568_v16, %v572_v17  ;;  %v2736_v14 = vld [vmem:[%s2943_s16 + $0x128] sm:$0xff]   ;;  %v2738_v17 = vld [vmem:[%s2943_s16 + $0x170] sm:$0xff]  }
  0x2f   : > { %v2737_v16 = vld [vmem:[%s2943_s16 + $0x1a8] sm:$0xff]  }
  0x30   : > { %2484 = vmatpush3.bf16.msra.mxu0 %v2704_v24  ;;  %v689_v24 = vsel %vm681_vm0, %v677_v18, %v685_v21  ;;  %v2739_v18 = vld [vmem:[%s2943_s16 + $0x1f0] sm:$0xff]   ;;  %v2742_v21 = vld [vmem:[%s2943_s16 + $0x178] sm:$0xff]  }
  0x31   : > { %2506 = vmatpush3.bf16.msra.mxu1 %v2705_v25  ;;  %2485 = vmatprep.subr.bf16.mxu0 %v2706_v27  ;;  %v704_v25 = vrot.slane %v689_v24, %v3007_v0  ;;  %v697_v26 = vcombine.high %v689_v24, %v689_v24  ;;  %v390_v27 = vunpack.c.h.bf16 %v387_v53  ;;  %v2722_v53 = vld [vmem:[%s2943_s16 + $0x150] sm:$0xff]   ;;  %v2745_v24 = vld [vmem:[%s2943_s16 + $0x1b8] sm:$0xff]  }
  0x32   : > { %2507 = vmatprep.subr.bf16.mxu1 %v2707_v28  ;;  %v494_v28 = vcombine.low %v486_v19, %v493_v20  ;;  %v2740_v19 = vld [vmem:[%s2943_s16 + $0x130] sm:$0xff]  }
  0x33   : > { %v2741_v20 = vld [vmem:[%s2943_s16 + $0x1b0] sm:$0xff]  }
  0x34   : > { %2486 = vmatpush3.bf16.msra.mxu0 %v2708_v29  ;;  %v630_v29 = vrot.slane %v622_v22, %v3007_v0  ;;  %v534_v47 = vmul.f32 %v494_v28, %v390_v27  ;;  %v2743_v22 = vld [vmem:[%s2943_s16 + $0x1f8] sm:$0xff]   ;;  %v2748_v28 = vld [vmem:[%s2943_s16 + $0x200] sm:$0xff]  }
  0x35   : > { %2508 = vmatpush3.bf16.msra.mxu1 %v2709_v30  ;;  %2487 = vmatprep.subr.bf16.mxu0 %v2710_v32  ;;  %v637_v30 = vrot.slane %v623_v23, %v3007_v0  ;;  %v712_v32 = vcombine.high %v704_v25, %v704_v25  ;;  %v2744_v23 = vld [vmem:[%s2943_s16 + $0x138] sm:$0xff]  }
  0x36   : > { %2509 = vmatprep.subr.bf16.mxu1 %v2711_v34  ;;  %v711_v34 = vrot.slane %v697_v26, %v3007_v0  ;;  %v2747_v26 = vld [vmem:[%s2943_s16 + $0x2c0] sm:$0xff]  }
  0x37   : > { %v782_v39 = vpack.c.bf16 %v712_v32, %v712_v32  ;;  %v638_v48 = vcombine.low %v630_v29, %v637_v30  ;;  %v2749_v29 = vld [vmem:[%s2943_s16 + $0x280] sm:$0xff]   ;;  %v2750_v32 = vld [vmem:[%s2943_s16 + $0x248] sm:$0xff]  }
  0x38   : > { %2488 = vmatpush3.bf16.msra.mxu0 %v2712_v36  ;;  %v781_v36 = vpack.c.bf16 %v704_v25, %v704_v25  ;;  %v713_v40 = vcombine.high %v711_v34, %v711_v34  ;;  %v783_v44 = vpack.c.bf16 %v711_v34, %v711_v34  ;;  %v2746_v25 = vld [vmem:[%s2943_s16 + $0x240] sm:$0xff]   ;;  %v2751_v34 = vld [vmem:[%s2943_s16 + $0x2c8] sm:$0xff]  }
  0x39   : > { %2510 = vmatpush3.bf16.msra.mxu1 %v2713_v38  ;;  %2517 = vmatprep.subr.bf16.mxu0 %v2714_v45  ;;  %v2716_v38 = vld [vmem:[%s2943_s16 + $0x100] sm:$0xff]   ;;  %v2718_v45 = vld [vmem:[%s2943_s16 + $0x148] sm:$0xff]   ;;  %v678_v54 = vadd.f32 %v638_v48, %v534_v47  ;;  %v2759_v47 = vld [vmem:[%s2943_s16 + $0x2d8] sm:$0xff]  }
  0x3a   : > { %2539 = vmatprep.subr.bf16.mxu1 %v2715_v52  ;;  %1854 = vmatprep.mubr.bf16.mxu0 %v782_v39  ;;  %v784_v49 = vpack.c.bf16 %v713_v40, %v713_v40  ;;  %v2721_v52 = vld [vmem:[%s2943_s16 + $0x188] sm:$0xff]   ;;  %v2754_v39 = vld [vmem:[%s2943_s16 + $0x250] sm:$0xff]   ;;  %v2760_v48 = vld [vmem:[%s2943_s16 + $0x218] sm:$0xff]  }
  0x3b   : > { %1855 = vmatmul.mubr.bf16.vlgmr.msra.gmra.mrb[0].mxu0 %v781_v36  ;;  %vm682_vm1 = vcmp.ge.f32.partialorder %v678_v54, 0.0  ;;  %v686_v62 = vmul.f32 0.2, %v678_v54  ;;  %v2752_v36 = vld [vmem:[%s2943_s16 + $0x208] sm:$0xff]   ;;  %v2755_v40 = vld [vmem:[%s2943_s16 + $0x2d0] sm:$0xff]  }
  0x3c   : > { %1894 = vmatprep.mubr.bf16.mxu1 %v784_v49  ;;  %2518 = vmatpush3.bf16.msra.mxu0 %v2716_v38  ;;  %v2753_v38 = vld [vmem:[%s2943_s16 + $0x288] sm:$0xff]  }
  0x3d   : > { %1895 = vmatmul.mubr.bf16.vlgmr.msra.gmra.mrb[0].mxu1 %v783_v44  ;;  %2519 = vmatprep.subr.bf16.mxu0 %v2718_v45  ;;  %v690_v1 = vsel %vm682_vm1, %v678_v54, %v686_v62  ;;  %v2757_v44 = vld [vmem:[%s2943_s16 + $0x290] sm:$0xff]   ;;  %v2758_v45 = vld [vmem:[%s2943_s16 + $0x258] sm:$0xff]   ;;  %v394_v49 = vld [vmem:[%s2933_s9 + $0x8] sm:$0xff] }
  0x3e   : > { %2540 = vmatpush3.bf16.msra.mxu1 %v2717_v43  ;;  %v721_v3 = vrot.slane %v690_v1, %v3007_v0  ;;  %v714_v4 = vcombine.high %v690_v1, %v690_v1  ;;  %v2756_v43 = vld [vmem:[%s2943_s16 + $0x210] sm:$0xff]   ;;  %v2762_v54 = vld [vmem:[%s2943_s16 + $0x260] sm:$0xff]  }
  0x3f   : > { %2541 = vmatprep.subr.bf16.mxu1 %v2719_v50  ;;  %v432_v50 = vrot.slane %v394_v49, %v2974_v31 }
  0x40   : > { %2520 = vmatpush3.bf16.msra.mxu0 %v2720_v51  ;;  %v729_v7 = vcombine.high %v721_v3, %v721_v3  ;;  %v728_v8 = vrot.slane %v714_v4, %v3007_v0  ;;  %v785_v27 = vpack.c.bf16 %v721_v3, %v721_v3  ;;  %v436_v51 = vrot.slane %v394_v49, %v2977_v33 }
  0x41   : > { %2521 = vmatprep.subr.bf16.mxu0 %v2722_v53  ;;  %v3079_v53 = vld [vmem:[%s2938_s13 + $0x8] sm:$0xff] }
  0x42   : > { %2542 = vmatpush3.bf16.msra.mxu1 %v2721_v52  ;;  %v786_v11 = vpack.c.bf16 %v729_v7, %v729_v7  ;;  %v730_v12 = vcombine.high %v728_v8, %v728_v8  ;;  %v787_v30 = vpack.c.bf16 %v728_v8, %v728_v8  ;;  %v440_v52 = vrot.slane %v394_v49, %v2980_v35 }
  0x43   : > { %2543 = vmatprep.subr.bf16.mxu1 %v2723_v55  ;;  %v444_v55 = vrot.slane %v394_v49, %v2983_v37  ;;  %v588_v62 = vrot.slane %v3079_v53, %v2983_v37  ;;  %v448_v8 = vrot.slane %v394_v49, %v2988_v41 }
  0x44   : > { %2522 = vmatpush3.bf16.msra.mxu0 %v2724_v56  ;;  %1934 = vmatprep.mubr.bf16.mxu0 %v786_v11  ;;  %v788_v15 = vpack.c.bf16 %v730_v12, %v730_v12  ;;  %v576_v56 = vrot.slane %v3079_v53, %v2974_v31  ;;  %v2763_v31 = vld [vmem:[%s2943_s16 + $0x2e0] sm:$0xff]   ;;  %v456_v12 = vrot.slane %v394_v49, %v2995_v46 }
  0x45   : > { %2523 = vmatprep.subr.bf16.mxu0 %v2726_v59  ;;  %v584_v59 = vrot.slane %v3079_v53, %v2980_v35  ;;  %v496_v1 = vcombine.low %v440_v52, %v444_v55  ;;  %v2764_v35 = vld [vmem:[%s2943_s16 + $0x220] sm:$0xff]  }
  0x46   : > { %2544 = vmatpush3.bf16.msra.mxu1 %v2725_v58  ;;  %1974 = vmatprep.mubr.bf16.mxu1 %v788_v15  ;;  %v580_v58 = vrot.slane %v3079_v53, %v2977_v33  ;;  %v2779_v55 = vld [vmem:[%s2943_s16 + $0x3c0] sm:$0xff]  }
  0x47   : > { %2545 = vmatprep.subr.bf16.mxu1 %v2727_v60  ;;  %v3090_v60 = vld [vmem:[%s2928_s30 + $0x8] sm:$0xff]  ;;  %v640_v3 = vcombine.low %v584_v59, %v588_v62 }
  0x48   : > { %2524 = vmatpush3.bf16.msra.mxu0 %v2728_v61  ;;  %v495_v61 = vcombine.low %v432_v50, %v436_v51  ;;  %v391_v4 = vunpack.c.l.bf16 %v3090_v60 }
  0x49   : > { %2525 = vmatprep.subr.bf16.mxu0 %v2730_v2  ;;  %v639_v2 = vcombine.low %v576_v56, %v580_v58  ;;  %v654_v7 = vrot.slane %v640_v3, %v3007_v0  ;;  %v2780_v56 = vld [vmem:[%s2943_s16 + $0x300] sm:$0xff]  }
  0x4a   : > { %2546 = vmatpush3.bf16.msra.mxu1 %v2729_v63  ;;  %v2761_v63 = vld [vmem:[%s2943_s16 + $0x298] sm:$0xff]   ;;  %v503_v33 = vrot.slane %v495_v61, %v3007_v0  ;;  %v2781_v61 = vld [vmem:[%s2943_s16 + $0x380] sm:$0xff]  }
  0x4b   : > { %2547 = vmatprep.subr.bf16.mxu1 %v2731_v5  ;;  %v510_v5 = vrot.slane %v496_v1, %v3007_v0  ;;  %v647_v37 = vrot.slane %v639_v2, %v3007_v0  ;;  %v2783_v1 = vld [vmem:[%s2943_s16 + $0x3c8] sm:$0xff]  }
  0x4c   : > { %2526 = vmatpush3.bf16.msra.mxu0 %v2732_v6  ;;  %v2766_v6 = vld [vmem:[%s2943_s16 + $0x268] sm:$0xff]  }
  0x4d   : > { %2527 = vmatprep.subr.bf16.mxu0 %v2734_v10  ;;  %v2765_v10 = vld [vmem:[%s2943_s16 + $0x2a0] sm:$0xff]   ;;  %v511_v11 = vcombine.low %v503_v33, %v510_v5  ;;  %v655_v15 = vcombine.low %v647_v37, %v654_v7  ;;  %v2784_v2 = vld [vmem:[%s2943_s16 + $0x308] sm:$0xff]   ;;  %v2790_v5 = vld [vmem:[%s2943_s16 + $0x358] sm:$0xff]  }
  0x4e   : > { %2548 = vmatpush3.bf16.msra.mxu1 %v2733_v9  ;;  %v452_v9 = vrot.slane %v394_v49, %v2990_v42  ;;  %v2785_v33 = vld [vmem:[%s2943_s16 + $0x388] sm:$0xff]   ;;  %v2789_v37 = vld [vmem:[%s2943_s16 + $0x390] sm:$0xff]  }
  0x4f   : > { %2549 = vmatprep.subr.bf16.mxu1 %v2735_v13  ;;  %v460_v13 = vrot.slane %v394_v49, %v3005_v57 }
  0x50   : > { %2528 = vmatpush3.bf16.msra.mxu0 %v2736_v14  ;;  %v2767_v14 = vld [vmem:[%s2943_s16 + $0x2e8] sm:$0xff]  }
  0x51   : > { %2529 = vmatprep.subr.bf16.mxu0 %v2738_v17  ;;  %v535_v17 = vmul.f32 %v511_v11, %v391_v4  ;;  %v2788_v4 = vld [vmem:[%s2943_s16 + $0x310] sm:$0xff]   ;;  %v2793_v11 = vld [vmem:[%s2943_s16 + $0x398] sm:$0xff]  }
  0x52   : > { %2550 = vmatpush3.bf16.msra.mxu1 %v2737_v16  ;;  %v2768_v16 = vld [vmem:[%s2943_s16 + $0x228] sm:$0xff]  }
  0x53   : > { %2551 = vmatprep.subr.bf16.mxu1 %v2739_v18  ;;  %v2770_v18 = vld [vmem:[%s2943_s16 + $0x270] sm:$0xff]  }
  0x54   : > { %2530 = vmatpush3.bf16.msra.mxu0 %v2740_v19  ;;  %v512_v19 = vcombine.low %v448_v8, %v452_v9  ;;  %v2792_v8 = vld [vmem:[%s2943_s16 + $0x318] sm:$0xff]   ;;  %v2794_v9 = vld [vmem:[%s2943_s16 + $0x360] sm:$0xff]  }
  0x55   : > { %2531 = vmatprep.subr.bf16.mxu0 %v2742_v21  ;;  %v596_v21 = vrot.slane %v3079_v53, %v2990_v42  ;;  %v2774_v42 = vld [vmem:[%s2943_s16 + $0x278] sm:$0xff]  }
  0x56   : > { %2552 = vmatpush3.bf16.msra.mxu1 %v2741_v20  ;;  %v592_v20 = vrot.slane %v3079_v53, %v2988_v41 }
  0x57   : > { %2553 = vmatprep.subr.bf16.mxu1 %v2743_v22  ;;  %v2769_v22 = vld [vmem:[%s2943_s16 + $0x2a8] sm:$0xff]  }
  0x58   : > { %2532 = vmatpush3.bf16.msra.mxu0 %v2744_v23  ;;  %v679_v23 = vadd.f32 %v655_v15, %v535_v17  ;;  %v2796_v15 = vld [vmem:[%s2943_s16 + $0x320] sm:$0xff]  }
  0x59   : > { %2561 = vmatprep.subr.bf16.mxu0 %v2746_v25  ;;  %v600_v25 = vrot.slane %v3079_v53, %v2995_v46 }
  0x5a   : > { %2554 = vmatpush3.bf16.msra.mxu1 %v2745_v24  ;;  %v513_v24 = vcombine.low %v456_v12, %v460_v13  ;;  %vm683_vm2 = vcmp.ge.f32.partialorder %v679_v23, 0.0  ;;  %v687_v41 = vmul.f32 0.2, %v679_v23 }
  0x5b   : > { %1935 = vmatmul.mubr.bf16.vlgmr.msra.gmra.mrb[4].mxu0 %v785_v27  ;;  %2583 = vmatprep.subr.bf16.mxu1 %v2747_v26  ;;  %v604_v26 = vrot.slane %v3079_v53, %v3005_v57  ;;  %v2771_v27 = vld [vmem:[%s2943_s16 + $0x2f0] sm:$0xff]   ;;  %v656_v57 = vcombine.low %v592_v20, %v596_v21 }
  0x5c   : > { %2562 = vmatpush3.bf16.msra.mxu0 %v2748_v28  ;;  %v2772_v28 = vld [vmem:[%s2943_s16 + $0x230] sm:$0xff]   ;;  %v691_v46 = vsel %vm683_vm2, %v679_v23, %v687_v41  ;;  %v2800_v23 = vld [vmem:[%s2943_s16 + $0x328] sm:$0xff]  }
  0x5d   : > { %1975 = vmatmul.mubr.bf16.vlgmr.msra.gmra.mrb[4].mxu1 %v787_v30  ;;  %2563 = vmatprep.subr.bf16.mxu0 %v2750_v32  ;;  %v2773_v30 = vld [vmem:[%s2943_s16 + $0x2b0] sm:$0xff]   ;;  %v527_v32 = vrot.slane %v513_v24, %v3007_v0  ;;  %v664_v50 = vrot.slane %v656_v57, %v3007_v0 }
  0x5e   : > { %2584 = vmatpush3.bf16.msra.mxu1 %v2749_v29  ;;  %v520_v29 = vrot.slane %v512_v19, %v3007_v0  ;;  %v2797_v19 = vld [vmem:[%s2943_s16 + $0x3a0] sm:$0xff]   ;;  %v2805_v41 = vld [vmem:[%s2943_s16 + $0x3b0] sm:$0xff]  }
  0x5f   : > { %2585 = vmatprep.subr.bf16.mxu1 %v2751_v34  ;;  %v657_v34 = vcombine.low %v600_v25, %v604_v26  ;;  %v2801_v25 = vld [vmem:[%s2943_s16 + $0x3a8] sm:$0xff]   ;;  %v2803_v26 = vld [vmem:[%s2943_s16 + $0x3f0] sm:$0xff]  }
  0x60   : > { %2564 = vmatpush3.bf16.msra.mxu0 %v2752_v36  ;;  %v2775_v36 = vld [vmem:[%s2943_s16 + $0x2f8] sm:$0xff]   ;;  %v528_v49 = vcombine.low %v520_v29, %v527_v32 }
  0x61   : > { %2565 = vmatprep.subr.bf16.mxu0 %v2754_v39  ;;  %v731_v39 = vcombine.high %v691_v46, %v691_v46  ;;  %v671_v51 = vrot.slane %v657_v34, %v3007_v0  ;;  %v2808_v29 = vld [vmem:[%s2943_s16 + $0x338] sm:$0xff]  }
  0x62   : > { %2586 = vmatpush3.bf16.msra.mxu1 %v2753_v38  ;;  %v738_v38 = vrot.slane %v691_v46, %v3007_v0 }
  0x63   : > { %2587 = vmatprep.subr.bf16.mxu1 %v2755_v40  ;;  %v2776_v40 = vld [vmem:[%s2943_s16 + $0x238] sm:$0xff]  }
  0x64   : > { %2566 = vmatpush3.bf16.msra.mxu0 %v2756_v43  ;;  %v746_v43 = vcombine.high %v738_v38, %v738_v38 }
  0x65   : > { %2567 = vmatprep.subr.bf16.mxu0 %v2758_v45  ;;  %v2778_v45 = vld [vmem:[%s2943_s16 + $0x340] sm:$0xff]  }
  0x66   : > { %2588 = vmatpush3.bf16.msra.mxu1 %v2757_v44  ;;  %v745_v44 = vrot.slane %v731_v39, %v3007_v0  ;;  %v790_v52 = vpack.c.bf16 %v746_v43, %v746_v43 }
  0x67   : > { %2589 = vmatprep.subr.bf16.mxu1 %v2759_v47  ;;  %v2777_v47 = vld [vmem:[%s2943_s16 + $0x2b8] sm:$0xff]  }
  0x68   : > { %2568 = vmatpush3.bf16.msra.mxu0 %v2760_v48  ;;  %v392_v48 = vunpack.c.h.bf16 %v3090_v60  ;;  %v747_v53 = vcombine.high %v745_v44, %v745_v44  ;;  %2014 = vmatprep.mubr.bf16.mxu0 %v790_v52  ;;  %v791_v59 = vpack.c.bf16 %v745_v44, %v745_v44  ;;  %v2782_v60 = vld [vmem:[%s2943_s16 + $0x348] sm:$0xff]  }
  0x69   : > { %2569 = vmatprep.subr.bf16.mxu0 %v2762_v54  ;;  %v789_v54 = vpack.c.bf16 %v738_v38, %v738_v38 }
  0x6a   : > { %2590 = vmatpush3.bf16.msra.mxu1 %v2761_v63  ;;  %v792_v58 = vpack.c.bf16 %v747_v53, %v747_v53  ;;  %v536_v62 = vmul.f32 %v528_v49, %v392_v48  ;;  %v672_v63 = vcombine.low %v664_v50, %v671_v51 }
  0x6b   : > { %2591 = vmatprep.subr.bf16.mxu1 %v2763_v31  ;;  %v2786_v31 = vld [vmem:[%s2943_s16 + $0x350] sm:$0xff]  }
  0x6c   : > { %2570 = vmatpush3.bf16.msra.mxu0 %v2764_v35  ;;  %2054 = vmatprep.mubr.bf16.mxu1 %v792_v58  ;;  %v680_v3 = vadd.f32 %v672_v63, %v536_v62  ;;  %v2787_v35 = vld [vmem:[%s2943_s16 + $0x3d0] sm:$0xff]  }
  0x6d   : > { %2571 = vmatprep.subr.bf16.mxu0 %v2766_v6  ;;  %v2791_v6 = vld [vmem:[%s2943_s16 + $0x3d8] sm:$0xff]  }
  0x6e   : > { %2592 = vmatpush3.bf16.msra.mxu1 %v2765_v10  ;;  %vm684_vm3 = vcmp.ge.f32.partialorder %v680_v3, 0.0  ;;  %v688_v7 = vmul.f32 0.2, %v680_v3 }
  0x6f   : > { %2593 = vmatprep.subr.bf16.mxu1 %v2767_v14  ;;  %v2795_v14 = vld [vmem:[%s2943_s16 + $0x3e0] sm:$0xff]  }
  0x70   : > { %2572 = vmatpush3.bf16.msra.mxu0 %v2768_v16  ;;  %v692_v10 = vsel %vm684_vm3, %v680_v3, %v688_v7 }
  0x71   : > { %2573 = vmatprep.subr.bf16.mxu0 %v2770_v18  ;;  %v755_v12 = vrot.slane %v692_v10, %v3007_v0  ;;  %v748_v13 = vcombine.high %v692_v10, %v692_v10  ;;  %v2798_v18 = vld [vmem:[%s2943_s16 + $0x368] sm:$0xff]  }
  0x72   : > { %2594 = vmatpush3.bf16.msra.mxu1 %v2769_v22  ;;  %v2799_v22 = vld [vmem:[%s2943_s16 + $0x3e8] sm:$0xff]  }
  0x73   : > { %2595 = vmatprep.subr.bf16.mxu1 %v2771_v27  ;;  %v763_v16 = vcombine.high %v755_v12, %v755_v12  ;;  %v762_v17 = vrot.slane %v748_v13, %v3007_v0  ;;  %v2802_v0 = vld [vmem:[%s2943_s16 + $0x370] sm:$0xff]   ;;  %v793_v46 = vpack.c.bf16 %v755_v12, %v755_v12 }
  0x74   : > { %2574 = vmatpush3.bf16.msra.mxu0 %v2772_v28  ;;  %v2804_v27 = vld [vmem:[%s2943_s16 + $0x330] sm:$0xff]   ;;  %v2806_v28 = vld [vmem:[%s2943_s16 + $0x378] sm:$0xff]  }
  0x75   : > { %2575 = vmatprep.subr.bf16.mxu0 %v2774_v42  ;;  %v794_v20 = vpack.c.bf16 %v763_v16, %v763_v16  ;;  %v764_v21 = vcombine.high %v762_v17, %v762_v17  ;;  %v2807_v42 = vld [vmem:[%s2943_s16 + $0x3f8] sm:$0xff]   ;;  %v795_v32 = vpack.c.bf16 %v762_v17, %v762_v17  ;;  %v797_v17 = vld [vmem:[#allocation2] sm:$0x3] }
  0x76   : > { %2596 = vmatpush3.bf16.msra.mxu1 %v2773_v30  ;;  %v2809_v30 = vld [vmem:[%s2943_s16 + $0x3b8] sm:$0xff]  }
  0x77   : > { %2597 = vmatprep.subr.bf16.mxu1 %v2775_v36  ;;  %v796_v24 = vpack.c.bf16 %v764_v21, %v764_v21 }
  0x78   : > { %2576 = vmatpush3.bf16.msra.mxu0 %v2776_v40 }
  0x79   : > { %2605 = vmatprep.subr.bf16.mxu0 %v2778_v45 }
  0x7a   : > { %2598 = vmatpush3.bf16.msra.mxu1 %v2777_v47 }
  0x7b   : > { %2015 = vmatmul.mubr.bf16.vlgmr.msra.gmra.mrb[8].mxu0 %v789_v54  ;;  %2627 = vmatprep.subr.bf16.mxu1 %v2779_v55 }
  0x7c   : > { %2606 = vmatpush3.bf16.msra.mxu0 %v2780_v56  ;;  %2094 = vmatprep.mubr.bf16.mxu0 %v794_v20 }
  0x7d   : > { %2055 = vmatmul.mubr.bf16.vlgmr.msra.gmra.mrb[8].mxu1 %v791_v59  ;;  %2607 = vmatprep.subr.bf16.mxu0 %v2782_v60 }
  0x7e   : > { %2628 = vmatpush3.bf16.msra.mxu1 %v2781_v61  ;;  %2134 = vmatprep.mubr.bf16.mxu1 %v796_v24 }
  0x7f   : > { %2629 = vmatprep.subr.bf16.mxu1 %v2783_v1 }
  0x80   : > { %2608 = vmatpush3.bf16.msra.mxu0 %v2784_v2 }
  0x81   : > { %2609 = vmatprep.subr.bf16.mxu0 %v2786_v31 }
  0x82   : > { %2630 = vmatpush3.bf16.msra.mxu1 %v2785_v33 }
  0x83   : > { %2631 = vmatprep.subr.bf16.mxu1 %v2787_v35 }
  0x84   : > { %2610 = vmatpush3.bf16.msra.mxu0 %v2788_v4 }
  0x85   : > { %2611 = vmatprep.subr.bf16.mxu0 %v2790_v5 }
  0x86   : > { %2632 = vmatpush3.bf16.msra.mxu1 %v2789_v37 }
  0x87   : > { %2633 = vmatprep.subr.bf16.mxu1 %v2791_v6 }
  0x88   : > { %2612 = vmatpush3.bf16.msra.mxu0 %v2792_v8 }
  0x89   : > { %2613 = vmatprep.subr.bf16.mxu0 %v2794_v9 }
  0x8a   : > { %2634 = vmatpush3.bf16.msra.mxu1 %v2793_v11 }
  0x8b   : > { %2635 = vmatprep.subr.bf16.mxu1 %v2795_v14 }
  0x8c   : > { %2614 = vmatpush3.bf16.msra.mxu0 %v2796_v15 }
  0x8d   : > { %2615 = vmatprep.subr.bf16.mxu0 %v2798_v18 }
  0x8e   : > { %2636 = vmatpush3.bf16.msra.mxu1 %v2797_v19 }
  0x8f   : > { %2637 = vmatprep.subr.bf16.mxu1 %v2799_v22  ;;  %v2467_v22 = vld [vmem:[%s3214_s2] ss:$0 sm:$0xff] (!%p2466_p7) }
  0x90   : > { %2616 = vmatpush3.bf16.msra.mxu0 %v2800_v23 }
  0x91   : > { %2617 = vmatprep.subr.bf16.mxu0 %v2802_v0 }
  0x92   : > { %2638 = vmatpush3.bf16.msra.mxu1 %v2801_v25 }
  0x93   : > { %2639 = vmatprep.subr.bf16.mxu1 %v2803_v26 }
  0x94   : > { %2618 = vmatpush3.bf16.msra.mxu0 %v2804_v27 }
  0x95   : > { %2619 = vmatprep.subr.bf16.mxu0 %v2806_v28 }
  0x96   : > { %2640 = vmatpush3.bf16.msra.mxu1 %v2805_v41 }
  0x97   : > { %2641 = vmatprep.subr.bf16.mxu1 %v2807_v42 }
  0x98   : > { %2620 = vmatpush3.bf16.msra.mxu0 %v2808_v29 }
  0x9a   : > { %2642 = vmatpush3.bf16.msra.mxu1 %v2809_v30 }
  0x9b   : > { %2095 = vmatmul.mubr.bf16.vlgmr.msra.gmra.mrb[12].mxu0 %v793_v46 }
  0x9d   : > { %2135 = vmatmul.mubr.bf16.vlgmr.msra.gmra.mrb[12].mxu1 %v795_v32 }
 0x10e   : > { %v2489_v57 = vpop.f32.mrb[0].mxu0 }
 0x10f   : > { %v2490_v34 = vpop.f32.mrb[1].mxu0 }
 0x110   : > { %v2511_v36 = vpop.f32.mrb[0].mxu1  ;;  %v2491_v38 = vadd.f32 %v2490_v34, %v2489_v57  ;;  %v2492_v39 = vpop.f32.mrb[2].mxu0 }
 0x111   : > { %v2512_v40 = vpop.f32.mrb[1].mxu1  ;;  %v2493_v43 = vpop.f32.mrb[3].mxu0 }
 0x112   : > { %v2513_v44 = vadd.f32 %v2512_v40, %v2511_v36  ;;  %v2514_v45 = vpop.f32.mrb[2].mxu1 }
 0x113   : > { %v2515_v47 = vpop.f32.mrb[3].mxu1 }
 0x114   : > { %v1897_v48 = vadd.f32 %v2513_v44, %v2491_v38 }
 0x12e   : > { %v2533_v49 = vpop.f32.mrb[4].mxu0 }
 0x12f   : > { %v2534_v50 = vpop.f32.mrb[5].mxu0 }
 0x130   : > { %v2555_v51 = vpop.f32.mrb[4].mxu1  ;;  %v2535_v52 = vadd.f32 %v2534_v50, %v2533_v49  ;;  %v2536_v53 = vpop.f32.mrb[6].mxu0 }
 0x131   : > { %v2556_v54 = vpop.f32.mrb[5].mxu1  ;;  %v2537_v55 = vpop.f32.mrb[7].mxu0 }
 0x132   : > { %v1937_v56 = vadd.f32 %v2535_v52, %v1897_v48  ;;  %v2557_v58 = vadd.f32 %v2556_v54, %v2555_v51  ;;  %v2558_v59 = vpop.f32.mrb[6].mxu1 }
 0x133   : > { %v2559_v60 = vpop.f32.mrb[7].mxu1 }
 0x134   : > { %v1977_v61 = vadd.f32 %v2557_v58, %v1937_v56 }
 0x14e   : > { %v2577_v62 = vpop.f32.mrb[8].mxu0 }
 0x14f   : > { %v2578_v63 = vpop.f32.mrb[9].mxu0 }
 0x150   : > { %v2599_v1 = vpop.f32.mrb[8].mxu1  ;;  %v2579_v2 = vadd.f32 %v2578_v63, %v2577_v62  ;;  %v2580_v31 = vpop.f32.mrb[10].mxu0 }
 0x151   : > { %v2600_v33 = vpop.f32.mrb[9].mxu1  ;;  %v2581_v3 = vpop.f32.mrb[11].mxu0 }
 0x152   : > { %v2017_v35 = vadd.f32 %v2579_v2, %v1977_v61  ;;  %v2601_v4 = vadd.f32 %v2600_v33, %v2599_v1  ;;  %v2602_v5 = vpop.f32.mrb[10].mxu1 }
 0x153   : > { %v2603_v37 = vpop.f32.mrb[11].mxu1 }
 0x154   : > { %v2057_v6 = vadd.f32 %v2601_v4, %v2017_v35 }
 0x16e   : > { %v2621_v7 = vpop.f32.mrb[12].mxu0 }
 0x16f   : > { %v2622_v8 = vpop.f32.mrb[13].mxu0 }
 0x170   : > { %v2643_v9 = vpop.f32.mrb[12].mxu1  ;;  %v2623_v10 = vadd.f32 %v2622_v8, %v2621_v7  ;;  %v2624_v11 = vpop.f32.mrb[14].mxu0 }
 0x171   : > { %v2644_v12 = vpop.f32.mrb[13].mxu1  ;;  %v2625_v13 = vpop.f32.mrb[15].mxu0 }
 0x172   : > { %v2097_v14 = vadd.f32 %v2623_v10, %v2057_v6  ;;  %v2645_v15 = vadd.f32 %v2644_v12, %v2643_v9  ;;  %v2646_v16 = vpop.f32.mrb[14].mxu1  ;;  %2147 = sbr.rel (%p2466_p7) target bundleno = 403 (0x193), region = 48 }
 0x173   : > { %v2647_v18 = vpop.f32.mrb[15].mxu1 }
 0x174   : > { %v2137_v19 = vadd.f32 %v2645_v15, %v2097_v14 }
 0x176   : > { %v2142_v20 = vadd.f32 %v2137_v19, %v797_v17 }
 0x178   : > { %2143 = vst [vmem:[#allocation2] sm:$0x3] %v2142_v20 }
 0x17f   : > { %v2148_v21 = vld [vmem:[#allocation2] sm:$0x3] }
 0x180   : > { %v2156_v23 = vadd.f32 %v2467_v22, %v2148_v21 }
 0x182   : > { %2157 = vst [vmem:[%s3217_s5] sm:$0x3] %v2156_v23  ;;  %v2159_v24 = vsel %vm2158_vm4, %v2156_v23, 0.0  ;;  %v2166_v0 = vmul.f32 %v2156_v23, %v2156_v23 }
 0x183   : > { %v2160_v25 = vrot.slane %v2159_v24, 4 }
 0x184   : > { %v2167_v26 = vsel %vm2158_vm4, %v2166_v0, 0.0 }
 0x185   : > { %v2161_v27 = vadd.f32 %v2160_v25, %v2159_v24  ;;  %v2168_v28 = vrot.slane %v2167_v26, 4 }
 0x187   : > { %v2162_v41 = vrot.slane %v2161_v27, 2  ;;  %v2169_v42 = vadd.f32 %v2168_v28, %v2167_v26 }
 0x189   : > { %v2163_v29 = vadd.f32 %v2162_v41, %v2161_v27  ;;  %v2170_v30 = vrot.slane %v2169_v42, 2 }
 0x18b   : > { %v2164_v46 = vrot.slane %v2163_v29, 1  ;;  %v2171_v32 = vadd.f32 %v2170_v30, %v2169_v42 }
 0x18d   : > { %v2165_v57 = vadd.f32 %v2164_v46, %v2163_v29  ;;  %v2172_v34 = vrot.slane %v2171_v32, 1 }
 0x18f   : > { %v2173_v36 = vadd.f32 %v2172_v34, %v2171_v32 }
 0x191   : > { %v2175_v38 = vsel %vm2174_vm5, %v2165_v57, %v2173_v36 }
 0x192   : > { %2176 = vst [vmem:[#allocation3] sm:$0x3] %v2175_v38 }
 0x193 PF: > { %p3177_p8 = scmp.eq.s32.totalorder %s2327_s24, 3  ;;  %s2866_s26 = smov [#allocation3]  }
 0x194   : > { %s2197_s27 = sshll.u32 %s2866_s26, 4  ;;  %s2198_s27 = int_to_ptr.vmem [resolvable:$true] %s2197_s27 }
 0x195   : > { %s2810_s28 = scalar_lea.vmem %s2198_s27, 32  ;;  %p2817_p12 = scmp.lt.s32.totalorder %s2198_s27, %s2198_s27 }
 0x196   : > { %p2811_p9 = scmp.ne.s32.totalorder %s2198_s27, %s2810_s28  ;;  %p2818_p13 = scmp.lt.s32.totalorder %s2810_s28, %s2810_s28 }
 0x198   : > { %p2812_p10 = pnand %p2811_p9, %p3177_p8  ;;  %p2819_p0 = por %p2818_p13, %p2817_p12 }
 0x19a   : > { %p2813_p11 = pneg %p2812_p10 }
 0x19c   : > { %p2820_p1 = pnand %p2819_p0, %p2813_p11 }
 0x19e   : > { %2823 = shalt.err (!%p2820_p1)
}
 0x19f   : > { %s2824_s24 = scalar_lea.hbm %s3218_s6, 32 }
 0x1a0   : > { %p2825_p2 = scmp.ne.s32.totalorder %s3218_s6, %s2824_s24  ;;  %p2830_p5 = scmp.lt.u32.totalorder %s2824_s24, %s3218_s6 }
 0x1a2   : > { %p2826_p3 = pnand %p2825_p2, %p3177_p8 }
 0x1a4   : > { %p2827_p4 = pneg %p2826_p3 }
 0x1a6   : > { %p2832_p6 = pnand %p2830_p5, %p2827_p4 }
 0x1a8   : > { %2835 = shalt.err (!%p2832_p6)
}
 0x1a9   : > { %2650 = dma.vmem_to_hbm [thread:$0]  (%p3177_p8), %s2198_s27, 32, %s3218_s6, [#allocation4]  }
 0x1aa   : > { %2849 = dma.done.wait (%p3177_p8), [#allocation4], 32  }
 0x1ab   : > { %2851 = vsyncadd (%p3177_p8), [#allocation4], 4294967264 }
 0x1ac PF: > { %s18_s23 = sadd.s32 1, %s2862_s23   ;;  %s3220_s21 = smov %s2858_s22 }
 0x1ad   : > { %p15_p7 = scmp.ge.s32.totalorder %s18_s23, 6   ;;  %s3221_s22 = smov %s3223_s25 }
 0x1af   :  { %17 = sbr.rel (!%p15_p7) target bundleno = 2 (0x2), region = 100 }
 0x1b6   :  { %2220 = vsyncpa [#allocation4], 1 }
 0x1b7   :  { %2222 = vsyncpa [#allocation4 + $0x1], 1 }

</bundles_post_ra>
